<compile_context>
chip_gen: v5e
topology: v5e:2x2
jax: 0.10.0
libtpu: 0.0.40
codegen_flags: <defaults>
</compile_context>

<pallas_src>
import math
import numpy as np

import jax
import jax.numpy as jnp
from jax.experimental import pallas as pl
from jax.experimental.pallas import tpu as pltpu

# ---------------- config (small shapes consistent with MaskedUViT) ----------------
IMG = 16
PATCH = 4
IN_CHANS = 4
EMBED = 64
DEPTH = 2            # -> 1 in_block, 1 mid_block, 1 out_block (with skip)
HEADS = 4
MLP_RATIO = 4.0
BATCH = 2
NUM_PATCHES = (IMG // PATCH) ** 2        # 16
PATCH_DIM = PATCH * PATCH * IN_CHANS     # 64
EXTRAS = 1                               # num_classes = -1 -> only the time token
SEQ = EXTRAS + NUM_PATCHES               # 17
HIDDEN = int(EMBED * MLP_RATIO)          # 256
HEAD_DIM = EMBED // HEADS                # 16
LN_EPS = 1e-5
WMAX = max(3 * EMBED, HIDDEN)            # 256: column width of both slabs

# Set to jnp.bfloat16 on v6e/v7x to feed the MXU at bf16 rate (small numeric
# drift vs the f32 PyTorch reference); f32 keeps exact reference semantics.
MM_DTYPE = jnp.float32


# ---------------- slab layout (shared by the host packer and the kernel) ----------------
def _build_layouts():
    block_names = ([f"in{i}" for i in range(DEPTH // 2)] + ["mid"]
                   + [f"out{i}" for i in range(DEPTH // 2)])
    m_layout, v_layout = {}, {}
    mr = 0
    vr = 0

    def addm(name, rows, cols):
        nonlocal mr
        m_layout[name] = (mr, rows, cols)
        mr += rows

    def addv(name, cols):
        nonlocal vr
        v_layout[name] = (vr, cols)
        vr += 1

    addm("patch", PATCH_DIM, EMBED)
    for name in block_names:
        if name.startswith("out"):
            addm(name + ".skip", 2 * EMBED, EMBED)
            addv(name + ".skip_b", EMBED)
        addm(name + ".qkv", EMBED, 3 * EMBED)
        addm(name + ".proj", EMBED, EMBED)
        addm(name + ".fc1", EMBED, HIDDEN)
        addm(name + ".fc2", HIDDEN, EMBED)
        addv(name + ".n1w", EMBED)
        addv(name + ".n1b", EMBED)
        addv(name + ".proj_b", EMBED)
        addv(name + ".n2w", EMBED)
        addv(name + ".n2b", EMBED)
        addv(name + ".fc1_b", HIDDEN)
        addv(name + ".fc2_b", EMBED)
    addm("out", EMBED, PATCH_DIM)
    addv("norm_w", EMBED)
    addv("norm_b", EMBED)
    addv("out_b", PATCH_DIM)

    m_rows = ((mr + 7) // 8) * 8
    v_rows = ((vr + 7) // 8) * 8
    return block_names, m_layout, m_rows, v_layout, v_rows


BLOCK_NAMES, M_LAYOUT, M_ROWS, V_LAYOUT, V_ROWS = _build_layouts()


# ---------------- in-kernel helpers ----------------
def _layernorm(x, w, b):
    mu = jnp.mean(x, axis=-1, keepdims=True)
    var = jnp.mean((x - mu) ** 2, axis=-1, keepdims=True)
    return (x - mu) * jax.lax.rsqrt(var + LN_EPS) * w + b


def _erf(x):
    # Abramowitz & Stegun 7.1.26 (|err| < 1.5e-7); only exp/mul/add/where.
    a1, a2, a3, a4, a5 = 0.254829592, -0.284496736, 1.421413741, -1.453152027, 1.061405429
    p = 0.3275911
    sgn = jnp.where(x >= 0.0, 1.0, -1.0)
    ax = jnp.abs(x)
    t = 1.0 / (1.0 + p * ax)
    poly = ((((a5 * t + a4) * t + a3) * t + a2) * t + a1) * t
    return sgn * (1.0 - poly * jnp.exp(-ax * ax))


def _gelu(x):
    # exact (erf-form) GELU, matching torch.nn.GELU()
    return 0.5 * x * (1.0 + _erf(x * (1.0 / math.sqrt(2.0))))


def _mm(a, b):
    return jnp.dot(a.astype(MM_DTYPE), b.astype(MM_DTYPE),
                   preferred_element_type=jnp.float32)


# ---------------- fused Pallas kernel ----------------
def make_fused_kernel(batch):
    n_in = n_out = DEPTH // 2
    bt = batch * SEQ
    dn = (((1,), (1,)), ((), ()))      # q @ k^T : contract the feature dim

    def mget(w_ref, name):             # static, zero-cost slab slice
        off, rows, cols = M_LAYOUT[name]
        return w_ref[off:off + rows, 0:cols]

    def vget(v_ref, name):             # (1, cols) row for broadcast add
        off, cols = V_LAYOUT[name]
        return v_ref[off:off + 1, 0:cols]

    def kernel(tok_ref, add_ref, w_ref, v_ref, o_ref):
        # patch embed + folded {time token, pos embed, patch bias}
        x = _mm(tok_ref[...], mget(w_ref, "patch")) + add_ref[...]          # (bt, D)

        # additive block-diagonal mask: tokens attend only within their batch
        rb = jax.lax.broadcasted_iota(jnp.int32, (bt, bt), 0)
        cb = jax.lax.broadcasted_iota(jnp.int32, (bt, bt), 1)
        neg_mask = jnp.full((bt, bt), -1e30, jnp.float32)
        for b in range(batch):
            rin = (rb >= b * SEQ) & (rb < (b + 1) * SEQ)
            cin = (cb >= b * SEQ) & (cb < (b + 1) * SEQ)
            neg_mask = jnp.where(rin & cin, 0.0, neg_mask)

        def block(x, name, skip_val):
            if skip_val is not None:
                # skip_linear(cat(x, skip)): one K=128 matmul on the lane concat
                xs = jnp.concatenate([x, skip_val], axis=-1)                 # (bt, 2D)
                x = _mm(xs, mget(w_ref, name + ".skip")) + vget(v_ref, name + ".skip_b")

            # --- attention: fused QKV, per-head softmax, fused output proj ---
            h1 = _layernorm(x, vget(v_ref, name + ".n1w"), vget(v_ref, name + ".n1b"))
            qkv = _mm(h1, mget(w_ref, name + ".qkv"))                        # (bt, 3D); q pre-scaled
            heads = []
            for h in range(HEADS):
                q = qkv[:, h * HEAD_DIM:(h + 1) * HEAD_DIM]
                k = qkv[:, EMBED + h * HEAD_DIM:EMBED + (h + 1) * HEAD_DIM]
                v = qkv[:, 2 * EMBED + h * HEAD_DIM:2 * EMBED + (h + 1) * HEAD_DIM]
                s = jax.lax.dot_general(q.astype(MM_DTYPE), k.astype(MM_DTYPE), dn,
                                        preferred_element_type=jnp.float32) + neg_mask
                s = s - jnp.max(s, axis=-1, keepdims=True)
                p = jnp.exp(s)
                p = p * pl.reciprocal(jnp.sum(p, axis=-1, keepdims=True), approx=False)
                heads.append(_mm(p, v))                                      # (bt, hd)
            ho = jnp.concatenate(heads, axis=-1)                             # (bt, D)
            x = x + _mm(ho, mget(w_ref, name + ".proj")) + vget(v_ref, name + ".proj_b")

            # --- MLP ---
            h2 = _layernorm(x, vget(v_ref, name + ".n2w"), vget(v_ref, name + ".n2b"))
            m = _mm(h2, mget(w_ref, name + ".fc1")) + vget(v_ref, name + ".fc1_b")
            m = _gelu(m)
            m = _mm(m, mget(w_ref, name + ".fc2")) + vget(v_ref, name + ".fc2_b")
            return x + m

        skips = []
        for i in range(n_in):
            x = block(x, f"in{i}", None)
            skips.append(x)
        x = block(x, "mid", None)
        for i in range(n_out):
            x = block(x, f"out{i}", skips.pop())

        # final LayerNorm + encoder_to_output; store only the patch rows
        y = _layernorm(x, vget(v_ref, "norm_w"), vget(v_ref, "norm_b"))
        y = _mm(y, mget(w_ref, "out")) + vget(v_ref, "out_b")                # (bt, PATCH_DIM)
        for b in range(batch):
            o_ref[b] = y[b * SEQ + EXTRAS:b * SEQ + EXTRAS + NUM_PATCHES]

    return kernel


# ---------------- plain-JAX glue ----------------
def timestep_embedding(timesteps, dim, max_period=10000):
    half = dim // 2
    freqs = jnp.exp(-math.log(max_period) *
                    jnp.arange(half, dtype=jnp.float32) / half)
    args = timesteps[:, None].astype(jnp.float32) * freqs[None]
    emb = jnp.concatenate([jnp.cos(args), jnp.sin(args)], axis=-1)
    if dim % 2:
        emb = jnp.concatenate([emb, jnp.zeros_like(emb[:, :1])], axis=-1)
    return emb


def patchify(x):
    # NCHW -> (B, Np, C*P*P), inner order (C, p1, p2) == Conv2d(k=P, s=P) semantics
    B, C, H, W = x.shape
    hp, wp = H // PATCH, W // PATCH
    x = x.reshape(B, C, hp, PATCH, wp, PATCH)
    x = x.transpose(0, 2, 4, 1, 3, 5)
    return x.reshape(B, hp * wp, C * PATCH * PATCH)


def unpatchify(x, channels):
    # einops 'B (h w) (p1 p2 C) -> B C (h p1) (w p2)'
    B, L, pd = x.shape
    p = int(round((pd // channels) ** 0.5))
    h = w = int(round(L ** 0.5))
    x = x.reshape(B, h, w, p, p, channels)
    x = x.transpose(0, 5, 1, 3, 2, 4)
    return x.reshape(B, channels, h * p, w * p)


# ---------------- parameter construction (deterministic, PyTorch layout) ----------------
def init_params(key):
    ks = iter(jax.random.split(key, 32))

    def nrm(shape, std=0.02):
        return (std * jax.random.normal(next(ks), shape)).astype(jnp.float32)

    D, H = EMBED, HIDDEN
    p = {}
    p["patch_w"] = nrm((D, PATCH_DIM))                # Conv2d weight flattened (Dout, C*P*P)
    p["patch_b"] = jnp.zeros((1, D), jnp.float32)
    p["pos_embed"] = nrm((1, SEQ, D))

    def block_params(skip):
        bp = {}
        if skip:
            bp["skip_w"] = nrm((D, 2 * D))            # torch Linear (out, in)
            bp["skip_b"] = jnp.zeros((1, D), jnp.float32)
        bp["n1w"] = jnp.ones((1, D), jnp.float32)
        bp["n1b"] = jnp.zeros((1, D), jnp.float32)
        bp["qkv_w"] = nrm((3 * D, D))                 # qkv_bias=False
        bp["proj_w"] = nrm((D, D))
        bp["proj_b"] = jnp.zeros((1, D), jnp.float32)
        bp["n2w"] = jnp.ones((1, D), jnp.float32)
        bp["n2b"] = jnp.zeros((1, D), jnp.float32)
        bp["fc1_w"] = nrm((H, D))
        bp["fc1_b"] = jnp.zeros((1, H), jnp.float32)
        bp["fc2_w"] = nrm((D, H))
        bp["fc2_b"] = jnp.zeros((1, D), jnp.float32)
        return bp

    p["in_blocks"] = [block_params(False) for _ in range(DEPTH // 2)]
    p["mid_block"] = block_params(False)
    p["out_blocks"] = [block_params(True) for _ in range(DEPTH // 2)]
    p["norm_w"] = jnp.ones((1, D), jnp.float32)
    p["norm_b"] = jnp.zeros((1, D), jnp.float32)
    p["out_w"] = nrm((PATCH_DIM, D))                  # encoder_to_output (out, in)
    p["out_b"] = jnp.zeros((1, PATCH_DIM), jnp.float32)
    return p


def prepare_weights(params):
    """One-time host-side packing: transpose every weight to (Din, Dout), fold the
    softmax scale into the q columns of the fused qkv weight, and pack every
    matrix / vector into two contiguous, row-aligned VMEM slabs."""
    D = EMBED
    scale = float(HEAD_DIM) ** -0.5
    w_slab = np.zeros((M_ROWS, WMAX), np.float32)
    v_slab = np.zeros((V_ROWS, WMAX), np.float32)

    def putm(name, mat):
        off, rows, cols = M_LAYOUT[name]
        assert mat.shape == (rows, cols), (name, mat.shape)
        w_slab[off:off + rows, :cols] = mat

    def putv(name, vec):
        off, cols = V_LAYOUT[name]
        v_slab[off, :cols] = np.array(vec, np.float32).reshape(-1)

    putm("patch", np.array(params["patch_w"], np.float32).T)
    blocks = list(params["in_blocks"]) + [params["mid_block"]] + list(params["out_blocks"])
    for name, bp in zip(BLOCK_NAMES, blocks):
        if name.startswith("out"):
            putm(name + ".skip", np.array(bp["skip_w"], np.float32).T)   # (2D, D): rows [x ; skip]
            putv(name + ".skip_b", bp["skip_b"])
        qkv_t = np.array(bp["qkv_w"], np.float32).T.copy()               # (D, 3D): cols [q | k | v]
        qkv_t[:, :D] *= scale                                            # fold softmax scale into q
        putm(name + ".qkv", qkv_t)
        putm(name + ".proj", np.array(bp["proj_w"], np.float32).T)
        putm(name + ".fc1", np.array(bp["fc1_w"], np.float32).T)
        putm(name + ".fc2", np.array(bp["fc2_w"], np.float32).T)
        putv(name + ".n1w", bp["n1w"])
        putv(name + ".n1b", bp["n1b"])
        putv(name + ".proj_b", bp["proj_b"])
        putv(name + ".n2w", bp["n2w"])
        putv(name + ".n2b", bp["n2b"])
        putv(name + ".fc1_b", bp["fc1_b"])
        putv(name + ".fc2_b", bp["fc2_b"])
    putm("out", np.array(params["out_w"], np.float32).T)
    putv("norm_w", params["norm_w"])
    putv("norm_b", params["norm_b"])
    putv("out_b", params["out_b"])

    return {"w_slab": jnp.asarray(w_slab), "v_slab": jnp.asarray(v_slab),
            "pos_embed": params["pos_embed"], "patch_b": params["patch_b"]}


# ---------------- full forward (single fused pallas_call) ----------------
def masked_uvit_forward(prep, x, timesteps):
    B = x.shape[0]
    patches = patchify(x)                                            # (B, Np, PATCH_DIM)
    # zero row 0 per batch -> the patch matmul directly yields a (SEQ, D) tile;
    # time token / pos embed / patch bias are folded into one additive tensor.
    tok = jnp.concatenate(
        [jnp.zeros((B, EXTRAS, PATCH_DIM), jnp.float32), patches], axis=1)   # (B, SEQ, PATCH_DIM)
    tt = timestep_embedding(timesteps, EMBED)                        # (B, D); time_embed is Identity
    pos = prep["pos_embed"][0]                                       # (SEQ, D)
    add = pos[None, :, :] + jnp.concatenate(
        [tt[:, None, :],
         jnp.broadcast_to(prep["patch_b"], (B, NUM_PATCHES, EMBED))], axis=1)  # (B, SEQ, D)

    tok_f = tok.reshape(B * SEQ, PATCH_DIM)
    add_f = add.reshape(B * SEQ, EMBED)

    kernel = make_fused_kernel(B)
    noise = pl.pallas_call(
        kernel,
        out_shape=jax.ShapeDtypeStruct((B, NUM_PATCHES, PATCH_DIM), jnp.float32),
        grid=(1,),
        in_specs=[
            pl.BlockSpec((B * SEQ, PATCH_DIM), lambda i: (0, 0)),
            pl.BlockSpec((B * SEQ, EMBED), lambda i: (0, 0)),
            pl.BlockSpec((M_ROWS, WMAX), lambda i: (0, 0)),
            pl.BlockSpec((V_ROWS, WMAX), lambda i: (0, 0)),
        ],
        out_specs=pl.BlockSpec((B, NUM_PATCHES, PATCH_DIM), lambda i: (0, 0, 0)),
        compiler_params=pltpu.CompilerParams(dimension_semantics=("arbitrary",)),
    )(tok_f, add_f, prep["w_slab"], prep["v_slab"])

    return unpatchify(noise, IN_CHANS)                               # (B, C, IMG, IMG)


if __name__ == "__main__":
    key = jax.random.PRNGKey(0)
    kp, kx, kt = jax.random.split(key, 3)
    params = init_params(kp)
    prep = prepare_weights(params)             # one-time host-side slab packing
    x = jax.random.normal(kx, (BATCH, IN_CHANS, IMG, IMG), jnp.float32)
    timesteps = jax.random.uniform(kt, (BATCH,), jnp.float32, 0.0, 1000.0)

    fwd = jax.jit(masked_uvit_forward)
    out = jax.block_until_ready(fwd(prep, x, timesteps))
    assert out.shape == (BATCH, IN_CHANS, IMG, IMG), out.shape
    assert bool(jnp.all(jnp.isfinite(out)))
    print("KERNEL_OK")
</pallas_src>

<mosaic_0001>
module attributes {stable_mosaic.version = 11 : i64} {
  func.func @kernel(%arg0: i32, %arg1: memref<34x64xf32, #tpu.memory_space<vmem>>, %arg2: memref<34x64xf32, #tpu.memory_space<vmem>>, %arg3: memref<1600x256xf32, #tpu.memory_space<vmem>>, %arg4: memref<32x256xf32, #tpu.memory_space<vmem>>, %arg5: memref<2x16x64xf32, #tpu.memory_space<vmem>>) attributes {dimension_semantics = [#tpu.dimension_semantics<arbitrary>], iteration_bounds = array<i64: 1>, scalar_prefetch = 0 : i64, scratch_operands = 0 : i64, tpu.core_type = #tpu.core_type<tc>, window_params = [{pipeline_mode = #tpu.pipeline_mode<synchronous>, transform_indices = @transform_0, window_bounds = array<i64: 34, 64>}, {pipeline_mode = #tpu.pipeline_mode<synchronous>, transform_indices = @transform_1, window_bounds = array<i64: 34, 64>}, {pipeline_mode = #tpu.pipeline_mode<synchronous>, transform_indices = @transform_2, window_bounds = array<i64: 1600, 256>}, {pipeline_mode = #tpu.pipeline_mode<synchronous>, transform_indices = @transform_3, window_bounds = array<i64: 32, 256>}, {pipeline_mode = #tpu.pipeline_mode<synchronous>, transform_indices = @transform_4, window_bounds = array<i64: 2, 16, 64>}]} {
    %c0 = arith.constant 0 : index
    %c0_0 = arith.constant 0 : index
    %0 = vector.load %arg1[%c0, %c0_0] : memref<34x64xf32, #tpu.memory_space<vmem>>, vector<34x64xf32>
    %c0_1 = arith.constant 0 : index
    %c0_2 = arith.constant 0 : index
    %1 = vector.load %arg3[%c0_1, %c0_2] : memref<1600x256xf32, #tpu.memory_space<vmem>>, vector<64x64xf32>
    %cst = arith.constant dense<0.000000e+00> : vector<34x64xf32>
    %2 = tpu.matmul %0, %1, %cst {dimension_numbers = #tpu.dot_dimension_numbers<[1], [0], [0], [1], [0, 0, 1, 1], [], []>} : vector<34x64xf32>, vector<64x64xf32>, vector<34x64xf32> -> vector<34x64xf32>
    %c0_3 = arith.constant 0 : index
    %c0_4 = arith.constant 0 : index
    %3 = vector.load %arg2[%c0_3, %c0_4] : memref<34x64xf32, #tpu.memory_space<vmem>>, vector<34x64xf32>
    %4 = arith.addf %2, %3 : vector<34x64xf32>
    %5 = tpu.iota {dimensions = array<i32: 0>} : vector<34x34xi32>
    %6 = tpu.iota {dimensions = array<i32: 1>} : vector<34x34xi32>
    %cst_5 = arith.constant -1.000000e+30 : f32
    %7 = vector.broadcast %cst_5 : f32 to vector<34x34xf32>
    %c0_i32 = arith.constant 0 : i32
    %8 = vector.broadcast %c0_i32 : i32 to vector<34x34xi32>
    %9 = arith.cmpi sge, %5, %8 : vector<34x34xi32>
    %c17_i32 = arith.constant 17 : i32
    %10 = vector.broadcast %c17_i32 : i32 to vector<34x34xi32>
    %11 = arith.cmpi slt, %5, %10 : vector<34x34xi32>
    %12 = arith.andi %9, %11 : vector<34x34xi1>
    %c0_i32_6 = arith.constant 0 : i32
    %13 = vector.broadcast %c0_i32_6 : i32 to vector<34x34xi32>
    %14 = arith.cmpi sge, %6, %13 : vector<34x34xi32>
    %c17_i32_7 = arith.constant 17 : i32
    %15 = vector.broadcast %c17_i32_7 : i32 to vector<34x34xi32>
    %16 = arith.cmpi slt, %6, %15 : vector<34x34xi32>
    %17 = arith.andi %14, %16 : vector<34x34xi1>
    %18 = arith.andi %12, %17 : vector<34x34xi1>
    %cst_8 = arith.constant 0.000000e+00 : f32
    %19 = vector.broadcast %cst_8 : f32 to vector<34x34xf32>
    %20 = arith.select %18, %19, %7 : vector<34x34xi1>, vector<34x34xf32>
    %c17_i32_9 = arith.constant 17 : i32
    %21 = vector.broadcast %c17_i32_9 : i32 to vector<34x34xi32>
    %22 = arith.cmpi sge, %5, %21 : vector<34x34xi32>
    %c34_i32 = arith.constant 34 : i32
    %23 = vector.broadcast %c34_i32 : i32 to vector<34x34xi32>
    %24 = arith.cmpi slt, %5, %23 : vector<34x34xi32>
    %25 = arith.andi %22, %24 : vector<34x34xi1>
    %c17_i32_10 = arith.constant 17 : i32
    %26 = vector.broadcast %c17_i32_10 : i32 to vector<34x34xi32>
    %27 = arith.cmpi sge, %6, %26 : vector<34x34xi32>
    %c34_i32_11 = arith.constant 34 : i32
    %28 = vector.broadcast %c34_i32_11 : i32 to vector<34x34xi32>
    %29 = arith.cmpi slt, %6, %28 : vector<34x34xi32>
    %30 = arith.andi %27, %29 : vector<34x34xi1>
    %31 = arith.andi %25, %30 : vector<34x34xi1>
    %cst_12 = arith.constant 0.000000e+00 : f32
    %32 = vector.broadcast %cst_12 : f32 to vector<34x34xf32>
    %33 = arith.select %31, %32, %20 : vector<34x34xi1>, vector<34x34xf32>
    %c0_13 = arith.constant 0 : index
    %c0_14 = arith.constant 0 : index
    %34 = vector.load %arg4[%c0_13, %c0_14] : memref<32x256xf32, #tpu.memory_space<vmem>>, vector<1x64xf32>
    %c1 = arith.constant 1 : index
    %c0_15 = arith.constant 0 : index
    %35 = vector.load %arg4[%c1, %c0_15] : memref<32x256xf32, #tpu.memory_space<vmem>>, vector<1x64xf32>
    %cst_16 = arith.constant dense<0.000000e+00> : vector<34xf32>
    %36 = vector.multi_reduction <add>, %4, %cst_16 [1] : vector<34x64xf32> to vector<34xf32>
    %37 = vector.shape_cast %36 : vector<34xf32> to vector<34x1xf32>
    %cst_17 = arith.constant 6.400000e+01 : f32
    %38 = vector.broadcast %cst_17 : f32 to vector<34x1xf32>
    %39 = arith.divf %37, %38 : vector<34x1xf32>
    %40 = vector.broadcast %39 : vector<34x1xf32> to vector<34x64xf32>
    %41 = arith.subf %4, %40 : vector<34x64xf32>
    %42 = arith.mulf %41, %41 : vector<34x64xf32>
    %cst_18 = arith.constant dense<0.000000e+00> : vector<34xf32>
    %43 = vector.multi_reduction <add>, %42, %cst_18 [1] : vector<34x64xf32> to vector<34xf32>
    %44 = vector.shape_cast %43 : vector<34xf32> to vector<34x1xf32>
    %cst_19 = arith.constant 6.400000e+01 : f32
    %45 = vector.broadcast %cst_19 : f32 to vector<34x1xf32>
    %46 = arith.divf %44, %45 : vector<34x1xf32>
    %47 = vector.broadcast %39 : vector<34x1xf32> to vector<34x64xf32>
    %48 = arith.subf %4, %47 : vector<34x64xf32>
    %cst_20 = arith.constant 9.99999974E-6 : f32
    %49 = vector.broadcast %cst_20 : f32 to vector<34x1xf32>
    %50 = arith.addf %46, %49 : vector<34x1xf32>
    %51 = math.rsqrt %50 : vector<34x1xf32>
    %52 = vector.broadcast %51 : vector<34x1xf32> to vector<34x64xf32>
    %53 = arith.mulf %48, %52 : vector<34x64xf32>
    %54 = vector.broadcast %34 : vector<1x64xf32> to vector<34x64xf32>
    %55 = arith.mulf %53, %54 : vector<34x64xf32>
    %56 = vector.broadcast %35 : vector<1x64xf32> to vector<34x64xf32>
    %57 = arith.addf %55, %56 : vector<34x64xf32>
    %c64 = arith.constant 64 : index
    %c0_21 = arith.constant 0 : index
    %58 = vector.load %arg3[%c64, %c0_21] : memref<1600x256xf32, #tpu.memory_space<vmem>>, vector<64x192xf32>
    %cst_22 = arith.constant dense<0.000000e+00> : vector<34x192xf32>
    %59 = tpu.matmul %57, %58, %cst_22 {dimension_numbers = #tpu.dot_dimension_numbers<[1], [0], [0], [1], [0, 0, 1, 1], [], []>} : vector<34x64xf32>, vector<64x192xf32>, vector<34x192xf32> -> vector<34x192xf32>
    %60 = vector.extract_strided_slice %59 {offsets = [0, 0], sizes = [34, 16], strides = [1, 1]} : vector<34x192xf32> to vector<34x16xf32>
    %61 = vector.extract_strided_slice %59 {offsets = [0, 64], sizes = [34, 16], strides = [1, 1]} : vector<34x192xf32> to vector<34x16xf32>
    %62 = vector.extract_strided_slice %59 {offsets = [0, 128], sizes = [34, 16], strides = [1, 1]} : vector<34x192xf32> to vector<34x16xf32>
    %cst_23 = arith.constant dense<0.000000e+00> : vector<34x34xf32>
    %63 = tpu.matmul %60, %61, %cst_23 {dimension_numbers = #tpu.dot_dimension_numbers<[1], [1], [0], [0], [0, 0, 1, 0], [], []>} : vector<34x16xf32>, vector<34x16xf32>, vector<34x34xf32> -> vector<34x34xf32>
    %64 = arith.addf %63, %33 : vector<34x34xf32>
    %cst_24 = arith.constant dense<0xFF800000> : vector<34xf32>
    %65 = vector.multi_reduction <maximumf>, %64, %cst_24 [1] : vector<34x34xf32> to vector<34xf32>
    %66 = vector.shape_cast %65 : vector<34xf32> to vector<34x1xf32>
    %67 = vector.broadcast %66 : vector<34x1xf32> to vector<34x34xf32>
    %68 = arith.subf %64, %67 : vector<34x34xf32>
    %69 = math.exp %68 : vector<34x34xf32>
    %cst_25 = arith.constant dense<0.000000e+00> : vector<34xf32>
    %70 = vector.multi_reduction <add>, %69, %cst_25 [1] : vector<34x34xf32> to vector<34xf32>
    %71 = vector.shape_cast %70 : vector<34xf32> to vector<34x1xf32>
    %72 = tpu.reciprocal %71 : vector<34x1xf32> -> vector<34x1xf32>
    %73 = vector.broadcast %72 : vector<34x1xf32> to vector<34x34xf32>
    %74 = arith.mulf %69, %73 : vector<34x34xf32>
    %cst_26 = arith.constant dense<0.000000e+00> : vector<34x16xf32>
    %75 = tpu.matmul %74, %62, %cst_26 {dimension_numbers = #tpu.dot_dimension_numbers<[1], [0], [0], [1], [0, 0, 1, 1], [], []>} : vector<34x34xf32>, vector<34x16xf32>, vector<34x16xf32> -> vector<34x16xf32>
    %76 = vector.extract_strided_slice %59 {offsets = [0, 16], sizes = [34, 16], strides = [1, 1]} : vector<34x192xf32> to vector<34x16xf32>
    %77 = vector.extract_strided_slice %59 {offsets = [0, 80], sizes = [34, 16], strides = [1, 1]} : vector<34x192xf32> to vector<34x16xf32>
    %78 = vector.extract_strided_slice %59 {offsets = [0, 144], sizes = [34, 16], strides = [1, 1]} : vector<34x192xf32> to vector<34x16xf32>
    %cst_27 = arith.constant dense<0.000000e+00> : vector<34x34xf32>
    %79 = tpu.matmul %76, %77, %cst_27 {dimension_numbers = #tpu.dot_dimension_numbers<[1], [1], [0], [0], [0, 0, 1, 0], [], []>} : vector<34x16xf32>, vector<34x16xf32>, vector<34x34xf32> -> vector<34x34xf32>
    %80 = arith.addf %79, %33 : vector<34x34xf32>
    %cst_28 = arith.constant dense<0xFF800000> : vector<34xf32>
    %81 = vector.multi_reduction <maximumf>, %80, %cst_28 [1] : vector<34x34xf32> to vector<34xf32>
    %82 = vector.shape_cast %81 : vector<34xf32> to vector<34x1xf32>
    %83 = vector.broadcast %82 : vector<34x1xf32> to vector<34x34xf32>
    %84 = arith.subf %80, %83 : vector<34x34xf32>
    %85 = math.exp %84 : vector<34x34xf32>
    %cst_29 = arith.constant dense<0.000000e+00> : vector<34xf32>
    %86 = vector.multi_reduction <add>, %85, %cst_29 [1] : vector<34x34xf32> to vector<34xf32>
    %87 = vector.shape_cast %86 : vector<34xf32> to vector<34x1xf32>
    %88 = tpu.reciprocal %87 : vector<34x1xf32> -> vector<34x1xf32>
    %89 = vector.broadcast %88 : vector<34x1xf32> to vector<34x34xf32>
    %90 = arith.mulf %85, %89 : vector<34x34xf32>
    %cst_30 = arith.constant dense<0.000000e+00> : vector<34x16xf32>
    %91 = tpu.matmul %90, %78, %cst_30 {dimension_numbers = #tpu.dot_dimension_numbers<[1], [0], [0], [1], [0, 0, 1, 1], [], []>} : vector<34x34xf32>, vector<34x16xf32>, vector<34x16xf32> -> vector<34x16xf32>
    %92 = vector.extract_strided_slice %59 {offsets = [0, 32], sizes = [34, 16], strides = [1, 1]} : vector<34x192xf32> to vector<34x16xf32>
    %93 = vector.extract_strided_slice %59 {offsets = [0, 96], sizes = [34, 16], strides = [1, 1]} : vector<34x192xf32> to vector<34x16xf32>
    %94 = vector.extract_strided_slice %59 {offsets = [0, 160], sizes = [34, 16], strides = [1, 1]} : vector<34x192xf32> to vector<34x16xf32>
    %cst_31 = arith.constant dense<0.000000e+00> : vector<34x34xf32>
    %95 = tpu.matmul %92, %93, %cst_31 {dimension_numbers = #tpu.dot_dimension_numbers<[1], [1], [0], [0], [0, 0, 1, 0], [], []>} : vector<34x16xf32>, vector<34x16xf32>, vector<34x34xf32> -> vector<34x34xf32>
    %96 = arith.addf %95, %33 : vector<34x34xf32>
    %cst_32 = arith.constant dense<0xFF800000> : vector<34xf32>
    %97 = vector.multi_reduction <maximumf>, %96, %cst_32 [1] : vector<34x34xf32> to vector<34xf32>
    %98 = vector.shape_cast %97 : vector<34xf32> to vector<34x1xf32>
    %99 = vector.broadcast %98 : vector<34x1xf32> to vector<34x34xf32>
    %100 = arith.subf %96, %99 : vector<34x34xf32>
    %101 = math.exp %100 : vector<34x34xf32>
    %cst_33 = arith.constant dense<0.000000e+00> : vector<34xf32>
    %102 = vector.multi_reduction <add>, %101, %cst_33 [1] : vector<34x34xf32> to vector<34xf32>
    %103 = vector.shape_cast %102 : vector<34xf32> to vector<34x1xf32>
    %104 = tpu.reciprocal %103 : vector<34x1xf32> -> vector<34x1xf32>
    %105 = vector.broadcast %104 : vector<34x1xf32> to vector<34x34xf32>
    %106 = arith.mulf %101, %105 : vector<34x34xf32>
    %cst_34 = arith.constant dense<0.000000e+00> : vector<34x16xf32>
    %107 = tpu.matmul %106, %94, %cst_34 {dimension_numbers = #tpu.dot_dimension_numbers<[1], [0], [0], [1], [0, 0, 1, 1], [], []>} : vector<34x34xf32>, vector<34x16xf32>, vector<34x16xf32> -> vector<34x16xf32>
    %108 = vector.extract_strided_slice %59 {offsets = [0, 48], sizes = [34, 16], strides = [1, 1]} : vector<34x192xf32> to vector<34x16xf32>
    %109 = vector.extract_strided_slice %59 {offsets = [0, 112], sizes = [34, 16], strides = [1, 1]} : vector<34x192xf32> to vector<34x16xf32>
    %110 = vector.extract_strided_slice %59 {offsets = [0, 176], sizes = [34, 16], strides = [1, 1]} : vector<34x192xf32> to vector<34x16xf32>
    %cst_35 = arith.constant dense<0.000000e+00> : vector<34x34xf32>
    %111 = tpu.matmul %108, %109, %cst_35 {dimension_numbers = #tpu.dot_dimension_numbers<[1], [1], [0], [0], [0, 0, 1, 0], [], []>} : vector<34x16xf32>, vector<34x16xf32>, vector<34x34xf32> -> vector<34x34xf32>
    %112 = arith.addf %111, %33 : vector<34x34xf32>
    %cst_36 = arith.constant dense<0xFF800000> : vector<34xf32>
    %113 = vector.multi_reduction <maximumf>, %112, %cst_36 [1] : vector<34x34xf32> to vector<34xf32>
    %114 = vector.shape_cast %113 : vector<34xf32> to vector<34x1xf32>
    %115 = vector.broadcast %114 : vector<34x1xf32> to vector<34x34xf32>
    %116 = arith.subf %112, %115 : vector<34x34xf32>
    %117 = math.exp %116 : vector<34x34xf32>
    %cst_37 = arith.constant dense<0.000000e+00> : vector<34xf32>
    %118 = vector.multi_reduction <add>, %117, %cst_37 [1] : vector<34x34xf32> to vector<34xf32>
    %119 = vector.shape_cast %118 : vector<34xf32> to vector<34x1xf32>
    %120 = tpu.reciprocal %119 : vector<34x1xf32> -> vector<34x1xf32>
    %121 = vector.broadcast %120 : vector<34x1xf32> to vector<34x34xf32>
    %122 = arith.mulf %117, %121 : vector<34x34xf32>
    %cst_38 = arith.constant dense<0.000000e+00> : vector<34x16xf32>
    %123 = tpu.matmul %122, %110, %cst_38 {dimension_numbers = #tpu.dot_dimension_numbers<[1], [0], [0], [1], [0, 0, 1, 1], [], []>} : vector<34x34xf32>, vector<34x16xf32>, vector<34x16xf32> -> vector<34x16xf32>
    %124 = tpu.concatenate %75, %91, %107, %123 in 1 : vector<34x16xf32>, vector<34x16xf32>, vector<34x16xf32>, vector<34x16xf32> -> vector<34x64xf32>
    %c128 = arith.constant 128 : index
    %c0_39 = arith.constant 0 : index
    %125 = vector.load %arg3[%c128, %c0_39] : memref<1600x256xf32, #tpu.memory_space<vmem>>, vector<64x64xf32>
    %cst_40 = arith.constant dense<0.000000e+00> : vector<34x64xf32>
    %126 = tpu.matmul %124, %125, %cst_40 {dimension_numbers = #tpu.dot_dimension_numbers<[1], [0], [0], [1], [0, 0, 1, 1], [], []>} : vector<34x64xf32>, vector<64x64xf32>, vector<34x64xf32> -> vector<34x64xf32>
    %127 = arith.addf %4, %126 : vector<34x64xf32>
    %c2 = arith.constant 2 : index
    %c0_41 = arith.constant 0 : index
    %128 = vector.load %arg4[%c2, %c0_41] : memref<32x256xf32, #tpu.memory_space<vmem>>, vector<1x64xf32>
    %129 = vector.broadcast %128 : vector<1x64xf32> to vector<34x64xf32>
    %130 = arith.addf %127, %129 : vector<34x64xf32>
    %c3 = arith.constant 3 : index
    %c0_42 = arith.constant 0 : index
    %131 = vector.load %arg4[%c3, %c0_42] : memref<32x256xf32, #tpu.memory_space<vmem>>, vector<1x64xf32>
    %c4 = arith.constant 4 : index
    %c0_43 = arith.constant 0 : index
    %132 = vector.load %arg4[%c4, %c0_43] : memref<32x256xf32, #tpu.memory_space<vmem>>, vector<1x64xf32>
    %cst_44 = arith.constant dense<0.000000e+00> : vector<34xf32>
    %133 = vector.multi_reduction <add>, %130, %cst_44 [1] : vector<34x64xf32> to vector<34xf32>
    %134 = vector.shape_cast %133 : vector<34xf32> to vector<34x1xf32>
    %cst_45 = arith.constant 6.400000e+01 : f32
    %135 = vector.broadcast %cst_45 : f32 to vector<34x1xf32>
    %136 = arith.divf %134, %135 : vector<34x1xf32>
    %137 = vector.broadcast %136 : vector<34x1xf32> to vector<34x64xf32>
    %138 = arith.subf %130, %137 : vector<34x64xf32>
    %139 = arith.mulf %138, %138 : vector<34x64xf32>
    %cst_46 = arith.constant dense<0.000000e+00> : vector<34xf32>
    %140 = vector.multi_reduction <add>, %139, %cst_46 [1] : vector<34x64xf32> to vector<34xf32>
    %141 = vector.shape_cast %140 : vector<34xf32> to vector<34x1xf32>
    %cst_47 = arith.constant 6.400000e+01 : f32
    %142 = vector.broadcast %cst_47 : f32 to vector<34x1xf32>
    %143 = arith.divf %141, %142 : vector<34x1xf32>
    %144 = vector.broadcast %136 : vector<34x1xf32> to vector<34x64xf32>
    %145 = arith.subf %130, %144 : vector<34x64xf32>
    %cst_48 = arith.constant 9.99999974E-6 : f32
    %146 = vector.broadcast %cst_48 : f32 to vector<34x1xf32>
    %147 = arith.addf %143, %146 : vector<34x1xf32>
    %148 = math.rsqrt %147 : vector<34x1xf32>
    %149 = vector.broadcast %148 : vector<34x1xf32> to vector<34x64xf32>
    %150 = arith.mulf %145, %149 : vector<34x64xf32>
    %151 = vector.broadcast %131 : vector<1x64xf32> to vector<34x64xf32>
    %152 = arith.mulf %150, %151 : vector<34x64xf32>
    %153 = vector.broadcast %132 : vector<1x64xf32> to vector<34x64xf32>
    %154 = arith.addf %152, %153 : vector<34x64xf32>
    %c192 = arith.constant 192 : index
    %c0_49 = arith.constant 0 : index
    %155 = vector.load %arg3[%c192, %c0_49] : memref<1600x256xf32, #tpu.memory_space<vmem>>, vector<64x256xf32>
    %cst_50 = arith.constant dense<0.000000e+00> : vector<34x256xf32>
    %156 = tpu.matmul %154, %155, %cst_50 {dimension_numbers = #tpu.dot_dimension_numbers<[1], [0], [0], [1], [0, 0, 1, 1], [], []>} : vector<34x64xf32>, vector<64x256xf32>, vector<34x256xf32> -> vector<34x256xf32>
    %c5 = arith.constant 5 : index
    %c0_51 = arith.constant 0 : index
    %157 = vector.load %arg4[%c5, %c0_51] : memref<32x256xf32, #tpu.memory_space<vmem>>, vector<1x256xf32>
    %158 = vector.broadcast %157 : vector<1x256xf32> to vector<34x256xf32>
    %159 = arith.addf %156, %158 : vector<34x256xf32>
    %cst_52 = arith.constant 5.000000e-01 : f32
    %160 = vector.broadcast %cst_52 : f32 to vector<34x256xf32>
    %161 = arith.mulf %160, %159 : vector<34x256xf32>
    %cst_53 = arith.constant 0.707106769 : f32
    %162 = vector.broadcast %cst_53 : f32 to vector<34x256xf32>
    %163 = arith.mulf %159, %162 : vector<34x256xf32>
    %cst_54 = arith.constant 0.000000e+00 : f32
    %164 = vector.broadcast %cst_54 : f32 to vector<34x256xf32>
    %165 = arith.cmpf oge, %163, %164 : vector<34x256xf32>
    %cst_55 = arith.constant 1.000000e+00 : f32
    %cst_56 = arith.constant -1.000000e+00 : f32
    %166 = vector.broadcast %cst_55 : f32 to vector<34x256xf32>
    %167 = vector.broadcast %cst_56 : f32 to vector<34x256xf32>
    %168 = arith.select %165, %166, %167 : vector<34x256xi1>, vector<34x256xf32>
    %169 = math.absf %163 : vector<34x256xf32>
    %cst_57 = arith.constant 0.327591091 : f32
    %170 = vector.broadcast %cst_57 : f32 to vector<34x256xf32>
    %171 = arith.mulf %170, %169 : vector<34x256xf32>
    %cst_58 = arith.constant 1.000000e+00 : f32
    %172 = vector.broadcast %cst_58 : f32 to vector<34x256xf32>
    %173 = arith.addf %172, %171 : vector<34x256xf32>
    %cst_59 = arith.constant 1.000000e+00 : f32
    %174 = vector.broadcast %cst_59 : f32 to vector<34x256xf32>
    %175 = arith.divf %174, %173 : vector<34x256xf32>
    %cst_60 = arith.constant 1.06140542 : f32
    %176 = vector.broadcast %cst_60 : f32 to vector<34x256xf32>
    %177 = arith.mulf %176, %175 : vector<34x256xf32>
    %cst_61 = arith.constant -1.45315206 : f32
    %178 = vector.broadcast %cst_61 : f32 to vector<34x256xf32>
    %179 = arith.addf %177, %178 : vector<34x256xf32>
    %180 = arith.mulf %179, %175 : vector<34x256xf32>
    %cst_62 = arith.constant 1.42141378 : f32
    %181 = vector.broadcast %cst_62 : f32 to vector<34x256xf32>
    %182 = arith.addf %180, %181 : vector<34x256xf32>
    %183 = arith.mulf %182, %175 : vector<34x256xf32>
    %cst_63 = arith.constant -0.284496725 : f32
    %184 = vector.broadcast %cst_63 : f32 to vector<34x256xf32>
    %185 = arith.addf %183, %184 : vector<34x256xf32>
    %186 = arith.mulf %185, %175 : vector<34x256xf32>
    %cst_64 = arith.constant 0.254829586 : f32
    %187 = vector.broadcast %cst_64 : f32 to vector<34x256xf32>
    %188 = arith.addf %186, %187 : vector<34x256xf32>
    %189 = arith.mulf %188, %175 : vector<34x256xf32>
    %cst_65 = arith.constant 0.000000e+00 : f32
    %190 = vector.broadcast %cst_65 : f32 to vector<34x256xf32>
    %191 = arith.subf %190, %169 : vector<34x256xf32>
    %192 = arith.mulf %191, %169 : vector<34x256xf32>
    %193 = math.exp %192 : vector<34x256xf32>
    %194 = arith.mulf %189, %193 : vector<34x256xf32>
    %cst_66 = arith.constant 1.000000e+00 : f32
    %195 = vector.broadcast %cst_66 : f32 to vector<34x256xf32>
    %196 = arith.subf %195, %194 : vector<34x256xf32>
    %197 = arith.mulf %168, %196 : vector<34x256xf32>
    %cst_67 = arith.constant 1.000000e+00 : f32
    %198 = vector.broadcast %cst_67 : f32 to vector<34x256xf32>
    %199 = arith.addf %198, %197 : vector<34x256xf32>
    %200 = arith.mulf %161, %199 : vector<34x256xf32>
    %c256 = arith.constant 256 : index
    %c0_68 = arith.constant 0 : index
    %201 = vector.load %arg3[%c256, %c0_68] : memref<1600x256xf32, #tpu.memory_space<vmem>>, vector<256x64xf32>
    %cst_69 = arith.constant dense<0.000000e+00> : vector<34x64xf32>
    %202 = tpu.matmul %200, %201, %cst_69 {dimension_numbers = #tpu.dot_dimension_numbers<[1], [0], [0], [1], [0, 0, 1, 1], [], []>} : vector<34x256xf32>, vector<256x64xf32>, vector<34x64xf32> -> vector<34x64xf32>
    %c6 = arith.constant 6 : index
    %c0_70 = arith.constant 0 : index
    %203 = vector.load %arg4[%c6, %c0_70] : memref<32x256xf32, #tpu.memory_space<vmem>>, vector<1x64xf32>
    %204 = vector.broadcast %203 : vector<1x64xf32> to vector<34x64xf32>
    %205 = arith.addf %202, %204 : vector<34x64xf32>
    %206 = arith.addf %130, %205 : vector<34x64xf32>
    %c7 = arith.constant 7 : index
    %c0_71 = arith.constant 0 : index
    %207 = vector.load %arg4[%c7, %c0_71] : memref<32x256xf32, #tpu.memory_space<vmem>>, vector<1x64xf32>
    %c8 = arith.constant 8 : index
    %c0_72 = arith.constant 0 : index
    %208 = vector.load %arg4[%c8, %c0_72] : memref<32x256xf32, #tpu.memory_space<vmem>>, vector<1x64xf32>
    %cst_73 = arith.constant dense<0.000000e+00> : vector<34xf32>
    %209 = vector.multi_reduction <add>, %206, %cst_73 [1] : vector<34x64xf32> to vector<34xf32>
    %210 = vector.shape_cast %209 : vector<34xf32> to vector<34x1xf32>
    %cst_74 = arith.constant 6.400000e+01 : f32
    %211 = vector.broadcast %cst_74 : f32 to vector<34x1xf32>
    %212 = arith.divf %210, %211 : vector<34x1xf32>
    %213 = vector.broadcast %212 : vector<34x1xf32> to vector<34x64xf32>
    %214 = arith.subf %206, %213 : vector<34x64xf32>
    %215 = arith.mulf %214, %214 : vector<34x64xf32>
    %cst_75 = arith.constant dense<0.000000e+00> : vector<34xf32>
    %216 = vector.multi_reduction <add>, %215, %cst_75 [1] : vector<34x64xf32> to vector<34xf32>
    %217 = vector.shape_cast %216 : vector<34xf32> to vector<34x1xf32>
    %cst_76 = arith.constant 6.400000e+01 : f32
    %218 = vector.broadcast %cst_76 : f32 to vector<34x1xf32>
    %219 = arith.divf %217, %218 : vector<34x1xf32>
    %220 = vector.broadcast %212 : vector<34x1xf32> to vector<34x64xf32>
    %221 = arith.subf %206, %220 : vector<34x64xf32>
    %cst_77 = arith.constant 9.99999974E-6 : f32
    %222 = vector.broadcast %cst_77 : f32 to vector<34x1xf32>
    %223 = arith.addf %219, %222 : vector<34x1xf32>
    %224 = math.rsqrt %223 : vector<34x1xf32>
    %225 = vector.broadcast %224 : vector<34x1xf32> to vector<34x64xf32>
    %226 = arith.mulf %221, %225 : vector<34x64xf32>
    %227 = vector.broadcast %207 : vector<1x64xf32> to vector<34x64xf32>
    %228 = arith.mulf %226, %227 : vector<34x64xf32>
    %229 = vector.broadcast %208 : vector<1x64xf32> to vector<34x64xf32>
    %230 = arith.addf %228, %229 : vector<34x64xf32>
    %c512 = arith.constant 512 : index
    %c0_78 = arith.constant 0 : index
    %231 = vector.load %arg3[%c512, %c0_78] : memref<1600x256xf32, #tpu.memory_space<vmem>>, vector<64x192xf32>
    %cst_79 = arith.constant dense<0.000000e+00> : vector<34x192xf32>
    %232 = tpu.matmul %230, %231, %cst_79 {dimension_numbers = #tpu.dot_dimension_numbers<[1], [0], [0], [1], [0, 0, 1, 1], [], []>} : vector<34x64xf32>, vector<64x192xf32>, vector<34x192xf32> -> vector<34x192xf32>
    %233 = vector.extract_strided_slice %232 {offsets = [0, 0], sizes = [34, 16], strides = [1, 1]} : vector<34x192xf32> to vector<34x16xf32>
    %234 = vector.extract_strided_slice %232 {offsets = [0, 64], sizes = [34, 16], strides = [1, 1]} : vector<34x192xf32> to vector<34x16xf32>
    %235 = vector.extract_strided_slice %232 {offsets = [0, 128], sizes = [34, 16], strides = [1, 1]} : vector<34x192xf32> to vector<34x16xf32>
    %cst_80 = arith.constant dense<0.000000e+00> : vector<34x34xf32>
    %236 = tpu.matmul %233, %234, %cst_80 {dimension_numbers = #tpu.dot_dimension_numbers<[1], [1], [0], [0], [0, 0, 1, 0], [], []>} : vector<34x16xf32>, vector<34x16xf32>, vector<34x34xf32> -> vector<34x34xf32>
    %237 = arith.addf %236, %33 : vector<34x34xf32>
    %cst_81 = arith.constant dense<0xFF800000> : vector<34xf32>
    %238 = vector.multi_reduction <maximumf>, %237, %cst_81 [1] : vector<34x34xf32> to vector<34xf32>
    %239 = vector.shape_cast %238 : vector<34xf32> to vector<34x1xf32>
    %240 = vector.broadcast %239 : vector<34x1xf32> to vector<34x34xf32>
    %241 = arith.subf %237, %240 : vector<34x34xf32>
    %242 = math.exp %241 : vector<34x34xf32>
    %cst_82 = arith.constant dense<0.000000e+00> : vector<34xf32>
    %243 = vector.multi_reduction <add>, %242, %cst_82 [1] : vector<34x34xf32> to vector<34xf32>
    %244 = vector.shape_cast %243 : vector<34xf32> to vector<34x1xf32>
    %245 = tpu.reciprocal %244 : vector<34x1xf32> -> vector<34x1xf32>
    %246 = vector.broadcast %245 : vector<34x1xf32> to vector<34x34xf32>
    %247 = arith.mulf %242, %246 : vector<34x34xf32>
    %cst_83 = arith.constant dense<0.000000e+00> : vector<34x16xf32>
    %248 = tpu.matmul %247, %235, %cst_83 {dimension_numbers = #tpu.dot_dimension_numbers<[1], [0], [0], [1], [0, 0, 1, 1], [], []>} : vector<34x34xf32>, vector<34x16xf32>, vector<34x16xf32> -> vector<34x16xf32>
    %249 = vector.extract_strided_slice %232 {offsets = [0, 16], sizes = [34, 16], strides = [1, 1]} : vector<34x192xf32> to vector<34x16xf32>
    %250 = vector.extract_strided_slice %232 {offsets = [0, 80], sizes = [34, 16], strides = [1, 1]} : vector<34x192xf32> to vector<34x16xf32>
    %251 = vector.extract_strided_slice %232 {offsets = [0, 144], sizes = [34, 16], strides = [1, 1]} : vector<34x192xf32> to vector<34x16xf32>
    %cst_84 = arith.constant dense<0.000000e+00> : vector<34x34xf32>
    %252 = tpu.matmul %249, %250, %cst_84 {dimension_numbers = #tpu.dot_dimension_numbers<[1], [1], [0], [0], [0, 0, 1, 0], [], []>} : vector<34x16xf32>, vector<34x16xf32>, vector<34x34xf32> -> vector<34x34xf32>
    %253 = arith.addf %252, %33 : vector<34x34xf32>
    %cst_85 = arith.constant dense<0xFF800000> : vector<34xf32>
    %254 = vector.multi_reduction <maximumf>, %253, %cst_85 [1] : vector<34x34xf32> to vector<34xf32>
    %255 = vector.shape_cast %254 : vector<34xf32> to vector<34x1xf32>
    %256 = vector.broadcast %255 : vector<34x1xf32> to vector<34x34xf32>
    %257 = arith.subf %253, %256 : vector<34x34xf32>
    %258 = math.exp %257 : vector<34x34xf32>
    %cst_86 = arith.constant dense<0.000000e+00> : vector<34xf32>
    %259 = vector.multi_reduction <add>, %258, %cst_86 [1] : vector<34x34xf32> to vector<34xf32>
    %260 = vector.shape_cast %259 : vector<34xf32> to vector<34x1xf32>
    %261 = tpu.reciprocal %260 : vector<34x1xf32> -> vector<34x1xf32>
    %262 = vector.broadcast %261 : vector<34x1xf32> to vector<34x34xf32>
    %263 = arith.mulf %258, %262 : vector<34x34xf32>
    %cst_87 = arith.constant dense<0.000000e+00> : vector<34x16xf32>
    %264 = tpu.matmul %263, %251, %cst_87 {dimension_numbers = #tpu.dot_dimension_numbers<[1], [0], [0], [1], [0, 0, 1, 1], [], []>} : vector<34x34xf32>, vector<34x16xf32>, vector<34x16xf32> -> vector<34x16xf32>
    %265 = vector.extract_strided_slice %232 {offsets = [0, 32], sizes = [34, 16], strides = [1, 1]} : vector<34x192xf32> to vector<34x16xf32>
    %266 = vector.extract_strided_slice %232 {offsets = [0, 96], sizes = [34, 16], strides = [1, 1]} : vector<34x192xf32> to vector<34x16xf32>
    %267 = vector.extract_strided_slice %232 {offsets = [0, 160], sizes = [34, 16], strides = [1, 1]} : vector<34x192xf32> to vector<34x16xf32>
    %cst_88 = arith.constant dense<0.000000e+00> : vector<34x34xf32>
    %268 = tpu.matmul %265, %266, %cst_88 {dimension_numbers = #tpu.dot_dimension_numbers<[1], [1], [0], [0], [0, 0, 1, 0], [], []>} : vector<34x16xf32>, vector<34x16xf32>, vector<34x34xf32> -> vector<34x34xf32>
    %269 = arith.addf %268, %33 : vector<34x34xf32>
    %cst_89 = arith.constant dense<0xFF800000> : vector<34xf32>
    %270 = vector.multi_reduction <maximumf>, %269, %cst_89 [1] : vector<34x34xf32> to vector<34xf32>
    %271 = vector.shape_cast %270 : vector<34xf32> to vector<34x1xf32>
    %272 = vector.broadcast %271 : vector<34x1xf32> to vector<34x34xf32>
    %273 = arith.subf %269, %272 : vector<34x34xf32>
    %274 = math.exp %273 : vector<34x34xf32>
    %cst_90 = arith.constant dense<0.000000e+00> : vector<34xf32>
    %275 = vector.multi_reduction <add>, %274, %cst_90 [1] : vector<34x34xf32> to vector<34xf32>
    %276 = vector.shape_cast %275 : vector<34xf32> to vector<34x1xf32>
    %277 = tpu.reciprocal %276 : vector<34x1xf32> -> vector<34x1xf32>
    %278 = vector.broadcast %277 : vector<34x1xf32> to vector<34x34xf32>
    %279 = arith.mulf %274, %278 : vector<34x34xf32>
    %cst_91 = arith.constant dense<0.000000e+00> : vector<34x16xf32>
    %280 = tpu.matmul %279, %267, %cst_91 {dimension_numbers = #tpu.dot_dimension_numbers<[1], [0], [0], [1], [0, 0, 1, 1], [], []>} : vector<34x34xf32>, vector<34x16xf32>, vector<34x16xf32> -> vector<34x16xf32>
    %281 = vector.extract_strided_slice %232 {offsets = [0, 48], sizes = [34, 16], strides = [1, 1]} : vector<34x192xf32> to vector<34x16xf32>
    %282 = vector.extract_strided_slice %232 {offsets = [0, 112], sizes = [34, 16], strides = [1, 1]} : vector<34x192xf32> to vector<34x16xf32>
    %283 = vector.extract_strided_slice %232 {offsets = [0, 176], sizes = [34, 16], strides = [1, 1]} : vector<34x192xf32> to vector<34x16xf32>
    %cst_92 = arith.constant dense<0.000000e+00> : vector<34x34xf32>
    %284 = tpu.matmul %281, %282, %cst_92 {dimension_numbers = #tpu.dot_dimension_numbers<[1], [1], [0], [0], [0, 0, 1, 0], [], []>} : vector<34x16xf32>, vector<34x16xf32>, vector<34x34xf32> -> vector<34x34xf32>
    %285 = arith.addf %284, %33 : vector<34x34xf32>
    %cst_93 = arith.constant dense<0xFF800000> : vector<34xf32>
    %286 = vector.multi_reduction <maximumf>, %285, %cst_93 [1] : vector<34x34xf32> to vector<34xf32>
    %287 = vector.shape_cast %286 : vector<34xf32> to vector<34x1xf32>
    %288 = vector.broadcast %287 : vector<34x1xf32> to vector<34x34xf32>
    %289 = arith.subf %285, %288 : vector<34x34xf32>
    %290 = math.exp %289 : vector<34x34xf32>
    %cst_94 = arith.constant dense<0.000000e+00> : vector<34xf32>
    %291 = vector.multi_reduction <add>, %290, %cst_94 [1] : vector<34x34xf32> to vector<34xf32>
    %292 = vector.shape_cast %291 : vector<34xf32> to vector<34x1xf32>
    %293 = tpu.reciprocal %292 : vector<34x1xf32> -> vector<34x1xf32>
    %294 = vector.broadcast %293 : vector<34x1xf32> to vector<34x34xf32>
    %295 = arith.mulf %290, %294 : vector<34x34xf32>
    %cst_95 = arith.constant dense<0.000000e+00> : vector<34x16xf32>
    %296 = tpu.matmul %295, %283, %cst_95 {dimension_numbers = #tpu.dot_dimension_numbers<[1], [0], [0], [1], [0, 0, 1, 1], [], []>} : vector<34x34xf32>, vector<34x16xf32>, vector<34x16xf32> -> vector<34x16xf32>
    %297 = tpu.concatenate %248, %264, %280, %296 in 1 : vector<34x16xf32>, vector<34x16xf32>, vector<34x16xf32>, vector<34x16xf32> -> vector<34x64xf32>
    %c576 = arith.constant 576 : index
    %c0_96 = arith.constant 0 : index
    %298 = vector.load %arg3[%c576, %c0_96] : memref<1600x256xf32, #tpu.memory_space<vmem>>, vector<64x64xf32>
    %cst_97 = arith.constant dense<0.000000e+00> : vector<34x64xf32>
    %299 = tpu.matmul %297, %298, %cst_97 {dimension_numbers = #tpu.dot_dimension_numbers<[1], [0], [0], [1], [0, 0, 1, 1], [], []>} : vector<34x64xf32>, vector<64x64xf32>, vector<34x64xf32> -> vector<34x64xf32>
    %300 = arith.addf %206, %299 : vector<34x64xf32>
    %c9 = arith.constant 9 : index
    %c0_98 = arith.constant 0 : index
    %301 = vector.load %arg4[%c9, %c0_98] : memref<32x256xf32, #tpu.memory_space<vmem>>, vector<1x64xf32>
    %302 = vector.broadcast %301 : vector<1x64xf32> to vector<34x64xf32>
    %303 = arith.addf %300, %302 : vector<34x64xf32>
    %c10 = arith.constant 10 : index
    %c0_99 = arith.constant 0 : index
    %304 = vector.load %arg4[%c10, %c0_99] : memref<32x256xf32, #tpu.memory_space<vmem>>, vector<1x64xf32>
    %c11 = arith.constant 11 : index
    %c0_100 = arith.constant 0 : index
    %305 = vector.load %arg4[%c11, %c0_100] : memref<32x256xf32, #tpu.memory_space<vmem>>, vector<1x64xf32>
    %cst_101 = arith.constant dense<0.000000e+00> : vector<34xf32>
    %306 = vector.multi_reduction <add>, %303, %cst_101 [1] : vector<34x64xf32> to vector<34xf32>
    %307 = vector.shape_cast %306 : vector<34xf32> to vector<34x1xf32>
    %cst_102 = arith.constant 6.400000e+01 : f32
    %308 = vector.broadcast %cst_102 : f32 to vector<34x1xf32>
    %309 = arith.divf %307, %308 : vector<34x1xf32>
    %310 = vector.broadcast %309 : vector<34x1xf32> to vector<34x64xf32>
    %311 = arith.subf %303, %310 : vector<34x64xf32>
    %312 = arith.mulf %311, %311 : vector<34x64xf32>
    %cst_103 = arith.constant dense<0.000000e+00> : vector<34xf32>
    %313 = vector.multi_reduction <add>, %312, %cst_103 [1] : vector<34x64xf32> to vector<34xf32>
    %314 = vector.shape_cast %313 : vector<34xf32> to vector<34x1xf32>
    %cst_104 = arith.constant 6.400000e+01 : f32
    %315 = vector.broadcast %cst_104 : f32 to vector<34x1xf32>
    %316 = arith.divf %314, %315 : vector<34x1xf32>
    %317 = vector.broadcast %309 : vector<34x1xf32> to vector<34x64xf32>
    %318 = arith.subf %303, %317 : vector<34x64xf32>
    %cst_105 = arith.constant 9.99999974E-6 : f32
    %319 = vector.broadcast %cst_105 : f32 to vector<34x1xf32>
    %320 = arith.addf %316, %319 : vector<34x1xf32>
    %321 = math.rsqrt %320 : vector<34x1xf32>
    %322 = vector.broadcast %321 : vector<34x1xf32> to vector<34x64xf32>
    %323 = arith.mulf %318, %322 : vector<34x64xf32>
    %324 = vector.broadcast %304 : vector<1x64xf32> to vector<34x64xf32>
    %325 = arith.mulf %323, %324 : vector<34x64xf32>
    %326 = vector.broadcast %305 : vector<1x64xf32> to vector<34x64xf32>
    %327 = arith.addf %325, %326 : vector<34x64xf32>
    %c640 = arith.constant 640 : index
    %c0_106 = arith.constant 0 : index
    %328 = vector.load %arg3[%c640, %c0_106] : memref<1600x256xf32, #tpu.memory_space<vmem>>, vector<64x256xf32>
    %cst_107 = arith.constant dense<0.000000e+00> : vector<34x256xf32>
    %329 = tpu.matmul %327, %328, %cst_107 {dimension_numbers = #tpu.dot_dimension_numbers<[1], [0], [0], [1], [0, 0, 1, 1], [], []>} : vector<34x64xf32>, vector<64x256xf32>, vector<34x256xf32> -> vector<34x256xf32>
    %c12 = arith.constant 12 : index
    %c0_108 = arith.constant 0 : index
    %330 = vector.load %arg4[%c12, %c0_108] : memref<32x256xf32, #tpu.memory_space<vmem>>, vector<1x256xf32>
    %331 = vector.broadcast %330 : vector<1x256xf32> to vector<34x256xf32>
    %332 = arith.addf %329, %331 : vector<34x256xf32>
    %cst_109 = arith.constant 5.000000e-01 : f32
    %333 = vector.broadcast %cst_109 : f32 to vector<34x256xf32>
    %334 = arith.mulf %333, %332 : vector<34x256xf32>
    %cst_110 = arith.constant 0.707106769 : f32
    %335 = vector.broadcast %cst_110 : f32 to vector<34x256xf32>
    %336 = arith.mulf %332, %335 : vector<34x256xf32>
    %cst_111 = arith.constant 0.000000e+00 : f32
    %337 = vector.broadcast %cst_111 : f32 to vector<34x256xf32>
    %338 = arith.cmpf oge, %336, %337 : vector<34x256xf32>
    %cst_112 = arith.constant 1.000000e+00 : f32
    %cst_113 = arith.constant -1.000000e+00 : f32
    %339 = vector.broadcast %cst_112 : f32 to vector<34x256xf32>
    %340 = vector.broadcast %cst_113 : f32 to vector<34x256xf32>
    %341 = arith.select %338, %339, %340 : vector<34x256xi1>, vector<34x256xf32>
    %342 = math.absf %336 : vector<34x256xf32>
    %cst_114 = arith.constant 0.327591091 : f32
    %343 = vector.broadcast %cst_114 : f32 to vector<34x256xf32>
    %344 = arith.mulf %343, %342 : vector<34x256xf32>
    %cst_115 = arith.constant 1.000000e+00 : f32
    %345 = vector.broadcast %cst_115 : f32 to vector<34x256xf32>
    %346 = arith.addf %345, %344 : vector<34x256xf32>
    %cst_116 = arith.constant 1.000000e+00 : f32
    %347 = vector.broadcast %cst_116 : f32 to vector<34x256xf32>
    %348 = arith.divf %347, %346 : vector<34x256xf32>
    %cst_117 = arith.constant 1.06140542 : f32
    %349 = vector.broadcast %cst_117 : f32 to vector<34x256xf32>
    %350 = arith.mulf %349, %348 : vector<34x256xf32>
    %cst_118 = arith.constant -1.45315206 : f32
    %351 = vector.broadcast %cst_118 : f32 to vector<34x256xf32>
    %352 = arith.addf %350, %351 : vector<34x256xf32>
    %353 = arith.mulf %352, %348 : vector<34x256xf32>
    %cst_119 = arith.constant 1.42141378 : f32
    %354 = vector.broadcast %cst_119 : f32 to vector<34x256xf32>
    %355 = arith.addf %353, %354 : vector<34x256xf32>
    %356 = arith.mulf %355, %348 : vector<34x256xf32>
    %cst_120 = arith.constant -0.284496725 : f32
    %357 = vector.broadcast %cst_120 : f32 to vector<34x256xf32>
    %358 = arith.addf %356, %357 : vector<34x256xf32>
    %359 = arith.mulf %358, %348 : vector<34x256xf32>
    %cst_121 = arith.constant 0.254829586 : f32
    %360 = vector.broadcast %cst_121 : f32 to vector<34x256xf32>
    %361 = arith.addf %359, %360 : vector<34x256xf32>
    %362 = arith.mulf %361, %348 : vector<34x256xf32>
    %cst_122 = arith.constant 0.000000e+00 : f32
    %363 = vector.broadcast %cst_122 : f32 to vector<34x256xf32>
    %364 = arith.subf %363, %342 : vector<34x256xf32>
    %365 = arith.mulf %364, %342 : vector<34x256xf32>
    %366 = math.exp %365 : vector<34x256xf32>
    %367 = arith.mulf %362, %366 : vector<34x256xf32>
    %cst_123 = arith.constant 1.000000e+00 : f32
    %368 = vector.broadcast %cst_123 : f32 to vector<34x256xf32>
    %369 = arith.subf %368, %367 : vector<34x256xf32>
    %370 = arith.mulf %341, %369 : vector<34x256xf32>
    %cst_124 = arith.constant 1.000000e+00 : f32
    %371 = vector.broadcast %cst_124 : f32 to vector<34x256xf32>
    %372 = arith.addf %371, %370 : vector<34x256xf32>
    %373 = arith.mulf %334, %372 : vector<34x256xf32>
    %c704 = arith.constant 704 : index
    %c0_125 = arith.constant 0 : index
    %374 = vector.load %arg3[%c704, %c0_125] : memref<1600x256xf32, #tpu.memory_space<vmem>>, vector<256x64xf32>
    %cst_126 = arith.constant dense<0.000000e+00> : vector<34x64xf32>
    %375 = tpu.matmul %373, %374, %cst_126 {dimension_numbers = #tpu.dot_dimension_numbers<[1], [0], [0], [1], [0, 0, 1, 1], [], []>} : vector<34x256xf32>, vector<256x64xf32>, vector<34x64xf32> -> vector<34x64xf32>
    %c13 = arith.constant 13 : index
    %c0_127 = arith.constant 0 : index
    %376 = vector.load %arg4[%c13, %c0_127] : memref<32x256xf32, #tpu.memory_space<vmem>>, vector<1x64xf32>
    %377 = vector.broadcast %376 : vector<1x64xf32> to vector<34x64xf32>
    %378 = arith.addf %375, %377 : vector<34x64xf32>
    %379 = arith.addf %303, %378 : vector<34x64xf32>
    %380 = tpu.concatenate %379, %206 in 1 : vector<34x64xf32>, vector<34x64xf32> -> vector<34x128xf32>
    %c960 = arith.constant 960 : index
    %c0_128 = arith.constant 0 : index
    %381 = vector.load %arg3[%c960, %c0_128] : memref<1600x256xf32, #tpu.memory_space<vmem>>, vector<128x64xf32>
    %cst_129 = arith.constant dense<0.000000e+00> : vector<34x64xf32>
    %382 = tpu.matmul %380, %381, %cst_129 {dimension_numbers = #tpu.dot_dimension_numbers<[1], [0], [0], [1], [0, 0, 1, 1], [], []>} : vector<34x128xf32>, vector<128x64xf32>, vector<34x64xf32> -> vector<34x64xf32>
    %c14 = arith.constant 14 : index
    %c0_130 = arith.constant 0 : index
    %383 = vector.load %arg4[%c14, %c0_130] : memref<32x256xf32, #tpu.memory_space<vmem>>, vector<1x64xf32>
    %384 = vector.broadcast %383 : vector<1x64xf32> to vector<34x64xf32>
    %385 = arith.addf %382, %384 : vector<34x64xf32>
    %c15 = arith.constant 15 : index
    %c0_131 = arith.constant 0 : index
    %386 = vector.load %arg4[%c15, %c0_131] : memref<32x256xf32, #tpu.memory_space<vmem>>, vector<1x64xf32>
    %c16 = arith.constant 16 : index
    %c0_132 = arith.constant 0 : index
    %387 = vector.load %arg4[%c16, %c0_132] : memref<32x256xf32, #tpu.memory_space<vmem>>, vector<1x64xf32>
    %cst_133 = arith.constant dense<0.000000e+00> : vector<34xf32>
    %388 = vector.multi_reduction <add>, %385, %cst_133 [1] : vector<34x64xf32> to vector<34xf32>
    %389 = vector.shape_cast %388 : vector<34xf32> to vector<34x1xf32>
    %cst_134 = arith.constant 6.400000e+01 : f32
    %390 = vector.broadcast %cst_134 : f32 to vector<34x1xf32>
    %391 = arith.divf %389, %390 : vector<34x1xf32>
    %392 = vector.broadcast %391 : vector<34x1xf32> to vector<34x64xf32>
    %393 = arith.subf %385, %392 : vector<34x64xf32>
    %394 = arith.mulf %393, %393 : vector<34x64xf32>
    %cst_135 = arith.constant dense<0.000000e+00> : vector<34xf32>
    %395 = vector.multi_reduction <add>, %394, %cst_135 [1] : vector<34x64xf32> to vector<34xf32>
    %396 = vector.shape_cast %395 : vector<34xf32> to vector<34x1xf32>
    %cst_136 = arith.constant 6.400000e+01 : f32
    %397 = vector.broadcast %cst_136 : f32 to vector<34x1xf32>
    %398 = arith.divf %396, %397 : vector<34x1xf32>
    %399 = vector.broadcast %391 : vector<34x1xf32> to vector<34x64xf32>
    %400 = arith.subf %385, %399 : vector<34x64xf32>
    %cst_137 = arith.constant 9.99999974E-6 : f32
    %401 = vector.broadcast %cst_137 : f32 to vector<34x1xf32>
    %402 = arith.addf %398, %401 : vector<34x1xf32>
    %403 = math.rsqrt %402 : vector<34x1xf32>
    %404 = vector.broadcast %403 : vector<34x1xf32> to vector<34x64xf32>
    %405 = arith.mulf %400, %404 : vector<34x64xf32>
    %406 = vector.broadcast %386 : vector<1x64xf32> to vector<34x64xf32>
    %407 = arith.mulf %405, %406 : vector<34x64xf32>
    %408 = vector.broadcast %387 : vector<1x64xf32> to vector<34x64xf32>
    %409 = arith.addf %407, %408 : vector<34x64xf32>
    %c1088 = arith.constant 1088 : index
    %c0_138 = arith.constant 0 : index
    %410 = vector.load %arg3[%c1088, %c0_138] : memref<1600x256xf32, #tpu.memory_space<vmem>>, vector<64x192xf32>
    %cst_139 = arith.constant dense<0.000000e+00> : vector<34x192xf32>
    %411 = tpu.matmul %409, %410, %cst_139 {dimension_numbers = #tpu.dot_dimension_numbers<[1], [0], [0], [1], [0, 0, 1, 1], [], []>} : vector<34x64xf32>, vector<64x192xf32>, vector<34x192xf32> -> vector<34x192xf32>
    %412 = vector.extract_strided_slice %411 {offsets = [0, 0], sizes = [34, 16], strides = [1, 1]} : vector<34x192xf32> to vector<34x16xf32>
    %413 = vector.extract_strided_slice %411 {offsets = [0, 64], sizes = [34, 16], strides = [1, 1]} : vector<34x192xf32> to vector<34x16xf32>
    %414 = vector.extract_strided_slice %411 {offsets = [0, 128], sizes = [34, 16], strides = [1, 1]} : vector<34x192xf32> to vector<34x16xf32>
    %cst_140 = arith.constant dense<0.000000e+00> : vector<34x34xf32>
    %415 = tpu.matmul %412, %413, %cst_140 {dimension_numbers = #tpu.dot_dimension_numbers<[1], [1], [0], [0], [0, 0, 1, 0], [], []>} : vector<34x16xf32>, vector<34x16xf32>, vector<34x34xf32> -> vector<34x34xf32>
    %416 = arith.addf %415, %33 : vector<34x34xf32>
    %cst_141 = arith.constant dense<0xFF800000> : vector<34xf32>
    %417 = vector.multi_reduction <maximumf>, %416, %cst_141 [1] : vector<34x34xf32> to vector<34xf32>
    %418 = vector.shape_cast %417 : vector<34xf32> to vector<34x1xf32>
    %419 = vector.broadcast %418 : vector<34x1xf32> to vector<34x34xf32>
    %420 = arith.subf %416, %419 : vector<34x34xf32>
    %421 = math.exp %420 : vector<34x34xf32>
    %cst_142 = arith.constant dense<0.000000e+00> : vector<34xf32>
    %422 = vector.multi_reduction <add>, %421, %cst_142 [1] : vector<34x34xf32> to vector<34xf32>
    %423 = vector.shape_cast %422 : vector<34xf32> to vector<34x1xf32>
    %424 = tpu.reciprocal %423 : vector<34x1xf32> -> vector<34x1xf32>
    %425 = vector.broadcast %424 : vector<34x1xf32> to vector<34x34xf32>
    %426 = arith.mulf %421, %425 : vector<34x34xf32>
    %cst_143 = arith.constant dense<0.000000e+00> : vector<34x16xf32>
    %427 = tpu.matmul %426, %414, %cst_143 {dimension_numbers = #tpu.dot_dimension_numbers<[1], [0], [0], [1], [0, 0, 1, 1], [], []>} : vector<34x34xf32>, vector<34x16xf32>, vector<34x16xf32> -> vector<34x16xf32>
    %428 = vector.extract_strided_slice %411 {offsets = [0, 16], sizes = [34, 16], strides = [1, 1]} : vector<34x192xf32> to vector<34x16xf32>
    %429 = vector.extract_strided_slice %411 {offsets = [0, 80], sizes = [34, 16], strides = [1, 1]} : vector<34x192xf32> to vector<34x16xf32>
    %430 = vector.extract_strided_slice %411 {offsets = [0, 144], sizes = [34, 16], strides = [1, 1]} : vector<34x192xf32> to vector<34x16xf32>
    %cst_144 = arith.constant dense<0.000000e+00> : vector<34x34xf32>
    %431 = tpu.matmul %428, %429, %cst_144 {dimension_numbers = #tpu.dot_dimension_numbers<[1], [1], [0], [0], [0, 0, 1, 0], [], []>} : vector<34x16xf32>, vector<34x16xf32>, vector<34x34xf32> -> vector<34x34xf32>
    %432 = arith.addf %431, %33 : vector<34x34xf32>
    %cst_145 = arith.constant dense<0xFF800000> : vector<34xf32>
    %433 = vector.multi_reduction <maximumf>, %432, %cst_145 [1] : vector<34x34xf32> to vector<34xf32>
    %434 = vector.shape_cast %433 : vector<34xf32> to vector<34x1xf32>
    %435 = vector.broadcast %434 : vector<34x1xf32> to vector<34x34xf32>
    %436 = arith.subf %432, %435 : vector<34x34xf32>
    %437 = math.exp %436 : vector<34x34xf32>
    %cst_146 = arith.constant dense<0.000000e+00> : vector<34xf32>
    %438 = vector.multi_reduction <add>, %437, %cst_146 [1] : vector<34x34xf32> to vector<34xf32>
    %439 = vector.shape_cast %438 : vector<34xf32> to vector<34x1xf32>
    %440 = tpu.reciprocal %439 : vector<34x1xf32> -> vector<34x1xf32>
    %441 = vector.broadcast %440 : vector<34x1xf32> to vector<34x34xf32>
    %442 = arith.mulf %437, %441 : vector<34x34xf32>
    %cst_147 = arith.constant dense<0.000000e+00> : vector<34x16xf32>
    %443 = tpu.matmul %442, %430, %cst_147 {dimension_numbers = #tpu.dot_dimension_numbers<[1], [0], [0], [1], [0, 0, 1, 1], [], []>} : vector<34x34xf32>, vector<34x16xf32>, vector<34x16xf32> -> vector<34x16xf32>
    %444 = vector.extract_strided_slice %411 {offsets = [0, 32], sizes = [34, 16], strides = [1, 1]} : vector<34x192xf32> to vector<34x16xf32>
    %445 = vector.extract_strided_slice %411 {offsets = [0, 96], sizes = [34, 16], strides = [1, 1]} : vector<34x192xf32> to vector<34x16xf32>
    %446 = vector.extract_strided_slice %411 {offsets = [0, 160], sizes = [34, 16], strides = [1, 1]} : vector<34x192xf32> to vector<34x16xf32>
    %cst_148 = arith.constant dense<0.000000e+00> : vector<34x34xf32>
    %447 = tpu.matmul %444, %445, %cst_148 {dimension_numbers = #tpu.dot_dimension_numbers<[1], [1], [0], [0], [0, 0, 1, 0], [], []>} : vector<34x16xf32>, vector<34x16xf32>, vector<34x34xf32> -> vector<34x34xf32>
    %448 = arith.addf %447, %33 : vector<34x34xf32>
    %cst_149 = arith.constant dense<0xFF800000> : vector<34xf32>
    %449 = vector.multi_reduction <maximumf>, %448, %cst_149 [1] : vector<34x34xf32> to vector<34xf32>
    %450 = vector.shape_cast %449 : vector<34xf32> to vector<34x1xf32>
    %451 = vector.broadcast %450 : vector<34x1xf32> to vector<34x34xf32>
    %452 = arith.subf %448, %451 : vector<34x34xf32>
    %453 = math.exp %452 : vector<34x34xf32>
    %cst_150 = arith.constant dense<0.000000e+00> : vector<34xf32>
    %454 = vector.multi_reduction <add>, %453, %cst_150 [1] : vector<34x34xf32> to vector<34xf32>
    %455 = vector.shape_cast %454 : vector<34xf32> to vector<34x1xf32>
    %456 = tpu.reciprocal %455 : vector<34x1xf32> -> vector<34x1xf32>
    %457 = vector.broadcast %456 : vector<34x1xf32> to vector<34x34xf32>
    %458 = arith.mulf %453, %457 : vector<34x34xf32>
    %cst_151 = arith.constant dense<0.000000e+00> : vector<34x16xf32>
    %459 = tpu.matmul %458, %446, %cst_151 {dimension_numbers = #tpu.dot_dimension_numbers<[1], [0], [0], [1], [0, 0, 1, 1], [], []>} : vector<34x34xf32>, vector<34x16xf32>, vector<34x16xf32> -> vector<34x16xf32>
    %460 = vector.extract_strided_slice %411 {offsets = [0, 48], sizes = [34, 16], strides = [1, 1]} : vector<34x192xf32> to vector<34x16xf32>
    %461 = vector.extract_strided_slice %411 {offsets = [0, 112], sizes = [34, 16], strides = [1, 1]} : vector<34x192xf32> to vector<34x16xf32>
    %462 = vector.extract_strided_slice %411 {offsets = [0, 176], sizes = [34, 16], strides = [1, 1]} : vector<34x192xf32> to vector<34x16xf32>
    %cst_152 = arith.constant dense<0.000000e+00> : vector<34x34xf32>
    %463 = tpu.matmul %460, %461, %cst_152 {dimension_numbers = #tpu.dot_dimension_numbers<[1], [1], [0], [0], [0, 0, 1, 0], [], []>} : vector<34x16xf32>, vector<34x16xf32>, vector<34x34xf32> -> vector<34x34xf32>
    %464 = arith.addf %463, %33 : vector<34x34xf32>
    %cst_153 = arith.constant dense<0xFF800000> : vector<34xf32>
    %465 = vector.multi_reduction <maximumf>, %464, %cst_153 [1] : vector<34x34xf32> to vector<34xf32>
    %466 = vector.shape_cast %465 : vector<34xf32> to vector<34x1xf32>
    %467 = vector.broadcast %466 : vector<34x1xf32> to vector<34x34xf32>
    %468 = arith.subf %464, %467 : vector<34x34xf32>
    %469 = math.exp %468 : vector<34x34xf32>
    %cst_154 = arith.constant dense<0.000000e+00> : vector<34xf32>
    %470 = vector.multi_reduction <add>, %469, %cst_154 [1] : vector<34x34xf32> to vector<34xf32>
    %471 = vector.shape_cast %470 : vector<34xf32> to vector<34x1xf32>
    %472 = tpu.reciprocal %471 : vector<34x1xf32> -> vector<34x1xf32>
    %473 = vector.broadcast %472 : vector<34x1xf32> to vector<34x34xf32>
    %474 = arith.mulf %469, %473 : vector<34x34xf32>
    %cst_155 = arith.constant dense<0.000000e+00> : vector<34x16xf32>
    %475 = tpu.matmul %474, %462, %cst_155 {dimension_numbers = #tpu.dot_dimension_numbers<[1], [0], [0], [1], [0, 0, 1, 1], [], []>} : vector<34x34xf32>, vector<34x16xf32>, vector<34x16xf32> -> vector<34x16xf32>
    %476 = tpu.concatenate %427, %443, %459, %475 in 1 : vector<34x16xf32>, vector<34x16xf32>, vector<34x16xf32>, vector<34x16xf32> -> vector<34x64xf32>
    %c1152 = arith.constant 1152 : index
    %c0_156 = arith.constant 0 : index
    %477 = vector.load %arg3[%c1152, %c0_156] : memref<1600x256xf32, #tpu.memory_space<vmem>>, vector<64x64xf32>
    %cst_157 = arith.constant dense<0.000000e+00> : vector<34x64xf32>
    %478 = tpu.matmul %476, %477, %cst_157 {dimension_numbers = #tpu.dot_dimension_numbers<[1], [0], [0], [1], [0, 0, 1, 1], [], []>} : vector<34x64xf32>, vector<64x64xf32>, vector<34x64xf32> -> vector<34x64xf32>
    %479 = arith.addf %385, %478 : vector<34x64xf32>
    %c17 = arith.constant 17 : index
    %c0_158 = arith.constant 0 : index
    %480 = vector.load %arg4[%c17, %c0_158] : memref<32x256xf32, #tpu.memory_space<vmem>>, vector<1x64xf32>
    %481 = vector.broadcast %480 : vector<1x64xf32> to vector<34x64xf32>
    %482 = arith.addf %479, %481 : vector<34x64xf32>
    %c18 = arith.constant 18 : index
    %c0_159 = arith.constant 0 : index
    %483 = vector.load %arg4[%c18, %c0_159] : memref<32x256xf32, #tpu.memory_space<vmem>>, vector<1x64xf32>
    %c19 = arith.constant 19 : index
    %c0_160 = arith.constant 0 : index
    %484 = vector.load %arg4[%c19, %c0_160] : memref<32x256xf32, #tpu.memory_space<vmem>>, vector<1x64xf32>
    %cst_161 = arith.constant dense<0.000000e+00> : vector<34xf32>
    %485 = vector.multi_reduction <add>, %482, %cst_161 [1] : vector<34x64xf32> to vector<34xf32>
    %486 = vector.shape_cast %485 : vector<34xf32> to vector<34x1xf32>
    %cst_162 = arith.constant 6.400000e+01 : f32
    %487 = vector.broadcast %cst_162 : f32 to vector<34x1xf32>
    %488 = arith.divf %486, %487 : vector<34x1xf32>
    %489 = vector.broadcast %488 : vector<34x1xf32> to vector<34x64xf32>
    %490 = arith.subf %482, %489 : vector<34x64xf32>
    %491 = arith.mulf %490, %490 : vector<34x64xf32>
    %cst_163 = arith.constant dense<0.000000e+00> : vector<34xf32>
    %492 = vector.multi_reduction <add>, %491, %cst_163 [1] : vector<34x64xf32> to vector<34xf32>
    %493 = vector.shape_cast %492 : vector<34xf32> to vector<34x1xf32>
    %cst_164 = arith.constant 6.400000e+01 : f32
    %494 = vector.broadcast %cst_164 : f32 to vector<34x1xf32>
    %495 = arith.divf %493, %494 : vector<34x1xf32>
    %496 = vector.broadcast %488 : vector<34x1xf32> to vector<34x64xf32>
    %497 = arith.subf %482, %496 : vector<34x64xf32>
    %cst_165 = arith.constant 9.99999974E-6 : f32
    %498 = vector.broadcast %cst_165 : f32 to vector<34x1xf32>
    %499 = arith.addf %495, %498 : vector<34x1xf32>
    %500 = math.rsqrt %499 : vector<34x1xf32>
    %501 = vector.broadcast %500 : vector<34x1xf32> to vector<34x64xf32>
    %502 = arith.mulf %497, %501 : vector<34x64xf32>
    %503 = vector.broadcast %483 : vector<1x64xf32> to vector<34x64xf32>
    %504 = arith.mulf %502, %503 : vector<34x64xf32>
    %505 = vector.broadcast %484 : vector<1x64xf32> to vector<34x64xf32>
    %506 = arith.addf %504, %505 : vector<34x64xf32>
    %c1216 = arith.constant 1216 : index
    %c0_166 = arith.constant 0 : index
    %507 = vector.load %arg3[%c1216, %c0_166] : memref<1600x256xf32, #tpu.memory_space<vmem>>, vector<64x256xf32>
    %cst_167 = arith.constant dense<0.000000e+00> : vector<34x256xf32>
    %508 = tpu.matmul %506, %507, %cst_167 {dimension_numbers = #tpu.dot_dimension_numbers<[1], [0], [0], [1], [0, 0, 1, 1], [], []>} : vector<34x64xf32>, vector<64x256xf32>, vector<34x256xf32> -> vector<34x256xf32>
    %c20 = arith.constant 20 : index
    %c0_168 = arith.constant 0 : index
    %509 = vector.load %arg4[%c20, %c0_168] : memref<32x256xf32, #tpu.memory_space<vmem>>, vector<1x256xf32>
    %510 = vector.broadcast %509 : vector<1x256xf32> to vector<34x256xf32>
    %511 = arith.addf %508, %510 : vector<34x256xf32>
    %cst_169 = arith.constant 5.000000e-01 : f32
    %512 = vector.broadcast %cst_169 : f32 to vector<34x256xf32>
    %513 = arith.mulf %512, %511 : vector<34x256xf32>
    %cst_170 = arith.constant 0.707106769 : f32
    %514 = vector.broadcast %cst_170 : f32 to vector<34x256xf32>
    %515 = arith.mulf %511, %514 : vector<34x256xf32>
    %cst_171 = arith.constant 0.000000e+00 : f32
    %516 = vector.broadcast %cst_171 : f32 to vector<34x256xf32>
    %517 = arith.cmpf oge, %515, %516 : vector<34x256xf32>
    %cst_172 = arith.constant 1.000000e+00 : f32
    %cst_173 = arith.constant -1.000000e+00 : f32
    %518 = vector.broadcast %cst_172 : f32 to vector<34x256xf32>
    %519 = vector.broadcast %cst_173 : f32 to vector<34x256xf32>
    %520 = arith.select %517, %518, %519 : vector<34x256xi1>, vector<34x256xf32>
    %521 = math.absf %515 : vector<34x256xf32>
    %cst_174 = arith.constant 0.327591091 : f32
    %522 = vector.broadcast %cst_174 : f32 to vector<34x256xf32>
    %523 = arith.mulf %522, %521 : vector<34x256xf32>
    %cst_175 = arith.constant 1.000000e+00 : f32
    %524 = vector.broadcast %cst_175 : f32 to vector<34x256xf32>
    %525 = arith.addf %524, %523 : vector<34x256xf32>
    %cst_176 = arith.constant 1.000000e+00 : f32
    %526 = vector.broadcast %cst_176 : f32 to vector<34x256xf32>
    %527 = arith.divf %526, %525 : vector<34x256xf32>
    %cst_177 = arith.constant 1.06140542 : f32
    %528 = vector.broadcast %cst_177 : f32 to vector<34x256xf32>
    %529 = arith.mulf %528, %527 : vector<34x256xf32>
    %cst_178 = arith.constant -1.45315206 : f32
    %530 = vector.broadcast %cst_178 : f32 to vector<34x256xf32>
    %531 = arith.addf %529, %530 : vector<34x256xf32>
    %532 = arith.mulf %531, %527 : vector<34x256xf32>
    %cst_179 = arith.constant 1.42141378 : f32
    %533 = vector.broadcast %cst_179 : f32 to vector<34x256xf32>
    %534 = arith.addf %532, %533 : vector<34x256xf32>
    %535 = arith.mulf %534, %527 : vector<34x256xf32>
    %cst_180 = arith.constant -0.284496725 : f32
    %536 = vector.broadcast %cst_180 : f32 to vector<34x256xf32>
    %537 = arith.addf %535, %536 : vector<34x256xf32>
    %538 = arith.mulf %537, %527 : vector<34x256xf32>
    %cst_181 = arith.constant 0.254829586 : f32
    %539 = vector.broadcast %cst_181 : f32 to vector<34x256xf32>
    %540 = arith.addf %538, %539 : vector<34x256xf32>
    %541 = arith.mulf %540, %527 : vector<34x256xf32>
    %cst_182 = arith.constant 0.000000e+00 : f32
    %542 = vector.broadcast %cst_182 : f32 to vector<34x256xf32>
    %543 = arith.subf %542, %521 : vector<34x256xf32>
    %544 = arith.mulf %543, %521 : vector<34x256xf32>
    %545 = math.exp %544 : vector<34x256xf32>
    %546 = arith.mulf %541, %545 : vector<34x256xf32>
    %cst_183 = arith.constant 1.000000e+00 : f32
    %547 = vector.broadcast %cst_183 : f32 to vector<34x256xf32>
    %548 = arith.subf %547, %546 : vector<34x256xf32>
    %549 = arith.mulf %520, %548 : vector<34x256xf32>
    %cst_184 = arith.constant 1.000000e+00 : f32
    %550 = vector.broadcast %cst_184 : f32 to vector<34x256xf32>
    %551 = arith.addf %550, %549 : vector<34x256xf32>
    %552 = arith.mulf %513, %551 : vector<34x256xf32>
    %c1280 = arith.constant 1280 : index
    %c0_185 = arith.constant 0 : index
    %553 = vector.load %arg3[%c1280, %c0_185] : memref<1600x256xf32, #tpu.memory_space<vmem>>, vector<256x64xf32>
    %cst_186 = arith.constant dense<0.000000e+00> : vector<34x64xf32>
    %554 = tpu.matmul %552, %553, %cst_186 {dimension_numbers = #tpu.dot_dimension_numbers<[1], [0], [0], [1], [0, 0, 1, 1], [], []>} : vector<34x256xf32>, vector<256x64xf32>, vector<34x64xf32> -> vector<34x64xf32>
    %c21 = arith.constant 21 : index
    %c0_187 = arith.constant 0 : index
    %555 = vector.load %arg4[%c21, %c0_187] : memref<32x256xf32, #tpu.memory_space<vmem>>, vector<1x64xf32>
    %556 = vector.broadcast %555 : vector<1x64xf32> to vector<34x64xf32>
    %557 = arith.addf %554, %556 : vector<34x64xf32>
    %558 = arith.addf %482, %557 : vector<34x64xf32>
    %c22 = arith.constant 22 : index
    %c0_188 = arith.constant 0 : index
    %559 = vector.load %arg4[%c22, %c0_188] : memref<32x256xf32, #tpu.memory_space<vmem>>, vector<1x64xf32>
    %c23 = arith.constant 23 : index
    %c0_189 = arith.constant 0 : index
    %560 = vector.load %arg4[%c23, %c0_189] : memref<32x256xf32, #tpu.memory_space<vmem>>, vector<1x64xf32>
    %cst_190 = arith.constant dense<0.000000e+00> : vector<34xf32>
    %561 = vector.multi_reduction <add>, %558, %cst_190 [1] : vector<34x64xf32> to vector<34xf32>
    %562 = vector.shape_cast %561 : vector<34xf32> to vector<34x1xf32>
    %cst_191 = arith.constant 6.400000e+01 : f32
    %563 = vector.broadcast %cst_191 : f32 to vector<34x1xf32>
    %564 = arith.divf %562, %563 : vector<34x1xf32>
    %565 = vector.broadcast %564 : vector<34x1xf32> to vector<34x64xf32>
    %566 = arith.subf %558, %565 : vector<34x64xf32>
    %567 = arith.mulf %566, %566 : vector<34x64xf32>
    %cst_192 = arith.constant dense<0.000000e+00> : vector<34xf32>
    %568 = vector.multi_reduction <add>, %567, %cst_192 [1] : vector<34x64xf32> to vector<34xf32>
    %569 = vector.shape_cast %568 : vector<34xf32> to vector<34x1xf32>
    %cst_193 = arith.constant 6.400000e+01 : f32
    %570 = vector.broadcast %cst_193 : f32 to vector<34x1xf32>
    %571 = arith.divf %569, %570 : vector<34x1xf32>
    %572 = vector.broadcast %564 : vector<34x1xf32> to vector<34x64xf32>
    %573 = arith.subf %558, %572 : vector<34x64xf32>
    %cst_194 = arith.constant 9.99999974E-6 : f32
    %574 = vector.broadcast %cst_194 : f32 to vector<34x1xf32>
    %575 = arith.addf %571, %574 : vector<34x1xf32>
    %576 = math.rsqrt %575 : vector<34x1xf32>
    %577 = vector.broadcast %576 : vector<34x1xf32> to vector<34x64xf32>
    %578 = arith.mulf %573, %577 : vector<34x64xf32>
    %579 = vector.broadcast %559 : vector<1x64xf32> to vector<34x64xf32>
    %580 = arith.mulf %578, %579 : vector<34x64xf32>
    %581 = vector.broadcast %560 : vector<1x64xf32> to vector<34x64xf32>
    %582 = arith.addf %580, %581 : vector<34x64xf32>
    %c1536 = arith.constant 1536 : index
    %c0_195 = arith.constant 0 : index
    %583 = vector.load %arg3[%c1536, %c0_195] : memref<1600x256xf32, #tpu.memory_space<vmem>>, vector<64x64xf32>
    %cst_196 = arith.constant dense<0.000000e+00> : vector<34x64xf32>
    %584 = tpu.matmul %582, %583, %cst_196 {dimension_numbers = #tpu.dot_dimension_numbers<[1], [0], [0], [1], [0, 0, 1, 1], [], []>} : vector<34x64xf32>, vector<64x64xf32>, vector<34x64xf32> -> vector<34x64xf32>
    %c24 = arith.constant 24 : index
    %c0_197 = arith.constant 0 : index
    %585 = vector.load %arg4[%c24, %c0_197] : memref<32x256xf32, #tpu.memory_space<vmem>>, vector<1x64xf32>
    %586 = vector.broadcast %585 : vector<1x64xf32> to vector<34x64xf32>
    %587 = arith.addf %584, %586 : vector<34x64xf32>
    %588 = vector.extract_strided_slice %587 {offsets = [1, 0], sizes = [16, 64], strides = [1, 1]} : vector<34x64xf32> to vector<16x64xf32>
    %c0_198 = arith.constant 0 : index
    %c0_199 = arith.constant 0 : index
    %c0_200 = arith.constant 0 : index
    %589 = vector.load %arg5[%c0_198, %c0_199, %c0_200] : memref<2x16x64xf32, #tpu.memory_space<vmem>>, vector<1x16x64xf32>
    %590 = vector.shape_cast %589 : vector<1x16x64xf32> to vector<16x64xf32>
    %591 = vector.shape_cast %588 : vector<16x64xf32> to vector<1x16x64xf32>
    tpu.vector_store %arg5[%c0_198, %c0_199, %c0_200], %591 {strides = array<i32>} : memref<2x16x64xf32, #tpu.memory_space<vmem>>, vector<1x16x64xf32>,
    %592 = vector.extract_strided_slice %587 {offsets = [18, 0], sizes = [16, 64], strides = [1, 1]} : vector<34x64xf32> to vector<16x64xf32>
    %c1_201 = arith.constant 1 : index
    %c0_202 = arith.constant 0 : index
    %c0_203 = arith.constant 0 : index
    %593 = vector.load %arg5[%c1_201, %c0_202, %c0_203] : memref<2x16x64xf32, #tpu.memory_space<vmem>>, vector<1x16x64xf32>
    %594 = vector.shape_cast %593 : vector<1x16x64xf32> to vector<16x64xf32>
    %595 = vector.shape_cast %592 : vector<16x64xf32> to vector<1x16x64xf32>
    tpu.vector_store %arg5[%c1_201, %c0_202, %c0_203], %595 {strides = array<i32>} : memref<2x16x64xf32, #tpu.memory_space<vmem>>, vector<1x16x64xf32>,
    return
  }
  func.func @transform_0(%arg0: i32) -> (i32, i32) {
    %c0_i32 = arith.constant 0 : i32
    %c0_i32_0 = arith.constant 0 : i32
    %c0_i32_1 = arith.constant 0 : i32
    return %c0_i32, %c0_i32_0 : i32, i32
  }
  func.func @transform_1(%arg0: i32) -> (i32, i32) {
    %c0_i32 = arith.constant 0 : i32
    %c0_i32_0 = arith.constant 0 : i32
    %c0_i32_1 = arith.constant 0 : i32
    return %c0_i32, %c0_i32_0 : i32, i32
  }
  func.func @transform_2(%arg0: i32) -> (i32, i32) {
    %c0_i32 = arith.constant 0 : i32
    %c0_i32_0 = arith.constant 0 : i32
    %c0_i32_1 = arith.constant 0 : i32
    return %c0_i32, %c0_i32_0 : i32, i32
  }
  func.func @transform_3(%arg0: i32) -> (i32, i32) {
    %c0_i32 = arith.constant 0 : i32
    %c0_i32_0 = arith.constant 0 : i32
    %c0_i32_1 = arith.constant 0 : i32
    return %c0_i32, %c0_i32_0 : i32, i32
  }
  func.func @transform_4(%arg0: i32) -> (i32, i32, i32) {
    %c0_i32 = arith.constant 0 : i32
    %c0_i32_0 = arith.constant 0 : i32
    %c0_i32_1 = arith.constant 0 : i32
    %c0_i32_2 = arith.constant 0 : i32
    return %c0_i32, %c0_i32_0, %c0_i32_1 : i32, i32, i32
  }
}

</mosaic_0001>

<bundles_post_ra>
// kernel: masked_uvit_forward.1
= control target key start
LH: loop header
LB: loop body
LE: loop exit
PB: predicated region body
PF: predicated region fallthrough
CT: control target
= control target key end

     0   :  { %9 = vsyncpa [#allocation3], 0  ;;  %s11131_s0 = inlined_call_operand.vmem [shape: f32[34,64], index: 0, kind: input, shape index: {}]   ;;  %s11132_s1 = inlined_call_operand.vmem [shape: f32[34,64], index: 1, kind: input, shape index: {}]   ;;  %s11133_s2 = inlined_call_operand.hbm [shape: f32[1600,256], index: 2, kind: input, shape index: {}]   ;;  %s11134_s3 = inlined_call_operand.hbm [shape: f32[32,256], index: 3, kind: input, shape index: {}]   ;;  %s11135_s4 = inlined_call_operand.vmem [shape: f32[2,16,64], index: 4, kind: output, shape index: {}]  }
   0x1   :  { %s19_s17 = sshll.u32 %s11133_s2, 4  ;;  %s20_s17 = int_to_ptr.hbm [resolvable:$true] %s19_s17 }
   0x2   :  { %10 = vsyncpa [#allocation5], 0  ;;  %s7598_s18 = smov [#allocation2]   ;;  %s32_s22 = sshll.u32 %s11134_s3, 4  ;;  %s33_s22 = int_to_ptr.hbm [resolvable:$true] %s32_s22 }
   0x3   :  { %s21_s19 = sshll.u32 %s7598_s18, 4  ;;  %s7599_s23 = smov 256   ;;  %s22_s19 = int_to_ptr.vmem [resolvable:$true] %s21_s19 }
   0x4   :  { %s7600_s24 = smov 16   ;;  %s7601_s25 = smov [#allocation4]  }
   0x5   :  { %27 = dma.hbm_to_vmem [thread:$0]  %s20_s17, 51200, %s22_s19, [#allocation3], %s7599_s23, %s7599_s23, %s7600_s24  }
   0x6   :  { %s34_s26 = sshll.u32 %s7601_s25, 4  ;;  %s35_s26 = int_to_ptr.vmem [resolvable:$true] %s34_s26 }
   0x7   :  { %40 = dma.hbm_to_vmem [thread:$0]  %s33_s22, 1024, %s35_s26, [#allocation5], %s7599_s23, %s7599_s23, %s7600_s24  }
   0x8   :  { %7594 = dma.done.wait [#allocation3], 51200  }
   0x9   :  { %7595 = vsyncadd [#allocation3], 4294916096 }
   0xa   :  { %7596 = dma.done.wait [#allocation5], 1024  }
   0xb   :  { %7597 = vsyncadd [#allocation5], 4294966272  ;;  %v61_v0 = vld [vmem:[#allocation2 + $0x70] sm:$0xff]  ;;  %v60_v1 = vld [vmem:[#allocation2 + $0x60] sm:$0xff]  ;;  %vm67_vm0 = vcmask 523264   ;;  %vm193_vm1 = vcmask 517120  }
   0xc   :  { %91 = vmatpush.msra.mxu0 %v61_v0  ;;  %v59_v2 = vld [vmem:[#allocation2 + $0x50] sm:$0xff]  ;;  %v58_v3 = vld [vmem:[#allocation2 + $0x40] sm:$0xff]  ;;  %v50_v9 = vld [vmem:[%s11131_s0 + $0x8] sm:$0xff]  ;;  %v7602_v33 = vmov 64.0   ;;  %s7604_s18 = smov 64   ;;  %s7605_s19 = smov 112  }
   0xd   :  { %v57_v4 = vld [vmem:[#allocation2 + $0x30] sm:$0xff]  ;;  %v56_v5 = vld [vmem:[#allocation2 + $0x20] sm:$0xff]  ;;  %v52_v11 = vld [vmem:[%s11131_s0 + $0x18] sm:$0xff]  ;;  %7114 = vrcp.f32 %v7602_v33  ;;  %s7606_s20 = smov 32   ;;  %s7607_s21 = smov 80  }
   0xe   :  { %92 = vmatpush.msra.mxu0 %v60_v1  ;;  %v55_v6 = vld [vmem:[#allocation2 + $0x10] sm:$0xff]  ;;  %v54_v7 = vld [vmem:[#allocation2] sm:$0xff]  ;;  %v63_v17 = vld [vmem:[%s11132_s1 + $0x8] sm:$0xff]  ;;  %s7608_s22 = smov 96  }
   0xf   :  { %v49_v8 = vld [vmem:[%s11131_s0] sm:$0xff]  ;;  %v51_v10 = vld [vmem:[%s11131_s0 + $0x10] sm:$0xff]  ;;  %v65_v25 = vld [vmem:[%s11132_s1 + $0x18] sm:$0xff] }
  0x10   :  { %93 = vmatpush.msra.mxu0 %v59_v2  ;;  %v53_v12 = vld [vmem:[%s11131_s0 + $0x20] sm:$0x3]  ;;  %v64_v21 = vld [vmem:[%s11132_s1 + $0x10] sm:$0xff]  ;;  %v324_v2 = vld [vmem:[#allocation2 + $0xf8] sm:$0xff] }
  0x11   :  { %v62_v13 = vld [vmem:[%s11132_s1] sm:$0xff]  ;;  %v323_v1 = vld [vmem:[#allocation2 + $0xf0] sm:$0xff]  ;;  %380 = vmatpush.msra.mxu2 %v324_v2 }
  0x12   :  { %94 = vmatpush.msra.mxu0 %v58_v3  ;;  %v66_v29 = vld [vmem:[%s11132_s1 + $0x20] sm:$0x3]  ;;  %348 = vmatpush.msra.mxu1 %v323_v1  ;;  %s7603_s1 = smov 48  }
  0x13   :  { %v7115_v34 = vpop.eup %7114  ;;  %v321_v3 = vld [vmem:[#allocation2 + $0xe0] sm:$0xff] }
  0x14   :  { %95 = vmatpush.msra.mxu0 %v57_v4  ;;  %v198_v35 = vmul.f32 64.0, %v7115_v34  ;;  %vm202_vm2 = vweird.f32 %v7115_v34  ;;  %v322_v4 = vld [vmem:[#allocation2 + $0xe8] sm:$0xff]  ;;  %349 = vmatpush.msra.mxu1 %v321_v3 }
  0x15   :  { %381 = vmatpush.msra.mxu2 %v322_v4 }
  0x16   :  { %96 = vmatpush.msra.mxu0 %v56_v5  ;;  %v199_v36 = vsub.f32 1.0, %v198_v35  ;;  %v319_v5 = vld [vmem:[#allocation2 + $0xd0] sm:$0xff] }
  0x17   :  { %350 = vmatpush.msra.mxu1 %v319_v5 }
  0x18   :  { %97 = vmatpush.msra.mxu0 %v55_v6  ;;  %v200_v37 = vmul.f32 %v7115_v34, %v199_v36  ;;  %v320_v6 = vld [vmem:[#allocation2 + $0xd8] sm:$0xff] }
  0x19   :  { %382 = vmatpush.msra.mxu2 %v320_v6 }
  0x1a   :  { %98 = vmatpush.msra.mxu0 %v54_v7  ;;  %v201_v38 = vadd.f32 %v7115_v34, %v200_v37  ;;  %v317_v7 = vld [vmem:[#allocation2 + $0xc0] sm:$0xff] }
  0x1b   :  { %6731 = vmatmul.msk.f32.vlgmr.msra.gmra.mxu0 %vm67_vm0, %v49_v8  ;;  %v318_v8 = vld [vmem:[#allocation2 + $0xc8] sm:$0xff]  ;;  %351 = vmatpush.msra.mxu1 %v317_v7 }
  0x1c   :  { %v7699_v39 = vsel %vm202_vm2, %v7115_v34, %v201_v38  ;;  %383 = vmatpush.msra.mxu2 %v318_v8 }
  0x23   :  { %6732 = vmatmul.msk.f32.gmra.mxu0 %vm67_vm0, %v50_v9  ;;  %v315_v9 = vld [vmem:[#allocation2 + $0xb0] sm:$0xff] }
  0x24   :  { %352 = vmatpush.msra.mxu1 %v315_v9 }
  0x2b   :  { %6733 = vmatmul.msk.f32.gmra.mxu0 %vm67_vm0, %v51_v10  ;;  %v316_v10 = vld [vmem:[#allocation2 + $0xb8] sm:$0xff] }
  0x2c   :  { %384 = vmatpush.msra.mxu2 %v316_v10 }
  0x33   :  { %6734 = vmatmul.msk.f32.gmra.mxu0 %vm67_vm0, %v52_v11  ;;  %v313_v11 = vld [vmem:[#allocation2 + $0xa0] sm:$0xff] }
  0x34   :  { %353 = vmatpush.msra.mxu1 %v313_v11 }
  0x3b   :  { %6735 = vmatmul.msk.f32.gmra.mxu0 %vm67_vm0, %v53_v12  ;;  %v314_v12 = vld [vmem:[#allocation2 + $0xa8] sm:$0xff] }
  0x3c   :  { %385 = vmatpush.msra.mxu2 %v314_v12 }
  0x98   :  { %v100_v14 = vpop.f32.mrf.mxu0 }
  0x99   :  { %v7667_v15 = vadd.f32 %v100_v14, %v62_v13  ;;  %v311_v13 = vld [vmem:[#allocation2 + $0x90] sm:$0xff]  ;;  %v312_v14 = vld [vmem:[#allocation2 + $0x98] sm:$0xff] }
  0x9a   :  { %354 = vmatpush.msra.mxu1 %v311_v13  ;;  %386 = vmatpush.msra.mxu2 %v312_v14 }
  0x9b   :  { %v181_v16 = vsel %vm67_vm0, %v7667_v15, 0.0 }
  0x9c   :  { %182 = vadd.xlane.f32.xlu0 %v181_v16  ;;  %v309_v16 = vld [vmem:[#allocation2 + $0x80] sm:$0xff] }
  0x9d   :  { %355 = vmatpush.msra.mxu1 %v309_v16 }
  0xa0   :  { %v103_v18 = vpop.f32.mrf.mxu0 }
  0xa1   :  { %v7674_v19 = vadd.f32 %v103_v18, %v63_v17  ;;  %v310_v17 = vld [vmem:[#allocation2 + $0x88] sm:$0xff] }
  0xa2   :  { %387 = vmatpush.msra.mxu2 %v310_v17 }
  0xa3   :  { %v184_v20 = vsel %vm67_vm0, %v7674_v19, 0.0 }
  0xa4   :  { %185 = vadd.xlane.f32.xlu0 %v184_v20 }
  0xa8   :  { %v106_v22 = vpop.f32.mrf.mxu0 }
  0xa9   :  { %v7681_v23 = vadd.f32 %v106_v22, %v64_v21 }
  0xab   :  { %v187_v24 = vsel %vm67_vm0, %v7681_v23, 0.0 }
  0xac   :  { %188 = vadd.xlane.f32.xlu1 %v187_v24 }
  0xb0   :  { %v109_v26 = vpop.f32.mrf.mxu0 }
  0xb1   :  { %v7688_v27 = vadd.f32 %v109_v26, %v65_v25 }
  0xb3   :  { %v190_v28 = vsel %vm67_vm0, %v7688_v27, 0.0 }
  0xb4   :  { %191 = vadd.xlane.f32.xlu1 %v190_v28 }
  0xb8   :  { %v112_v30 = vpop.f32.mrf.mxu0 }
  0xb9   :  { %v7695_v31 = vadd.f32 %v112_v30, %v66_v29 }
  0xbb   :  { %v194_v32 = vsel %vm193_vm1, %v7695_v31, 0.0 }
  0xbc   :  { %195 = vadd.xlane.f32.xlu2 %v194_v32 }
 0x10f   :  { %v183_v40 = vpop.xlane.xlu0 %182 }
 0x110   :  { %v204_v41 = vmul.f32 %v7699_v39, %v183_v40 }
 0x112   :  { %v7703_v42 = vsub.f32 %v7667_v15, %v204_v41  ;;  %v7739_v41 = vld [vmem:[#allocation4] ss:$0 sm:$0xff] }
 0x114   :  { %v214_v43 = vmul.f32 %v7703_v42, %v7703_v42 }
 0x116   :  { %v219_v44 = vsel %vm67_vm0, %v214_v43, 0.0 }
 0x117   :  { %220 = vadd.xlane.f32.xlu2 %v219_v44  ;;  %v186_v45 = vpop.xlane.xlu0 %185 }
 0x118   :  { %v205_v46 = vmul.f32 %v7699_v39, %v186_v45 }
 0x11a   :  { %v7710_v47 = vsub.f32 %v7674_v19, %v205_v46 }
 0x11c   :  { %v215_v48 = vmul.f32 %v7710_v47, %v7710_v47 }
 0x11e   :  { %v222_v49 = vsel %vm67_vm0, %v215_v48, 0.0  ;;  %v7742_v48 = vld [vmem:[#allocation4 + $0x1] ss:$0 sm:$0xff] }
 0x11f   :  { %v189_v50 = vpop.xlane.xlu1 %188  ;;  %223 = vadd.xlane.f32.xlu0 %v222_v49 }
 0x120   :  { %v206_v51 = vmul.f32 %v7699_v39, %v189_v50 }
 0x122   :  { %v7717_v52 = vsub.f32 %v7681_v23, %v206_v51 }
 0x124   :  { %v216_v53 = vmul.f32 %v7717_v52, %v7717_v52 }
 0x126   :  { %v225_v54 = vsel %vm67_vm0, %v216_v53, 0.0 }
 0x127   :  { %226 = vadd.xlane.f32.xlu1 %v225_v54  ;;  %v192_v55 = vpop.xlane.xlu1 %191 }
 0x128   :  { %v207_v56 = vmul.f32 %v7699_v39, %v192_v55 }
 0x12a   :  { %v7724_v57 = vsub.f32 %v7688_v27, %v207_v56 }
 0x12c   :  { %v217_v58 = vmul.f32 %v7724_v57, %v7724_v57 }
 0x12e   :  { %v228_v59 = vsel %vm67_vm0, %v217_v58, 0.0 }
 0x12f   :  { %v196_v60 = vpop.xlane.xlu2 %195  ;;  %229 = vadd.xlane.f32.xlu2 %v228_v59 }
 0x130   :  { %v208_v61 = vmul.f32 %v7699_v39, %v196_v60 }
 0x132   :  { %v7731_v62 = vsub.f32 %v7695_v31, %v208_v61 }
 0x134   :  { %v218_v63 = vmul.f32 %v7731_v62, %v7731_v62 }
 0x136   :  { %v231_v0 = vsel %vm193_vm1, %v218_v63, 0.0 }
 0x137   :  { %232 = vadd.xlane.f32.xlu0 %v231_v0 }
 0x18a   :  { %v221_v18 = vpop.xlane.xlu2 %220 }
 0x18b   :  { %v234_v20 = vmul.f32 %v221_v18, %v7699_v39 }
 0x18d   :  { %v239_v21 = vadd.f32 1e-05, %v234_v20 }
 0x18f   :  { %7116 = vrsqrt.f32 %v239_v21  ;;  %vm250_vm4 = vweird.f32 %v239_v21 }
 0x192   :  { %v224_v22 = vpop.xlane.xlu0 %223 }
 0x193   :  { %v235_v24 = vmul.f32 %v224_v22, %v7699_v39 }
 0x195   :  { %v7117_v25 = vpop.eup %7116  ;;  %v240_v26 = vadd.f32 1e-05, %v235_v24 }
 0x196   :  { %v245_v28 = vmul.f32 %v7117_v25, %v239_v21  ;;  %vm251_vm3 = vweird.f32 %v7117_v25 }
 0x197   :  { %7118 = vrsqrt.f32 %v240_v26  ;;  %vm252_vm5 = vmor %vm250_vm4, %vm251_vm3  ;;  %vm260_vm7 = vweird.f32 %v240_v26  ;;  %vm609_vm4 = vcmask 1041408  }
 0x198   :  { %v246_v29 = vmul.f32 %v7117_v25, %v245_v28 }
 0x19a   :  { %v247_v30 = vmul.f32 0.5, %v246_v29  ;;  %v227_v32 = vpop.xlane.xlu1 %226 }
 0x19b   :  { %v236_v33 = vmul.f32 %v227_v32, %v7699_v39 }
 0x19c   :  { %v248_v34 = vsub.f32 1.5, %v247_v30 }
 0x19d   :  { %v7119_v35 = vpop.eup %7118  ;;  %v241_v36 = vadd.f32 1e-05, %v236_v33 }
 0x19e   :  { %v249_v37 = vmul.f32 %v7117_v25, %v248_v34  ;;  %v255_v38 = vmul.f32 %v7119_v35, %v240_v26  ;;  %vm261_vm6 = vweird.f32 %v7119_v35 }
 0x19f   :  { %7120 = vrsqrt.f32 %v241_v36  ;;  %vm262_vm8 = vmor %vm260_vm7, %vm261_vm6  ;;  %vm270_vm10 = vweird.f32 %v241_v36  ;;  %vm472_vm7 = vcmask 277504  }
 0x1a0   :  { %v256_v40 = vmul.f32 %v7119_v35, %v255_v38  ;;  %v253_v43 = vsel %vm252_vm5, %v7117_v25, %v249_v37  ;;  %vm419_vm5 = vcmask 130048  }
 0x1a1   :  { %v294_v44 = vmul.f32 %v253_v43, %v7703_v42 }
 0x1a2   :  { %v257_v45 = vmul.f32 0.5, %v256_v40  ;;  %v230_v46 = vpop.xlane.xlu2 %229 }
 0x1a3   :  { %v237_v49 = vmul.f32 %v230_v46, %v7699_v39  ;;  %v299_v50 = vmul.f32 %v294_v44, %v7739_v41 }
 0x1a4   :  { %v258_v51 = vsub.f32 1.5, %v257_v45 }
 0x1a5   :  { %v7121_v53 = vpop.eup %7120  ;;  %v242_v54 = vadd.f32 1e-05, %v237_v49  ;;  %v304_v55 = vadd.f32 %v299_v50, %v7742_v48 }
 0x1a6   :  { %v259_v56 = vmul.f32 %v7119_v35, %v258_v51  ;;  %v265_v58 = vmul.f32 %v7121_v53, %v241_v36  ;;  %vm271_vm9 = vweird.f32 %v7121_v53 }
 0x1a7   :  { %7122 = vrsqrt.f32 %v242_v54  ;;  %6736 = vmatmul.msk.f32.vlgmr.msra.gmra.mxu1 %vm67_vm0, %v304_v55  ;;  %6741 = vmatmul.msk.f32.vlgmr.msra.gmra.mxu2 %vm67_vm0, %v304_v55  ;;  %vm272_vm11 = vmor %vm270_vm10, %vm271_vm9  ;;  %vm280_vm13 = vweird.f32 %v242_v54 }
 0x1a8   :  { %v266_v42 = vmul.f32 %v7121_v53, %v265_v58  ;;  %v263_v59 = vsel %vm262_vm8, %v7119_v35, %v259_v56 }
 0x1a9   :  { %v295_v60 = vmul.f32 %v263_v59, %v7710_v47 }
 0x1aa   :  { %v267_v61 = vmul.f32 0.5, %v266_v42  ;;  %v233_v63 = vpop.xlane.xlu0 %232 }
 0x1ab   :  { %v238_v0 = vmul.f32 %v233_v63, %v7699_v39  ;;  %v300_v1 = vmul.f32 %v295_v60, %v7739_v41 }
 0x1ac   :  { %v268_v2 = vsub.f32 1.5, %v267_v61 }
 0x1ad   :  { %v7123_v3 = vpop.eup %7122  ;;  %v243_v4 = vadd.f32 1e-05, %v238_v0  ;;  %v305_v5 = vadd.f32 %v300_v1, %v7742_v48 }
 0x1ae   :  { %v269_v6 = vmul.f32 %v7121_v53, %v268_v2  ;;  %v275_v7 = vmul.f32 %v7123_v3, %v242_v54  ;;  %vm281_vm12 = vweird.f32 %v7123_v3 }
 0x1af   :  { %7124 = vrsqrt.f32 %v243_v4  ;;  %6737 = vmatmul.msk.f32.gmra.mxu1 %vm67_vm0, %v305_v5  ;;  %6742 = vmatmul.msk.f32.gmra.mxu2 %vm67_vm0, %v305_v5  ;;  %vm282_vm14 = vmor %vm280_vm13, %vm281_vm12  ;;  %vm290_vm2 = vweird.f32 %v243_v4 }
 0x1b0   :  { %v276_v47 = vmul.f32 %v7123_v3, %v275_v7  ;;  %v273_v8 = vsel %vm272_vm11, %v7121_v53, %v269_v6 }
 0x1b1   :  { %v296_v9 = vmul.f32 %v273_v8, %v7717_v52 }
 0x1b2   :  { %v277_v10 = vmul.f32 0.5, %v276_v47 }
 0x1b3   :  { %v301_v11 = vmul.f32 %v296_v9, %v7739_v41 }
 0x1b4   :  { %v278_v12 = vsub.f32 1.5, %v277_v10 }
 0x1b5   :  { %v7125_v13 = vpop.eup %7124  ;;  %v306_v14 = vadd.f32 %v301_v11, %v7742_v48 }
 0x1b6   :  { %v279_v16 = vmul.f32 %v7123_v3, %v278_v12  ;;  %v285_v17 = vmul.f32 %v7125_v13, %v243_v4  ;;  %vm291_vm15 = vweird.f32 %v7125_v13 }
 0x1b7   :  { %6738 = vmatmul.msk.f32.gmra.mxu1 %vm67_vm0, %v306_v14  ;;  %6743 = vmatmul.msk.f32.gmra.mxu2 %vm67_vm0, %v306_v14  ;;  %vm292_vm3 = vmor %vm290_vm2, %vm291_vm15 }
 0x1b8   :  { %v286_v18 = vmul.f32 %v7125_v13, %v285_v17  ;;  %v283_v20 = vsel %vm282_vm14, %v7123_v3, %v279_v16 }
 0x1b9   :  { %v297_v52 = vmul.f32 %v283_v20, %v7724_v57 }
 0x1ba   :  { %v287_v21 = vmul.f32 0.5, %v286_v18 }
 0x1bb   :  { %v302_v22 = vmul.f32 %v297_v52, %v7739_v41 }
 0x1bc   :  { %v288_v24 = vsub.f32 1.5, %v287_v21 }
 0x1bd   :  { %v307_v25 = vadd.f32 %v302_v22, %v7742_v48 }
 0x1be   :  { %v289_v26 = vmul.f32 %v7125_v13, %v288_v24 }
 0x1bf   :  { %6739 = vmatmul.msk.f32.gmra.mxu1 %vm67_vm0, %v307_v25  ;;  %6744 = vmatmul.msk.f32.gmra.mxu2 %vm67_vm0, %v307_v25 }
 0x1c0   :  { %v293_v28 = vsel %vm292_vm3, %v7125_v13, %v289_v26  ;;  %vm485_vm3 = vcmask 271360  }
 0x1c1   :  { %v298_v29 = vmul.f32 %v293_v28, %v7731_v62  ;;  %v115_v28 = vlaneseq }
 0x1c3   :  { %v303_v30 = vmul.f32 %v298_v29, %v7739_v41  ;;  %v122_v29 = vand.u32 127, %v115_v28 }
 0x1c5   :  { %v308_v57 = vadd.f32 %v303_v30, %v7742_v48  ;;  %vm139_vm6 = vcmp.lt.s32.totalorder %v122_v29, 17  ;;  %v116_v30 = vshrl.u32 %v115_v28, 7  ;;  %vm166_vm8 = vcmp.ge.s32.totalorder %v122_v29, 17 }
 0x1c6   :  { %vm167_vm9 = vcmp.lt.s32.totalorder %v122_v29, 34 }
 0x1c7   :  { %6740 = vmatmul.msk.f32.gmra.mxu1 %vm67_vm0, %v308_v57  ;;  %6745 = vmatmul.msk.f32.gmra.mxu2 %vm67_vm0, %v308_v57  ;;  %v7609_v57 = vmov -1e+30   ;;  %vm7923_vm11 = vmand %vm166_vm8, %vm167_vm9 }
 0x224   :  { %v7770_v32 = vpop.f32.mrf.mxu1 }
 0x22a   :  { %v389_v33 = vpop.f32.mrf.mxu2 }
 0x22c   :  { %v7772_v34 = vpop.f32.mrf.mxu1 }
 0x232   :  { %v392_v35 = vpop.f32.mrf.mxu2 }
 0x233   :  { %v7848_v43 = vpack.i.bf16 %v389_v33, %v392_v35 }
 0x234   :  { %v7774_v36 = vpop.f32.mrf.mxu1 }
 0x23a   :  { %v395_v37 = vpop.f32.mrf.mxu2 }
 0x23c   :  { %v7776_v38 = vpop.f32.mrf.mxu1 }
 0x23d   :  { %661 = vrot.lane.b32.xlu2 %v7776_v38, %s7603_s1  ;;  %415 = vrot.lane.b32.xlu0 %v7776_v38, %s7604_s18 }
 0x242   :  { %v398_v62 = vpop.f32.mrf.mxu2 }
 0x243   :  { %v7862_v46 = vpack.i.bf16 %v395_v37, %v398_v62 }
 0x244   :  { %v7782_v40 = vpop.f32.mrf.mxu1 }
 0x245   :  { %659 = vrot.lane.b32.xlu0 %v7774_v36, %s7603_s1  ;;  %663 = vrot.lane.b32.xlu2 %v7782_v40, %s7603_s1 }
 0x246   :  { %417 = vrot.lane.b32.xlu1 %v7782_v40, %s7604_s18 }
 0x24a   :  { %v7790_v41 = vpop.f32.mrf.mxu2 }
 0x24b   :  { %6756 = vmatpush.msk.msrb.mxu0 %vm609_vm4, %v7790_v41 }
 0x24d   :  { %409 = vrot.lane.b32.xlu0 %v7770_v32, %s7604_s18  ;;  %625 = vmatpush.msrb.mxu0 %v398_v62 }
 0x24e   :  { %411 = vrot.lane.b32.xlu2 %v7772_v34, %s7604_s18  ;;  %413 = vrot.lane.b32.xlu1 %v7774_v36, %s7604_s18 }
 0x24f   :  { %626 = vmatpush.msrb.mxu0 %v395_v37 }
 0x251   :  { %627 = vmatpush.msrb.mxu0 %v392_v35 }
 0x253   :  { %628 = vmatpush.msrb.mxu0 %v389_v33 }
 0x255   :  { %647 = vrot.lane.b32.xlu0 %v7772_v34, %s7605_s19 }
 0x256   :  { %655 = vrot.lane.b32.xlu2 %v7770_v32, %s7603_s1  ;;  %657 = vrot.lane.b32.xlu1 %v7772_v34, %s7603_s1 }
 0x25d   :  { %1175 = vrot.lane.b32.xlu0 %v7776_v38, %s7600_s24 }
 0x25e   :  { %649 = vrot.lane.b32.xlu2 %v7774_v36, %s7605_s19  ;;  %645 = vrot.lane.b32.xlu1 %v7770_v32, %s7605_s19 }
 0x265   :  { %914 = vrot.lane.b32.xlu0 %v7770_v32, %s7606_s20 }
 0x266   :  { %651 = vrot.lane.b32.xlu2 %v7776_v38, %s7605_s19  ;;  %920 = vrot.lane.b32.xlu1 %v7776_v38, %s7606_s20 }
 0x26d   :  { %1159 = vrot.lane.b32.xlu0 %v7770_v32, %s7607_s21 }
 0x26e   :  { %918 = vrot.lane.b32.xlu2 %v7774_v36, %s7606_s20  ;;  %922 = vrot.lane.b32.xlu1 %v7782_v40, %s7606_s20 }
 0x275   :  { %908 = vrot.lane.b32.xlu0 %v7774_v36, %s7608_s22 }
 0x276   :  { %916 = vrot.lane.b32.xlu2 %v7772_v34, %s7606_s20  ;;  %1173 = vrot.lane.b32.xlu1 %v7774_v36, %s7600_s24 }
 0x27d   :  { %1177 = vrot.lane.b32.xlu0 %v7782_v40, %s7600_s24 }
 0x27e   :  { %1169 = vrot.lane.b32.xlu2 %v7770_v32, %s7600_s24  ;;  %1171 = vrot.lane.b32.xlu1 %v7772_v34, %s7600_s24 }
 0x285   :  { %653 = vrot.lane.b32.xlu0 %v7782_v40, %s7605_s19 }
 0x286   :  { %906 = vrot.lane.b32.xlu2 %v7772_v34, %s7608_s22  ;;  %904 = vrot.lane.b32.xlu1 %v7770_v32, %s7608_s22 }
 0x28d   :  { %1165 = vrot.lane.b32.xlu0 %v7776_v38, %s7607_s21 }
 0x28e   :  { %1163 = vrot.lane.b32.xlu2 %v7774_v36, %s7607_s21  ;;  %1161 = vrot.lane.b32.xlu1 %v7772_v34, %s7607_s21 }
 0x295   :  { %7030 = vrot.lane.b32.xlu0 %v7848_v43, %s7605_s19 }
 0x296   :  { %912 = vrot.lane.b32.xlu2 %v7782_v40, %s7608_s22  ;;  %910 = vrot.lane.b32.xlu1 %v7776_v38, %s7608_s22 }
 0x297   :  { %v662_v44 = vpop.permute.xlu2 %661 }
 0x29e   :  { %849 = vrot.lane.b32.xlu2 %v7790_v41, %s7605_s19  ;;  %1167 = vrot.lane.b32.xlu1 %v7782_v40, %s7607_s21 }
 0x29f   :  { %v664_v45 = vpop.permute.xlu2 %663 }
 0x2a0   :  { %6762 = vmatpush.xpose.msk.msrb.mxu1 %vm419_vm5, %v664_v45 }
 0x2a4   :  { %6763 = vmatpush.xpose.msk.msrb.mxu1 %vm419_vm5, %v662_v44 }
 0x2a6   :  { %7025 = vrot.lane.b32.xlu1 %v7862_v46, %s7605_s19 }
 0x2a8   :  { %v412_v48 = vpop.permute.xlu2 %411 }
 0x2af   :  { %v416_v49 = vpop.permute.xlu0 %415 }
 0x2b0   :  { %v656_v50 = vpop.permute.xlu2 %655 }
 0x2b7   :  { %v660_v51 = vpop.permute.xlu0 %659 }
 0x2b8   :  { %v650_v53 = vpop.permute.xlu2 %649  ;;  %v418_v54 = vpop.permute.xlu1 %417  ;;  %6764 = vmatpush.xpose.msk.msrb.mxu1 %vm419_vm5, %v660_v51 }
 0x2b9   :  { %6746 = vmatpush.xpose.msk.msra.mxu3 %vm419_vm5, %v418_v54 }
 0x2bd   :  { %6747 = vmatpush.xpose.msk.msra.mxu3 %vm419_vm5, %v416_v49 }
 0x2bf   :  { %v410_v55 = vpop.permute.xlu0 %409 }
 0x2c0   :  { %v652_v56 = vpop.permute.xlu2 %651  ;;  %v414_v58 = vpop.permute.xlu1 %413 }
 0x2c1   :  { %6748 = vmatpush.xpose.msk.msra.mxu3 %vm419_vm5, %v414_v58 }
 0x2c5   :  { %6749 = vmatpush.xpose.msk.msra.mxu3 %vm419_vm5, %v412_v48 }
 0x2c7   :  { %v648_v42 = vpop.permute.xlu0 %647 }
 0x2c8   :  { %v919_v59 = vpop.permute.xlu2 %918  ;;  %v658_v60 = vpop.permute.xlu1 %657 }
 0x2c9   :  { %6750 = vmatpush.xpose.msk.msra.mxu3 %vm419_vm5, %v410_v55  ;;  %6765 = vmatpush.xpose.msk.msrb.mxu1 %vm419_vm5, %v658_v60 }
 0x2cc   :  { %6751 = vmatmul.msk.f32.vlgmr.msra.gmra.mxu3 %vm419_vm5, %v7770_v32  ;;  %v7911_v32 = vsel %vm139_vm6, 0.0, %v7609_v57 }
 0x2cd   :  { %6766 = vmatpush.xpose.msk.msrb.mxu1 %vm419_vm5, %v656_v50 }
 0x2cf   :  { %v1176_v61 = vpop.permute.xlu0 %1175 }
 0x2d0   :  { %v917_v63 = vpop.permute.xlu2 %916  ;;  %v646_v0 = vpop.permute.xlu1 %645 }
 0x2d1   :  { %6767 = vmatmul.msk.f32.vlgmr.msrb.gmra.mxu1 %vm419_vm5, %v646_v0 }
 0x2d4   :  { %6752 = vmatmul.msk.f32.gmra.mxu3 %vm419_vm5, %v7772_v34 }
 0x2d7   :  { %v915_v1 = vpop.permute.xlu0 %914 }
 0x2d8   :  { %v1170_v2 = vpop.permute.xlu2 %1169  ;;  %v921_v3 = vpop.permute.xlu1 %920 }
 0x2d9   :  { %6768 = vmatmul.msk.f32.gmra.mxu1 %vm419_vm5, %v648_v42 }
 0x2dc   :  { %6753 = vmatmul.msk.f32.gmra.mxu3 %vm419_vm5, %v7774_v36  ;;  %v118_v36 = vadd.s32 16, %v116_v30 }
 0x2de   :  { %vm130_vm10 = vcmp.lt.s32.totalorder %v118_v36, 17  ;;  %vm153_vm13 = vcmp.ge.s32.totalorder %v118_v36, 17 }
 0x2df   :  { %v1160_v4 = vpop.permute.xlu0 %1159  ;;  %vm143_vm12 = vmand %vm130_vm10, %vm139_vm6 }
 0x2e0   :  { %v907_v5 = vpop.permute.xlu2 %906  ;;  %v923_v6 = vpop.permute.xlu1 %922  ;;  %v148_v51 = vsel %vm143_vm12, 0.0, %v7609_v57  ;;  %vm171_vm14 = vmand %vm153_vm13, %vm7923_vm11 }
 0x2e1   :  { %6769 = vmatmul.msk.f32.gmra.mxu1 %vm419_vm5, %v650_v53  ;;  %6778 = vmatpush.xpose.msk.msrb.mxu3 %vm419_vm5, %v923_v6  ;;  %v7940_v54 = vsel %vm171_vm14, 0.0, %v148_v51 }
 0x2e4   :  { %6754 = vmatmul.msk.f32.gmra.mxu3 %vm419_vm5, %v7776_v38 }
 0x2e5   :  { %6779 = vmatpush.xpose.msk.msrb.mxu3 %vm419_vm5, %v921_v3 }
 0x2e7   :  { %v909_v7 = vpop.permute.xlu0 %908 }
 0x2e8   :  { %v1164_v47 = vpop.permute.xlu2 %1163  ;;  %v1174_v8 = vpop.permute.xlu1 %1173 }
 0x2e9   :  { %6770 = vmatmul.msk.f32.gmra.mxu1 %vm419_vm5, %v652_v56  ;;  %6780 = vmatpush.xpose.msk.msrb.mxu3 %vm419_vm5, %v919_v59 }
 0x2ec   :  { %6755 = vmatmul.msk.f32.gmra.mxu3 %vm419_vm5, %v7782_v40 }
 0x2ed   :  { %6781 = vmatpush.xpose.msk.msrb.mxu3 %vm419_vm5, %v917_v63  ;;  %v7954_v63 = vsel %vm7923_vm11, 0.0, %v7609_v57 }
 0x2ef   :  { %v1178_v9 = vpop.permute.xlu0 %1177 }
 0x2f0   :  { %v913_v10 = vpop.permute.xlu2 %912  ;;  %v1172_v11 = vpop.permute.xlu1 %1171  ;;  %6794 = vmatpush.xpose.msk.msra.mxu1 %vm419_vm5, %v1178_v9 }
 0x2f1   :  { %6782 = vmatpush.xpose.msk.msrb.mxu3 %vm419_vm5, %v915_v1 }
 0x2f4   :  { %6795 = vmatpush.xpose.msk.msra.mxu1 %vm419_vm5, %v1176_v61  ;;  %v120_v61 = vadd.s32 32, %v116_v30 }
 0x2f6   :  { %vm160_vm15 = vcmp.lt.s32.totalorder %v120_v61, 34 }
 0x2f7   :  { %v654_v12 = vpop.permute.xlu0 %653  ;;  %vm173_vm2 = vmand %vm160_vm15, %vm7923_vm11 }
 0x2f8   :  { %v850_v13 = vpop.permute.xlu2 %849  ;;  %v905_v14 = vpop.permute.xlu1 %904  ;;  %6771 = vmatmul.msk.f32.gmra.mxu1 %vm419_vm5, %v654_v12  ;;  %v7968_v6 = vsel %vm173_vm2, 0.0, %v7609_v57 }
 0x2f9   :  { %6772 = vmatpush.msk.msrb.mxu2 %vm609_vm4, %v850_v13  ;;  %6783 = vmatmul.msk.f32.vlgmr.msrb.gmra.mxu3 %vm419_vm5, %v905_v14 }
 0x2fa   :  { %6796 = vmatpush.xpose.msk.msra.mxu1 %vm419_vm5, %v1174_v8 }
 0x2fe   :  { %6797 = vmatpush.xpose.msk.msra.mxu1 %vm419_vm5, %v1172_v11 }
 0x2ff   :  { %v1166_v18 = vpop.permute.xlu0 %1165 }
 0x300   :  { %v1162_v16 = vpop.permute.xlu1 %1161 }
 0x301   :  { %6784 = vmatmul.msk.f32.gmra.mxu3 %vm419_vm5, %v907_v5 }
 0x302   :  { %6798 = vmatpush.xpose.msk.msra.mxu1 %vm419_vm5, %v1170_v2 }
 0x305   :  { %6799 = vmatmul.msk.f32.vlgmr.msra.gmra.mxu1 %vm419_vm5, %v1160_v4 }
 0x307   :  { %v7031_v22 = vpop.permute.xlu0 %7030 }
 0x308   :  { %v911_v17 = vpop.permute.xlu1 %910  ;;  %v7032_v25 = vunpack.i.l.bf16 %v7031_v22  ;;  %v7033_v26 = vunpack.i.h.bf16 %v7031_v22 }
 0x309   :  { %6785 = vmatmul.msk.f32.gmra.mxu3 %vm419_vm5, %v909_v7 }
 0x30d   :  { %6800 = vmatmul.msk.f32.gmra.mxu1 %vm419_vm5, %v1162_v16 }
 0x310   :  { %v1168_v20 = vpop.permute.xlu1 %1167 }
 0x311   :  { %6786 = vmatmul.msk.f32.gmra.mxu3 %vm419_vm5, %v911_v17 }
 0x315   :  { %6801 = vmatmul.msk.f32.gmra.mxu1 %vm419_vm5, %v1164_v47 }
 0x318   :  { %v7026_v52 = vpop.permute.xlu1 %7025 }
 0x319   :  { %6787 = vmatmul.msk.f32.gmra.mxu3 %vm419_vm5, %v913_v10  ;;  %v7027_v21 = vunpack.i.l.bf16 %v7026_v52  ;;  %v7028_v24 = vunpack.i.h.bf16 %v7026_v52 }
 0x31b   :  { %884 = vmatpush.msrb.mxu2 %v7027_v21 }
 0x31d   :  { %6802 = vmatmul.msk.f32.gmra.mxu1 %vm419_vm5, %v1166_v18  ;;  %885 = vmatpush.msrb.mxu2 %v7028_v24 }
 0x31f   :  { %886 = vmatpush.msrb.mxu2 %v7032_v25 }
 0x321   :  { %887 = vmatpush.msrb.mxu2 %v7033_v26 }
 0x325   :  { %6803 = vmatmul.msk.f32.gmra.mxu1 %vm419_vm5, %v1168_v20 }
 0x34e   :  { %v702_v33 = vpop.f32.mrf.mxu1 }
 0x34f   :  { %v7914_v34 = vadd.f32 %v702_v33, %v7911_v32  ;;  %v457_v35 = vpop.f32.mrf.mxu3 }
 0x350   :  { %v7917_v37 = vadd.f32 %v457_v35, %v7911_v32 }
 0x351   :  { %v717_v38 = vsel %vm472_vm7, %v7914_v34, -inf }
 0x352   :  { %718 = vmax.xlane.f32.xlu0 %v717_v38  ;;  %v473_v62 = vsel %vm472_vm7, %v7917_v37, -inf }
 0x353   :  { %474 = vmax.xlane.f32.xlu2 %v473_v62 }
 0x356   :  { %v705_v44 = vpop.f32.mrf.mxu1 }
 0x357   :  { %v7929_v45 = vadd.f32 %v705_v44, %v7911_v32  ;;  %v460_v48 = vpop.f32.mrf.mxu3 }
 0x358   :  { %v7932_v49 = vadd.f32 %v460_v48, %v7911_v32 }
 0x359   :  { %v720_v50 = vsel %vm472_vm7, %v7929_v45, -inf }
 0x35a   :  { %721 = vmax.xlane.f32.xlu1 %v720_v50  ;;  %v476_v53 = vsel %vm472_vm7, %v7932_v49, -inf }
 0x35b   :  { %477 = vmax.xlane.f32.xlu0 %v476_v53 }
 0x35e   :  { %v708_v55 = vpop.f32.mrf.mxu1 }
 0x35f   :  { %v7943_v56 = vadd.f32 %v708_v55, %v7940_v54  ;;  %v463_v58 = vpop.f32.mrf.mxu3 }
 0x360   :  { %v7946_v42 = vadd.f32 %v463_v58, %v7940_v54 }
 0x361   :  { %v723_v59 = vsel %vm472_vm7, %v7943_v56, -inf }
 0x362   :  { %724 = vmax.xlane.f32.xlu2 %v723_v59  ;;  %v479_v60 = vsel %vm472_vm7, %v7946_v42, -inf }
 0x363   :  { %480 = vmax.xlane.f32.xlu1 %v479_v60 }
 0x366   :  { %v711_v0 = vpop.f32.mrf.mxu1 }
 0x367   :  { %v7957_v1 = vadd.f32 %v711_v0, %v7954_v63  ;;  %v466_v2 = vpop.f32.mrf.mxu3 }
 0x368   :  { %v7960_v3 = vadd.f32 %v466_v2, %v7954_v63 }
 0x369   :  { %v726_v4 = vsel %vm472_vm7, %v7957_v1, -inf }
 0x36a   :  { %727 = vmax.xlane.f32.xlu0 %v726_v4  ;;  %v482_v5 = vsel %vm472_vm7, %v7960_v3, -inf }
 0x36b   :  { %483 = vmax.xlane.f32.xlu2 %v482_v5 }
 0x36f   :  { %v469_v7 = vpop.f32.mrf.mxu3 }
 0x370   :  { %v7971_v47 = vadd.f32 %v469_v7, %v7968_v6 }
 0x372   :  { %v486_v8 = vsel %vm485_vm3, %v7971_v47, -inf }
 0x373   :  { %487 = vmax.xlane.f32.xlu0 %v486_v8 }
 0x375   :  { %v714_v9 = vpop.f32.mrf.mxu1 }
 0x376   :  { %v7976_v10 = vadd.f32 %v714_v9, %v7968_v6 }
 0x378   :  { %v729_v11 = vsel %vm485_vm3, %v7976_v10, -inf }
 0x379   :  { %730 = vmax.xlane.f32.xlu1 %v729_v11 }
 0x37c   :  { %v961_v12 = vpop.f32.mrf.mxu3 }
 0x37d   :  { %v7981_v13 = vadd.f32 %v961_v12, %v7911_v32 }
 0x37f   :  { %v976_v14 = vsel %vm472_vm7, %v7981_v13, -inf }
 0x381   :  { %977 = vmax.xlane.f32.xlu1 %v976_v14 }
 0x382   :  { %v1216_v16 = vpop.f32.mrf.mxu1 }
 0x383   :  { %v7986_v17 = vadd.f32 %v1216_v16, %v7911_v32 }
 0x384   :  { %v964_v18 = vpop.f32.mrf.mxu3 }
 0x385   :  { %v7989_v20 = vadd.f32 %v964_v18, %v7911_v32  ;;  %v1231_v52 = vsel %vm472_vm7, %v7986_v17, -inf }
 0x386   :  { %1232 = vmax.xlane.f32.xlu2 %v1231_v52 }
 0x387   :  { %v979_v21 = vsel %vm472_vm7, %v7989_v20, -inf }
 0x389   :  { %980 = vmax.xlane.f32.xlu1 %v979_v21 }
 0x38a   :  { %v1219_v22 = vpop.f32.mrf.mxu1 }
 0x38b   :  { %v7996_v24 = vadd.f32 %v1219_v22, %v7911_v32 }
 0x38c   :  { %v967_v25 = vpop.f32.mrf.mxu3 }
 0x38d   :  { %v1234_v26 = vsel %vm472_vm7, %v7996_v24, -inf  ;;  %v8011_v36 = vadd.f32 %v967_v25, %v7940_v54 }
 0x38e   :  { %1235 = vmax.xlane.f32.xlu0 %v1234_v26 }
 0x38f   :  { %v982_v48 = vsel %vm472_vm7, %v8011_v36, -inf }
 0x392   :  { %v1222_v28 = vpop.f32.mrf.mxu1 }
 0x393   :  { %v8001_v29 = vadd.f32 %v1222_v28, %v7940_v54 }
 0x394   :  { %v970_v30 = vpop.f32.mrf.mxu3 }
 0x395   :  { %v8004_v57 = vadd.f32 %v970_v30, %v7954_v63  ;;  %v1237_v33 = vsel %vm472_vm7, %v8001_v29, -inf }
 0x396   :  { %1238 = vmax.xlane.f32.xlu0 %v1237_v33 }
 0x397   :  { %v985_v35 = vsel %vm472_vm7, %v8004_v57, -inf }
 0x398   :  { %986 = vmax.xlane.f32.xlu2 %v985_v35 }
 0x39a   :  { %v1225_v38 = vpop.f32.mrf.mxu1 }
 0x39b   :  { %v8014_v62 = vadd.f32 %v1225_v38, %v7954_v63 }
 0x39c   :  { %v973_v40 = vpop.f32.mrf.mxu3 }
 0x39d   :  { %v8017_v44 = vadd.f32 %v973_v40, %v7968_v6  ;;  %v1240_v50 = vsel %vm472_vm7, %v8014_v62, -inf }
 0x39e   :  { %983 = vmax.xlane.f32.xlu0 %v982_v48  ;;  %1241 = vmax.xlane.f32.xlu1 %v1240_v50 }
 0x39f   :  { %v988_v51 = vsel %vm485_vm3, %v8017_v44, -inf }
 0x3a0   :  { %989 = vmax.xlane.f32.xlu2 %v988_v51 }
 0x3a2   :  { %v1228_v53 = vpop.f32.mrf.mxu1 }
 0x3a3   :  { %v8026_v55 = vadd.f32 %v1228_v53, %v7968_v6 }
 0x3a5   :  { %v1243_v58 = vsel %vm485_vm3, %v8026_v55, -inf }
 0x3a6   :  { %1244 = vmax.xlane.f32.xlu1 %v1243_v58 }
 0x3c5   :  { %v719_v59 = vpop.xlane.xlu0 %718 }
 0x3c6   :  { %v732_v60 = vsub.f32 %v7914_v34, %v719_v59  ;;  %v475_v61 = vpop.xlane.xlu2 %474 }
 0x3c7   :  { %v489_v2 = vsub.f32 %v7917_v37, %v475_v61 }
 0x3c8   :  { %v737_v0 = vmul.f32 1.442695, %v732_v60 }
 0x3c9   :  { %v494_v4 = vmul.f32 1.442695, %v489_v2 }
 0x3ca   :  { %7126 = vpow2.f32 %v737_v0 }
 0x3cb   :  { %7128 = vpow2.f32 %v494_v4 }
 0x3cd   :  { %v722_v5 = vpop.xlane.xlu1 %721 }
 0x3ce   :  { %v733_v7 = vsub.f32 %v7929_v45, %v722_v5  ;;  %v478_v8 = vpop.xlane.xlu0 %477 }
 0x3cf   :  { %v490_v9 = vsub.f32 %v7932_v49, %v478_v8 }
 0x3d0   :  { %v8034_v11 = vpop.eup %7126  ;;  %v739_v12 = vmul.f32 1.442695, %v733_v7 }
 0x3d1   :  { %v496_v14 = vmul.f32 1.442695, %v490_v9  ;;  %v747_v34 = vsel %vm472_vm7, %v8034_v11, 0.0  ;;  %v8038_v16 = vpop.eup %7128 }
 0x3d2   :  { %7130 = vpow2.f32 %v739_v12  ;;  %748 = vadd.xlane.f32.xlu2 %v747_v34  ;;  %v504_v26 = vsel %vm472_vm7, %v8038_v16, 0.0 }
 0x3d3   :  { %7132 = vpow2.f32 %v496_v14 }
 0x3d5   :  { %v725_v37 = vpop.xlane.xlu2 %724 }
 0x3d6   :  { %v734_v18 = vsub.f32 %v7943_v56, %v725_v37  ;;  %v481_v45 = vpop.xlane.xlu1 %480 }
 0x3d7   :  { %v491_v22 = vsub.f32 %v7946_v42, %v481_v45 }
 0x3d8   :  { %v8041_v52 = vpop.eup %7130  ;;  %v741_v49 = vmul.f32 1.442695, %v734_v18 }
 0x3d9   :  { %v8043_v21 = vpop.eup %7132  ;;  %v750_v25 = vsel %vm472_vm7, %v8041_v52, 0.0  ;;  %v498_v28 = vmul.f32 1.442695, %v491_v22 }
 0x3da   :  { %7134 = vpow2.f32 %v741_v49  ;;  %751 = vadd.xlane.f32.xlu1 %v750_v25  ;;  %505 = vadd.xlane.f32.xlu2 %v504_v26  ;;  %v507_v56 = vsel %vm472_vm7, %v8043_v21, 0.0 }
 0x3db   :  { %508 = vadd.xlane.f32.xlu0 %v507_v56  ;;  %7136 = vpow2.f32 %v498_v28 }
 0x3dd   :  { %v728_v30 = vpop.xlane.xlu0 %727 }
 0x3de   :  { %v735_v33 = vsub.f32 %v7957_v1, %v728_v30  ;;  %v484_v35 = vpop.xlane.xlu2 %483 }
 0x3df   :  { %v492_v42 = vsub.f32 %v7960_v3, %v484_v35 }
 0x3e0   :  { %v8054_v38 = vpop.eup %7134  ;;  %v743_v40 = vmul.f32 1.442695, %v735_v33 }
 0x3e1   :  { %v500_v48 = vmul.f32 1.442695, %v492_v42  ;;  %v753_v50 = vsel %vm472_vm7, %v8054_v38, 0.0  ;;  %v8058_v53 = vpop.eup %7136 }
 0x3e2   :  { %7138 = vpow2.f32 %v743_v40  ;;  %v510_v0 = vsel %vm472_vm7, %v8058_v53, 0.0 }
 0x3e3   :  { %7140 = vpow2.f32 %v500_v48  ;;  %754 = vadd.xlane.f32.xlu0 %v753_v50 }
 0x3e6   :  { %v488_v51 = vpop.xlane.xlu0 %487 }
 0x3e7   :  { %v493_v58 = vsub.f32 %v7971_v47, %v488_v51 }
 0x3e8   :  { %v8061_v1 = vpop.eup %7138 }
 0x3e9   :  { %v8063_v59 = vpop.eup %7140  ;;  %v502_v3 = vmul.f32 1.442695, %v493_v58  ;;  %v756_v60 = vsel %vm472_vm7, %v8061_v1, 0.0 }
 0x3ea   :  { %757 = vadd.xlane.f32.xlu2 %v756_v60  ;;  %v513_v61 = vsel %vm472_vm7, %v8063_v59, 0.0 }
 0x3eb   :  { %7142 = vpow2.f32 %v502_v3  ;;  %514 = vadd.xlane.f32.xlu1 %v513_v61  ;;  %511 = vadd.xlane.f32.xlu0 %v510_v0 }
 0x3ec   :  { %v731_v2 = vpop.xlane.xlu1 %730 }
 0x3ed   :  { %v736_v47 = vsub.f32 %v7976_v10, %v731_v2 }
 0x3ef   :  { %v745_v4 = vmul.f32 1.442695, %v736_v47 }
 0x3f1   :  { %v8072_v5 = vpop.eup %7142  ;;  %7144 = vpow2.f32 %v745_v4 }
 0x3f2   :  { %v516_v7 = vsel %vm485_vm3, %v8072_v5, 0.0 }
 0x3f3   :  { %517 = vadd.xlane.f32.xlu0 %v516_v7 }
 0x3f4   :  { %v978_v18 = vpop.xlane.xlu1 %977 }
 0x3f5   :  { %v991_v45 = vsub.f32 %v7981_v13, %v978_v18 }
 0x3f7   :  { %v8076_v8 = vpop.eup %7144  ;;  %v996_v22 = vmul.f32 1.442695, %v991_v45 }
 0x3f8   :  { %v759_v9 = vsel %vm485_vm3, %v8076_v8, 0.0 }
 0x3f9   :  { %v1233_v12 = vpop.xlane.xlu2 %1232  ;;  %760 = vadd.xlane.f32.xlu2 %v759_v9 }
 0x3fa   :  { %v1246_v14 = vsub.f32 %v7986_v17, %v1233_v12 }
 0x3fc   :  { %v1251_v34 = vmul.f32 1.442695, %v1246_v14  ;;  %v981_v25 = vpop.xlane.xlu1 %980 }
 0x3fd   :  { %v992_v56 = vsub.f32 %v7989_v20, %v981_v25 }
 0x3fe   :  { %7146 = vpow2.f32 %v1251_v34 }
 0x3ff   :  { %7148 = vpow2.f32 %v996_v22  ;;  %v998_v33 = vmul.f32 1.442695, %v992_v56 }
 0x401   :  { %v1236_v17 = vpop.xlane.xlu0 %1235 }
 0x402   :  { %v1247_v26 = vsub.f32 %v7996_v24, %v1236_v17 }
 0x404   :  { %v8081_v10 = vpop.eup %7146  ;;  %v1253_v28 = vmul.f32 1.442695, %v1247_v26 }
 0x405   :  { %v1261_v37 = vsel %vm472_vm7, %v8081_v10, 0.0 }
 0x406   :  { %1262 = vadd.xlane.f32.xlu1 %v1261_v37  ;;  %7150 = vpow2.f32 %v1253_v28 }
 0x407   :  { %7035 = vrot.lane.b32.xlu0 %v7862_v46, %s7607_s21  ;;  %7152 = vpow2.f32 %v998_v33 }
 0x409   :  { %v1239_v49 = vpop.xlane.xlu0 %1238 }
 0x40b   :  { %v987_v30 = vpop.xlane.xlu2 %986 }
 0x40c   :  { %v994_v58 = vsub.f32 %v8004_v57, %v987_v30 }
 0x40e   :  { %v1002_v61 = vmul.f32 1.442695, %v994_v58 }
 0x40f   :  { %7040 = vrot.lane.b32.xlu0 %v7848_v43, %s7607_s21 }
 0x411   :  { %1104 = vrot.lane.b32.xlu2 %v7790_v41, %s7608_s22  ;;  %v984_v35 = vpop.xlane.xlu0 %983  ;;  %v8101_v42 = vpop.xlane.xlu1 %1241 }
 0x412   :  { %v993_v13 = vsub.f32 %v8011_v36, %v984_v35 }
 0x413   :  { %v990_v50 = vpop.xlane.xlu2 %989 }
 0x414   :  { %v1000_v20 = vmul.f32 1.442695, %v993_v13 }
 0x417   :  { %7045 = vrot.lane.b32.xlu0 %v7862_v46, %s7608_s22  ;;  %v8098_v46 = vpop.eup %7148 }
 0x418   :  { %v1006_v24 = vsel %vm472_vm7, %v8098_v46, 0.0  ;;  %v8106_v48 = vpop.eup %7150 }
 0x419   :  { %v8108_v51 = vpop.eup %7152  ;;  %v1264_v36 = vsel %vm472_vm7, %v8106_v48, 0.0  ;;  %v1245_v60 = vpop.xlane.xlu1 %1244 }
 0x41a   :  { %v1009_v3 = vsel %vm472_vm7, %v8108_v51, 0.0  ;;  %v1250_v47 = vsub.f32 %v8026_v55, %v1245_v60 }
 0x41c   :  { %v1259_v7 = vmul.f32 1.442695, %v1250_v47 }
 0x41f   :  { %1359 = vrot.lane.b32.xlu1 %v7790_v41, %s7607_s21  ;;  %v1248_v41 = vsub.f32 %v8001_v29, %v1239_v49  ;;  %v995_v29 = vsub.f32 %v8017_v44, %v990_v50 }
 0x421   :  { %v1255_v40 = vmul.f32 1.442695, %v1248_v41  ;;  %v1004_v0 = vmul.f32 1.442695, %v995_v29 }
 0x423   :  { %7154 = vpow2.f32 %v1255_v40 }
 0x424   :  { %7156 = vpow2.f32 %v1000_v20 }
 0x429   :  { %v8116_v2 = vpop.eup %7154 }
 0x42a   :  { %v8119_v57 = vpop.eup %7156  ;;  %v1267_v44 = vsel %vm472_vm7, %v8116_v2, 0.0 }
 0x42b   :  { %v1012_v9 = vsel %vm472_vm7, %v8119_v57, 0.0 }
 0x43a   :  { %1007 = vadd.xlane.f32.xlu2 %v1006_v24 }
 0x441   :  { %1265 = vadd.xlane.f32.xlu0 %v1264_v36 }
 0x442   :  { %1010 = vadd.xlane.f32.xlu2 %v1009_v3 }
 0x445   :  { %v749_v4 = vpop.xlane.xlu2 %748 }
 0x446   :  { %7158 = vrcp.f32 %v749_v4  ;;  %v773_v49 = vand.u32 2147483648, %v749_v4  ;;  %v771_v56 = vand.u32 2147483647, %v749_v4  ;;  %vm767_vm8 = vweird.f32 %v749_v4 }
 0x447   :  { %7160 = vpow2.f32 %v1002_v61 }
 0x448   :  { %7162 = vpow2.f32 %v1004_v0  ;;  %v774_v35 = vor.u32 1.1754944e-38, %v773_v49  ;;  %vm772_vm10 = vcmp.eq.f32.partialorder %v771_v56, 8.507059e+37 }
 0x449   :  { %1268 = vadd.xlane.f32.xlu1 %v1267_v44  ;;  %7164 = vpow2.f32 %v1259_v7 }
 0x44a   :  { %1013 = vadd.xlane.f32.xlu2 %v1012_v9 }
 0x44c   :  { %v7159_v12 = vpop.eup %7158 }
 0x44d   :  { %v8125_v14 = vpop.eup %7160  ;;  %v763_v55 = vmul.f32 %v7159_v12, %v749_v4  ;;  %v752_v34 = vpop.xlane.xlu1 %751  ;;  %vm768_vm6 = vweird.f32 %v7159_v12 }
 0x44e   :  { %v506_v37 = vpop.xlane.xlu2 %505  ;;  %v8127_v17 = vpop.eup %7162  ;;  %7166 = vrcp.f32 %v752_v34  ;;  %v1015_v22 = vsel %vm472_vm7, %v8125_v14, 0.0  ;;  %vm769_vm9 = vmor %vm767_vm8, %vm768_vm6  ;;  %v785_v47 = vand.u32 2147483647, %v752_v34  ;;  %v787_v4 = vand.u32 2147483648, %v752_v34 }
 0x44f   :  { %v8129_v18 = vpop.xlane.xlu0 %508  ;;  %v764_v45 = vsub.f32 1.0, %v763_v55  ;;  %7168 = vrcp.f32 %v506_v37  ;;  %v1018_v26 = vsel %vm485_vm3, %v8127_v17, 0.0  ;;  %v8136_v28 = vpop.eup %7164  ;;  %v530_v50 = vand.u32 2147483648, %v506_v37 }
 0x450   :  { %7170 = vrcp.f32 %v8129_v18  ;;  %v1273_v29 = vsel %vm485_vm3, %v8136_v28, 0.0  ;;  %v528_v0 = vand.u32 2147483647, %v506_v37  ;;  %vm524_vm12 = vweird.f32 %v506_v37 }
 0x451   :  { %v765_v25 = vmul.f32 %v7159_v12, %v764_v45  ;;  %1016 = vadd.xlane.f32.xlu1 %v1015_v22  ;;  %vm781_vm14 = vweird.f32 %v752_v34  ;;  %vm786_vm6 = vcmp.eq.f32.partialorder %v785_v47, 8.507059e+37 }
 0x452   :  { %1019 = vadd.xlane.f32.xlu2 %v1018_v26  ;;  %vm8152_vm15 = vcmp.eq.f32.partialorder %v528_v0, 8.507059e+37 }
 0x453   :  { %v766_v30 = vadd.f32 %v7159_v12, %v765_v25  ;;  %v788_v25 = vor.u32 1.1754944e-38, %v787_v4 }
 0x454   :  { %v7167_v33 = vpop.eup %7166 }
 0x455   :  { %v7169_v41 = vpop.eup %7168  ;;  %v777_v13 = vmul.f32 %v7167_v33, %v752_v34  ;;  %7050 = vrot.lane.b32.xlu0 %v7848_v43, %s7608_s22  ;;  %v770_v24 = vsel %vm769_vm9, %v7159_v12, %v766_v30  ;;  %vm782_vm11 = vweird.f32 %v7167_v33  ;;  %v531_v12 = vor.u32 1.1754944e-38, %v530_v50 }
 0x456   :  { %v8140_v40 = vpop.eup %7170  ;;  %v520_v20 = vmul.f32 %v7169_v41, %v506_v37  ;;  %v775_v36 = vsel %vm772_vm10, %v774_v35, %v770_v24  ;;  %vm525_vm13 = vweird.f32 %v7169_v41  ;;  %vm8156_vm2 = vmor %vm781_vm14, %vm782_vm11  ;;  %vm538_vm9 = vweird.f32 %v8129_v18 }
 0x457   :  { %v8142_v58 = vpop.xlane.xlu0 %754  ;;  %v778_v3 = vsub.f32 1.0, %v777_v13  ;;  %v534_v60 = vmul.f32 %v8140_v40, %v8129_v18  ;;  %v832_v43 = vmul.f32 %v8034_v11, %v775_v36  ;;  %vm526_vm8 = vmor %vm524_vm12, %vm525_vm13  ;;  %vm539_vm10 = vweird.f32 %v8140_v40 }
 0x458   :  { %7172 = vrcp.f32 %v8142_v58  ;;  %v521_v61 = vsub.f32 1.0, %v520_v20  ;;  %vm540_vm11 = vmor %vm538_vm9, %vm539_vm10  ;;  %vm795_vm14 = vweird.f32 %v8142_v58 }
 0x459   :  { %v535_v44 = vsub.f32 1.0, %v534_v60  ;;  %1274 = vadd.xlane.f32.xlu1 %v1273_v29  ;;  %6773 = vmatmul.msk.f32.vlgmr.msrb.gmra.mxu2 %vm472_vm7, %v832_v43  ;;  %v779_v7 = vmul.f32 %v7167_v33, %v778_v3  ;;  %v544_v29 = vand.u32 2147483648, %v8129_v18  ;;  %v542_v60 = vand.u32 2147483647, %v8129_v18 }
 0x45a   :  { %v522_v9 = vmul.f32 %v7169_v41, %v521_v61  ;;  %v799_v61 = vand.u32 2147483647, %v8142_v58 }
 0x45b   :  { %v780_v55 = vadd.f32 %v7167_v33, %v779_v7  ;;  %v536_v45 = vmul.f32 %v8140_v40, %v535_v44  ;;  %vm543_vm13 = vcmp.eq.f32.partialorder %v542_v60, 8.507059e+37 }
 0x45c   :  { %v523_v49 = vadd.f32 %v7169_v41, %v522_v9 }
 0x45d   :  { %v8160_v37 = vpop.xlane.xlu2 %757  ;;  %v784_v34 = vsel %vm8156_vm2, %v7167_v33, %v780_v55  ;;  %v537_v56 = vadd.f32 %v8140_v40, %v536_v45  ;;  %vm800_vm2 = vcmp.eq.f32.partialorder %v799_v61, 8.507059e+37 }
 0x45e   :  { %v7173_v26 = vpop.eup %7172  ;;  %7174 = vrcp.f32 %v8160_v37  ;;  %v8169_v35 = vpop.xlane.xlu1 %514  ;;  %v527_v24 = vsel %vm526_vm8, %v7169_v41, %v523_v49  ;;  %v789_v20 = vsel %vm786_vm6, %v788_v25, %v784_v34  ;;  %v801_v41 = vand.u32 2147483648, %v8142_v58 }
 0x45f   :  { %v791_v30 = vmul.f32 %v7173_v26, %v8142_v58  ;;  %v8171_v13 = vpop.xlane.xlu0 %511  ;;  %7176 = vrcp.f32 %v8169_v35  ;;  %v532_v33 = vsel %vm8152_vm15, %v531_v12, %v527_v24  ;;  %v833_v50 = vmul.f32 %v8041_v52, %v789_v20 }
 0x460   :  { %7178 = vrcp.f32 %v8171_v13  ;;  %v589_v3 = vmul.f32 %v8038_v16, %v532_v33  ;;  %v541_v52 = vsel %vm540_vm11, %v8140_v40, %v537_v56  ;;  %vm796_vm12 = vweird.f32 %v7173_v26 }
 0x461   :  { %v792_v36 = vsub.f32 1.0, %v791_v30  ;;  %6774 = vmatmul.msk.f32.gmra.mxu2 %vm472_vm7, %v833_v50  ;;  %v545_v16 = vor.u32 1.1754944e-38, %v544_v29  ;;  %vm797_vm15 = vmor %vm795_vm14, %vm796_vm12  ;;  %v802_v7 = vor.u32 1.1754944e-38, %v801_v41  ;;  %v815_v34 = vand.u32 2147483648, %v8160_v37 }
 0x462   :  { %6757 = vmatmul.msk.f32.vlgmr.msrb.gmra.mxu0 %vm472_vm7, %v589_v3  ;;  %v813_v24 = vand.u32 2147483647, %v8160_v37  ;;  %v558_v20 = vand.u32 2147483648, %v8171_v13  ;;  %vm809_vm8 = vweird.f32 %v8160_v37  ;;  %v1249_v50 = vsub.f32 %v8014_v62, %v8101_v42 }
 0x463   :  { %v793_v43 = vmul.f32 %v7173_v26, %v792_v36  ;;  %v546_v44 = vsel %vm543_vm13, %v545_v16, %v541_v52  ;;  %vm552_vm10 = vweird.f32 %v8171_v13  ;;  %v816_v36 = vor.u32 1.1754944e-38, %v815_v34 }
 0x464   :  { %v7175_v0 = vpop.eup %7174  ;;  %v590_v22 = vmul.f32 %v8043_v21, %v546_v44  ;;  %vm814_vm12 = vcmp.eq.f32.partialorder %v813_v24, 8.507059e+37  ;;  %v559_v52 = vor.u32 1.1754944e-38, %v558_v20  ;;  %v570_v44 = vand.u32 2147483647, %v8169_v35 }
 0x465   :  { %v794_v47 = vadd.f32 %v7173_v26, %v793_v43  ;;  %v8191_v4 = vpop.eup %7176  ;;  %v805_v18 = vmul.f32 %v7175_v0, %v8160_v37  ;;  %vm810_vm6 = vweird.f32 %v7175_v0 }
 0x466   :  { %v7179_v9 = vpop.eup %7178  ;;  %v562_v40 = vmul.f32 %v8191_v4, %v8169_v35  ;;  %vm811_vm11 = vmor %vm809_vm8, %vm810_vm6  ;;  %vm571_vm8 = vcmp.eq.f32.partialorder %v570_v44, 8.507059e+37 }
 0x467   :  { %v8196_v12 = vpop.xlane.xlu0 %517  ;;  %v798_v55 = vsel %vm797_vm15, %v7173_v26, %v794_v47  ;;  %v806_v45 = vsub.f32 1.0, %v805_v18  ;;  %v548_v49 = vmul.f32 %v7179_v9, %v8171_v13  ;;  %v556_v26 = vand.u32 2147483647, %v8171_v13 }
 0x468   :  { %7180 = vrcp.f32 %v8196_v12  ;;  %v803_v58 = vsel %vm800_vm2, %v802_v7, %v798_v55  ;;  %v563_v11 = vsub.f32 1.0, %v562_v40  ;;  %vm553_vm9 = vweird.f32 %v7179_v9 }
 0x469   :  { %v834_v25 = vmul.f32 %v8054_v38, %v803_v58  ;;  %v549_v56 = vsub.f32 1.0, %v548_v49  ;;  %v807_v30 = vmul.f32 %v7175_v0, %v806_v45  ;;  %vm554_vm13 = vmor %vm552_vm10, %vm553_vm9  ;;  %vm557_vm14 = vcmp.eq.f32.partialorder %v556_v26, 8.507059e+37 }
 0x46a   :  { %6758 = vmatmul.msk.f32.gmra.mxu0 %vm472_vm7, %v590_v22  ;;  %v564_v33 = vmul.f32 %v8191_v4, %v563_v11  ;;  %vm567_vm15 = vweird.f32 %v8191_v4  ;;  %v572_v47 = vand.u32 2147483648, %v8169_v35  ;;  %vm566_vm2 = vweird.f32 %v8169_v35 }
 0x46b   :  { %6775 = vmatmul.msk.f32.gmra.mxu2 %vm472_vm7, %v834_v25  ;;  %v550_v21 = vmul.f32 %v7179_v9, %v549_v56  ;;  %v808_v38 = vadd.f32 %v7175_v0, %v807_v30  ;;  %vm568_vm6 = vmor %vm566_vm2, %vm567_vm15  ;;  %vm580_vm10 = vweird.f32 %v8196_v12  ;;  %v584_v30 = vand.u32 2147483647, %v8196_v12 }
 0x46c   :  { %v8212_v29 = vpop.xlane.xlu2 %760  ;;  %v565_v13 = vadd.f32 %v8191_v4, %v564_v33  ;;  %v573_v45 = vor.u32 1.1754944e-38, %v572_v47 }
 0x46d   :  { %7182 = vrcp.f32 %v8212_v29  ;;  %v551_v60 = vadd.f32 %v7179_v9, %v550_v21  ;;  %v812_v37 = vsel %vm811_vm11, %v7175_v0, %v808_v38  ;;  %v1257_v0 = vmul.f32 1.442695, %v1249_v50 }
 0x46e   :  { %v8215_v3 = vpop.eup %7180  ;;  %v817_v62 = vsel %vm814_vm12, %v816_v36, %v812_v37  ;;  %v829_v11 = vand.u32 2147483648, %v8212_v29  ;;  %v827_v56 = vand.u32 2147483647, %v8212_v29  ;;  %vm585_vm2 = vcmp.eq.f32.partialorder %v584_v30, 8.507059e+37 }
 0x46f   :  { %v576_v41 = vmul.f32 %v8215_v3, %v8196_v12  ;;  %v555_v42 = vsel %vm554_vm13, %v7179_v9, %v551_v60  ;;  %v835_v43 = vmul.f32 %v8061_v1, %v817_v62  ;;  %v569_v1 = vsel %vm568_vm6, %v8191_v4, %v565_v13 }
 0x470   :  { %v560_v16 = vsel %vm557_vm14, %v559_v52, %v555_v42  ;;  %7184 = vpow2.f32 %v1257_v0  ;;  %v574_v35 = vsel %vm571_vm8, %v573_v45, %v569_v1  ;;  %vm581_vm9 = vweird.f32 %v8215_v3 }
 0x471   :  { %v577_v61 = vsub.f32 1.0, %v576_v41  ;;  %v591_v18 = vmul.f32 %v8058_v53, %v560_v16  ;;  %v586_v4 = vand.u32 2147483648, %v8196_v12  ;;  %v592_v34 = vmul.f32 %v8063_v59, %v574_v35  ;;  %vm582_vm12 = vmor %vm580_vm10, %vm581_vm9 }
 0x472   :  { %vm823_vm13 = vweird.f32 %v8212_v29  ;;  %v830_v21 = vor.u32 1.1754944e-38, %v829_v11  ;;  %vm828_vm15 = vcmp.eq.f32.partialorder %v827_v56, 8.507059e+37 }
 0x473   :  { %6776 = vmatmul.msk.f32.gmra.mxu2 %vm472_vm7, %v835_v43  ;;  %v7183_v7 = vpop.eup %7182  ;;  %6759 = vmatmul.msk.f32.gmra.mxu0 %vm472_vm7, %v591_v18  ;;  %v578_v9 = vmul.f32 %v8215_v3, %v577_v61  ;;  %v587_v38 = vor.u32 1.1754944e-38, %v586_v4 }
 0x474   :  { %v819_v40 = vmul.f32 %v7183_v7, %v8212_v29  ;;  %v1105_v55 = vpop.permute.xlu2 %1104  ;;  %vm824_vm11 = vweird.f32 %v7183_v7 }
 0x475   :  { %6788 = vmatpush.msk.msra.mxu0 %vm609_vm4, %v1105_v55  ;;  %v579_v49 = vadd.f32 %v8215_v3, %v578_v9  ;;  %vm825_vm14 = vmor %vm823_vm13, %vm824_vm11 }
 0x476   :  { %v820_v53 = vsub.f32 1.0, %v819_v40  ;;  %v8241_v24 = vpop.eup %7184 }
 0x477   :  { %v583_v20 = vsel %vm582_vm12, %v8215_v3, %v579_v49  ;;  %v1270_v12 = vsel %vm472_vm7, %v8241_v24, 0.0 }
 0x478   :  { %v821_v58 = vmul.f32 %v7183_v7, %v820_v53  ;;  %v588_v50 = vsel %vm585_vm2, %v587_v38, %v583_v20 }
 0x479   :  { %v1263_v22 = vpop.xlane.xlu1 %1262  ;;  %v7036_v25 = vpop.permute.xlu0 %7035  ;;  %v593_v29 = vmul.f32 %v8072_v5, %v588_v50 }
 0x47a   :  { %7186 = vrcp.f32 %v1263_v22  ;;  %v822_v26 = vadd.f32 %v7183_v7, %v821_v58  ;;  %v1287_v61 = vand.u32 2147483648, %v1263_v22  ;;  %vm1281_vm8 = vweird.f32 %v1263_v22 }
 0x47b   :  { %6760 = vmatmul.msk.f32.gmra.mxu0 %vm472_vm7, %v592_v34  ;;  %v7037_v47 = vunpack.i.l.bf16 %v7036_v25  ;;  %v7038_v18 = vunpack.i.h.bf16 %v7036_v25 }
 0x47c   :  { %v826_v59 = vsel %vm825_vm14, %v7183_v7, %v822_v26  ;;  %v1288_v0 = vor.u32 1.1754944e-38, %v1287_v61 }
 0x47d   :  { %v831_v33 = vsel %vm828_vm15, %v830_v21, %v826_v59 }
 0x47e   :  { %v836_v36 = vmul.f32 %v8076_v8, %v831_v33  ;;  %v1285_v8 = vand.u32 2147483647, %v1263_v22 }
 0x47f   :  { %1271 = vadd.xlane.f32.xlu0 %v1270_v12 }
 0x480   :  { %v7187_v60 = vpop.eup %7186  ;;  %6777 = vmatmul.msk.f32.gmra.mxu2 %vm472_vm7, %v836_v36  ;;  %vm1286_vm10 = vcmp.eq.f32.partialorder %v1285_v8, 8.507059e+37 }
 0x481   :  { %v7041_v37 = vpop.permute.xlu0 %7040  ;;  %v1277_v3 = vmul.f32 %v7187_v60, %v1263_v22  ;;  %vm1282_vm6 = vweird.f32 %v7187_v60 }
 0x482   :  { %vm1283_vm9 = vmor %vm1281_vm8, %vm1282_vm6  ;;  %v7042_v44 = vunpack.i.l.bf16 %v7041_v37  ;;  %v7043_v1 = vunpack.i.h.bf16 %v7041_v37 }
 0x483   :  { %6761 = vmatmul.msk.f32.gmra.mxu0 %vm472_vm7, %v593_v29  ;;  %v1278_v41 = vsub.f32 1.0, %v1277_v3 }
 0x485   :  { %v1279_v42 = vmul.f32 %v7187_v60, %v1278_v41 }
 0x487   :  { %v1280_v13 = vadd.f32 %v7187_v60, %v1279_v42 }
 0x489   :  { %v7046_v52 = vpop.permute.xlu0 %7045  ;;  %v1284_v5 = vsel %vm1283_vm9, %v7187_v60, %v1280_v13 }
 0x48a   :  { %v7047_v62 = vunpack.i.l.bf16 %v7046_v52  ;;  %v7048_v43 = vunpack.i.h.bf16 %v7046_v52  ;;  %v1289_v7 = vsel %vm1286_vm10, %v1288_v0, %v1284_v5 }
 0x48b   :  { %v1346_v9 = vmul.f32 %v8081_v10, %v1289_v7 }
 0x48c   :  { %1139 = vmatpush.msra.mxu0 %v7047_v62 }
 0x48e   :  { %1140 = vmatpush.msra.mxu0 %v7048_v43 }
 0x491   :  { %v1360_v16 = vpop.permute.xlu1 %1359 }
 0x492   :  { %6804 = vmatpush.msk.msra.mxu2 %vm609_vm4, %v1360_v16 }
 0x494   :  { %1394 = vmatpush.msra.mxu2 %v7037_v47 }
 0x496   :  { %1395 = vmatpush.msra.mxu2 %v7038_v18 }
 0x498   :  { %1396 = vmatpush.msra.mxu2 %v7042_v44 }
 0x49a   :  { %1397 = vmatpush.msra.mxu2 %v7043_v1 }
 0x49b   :  { %6805 = vmatmul.msk.f32.vlgmr.msra.gmra.mxu2 %vm472_vm7, %v1346_v9 }
 0x4ad   :  { %v1008_v40 = vpop.xlane.xlu2 %1007 }
 0x4ae   :  { %7188 = vrcp.f32 %v1008_v40  ;;  %v1032_v30 = vand.u32 2147483648, %v1008_v40  ;;  %vm1026_vm13 = vweird.f32 %v1008_v40  ;;  %v1030_v33 = vand.u32 2147483647, %v1008_v40 }
 0x4b0   :  { %v1033_v60 = vor.u32 1.1754944e-38, %v1032_v30  ;;  %vm1031_vm8 = vcmp.eq.f32.partialorder %v1030_v33, 8.507059e+37 }
 0x4b4   :  { %v7189_v55 = vpop.eup %7188  ;;  %v1266_v45 = vpop.xlane.xlu0 %1265 }
 0x4b5   :  { %v1022_v53 = vmul.f32 %v7189_v55, %v1008_v40  ;;  %7190 = vrcp.f32 %v1266_v45  ;;  %v8255_v35 = vpop.xlane.xlu2 %1010  ;;  %vm1027_vm11 = vweird.f32 %v7189_v55  ;;  %v1301_v26 = vand.u32 2147483648, %v1266_v45 }
 0x4b6   :  { %7192 = vrcp.f32 %v8255_v35  ;;  %v1299_v38 = vand.u32 2147483647, %v1266_v45  ;;  %vm8268_vm14 = vmor %vm1026_vm13, %vm1027_vm11  ;;  %vm1295_vm15 = vweird.f32 %v1266_v45  ;;  %vm1040_vm13 = vweird.f32 %v8255_v35 }
 0x4b7   :  { %v1023_v49 = vsub.f32 1.0, %v1022_v53  ;;  %v1302_v37 = vor.u32 1.1754944e-38, %v1301_v26 }
 0x4b8   :  { %vm1300_vm6 = vcmp.eq.f32.partialorder %v1299_v38, 8.507059e+37 }
 0x4b9   :  { %v1024_v4 = vmul.f32 %v7189_v55, %v1023_v49 }
 0x4bb   :  { %v7191_v58 = vpop.eup %7190  ;;  %v1025_v20 = vadd.f32 %v7189_v55, %v1024_v4 }
 0x4bc   :  { %v8258_v11 = vpop.eup %7192  ;;  %v1291_v22 = vmul.f32 %v7191_v58, %v1266_v45  ;;  %v8260_v10 = vpop.xlane.xlu1 %1268  ;;  %vm1296_vm12 = vweird.f32 %v7191_v58 }
 0x4bd   :  { %v1036_v25 = vmul.f32 %v8258_v11, %v8255_v35  ;;  %7194 = vrcp.f32 %v8260_v10  ;;  %v8265_v34 = vpop.xlane.xlu2 %1013  ;;  %vm1297_vm2 = vmor %vm1295_vm15, %vm1296_vm12  ;;  %v1029_v3 = vsel %vm8268_vm14, %v7189_v55, %v1025_v20  ;;  %v1315_v5 = vand.u32 2147483648, %v8260_v10 }
 0x4be   :  { %v1292_v56 = vsub.f32 1.0, %v1291_v22  ;;  %7196 = vrcp.f32 %v8265_v34  ;;  %v1034_v47 = vsel %vm1031_vm8, %v1033_v60, %v1029_v3  ;;  %v1313_v44 = vand.u32 2147483647, %v8260_v10 }
 0x4bf   :  { %v1037_v59 = vsub.f32 1.0, %v1036_v25  ;;  %vm1041_vm10 = vweird.f32 %v8258_v11  ;;  %vm1309_vm11 = vweird.f32 %v8260_v10  ;;  %v1046_v55 = vand.u32 2147483648, %v8255_v35 }
 0x4c0   :  { %v1293_v21 = vmul.f32 %v7191_v58, %v1292_v56  ;;  %v1091_v53 = vmul.f32 %v8098_v46, %v1034_v47  ;;  %v1316_v49 = vor.u32 1.1754944e-38, %v1315_v5  ;;  %vm1314_vm14 = vcmp.eq.f32.partialorder %v1313_v44, 8.507059e+37  ;;  %vm1042_vm15 = vmor %vm1040_vm13, %vm1041_vm10 }
 0x4c1   :  { %v1038_v13 = vmul.f32 %v8258_v11, %v1037_v59  ;;  %v1060_v38 = vand.u32 2147483648, %v8265_v34  ;;  %vm1054_vm8 = vweird.f32 %v8265_v34 }
 0x4c2   :  { %v1294_v50 = vadd.f32 %v7191_v58, %v1293_v21 }
 0x4c3   :  { %v7195_v36 = vpop.eup %7194  ;;  %v1039_v9 = vadd.f32 %v8258_v11, %v1038_v13 }
 0x4c4   :  { %v8272_v29 = vpop.eup %7196  ;;  %v1305_v41 = vmul.f32 %v7195_v36, %v8260_v10  ;;  %v8277_v52 = vpop.xlane.xlu1 %1016  ;;  %v1298_v62 = vsel %vm1297_vm2, %v7191_v58, %v1294_v50  ;;  %vm1310_vm9 = vweird.f32 %v7195_v36  ;;  %v1044_v58 = vand.u32 2147483647, %v8255_v35 }
 0x4c5   :  { %v1050_v42 = vmul.f32 %v8272_v29, %v8265_v34  ;;  %7198 = vrcp.f32 %v8277_v52  ;;  %v1303_v43 = vsel %vm1300_vm6, %v1302_v37, %v1298_v62  ;;  %v8287_v1 = vpop.xlane.xlu2 %1019  ;;  %vm1311_vm12 = vmor %vm1309_vm11, %vm1310_vm9  ;;  %v1043_v46 = vsel %vm1042_vm15, %v8258_v11, %v1039_v9 }
 0x4c6   :  { %v1306_v61 = vsub.f32 1.0, %v1305_v41  ;;  %v1347_v8 = vmul.f32 %v8106_v48, %v1303_v43  ;;  %7200 = vrcp.f32 %v8287_v1  ;;  %v1047_v35 = vor.u32 1.1754944e-38, %v1046_v55 }
 0x4c7   :  { %v7051_v16 = vpop.permute.xlu0 %7050  ;;  %v1051_v7 = vsub.f32 1.0, %v1050_v42  ;;  %vm1045_vm2 = vcmp.eq.f32.partialorder %v1044_v58, 8.507059e+37  ;;  %vm1055_vm6 = vweird.f32 %v8272_v29  ;;  %v1058_v11 = vand.u32 2147483647, %v8265_v34 }
 0x4c8   :  { %v7052_v0 = vunpack.i.l.bf16 %v7051_v16  ;;  %6806 = vmatmul.msk.f32.gmra.mxu2 %vm472_vm7, %v1347_v8  ;;  %v1307_v18 = vmul.f32 %v7195_v36, %v1306_v61  ;;  %v7053_v40 = vunpack.i.h.bf16 %v7051_v16  ;;  %v1048_v30 = vsel %vm1045_vm2, %v1047_v35, %v1043_v46  ;;  %vm1056_vm9 = vmor %vm1054_vm8, %vm1055_vm6 }
 0x4c9   :  { %v1052_v25 = vmul.f32 %v8272_v29, %v1051_v7  ;;  %v1092_v59 = vmul.f32 %v8108_v51, %v1048_v30  ;;  %v1061_v50 = vor.u32 1.1754944e-38, %v1060_v38  ;;  %vm1059_vm10 = vcmp.eq.f32.partialorder %v1058_v11, 8.507059e+37 }
 0x4ca   :  { %1141 = vmatpush.msra.mxu0 %v7052_v0  ;;  %v1308_v48 = vadd.f32 %v7195_v36, %v1307_v18  ;;  %v1074_v51 = vand.u32 2147483648, %v8277_v52  ;;  %v1072_v34 = vand.u32 2147483647, %v8277_v52  ;;  %v1088_v61 = vand.u32 2147483648, %v8287_v1 }
 0x4cb   :  { %v7199_v45 = vpop.eup %7198  ;;  %v1053_v20 = vadd.f32 %v8272_v29, %v1052_v25  ;;  %vm1082_vm2 = vweird.f32 %v8287_v1 }
 0x4cc   :  { %1142 = vmatpush.msra.mxu0 %v7053_v40  ;;  %v1312_v4 = vsel %vm1311_vm12, %v7195_v36, %v1308_v48  ;;  %v1064_v22 = vmul.f32 %v7199_v45, %v8277_v52  ;;  %v7201_v21 = vpop.eup %7200  ;;  %vm1069_vm11 = vweird.f32 %v7199_v45  ;;  %vm1068_vm12 = vweird.f32 %v8277_v52  ;;  %v1275_v0 = vpop.xlane.xlu1 %1274 }
 0x4cd   :  { %6789 = vmatmul.msk.f32.vlgmr.msra.gmra.mxu0 %vm472_vm7, %v1091_v53  ;;  %v1317_v10 = vsel %vm1314_vm14, %v1316_v49, %v1312_v4  ;;  %v1057_v12 = vsel %vm1056_vm9, %v8272_v29, %v1053_v20  ;;  %vm1070_vm13 = vmor %vm1068_vm12, %vm1069_vm11  ;;  %v1075_v42 = vor.u32 1.1754944e-38, %v1074_v51  ;;  %vm1073_vm14 = vcmp.eq.f32.partialorder %v1072_v34, 8.507059e+37 }
 0x4ce   :  { %v1348_v56 = vmul.f32 %v8116_v2, %v1317_v10  ;;  %v1065_v26 = vsub.f32 1.0, %v1064_v22  ;;  %v1078_v2 = vmul.f32 %v7201_v21, %v8287_v1  ;;  %v1062_v36 = vsel %vm1059_vm10, %v1061_v50, %v1057_v12 }
 0x4cf   :  { %v1093_v3 = vmul.f32 %v8119_v57, %v1062_v36  ;;  %vm1083_vm15 = vweird.f32 %v7201_v21  ;;  %v1086_v52 = vand.u32 2147483647, %v8287_v1  ;;  %v1089_v47 = vor.u32 1.1754944e-38, %v1088_v61  ;;  %v1492_v61 = vld [vmem:[#allocation2 + $0x110] sm:$0xff] }
 0x4d0   :  { %6807 = vmatmul.msk.f32.gmra.mxu2 %vm472_vm7, %v1348_v56  ;;  %v1066_v33 = vmul.f32 %v7199_v45, %v1065_v26  ;;  %v1079_v60 = vsub.f32 1.0, %v1078_v2  ;;  %vm1084_vm6 = vmor %vm1082_vm2, %vm1083_vm15  ;;  %7202 = vrcp.f32 %v1275_v0  ;;  %v1343_v56 = vand.u32 2147483648, %v1275_v0 }
 0x4d1   :  { %vm1087_vm8 = vcmp.eq.f32.partialorder %v1086_v52, 8.507059e+37  ;;  %v1341_v26 = vand.u32 2147483647, %v1275_v0 }
 0x4d2   :  { %v1067_v37 = vadd.f32 %v7199_v45, %v1066_v33  ;;  %v1080_v62 = vmul.f32 %v7201_v21, %v1079_v60 }
 0x4d3   :  { %vm1342_vm2 = vcmp.eq.f32.partialorder %v1341_v26, 8.507059e+37 }
 0x4d4   :  { %v1071_v29 = vsel %vm1070_vm13, %v7199_v45, %v1067_v37  ;;  %v1081_v13 = vadd.f32 %v7201_v21, %v1080_v62  ;;  %v1496_v62 = vld [vmem:[#allocation2 + $0x150] sm:$0xff] }
 0x4d5   :  { %6790 = vmatmul.msk.f32.gmra.mxu0 %vm472_vm7, %v1092_v59  ;;  %v1076_v43 = vsel %vm1073_vm14, %v1075_v42, %v1071_v29  ;;  %vm1337_vm14 = vweird.f32 %v1275_v0  ;;  %v1497_v29 = vld [vmem:[#allocation2 + $0x160] sm:$0xff] }
 0x4d6   :  { %v1094_v57 = vmul.f32 %v8125_v14, %v1076_v43  ;;  %v1085_v16 = vsel %vm1084_vm6, %v7201_v21, %v1081_v13  ;;  %v7203_v7 = vpop.eup %7202  ;;  %v1344_v21 = vor.u32 1.1754944e-38, %v1343_v56  ;;  %v1495_v42 = vld [vmem:[#allocation2 + $0x140] sm:$0xff]  ;;  %v1494_v43 = vld [vmem:[#allocation2 + $0x130] sm:$0xff]  ;;  %vm1479_vm6 = vcmask 261120  }
 0x4d7   :  { %v1090_v5 = vsel %vm1087_vm8, %v1089_v47, %v1085_v16  ;;  %v1333_v9 = vmul.f32 %v7203_v7, %v1275_v0  ;;  %vm1338_vm13 = vweird.f32 %v7203_v7  ;;  %v1493_v13 = vld [vmem:[#allocation2 + $0x120] sm:$0xff]  ;;  %vm1485_vm8 = vcmask 392192  }
 0x4d8   :  { %v1095_v18 = vmul.f32 %v8127_v17, %v1090_v5  ;;  %vm1339_vm15 = vmor %vm1337_vm14, %vm1338_vm13 }
 0x4d9   :  { %v1334_v48 = vsub.f32 1.0, %v1333_v9 }
 0x4db   :  { %v1335_v58 = vmul.f32 %v7203_v7, %v1334_v48 }
 0x4dc   :  { %v889_v41 = vpop.f32.mrf.mxu2 }
 0x4dd   :  { %6791 = vmatmul.msk.f32.gmra.mxu0 %vm472_vm7, %v1093_v3  ;;  %1419 = vrot.lane.b32.xlu1 %v889_v41, %s7600_s24  ;;  %v1336_v46 = vadd.f32 %v7203_v7, %v1335_v58  ;;  %v1498_v41 = vld [vmem:[#allocation2 + $0x170] sm:$0xff] }
 0x4de   :  { %1522 = vmatpush.msra.mxu3 %v1498_v41 }
 0x4df   :  { %v1340_v20 = vsel %vm1339_vm15, %v7203_v7, %v1336_v46  ;;  %v630_v11 = vpop.f32.mrf.mxu0 }
 0x4e0   :  { %v1345_v38 = vsel %vm1342_vm2, %v1344_v21, %v1340_v20  ;;  %1523 = vmatpush.msra.mxu3 %v1497_v29 }
 0x4e1   :  { %v1350_v59 = vmul.f32 %v8136_v28, %v1345_v38 }
 0x4e2   :  { %1524 = vmatpush.msra.mxu3 %v1496_v62 }
 0x4e4   :  { %v892_v8 = vpop.f32.mrf.mxu2  ;;  %1525 = vmatpush.msra.mxu3 %v1495_v42 }
 0x4e5   :  { %6792 = vmatmul.msk.f32.gmra.mxu0 %vm472_vm7, %v1094_v57  ;;  %1421 = vrot.lane.b32.xlu1 %v892_v8, %s7600_s24  ;;  %v1491_v57 = vld [vmem:[#allocation2 + $0x100] sm:$0xff] }
 0x4e6   :  { %1526 = vmatpush.msra.mxu3 %v1494_v43 }
 0x4e8   :  { %1527 = vmatpush.msra.mxu3 %v1493_v13 }
 0x4ea   :  { %1528 = vmatpush.msra.mxu3 %v1492_v61 }
 0x4ec   :  { %1529 = vmatpush.msra.mxu3 %v1491_v57 }
 0x4ed   :  { %6793 = vmatmul.msk.f32.gmra.mxu0 %vm472_vm7, %v1095_v18 }
 0x4ee   :  { %v895_v44 = vpop.f32.mrf.mxu2 }
 0x4ef   :  { %1423 = vrot.lane.b32.xlu1 %v895_v44, %s7600_s24 }
 0x4f2   :  { %v1272_v14 = vpop.xlane.xlu0 %1271 }
 0x4f3   :  { %7204 = vrcp.f32 %v1272_v14  ;;  %v1329_v53 = vand.u32 2147483648, %v1272_v14  ;;  %v1327_v17 = vand.u32 2147483647, %v1272_v14  ;;  %vm1323_vm10 = vweird.f32 %v1272_v14 }
 0x4f5   :  { %v1330_v22 = vor.u32 1.1754944e-38, %v1329_v53  ;;  %vm1328_vm12 = vcmp.eq.f32.partialorder %v1327_v17, 8.507059e+37 }
 0x4f6   :  { %v898_v1 = vpop.f32.mrf.mxu2 }
 0x4f7   :  { %1425 = vrot.lane.b32.xlu1 %v898_v1, %s7600_s24 }
 0x4f9   :  { %v7205_v40 = vpop.eup %7204 }
 0x4fa   :  { %v1319_v55 = vmul.f32 %v7205_v40, %v1272_v14  ;;  %vm1324_vm9 = vweird.f32 %v7205_v40 }
 0x4fb   :  { %vm1325_vm11 = vmor %vm1323_vm10, %vm1324_vm9 }
 0x4fc   :  { %v1320_v45 = vsub.f32 1.0, %v1319_v55 }
 0x4fe   :  { %v1321_v49 = vmul.f32 %v7205_v40, %v1320_v45 }
 0x500   :  { %v1322_v4 = vadd.f32 %v7205_v40, %v1321_v49 }
 0x502   :  { %v1326_v10 = vsel %vm1325_vm11, %v7205_v40, %v1322_v4 }
 0x503   :  { %v1331_v25 = vsel %vm1328_vm12, %v1330_v22, %v1326_v10  ;;  %v901_v35 = vpop.f32.mrf.mxu2 }
 0x504   :  { %v1349_v30 = vmul.f32 %v8241_v24, %v1331_v25  ;;  %1427 = vrot.lane.b32.xlu1 %v901_v35, %s7600_s24  ;;  %v633_v24 = vpop.f32.mrf.mxu0 }
 0x506   :  { %6808 = vmatmul.msk.f32.gmra.mxu2 %vm472_vm7, %v1349_v30 }
 0x50c   :  { %v636_v12 = vpop.f32.mrf.mxu0 }
 0x50e   :  { %6809 = vmatmul.msk.f32.gmra.mxu2 %vm472_vm7, %v1350_v59 }
 0x514   :  { %v639_v33 = vpop.f32.mrf.mxu0 }
 0x51c   :  { %v8336_v50 = vpop.f32.mrf.mxu0 }
 0x51e   :  { %v1399_v2 = vpop.f32.mrf.mxu2 }
 0x51f   :  { %1459 = vrot.lane.b32.xlu0 %v1399_v2, %s7603_s1 }
 0x54a   :  { %v1144_v36 = vpop.f32.mrf.mxu0 }
 0x54b   :  { %1439 = vrot.lane.b32.xlu2 %v1144_v36, %s7606_s20  ;;  %v1402_v60 = vpop.f32.mrf.mxu2 }
 0x54c   :  { %1461 = vrot.lane.b32.xlu0 %v1402_v60, %s7603_s1 }
 0x54f   :  { %v1420_v16 = vpop.permute.xlu1 %1419 }
 0x550   :  { %v1474_v47 = vsel %vm419_vm5, %v630_v11, %v1420_v16  ;;  %v1551_v11 = vld [vmem:[#allocation4 + $0x2] ss:$0 sm:$0xff] }
 0x552   :  { %v1147_v37 = vpop.f32.mrf.mxu0 }
 0x553   :  { %1441 = vrot.lane.b32.xlu2 %v1147_v37, %s7606_s20  ;;  %v1405_v28 = vpop.f32.mrf.mxu2 }
 0x554   :  { %1463 = vrot.lane.b32.xlu0 %v1405_v28, %s7603_s1 }
 0x557   :  { %v1422_v14 = vpop.permute.xlu1 %1421 }
 0x558   :  { %v1475_v1 = vsel %vm419_vm5, %v633_v24, %v1422_v14 }
 0x55a   :  { %v1150_v51 = vpop.f32.mrf.mxu0 }
 0x55b   :  { %1443 = vrot.lane.b32.xlu2 %v1150_v51, %s7606_s20 }
 0x561   :  { %v1424_v55 = vpop.permute.xlu1 %1423 }
 0x562   :  { %v1153_v3 = vpop.f32.mrf.mxu0  ;;  %v1476_v53 = vsel %vm419_vm5, %v636_v12, %v1424_v55 }
 0x563   :  { %1445 = vrot.lane.b32.xlu2 %v1153_v3, %s7606_s20 }
 0x569   :  { %v1426_v22 = vpop.permute.xlu1 %1425 }
 0x56a   :  { %v1156_v34 = vpop.f32.mrf.mxu0  ;;  %v1477_v10 = vsel %vm419_vm5, %v639_v33, %v1426_v22  ;;  %v1691_v22 = vld [vmem:[#allocation2 + $0x1e0] sm:$0xff] }
 0x56b   :  { %1447 = vrot.lane.b32.xlu2 %v1156_v34, %s7606_s20 }
 0x576   :  { %v1428_v35 = vpop.permute.xlu1 %1427 }
 0x577   :  { %v1478_v26 = vsel %vm419_vm5, %v8336_v50, %v1428_v35  ;;  %v1688_v35 = vld [vmem:[#allocation2 + $0x1c8] sm:$0xff] }
 0x589   :  { %v1408_v52 = vpop.f32.mrf.mxu2 }
 0x58a   :  { %1465 = vrot.lane.b32.xlu0 %v1408_v52, %s7603_s1 }
 0x591   :  { %v1411_v8 = vpop.f32.mrf.mxu2  ;;  %v1460_v0 = vpop.permute.xlu0 %1459 }
 0x592   :  { %1467 = vrot.lane.b32.xlu0 %v1411_v8, %s7603_s1 }
 0x5a5   :  { %v1440_v5 = vpop.permute.xlu2 %1439 }
 0x5a6   :  { %v1480_v18 = vsel %vm1479_vm6, %v1474_v47, %v1440_v5 }
 0x5a7   :  { %v1486_v44 = vsel %vm1485_vm8, %v1480_v18, %v1460_v0 }
 0x5a8   :  { %6810 = vmatmul.msk.f32.vlgmr.msra.gmra.mxu3 %vm67_vm0, %v1486_v44 }
 0x5ad   :  { %v1442_v7 = vpop.permute.xlu2 %1441 }
 0x5ae   :  { %v1481_v9 = vsel %vm1479_vm6, %v1475_v1, %v1442_v7 }
 0x5b5   :  { %v1444_v45 = vpop.permute.xlu2 %1443 }
 0x5b6   :  { %v1482_v49 = vsel %vm1479_vm6, %v1476_v53, %v1444_v45 }
 0x5bd   :  { %v1446_v4 = vpop.permute.xlu2 %1445 }
 0x5be   :  { %v1462_v40 = vpop.permute.xlu0 %1461  ;;  %v1483_v46 = vsel %vm1479_vm6, %v1477_v10, %v1446_v4  ;;  %v1694_v4 = vld [vmem:[#allocation2 + $0x1f8] sm:$0xff]  ;;  %v1692_v10 = vld [vmem:[#allocation2 + $0x1e8] sm:$0xff] }
 0x5bf   :  { %v1487_v48 = vsel %vm1485_vm8, %v1481_v9, %v1462_v40  ;;  %1757 = vmatpush.msrb.mxu1 %v1694_v4 }
 0x5c0   :  { %6811 = vmatmul.msk.f32.gmra.mxu3 %vm67_vm0, %v1487_v48 }
 0x5c1   :  { %1758 = vmatpush.msrb.mxu1 %v1692_v10 }
 0x5c5   :  { %v1448_v30 = vpop.permute.xlu2 %1447 }
 0x5c6   :  { %v1464_v17 = vpop.permute.xlu0 %1463  ;;  %v1484_v20 = vsel %vm1479_vm6, %v1478_v26, %v1448_v30  ;;  %v1685_v30 = vld [vmem:[#allocation2 + $0x1b0] sm:$0xff]  ;;  %v1686_v26 = vld [vmem:[#allocation2 + $0x1b8] sm:$0xff] }
 0x5c7   :  { %v1488_v58 = vsel %vm1485_vm8, %v1482_v49, %v1464_v17 }
 0x5c8   :  { %6812 = vmatmul.msk.f32.gmra.mxu3 %vm67_vm0, %v1488_v58  ;;  %v1693_v58 = vld [vmem:[#allocation2 + $0x1f0] sm:$0xff] }
 0x5c9   :  { %1725 = vmatpush.msrb.mxu0 %v1693_v58 }
 0x5cb   :  { %1726 = vmatpush.msrb.mxu0 %v1691_v22 }
 0x5fc   :  { %v1466_v25 = vpop.permute.xlu0 %1465 }
 0x5fd   :  { %v1489_v56 = vsel %vm1485_vm8, %v1483_v46, %v1466_v25  ;;  %v1689_v46 = vld [vmem:[#allocation2 + $0x1d0] sm:$0xff]  ;;  %v1690_v25 = vld [vmem:[#allocation2 + $0x1d8] sm:$0xff] }
 0x5fe   :  { %6813 = vmatmul.msk.f32.gmra.mxu3 %vm67_vm0, %v1489_v56  ;;  %1727 = vmatpush.msrb.mxu0 %v1689_v46  ;;  %v1687_v56 = vld [vmem:[#allocation2 + $0x1c0] sm:$0xff] }
 0x5ff   :  { %1759 = vmatpush.msrb.mxu1 %v1690_v25 }
 0x600   :  { %1728 = vmatpush.msrb.mxu0 %v1687_v56 }
 0x601   :  { %1760 = vmatpush.msrb.mxu1 %v1688_v35 }
 0x602   :  { %1729 = vmatpush.msrb.mxu0 %v1685_v30 }
 0x603   :  { %1761 = vmatpush.msrb.mxu1 %v1686_v26 }
 0x604   :  { %v1468_v21 = vpop.permute.xlu0 %1467 }
 0x605   :  { %v1490_v38 = vsel %vm1485_vm8, %v1484_v20, %v1468_v21  ;;  %v1683_v20 = vld [vmem:[#allocation2 + $0x1a0] sm:$0xff]  ;;  %v1684_v21 = vld [vmem:[#allocation2 + $0x1a8] sm:$0xff] }
 0x606   :  { %6814 = vmatmul.msk.f32.gmra.mxu3 %vm67_vm0, %v1490_v38  ;;  %1730 = vmatpush.msrb.mxu0 %v1683_v20  ;;  %v1681_v38 = vld [vmem:[#allocation2 + $0x190] sm:$0xff] }
 0x607   :  { %1762 = vmatpush.msrb.mxu1 %v1684_v21 }
 0x608   :  { %1731 = vmatpush.msrb.mxu0 %v1681_v38 }
 0x62b   :  { %v1531_v59 = vpop.f32.mrf.mxu3 }
 0x62c   :  { %v1546_v2 = vadd.f32 %v1531_v59, %v7667_v15  ;;  %v1682_v59 = vld [vmem:[#allocation2 + $0x198] sm:$0xff] }
 0x62d   :  { %1763 = vmatpush.msrb.mxu1 %v1682_v59 }
 0x62e   :  { %v8369_v24 = vadd.f32 %v1551_v11, %v1546_v2  ;;  %v1679_v2 = vld [vmem:[#allocation2 + $0x180] sm:$0xff] }
 0x62f   :  { %1732 = vmatpush.msrb.mxu0 %v1679_v2 }
 0x630   :  { %v1559_v12 = vsel %vm67_vm0, %v8369_v24, 0.0 }
 0x631   :  { %1560 = vadd.xlane.f32.xlu1 %v1559_v12  ;;  %v1680_v12 = vld [vmem:[#allocation2 + $0x188] sm:$0xff] }
 0x632   :  { %1764 = vmatpush.msrb.mxu1 %v1680_v12 }
 0x643   :  { %v1534_v33 = vpop.f32.mrf.mxu3 }
 0x644   :  { %v1547_v50 = vadd.f32 %v1534_v33, %v7674_v19 }
 0x646   :  { %v8374_v36 = vadd.f32 %v1551_v11, %v1547_v50 }
 0x648   :  { %v1562_v60 = vsel %vm67_vm0, %v8374_v36, 0.0 }
 0x649   :  { %1563 = vadd.xlane.f32.xlu2 %v1562_v60 }
 0x64b   :  { %v1537_v37 = vpop.f32.mrf.mxu3 }
 0x64c   :  { %v1548_v28 = vadd.f32 %v1537_v37, %v7681_v23 }
 0x64e   :  { %v8379_v51 = vadd.f32 %v1551_v11, %v1548_v28 }
 0x650   :  { %v1565_v15 = vsel %vm67_vm0, %v8379_v51, 0.0 }
 0x651   :  { %1566 = vadd.xlane.f32.xlu0 %v1565_v15 }
 0x681   :  { %v1540_v3 = vpop.f32.mrf.mxu3 }
 0x682   :  { %v1549_v34 = vadd.f32 %v1540_v3, %v7688_v27 }
 0x684   :  { %v8384_v41 = vadd.f32 %v1551_v11, %v1549_v34 }
 0x686   :  { %v1568_v19 = vsel %vm67_vm0, %v8384_v41, 0.0 }
 0x687   :  { %1569 = vadd.xlane.f32.xlu1 %v1568_v19  ;;  %v8429_v19 = vld [vmem:[#allocation4 + $0x3] ss:$0 sm:$0xff] }
 0x689   :  { %v1543_v29 = vpop.f32.mrf.mxu3 }
 0x68a   :  { %v1550_v62 = vadd.f32 %v1543_v29, %v7695_v31 }
 0x68c   :  { %v8389_v42 = vadd.f32 %v1551_v11, %v1550_v62 }
 0x68e   :  { %v1571_v23 = vsel %vm193_vm1, %v8389_v42, 0.0 }
 0x68f   :  { %1572 = vadd.xlane.f32.xlu2 %v1571_v23 }
 0x6a4   :  { %v1561_v43 = vpop.xlane.xlu1 %1560 }
 0x6a5   :  { %v1574_v13 = vmul.f32 %v1561_v43, %v7699_v39  ;;  %v8432_v43 = vld [vmem:[#allocation4 + $0x4] ss:$0 sm:$0xff] }
 0x6a7   :  { %v8395_v27 = vsub.f32 %v8369_v24, %v1574_v13 }
 0x6a9   :  { %v1584_v61 = vmul.f32 %v8395_v27, %v8395_v27 }
 0x6ab   :  { %v1589_v57 = vsel %vm67_vm0, %v1584_v61, 0.0 }
 0x6ac   :  { %1590 = vadd.xlane.f32.xlu0 %v1589_v57 }
 0x6bc   :  { %v1564_v52 = vpop.xlane.xlu2 %1563 }
 0x6bd   :  { %v1575_v31 = vmul.f32 %v1564_v52, %v7699_v39 }
 0x6bf   :  { %v8402_v8 = vsub.f32 %v8374_v36, %v1575_v31 }
 0x6c1   :  { %v1585_v16 = vmul.f32 %v8402_v8, %v8402_v8 }
 0x6c3   :  { %v1592_v47 = vsel %vm67_vm0, %v1585_v16, 0.0 }
 0x6c4   :  { %1593 = vadd.xlane.f32.xlu1 %v1592_v47  ;;  %v1567_v5 = vpop.xlane.xlu0 %1566 }
 0x6c5   :  { %v1576_v0 = vmul.f32 %v1567_v5, %v7699_v39 }
 0x6c7   :  { %v8409_v18 = vsub.f32 %v8379_v51, %v1576_v0 }
 0x6c9   :  { %v1586_v44 = vmul.f32 %v8409_v18, %v8409_v18 }
 0x6cb   :  { %v1595_v14 = vsel %vm67_vm0, %v1586_v44, 0.0 }
 0x6cc   :  { %1596 = vadd.xlane.f32.xlu2 %v1595_v14 }
 0x6fa   :  { %v1570_v7 = vpop.xlane.xlu1 %1569 }
 0x6fb   :  { %v1577_v1 = vmul.f32 %v1570_v7, %v7699_v39 }
 0x6fd   :  { %v8416_v9 = vsub.f32 %v8384_v41, %v1577_v1 }
 0x6ff   :  { %v1587_v40 = vmul.f32 %v8416_v9, %v8416_v9 }
 0x701   :  { %v1598_v48 = vsel %vm67_vm0, %v1587_v40, 0.0 }
 0x702   :  { %1599 = vadd.xlane.f32.xlu0 %v1598_v48  ;;  %v1573_v55 = vpop.xlane.xlu2 %1572 }
 0x703   :  { %v1578_v45 = vmul.f32 %v1573_v55, %v7699_v39 }
 0x705   :  { %v8423_v53 = vsub.f32 %v8389_v42, %v1578_v45 }
 0x707   :  { %v1588_v49 = vmul.f32 %v8423_v53, %v8423_v53 }
 0x709   :  { %v1601_v17 = vsel %vm193_vm1, %v1588_v49, 0.0 }
 0x70a   :  { %1602 = vadd.xlane.f32.xlu1 %v1601_v17 }
 0x71f   :  { %v1591_v11 = vpop.xlane.xlu0 %1590 }
 0x720   :  { %v1604_v33 = vmul.f32 %v1591_v11, %v7699_v39 }
 0x722   :  { %v1609_v50 = vadd.f32 1e-05, %v1604_v33 }
 0x724   :  { %7206 = vrsqrt.f32 %v1609_v50  ;;  %vm1620_vm10 = vweird.f32 %v1609_v50 }
 0x72a   :  { %v7207_v60 = vpop.eup %7206 }
 0x72b   :  { %v1615_v37 = vmul.f32 %v7207_v60, %v1609_v50  ;;  %vm1621_vm9 = vweird.f32 %v7207_v60 }
 0x72c   :  { %vm1622_vm11 = vmor %vm1620_vm10, %vm1621_vm9 }
 0x72d   :  { %v1616_v28 = vmul.f32 %v7207_v60, %v1615_v37 }
 0x72f   :  { %v1617_v15 = vmul.f32 0.5, %v1616_v28 }
 0x731   :  { %v1618_v3 = vsub.f32 1.5, %v1617_v15 }
 0x733   :  { %v1619_v34 = vmul.f32 %v7207_v60, %v1618_v3 }
 0x735   :  { %v1623_v29 = vsel %vm1622_vm11, %v7207_v60, %v1619_v34 }
 0x736   :  { %v1664_v62 = vmul.f32 %v1623_v29, %v8395_v27 }
 0x737   :  { %v1594_v23 = vpop.xlane.xlu1 %1593 }
 0x738   :  { %v1669_v13 = vmul.f32 %v1664_v62, %v8429_v19  ;;  %v1605_v61 = vmul.f32 %v1594_v23, %v7699_v39 }
 0x73a   :  { %v1610_v57 = vadd.f32 1e-05, %v1605_v61  ;;  %v1674_v52 = vadd.f32 %v1669_v13, %v8432_v43 }
 0x73c   :  { %7208 = vrsqrt.f32 %v1610_v57  ;;  %6815 = vmatmul.msk.f32.vlgmr.msrb.gmra.mxu0 %vm67_vm0, %v1674_v52  ;;  %6820 = vmatmul.msk.f32.vlgmr.msrb.gmra.mxu1 %vm67_vm0, %v1674_v52  ;;  %vm1630_vm13 = vweird.f32 %v1610_v57 }
 0x73f   :  { %v1597_v31 = vpop.xlane.xlu2 %1596 }
 0x740   :  { %v1606_v16 = vmul.f32 %v1597_v31, %v7699_v39 }
 0x742   :  { %v7209_v47 = vpop.eup %7208  ;;  %v1611_v27 = vadd.f32 1e-05, %v1606_v16  ;;  %v2196_v16 = vld [vmem:[#allocation2 + $0x2f0] sm:$0xff] }
 0x743   :  { %v1625_v5 = vmul.f32 %v7209_v47, %v1610_v57  ;;  %vm1631_vm12 = vweird.f32 %v7209_v47  ;;  %v1696_v57 = vld [vmem:[#allocation4 + $0x5] ss:$8 sm:$0x3]  ;;  %2214 = vmatpush.msrb.mxu2 %v2196_v16 }
 0x744   :  { %7210 = vrsqrt.f32 %v1611_v27  ;;  %vm1632_vm14 = vmor %vm1630_vm13, %vm1631_vm12  ;;  %vm1640_vm2 = vweird.f32 %v1611_v27  ;;  %v8462_v52 = vperm.slane %v1696_v57, 0  ;;  %v8464_v31 = vperm.slane %v1696_v57, 1  ;;  %v2199_v57 = vld [vmem:[#allocation2 + $0x320] sm:$0xff] }
 0x745   :  { %v1626_v0 = vmul.f32 %v7209_v47, %v1625_v5  ;;  %v2211_v5 = vld [vmem:[#allocation2 + $0x3e0] sm:$0xff] }
 0x747   :  { %v1627_v44 = vmul.f32 0.5, %v1626_v0 }
 0x749   :  { %v1628_v14 = vsub.f32 1.5, %v1627_v44  ;;  %v2194_v44 = vld [vmem:[#allocation2 + $0x2d0] sm:$0xff] }
 0x74a   :  { %v7211_v7 = vpop.eup %7210 }
 0x74b   :  { %v1629_v1 = vmul.f32 %v7209_v47, %v1628_v14  ;;  %v1635_v40 = vmul.f32 %v7211_v7, %v1611_v27  ;;  %vm1641_vm15 = vweird.f32 %v7211_v7  ;;  %v2195_v27 = vld [vmem:[#allocation2 + $0x2e0] sm:$0xff]  ;;  %v2210_v14 = vld [vmem:[#allocation2 + $0x3d0] sm:$0xff] }
 0x74c   :  { %vm1642_vm9 = vmor %vm1640_vm2, %vm1641_vm15  ;;  %2215 = vmatpush.msrb.mxu2 %v2195_v27 }
 0x74d   :  { %v1636_v48 = vmul.f32 %v7211_v7, %v1635_v40  ;;  %v1633_v55 = vsel %vm1632_vm14, %v7209_v47, %v1629_v1  ;;  %v2212_v47 = vld [vmem:[#allocation2 + $0x3f0] sm:$0xff]  ;;  %v2193_v40 = vld [vmem:[#allocation2 + $0x2c0] sm:$0xff] }
 0x74e   :  { %v1665_v45 = vmul.f32 %v1633_v55, %v8402_v8  ;;  %2246 = vmatpush.msrb.mxu3 %v2212_v47  ;;  %2216 = vmatpush.msrb.mxu2 %v2194_v44 }
 0x74f   :  { %v1637_v49 = vmul.f32 0.5, %v1636_v48  ;;  %v2209_v48 = vld [vmem:[#allocation2 + $0x3c0] sm:$0xff] }
 0x750   :  { %v1670_v17 = vmul.f32 %v1665_v45, %v8429_v19  ;;  %2247 = vmatpush.msrb.mxu3 %v2211_v5  ;;  %2217 = vmatpush.msrb.mxu2 %v2193_v40 }
 0x751   :  { %v1638_v58 = vsub.f32 1.5, %v1637_v49  ;;  %v2192_v49 = vld [vmem:[#allocation2 + $0x2b0] sm:$0xff] }
 0x752   :  { %v1675_v4 = vadd.f32 %v1670_v17, %v8432_v43  ;;  %2248 = vmatpush.msrb.mxu3 %v2210_v14  ;;  %v2208_v17 = vld [vmem:[#allocation2 + $0x3b0] sm:$0xff]  ;;  %2218 = vmatpush.msrb.mxu2 %v2192_v49 }
 0x753   :  { %v1639_v22 = vmul.f32 %v7211_v7, %v1638_v58 }
 0x754   :  { %6816 = vmatmul.msk.f32.gmra.mxu0 %vm67_vm0, %v1675_v4  ;;  %6821 = vmatmul.msk.f32.gmra.mxu1 %vm67_vm0, %v1675_v4 }
 0x755   :  { %v1643_v10 = vsel %vm1642_vm9, %v7211_v7, %v1639_v22  ;;  %2249 = vmatpush.msrb.mxu3 %v2209_v48  ;;  %v2191_v22 = vld [vmem:[#allocation2 + $0x2a0] sm:$0xff] }
 0x756   :  { %v1666_v46 = vmul.f32 %v1643_v10, %v8409_v18  ;;  %v2207_v10 = vld [vmem:[#allocation2 + $0x3a0] sm:$0xff]  ;;  %2219 = vmatpush.msrb.mxu2 %v2191_v22 }
 0x757   :  { %2250 = vmatpush.msrb.mxu3 %v2208_v17 }
 0x758   :  { %v1671_v25 = vmul.f32 %v1666_v46, %v8429_v19 }
 0x759   :  { %2251 = vmatpush.msrb.mxu3 %v2207_v10 }
 0x75a   :  { %v1676_v8 = vadd.f32 %v1671_v25, %v8432_v43 }
 0x75c   :  { %6817 = vmatmul.msk.f32.gmra.mxu0 %vm67_vm0, %v1676_v8  ;;  %6822 = vmatmul.msk.f32.gmra.mxu1 %vm67_vm0, %v1676_v8  ;;  %v2190_v8 = vld [vmem:[#allocation2 + $0x290] sm:$0xff] }
 0x75d   :  { %2220 = vmatpush.msrb.mxu2 %v2190_v8 }
 0x775   :  { %v1600_v56 = vpop.xlane.xlu0 %1599 }
 0x776   :  { %v1607_v35 = vmul.f32 %v1600_v56, %v7699_v39  ;;  %v2206_v56 = vld [vmem:[#allocation2 + $0x390] sm:$0xff] }
 0x777   :  { %2252 = vmatpush.msrb.mxu3 %v2206_v56 }
 0x778   :  { %v1612_v30 = vadd.f32 1e-05, %v1607_v35  ;;  %v2189_v35 = vld [vmem:[#allocation2 + $0x280] sm:$0xff] }
 0x779   :  { %2221 = vmatpush.msrb.mxu2 %v2189_v35 }
 0x77a   :  { %7212 = vrsqrt.f32 %v1612_v30  ;;  %vm1650_vm11 = vweird.f32 %v1612_v30 }
 0x77d   :  { %v1603_v26 = vpop.xlane.xlu1 %1602 }
 0x77e   :  { %v1608_v20 = vmul.f32 %v1603_v26, %v7699_v39  ;;  %v2188_v26 = vld [vmem:[#allocation2 + $0x270] sm:$0xff] }
 0x77f   :  { %2222 = vmatpush.msrb.mxu2 %v2188_v26 }
 0x780   :  { %v7213_v21 = vpop.eup %7212  ;;  %v1613_v38 = vadd.f32 1e-05, %v1608_v20  ;;  %v2204_v20 = vld [vmem:[#allocation2 + $0x370] sm:$0xff] }
 0x781   :  { %v1645_v59 = vmul.f32 %v7213_v21, %v1612_v30  ;;  %vm1651_vm10 = vweird.f32 %v7213_v21  ;;  %v2205_v30 = vld [vmem:[#allocation2 + $0x380] sm:$0xff] }
 0x782   :  { %7214 = vrsqrt.f32 %v1613_v38  ;;  %vm1652_vm12 = vmor %vm1650_vm11, %vm1651_vm10  ;;  %vm1660_vm14 = vweird.f32 %v1613_v38  ;;  %2253 = vmatpush.msrb.mxu3 %v2205_v30 }
 0x783   :  { %v1646_v18 = vmul.f32 %v7213_v21, %v1645_v59 }
 0x784   :  { %2254 = vmatpush.msrb.mxu3 %v2204_v20 }
 0x785   :  { %v1647_v11 = vmul.f32 0.5, %v1646_v18  ;;  %v2186_v18 = vld [vmem:[#allocation2 + $0x250] sm:$0xff] }
 0x787   :  { %v1648_v2 = vsub.f32 1.5, %v1647_v11  ;;  %v2202_v11 = vld [vmem:[#allocation2 + $0x350] sm:$0xff] }
 0x788   :  { %v7215_v12 = vpop.eup %7214 }
 0x789   :  { %v1649_v33 = vmul.f32 %v7213_v21, %v1648_v2  ;;  %v1655_v50 = vmul.f32 %v7215_v12, %v1613_v38  ;;  %vm1661_vm13 = vweird.f32 %v7215_v12  ;;  %v2203_v38 = vld [vmem:[#allocation2 + $0x360] sm:$0xff] }
 0x78a   :  { %vm1662_vm15 = vmor %vm1660_vm14, %vm1661_vm13  ;;  %2255 = vmatpush.msrb.mxu3 %v2203_v38 }
 0x78b   :  { %v1656_v60 = vmul.f32 %v7215_v12, %v1655_v50  ;;  %v1653_v37 = vsel %vm1652_vm12, %v7213_v21, %v1649_v33  ;;  %v2187_v21 = vld [vmem:[#allocation2 + $0x260] sm:$0xff] }
 0x78c   :  { %v1667_v28 = vmul.f32 %v1653_v37, %v8416_v9  ;;  %2223 = vmatpush.msrb.mxu2 %v2187_v21  ;;  %2256 = vmatpush.msrb.mxu3 %v2202_v11  ;;  %v2185_v50 = vld [vmem:[#allocation2 + $0x240] sm:$0xff] }
 0x78d   :  { %v1657_v15 = vmul.f32 0.5, %v1656_v60  ;;  %v2201_v60 = vld [vmem:[#allocation2 + $0x340] sm:$0xff] }
 0x78e   :  { %v1672_v3 = vmul.f32 %v1667_v28, %v8429_v19  ;;  %2224 = vmatpush.msrb.mxu2 %v2186_v18  ;;  %2257 = vmatpush.msrb.mxu3 %v2201_v60 }
 0x78f   :  { %v1658_v34 = vsub.f32 1.5, %v1657_v15 }
 0x790   :  { %v1677_v29 = vadd.f32 %v1672_v3, %v8432_v43  ;;  %2225 = vmatpush.msrb.mxu2 %v2185_v50 }
 0x791   :  { %v1659_v62 = vmul.f32 %v7215_v12, %v1658_v34  ;;  %v2184_v34 = vld [vmem:[#allocation2 + $0x230] sm:$0xff] }
 0x792   :  { %6818 = vmatmul.msk.f32.gmra.mxu0 %vm67_vm0, %v1677_v29  ;;  %6823 = vmatmul.msk.f32.gmra.mxu1 %vm67_vm0, %v1677_v29  ;;  %v2200_v29 = vld [vmem:[#allocation2 + $0x330] sm:$0xff] }
 0x793   :  { %v1663_v23 = vsel %vm1662_vm15, %v7215_v12, %v1659_v62  ;;  %2226 = vmatpush.msrb.mxu2 %v2184_v34  ;;  %2258 = vmatpush.msrb.mxu3 %v2200_v29 }
 0x794   :  { %v1668_v13 = vmul.f32 %v1663_v23, %v8423_v53 }
 0x795   :  { %2259 = vmatpush.msrb.mxu3 %v2199_v57 }
 0x796   :  { %v1673_v61 = vmul.f32 %v1668_v13, %v8429_v19 }
 0x798   :  { %v1678_v9 = vadd.f32 %v1673_v61, %v8432_v43 }
 0x79a   :  { %6819 = vmatmul.msk.f32.gmra.mxu0 %vm67_vm0, %v1678_v9  ;;  %6824 = vmatmul.msk.f32.gmra.mxu1 %vm67_vm0, %v1678_v9  ;;  %v2183_v9 = vld [vmem:[#allocation2 + $0x220] sm:$0xff] }
 0x79b   :  { %2227 = vmatpush.msrb.mxu2 %v2183_v9 }
 0x7b9   :  { %v1734_v53 = vpop.f32.mrf.mxu0  ;;  %v1766_v0 = vpop.f32.mrf.mxu1 }
 0x7ba   :  { %v8467_v19 = vadd.f32 %v1734_v53, %v8462_v52  ;;  %v8470_v43 = vadd.f32 %v1766_v0, %v8464_v31  ;;  %v2182_v53 = vld [vmem:[#allocation2 + $0x210] sm:$0xff] }
 0x7bb   :  { %v2198_v0 = vld [vmem:[#allocation2 + $0x310] sm:$0xff]  ;;  %2228 = vmatpush.msrb.mxu2 %v2182_v53 }
 0x7bc   :  { %v8473_v7 = vmul.f32 0.70710677, %v8467_v19  ;;  %v8476_v1 = vmul.f32 0.70710677, %v8470_v43  ;;  %2260 = vmatpush.msrb.mxu3 %v2198_v0  ;;  %v8555_v57 = vmul.f32 0.5, %v8467_v19  ;;  %v8564_v0 = vmul.f32 0.5, %v8470_v43 }
 0x7be   :  { %v8479_v55 = vand.u32 2147483647, %v8473_v7  ;;  %v8482_v45 = vand.u32 2147483647, %v8476_v1 }
 0x7c0   :  { %v1831_v58 = vmul.f32 0.3275911, %v8479_v55  ;;  %v1832_v4 = vmul.f32 0.3275911, %v8482_v45  ;;  %v2091_v47 = vsub.f32 0.0, %v8479_v55  ;;  %v2092_v35 = vsub.f32 0.0, %v8482_v45 }
 0x7c2   :  { %v8486_v46 = vadd.f32 1.0, %v1831_v58  ;;  %v8488_v25 = vadd.f32 1.0, %v1832_v4  ;;  %v2181_v58 = vld [vmem:[#allocation2 + $0x200] sm:$0xff]  ;;  %v2101_v38 = vmul.f32 %v2091_v47, %v8479_v55 }
 0x7c3   :  { %v2197_v4 = vld [vmem:[#allocation2 + $0x300] sm:$0xff]  ;;  %2229 = vmatpush.msrb.mxu2 %v2181_v58  ;;  %v7610_v58 = vmov -1.0  }
 0x7c4   :  { %7216 = vrcp.f32 %v8486_v46  ;;  %v1860_v28 = vand.u32 2147483647, %v8486_v46  ;;  %v1862_v15 = vand.u32 2147483648, %v8486_v46  ;;  %v1875_v23 = vand.u32 2147483647, %v8488_v25  ;;  %2261 = vmatpush.msrb.mxu3 %v2197_v4 }
 0x7c5   :  { %7218 = vrcp.f32 %v8488_v25  ;;  %v1877_v13 = vand.u32 2147483648, %v8488_v25  ;;  %vm1856_vm10 = vweird.f32 %v8486_v46  ;;  %vm1871_vm11 = vweird.f32 %v8488_v25 }
 0x7c6   :  { %v1863_v44 = vor.u32 1.1754944e-38, %v1862_v15  ;;  %vm1861_vm13 = vcmp.eq.f32.partialorder %v1860_v28, 8.507059e+37  ;;  %vm1876_vm15 = vcmp.eq.f32.partialorder %v1875_v23, 8.507059e+37  ;;  %v2111_v34 = vmul.f32 1.442695, %v2101_v38 }
 0x7c7   :  { %v1878_v17 = vor.u32 1.1754944e-38, %v1877_v13 }
 0x7ca   :  { %v7217_v59 = vpop.eup %7216 }
 0x7cb   :  { %v7219_v2 = vpop.eup %7218  ;;  %v1852_v12 = vmul.f32 %v7217_v59, %v8486_v46  ;;  %vm1857_vm2 = vweird.f32 %v7217_v59 }
 0x7cc   :  { %v1867_v33 = vmul.f32 %v7219_v2, %v8488_v25  ;;  %vm1872_vm9 = vweird.f32 %v7219_v2  ;;  %vm1858_vm12 = vmor %vm1856_vm10, %vm1857_vm2  ;;  %vm1801_vm2 = vcmp.ge.f32.partialorder %v8473_v7, 0.0 }
 0x7cd   :  { %v1853_v37 = vsub.f32 1.0, %v1852_v12  ;;  %vm1873_vm14 = vmor %vm1871_vm11, %vm1872_vm9  ;;  %vm1802_vm9 = vcmp.ge.f32.partialorder %v8476_v1, 0.0  ;;  %v1811_v4 = vsel %vm1801_vm2, 1.0, %v7610_v58 }
 0x7ce   :  { %v1868_v3 = vsub.f32 1.0, %v1867_v33  ;;  %v1812_v38 = vsel %vm1802_vm9, 1.0, %v7610_v58 }
 0x7cf   :  { %v1854_v62 = vmul.f32 %v7217_v59, %v1853_v37 }
 0x7d0   :  { %v1869_v61 = vmul.f32 %v7219_v2, %v1868_v3 }
 0x7d1   :  { %v1855_v16 = vadd.f32 %v7217_v59, %v1854_v62  ;;  %v1737_v27 = vpop.f32.mrf.mxu0  ;;  %v1769_v5 = vpop.f32.mrf.mxu1 }
 0x7d2   :  { %v1870_v14 = vadd.f32 %v7219_v2, %v1869_v61  ;;  %v8503_v40 = vadd.f32 %v1737_v27, %v8462_v52  ;;  %v8506_v48 = vadd.f32 %v1769_v5, %v8464_v31 }
 0x7d3   :  { %v1859_v49 = vsel %vm1858_vm12, %v7217_v59, %v1855_v16 }
 0x7d4   :  { %v8509_v22 = vsel %vm1861_vm13, %v1863_v44, %v1859_v49  ;;  %v1874_v10 = vsel %vm1873_vm14, %v7219_v2, %v1870_v14  ;;  %v8512_v46 = vmul.f32 0.70710677, %v8503_v40  ;;  %v8515_v25 = vmul.f32 0.70710677, %v8506_v48 }
 0x7d5   :  { %v2001_v8 = vmul.f32 1.0614054, %v8509_v22  ;;  %v8518_v56 = vsel %vm1876_vm15, %v1878_v17, %v1874_v10  ;;  %v2102_v2 = vmul.f32 %v2092_v35, %v8482_v45 }
 0x7d6   :  { %v2002_v30 = vmul.f32 1.0614054, %v8518_v56  ;;  %v1823_v26 = vand.u32 2147483647, %v8512_v46  ;;  %v8524_v21 = vand.u32 2147483647, %v8515_v25 }
 0x7d7   :  { %v2011_v20 = vadd.f32 -1.4531521, %v2001_v8  ;;  %v2113_v23 = vmul.f32 1.442695, %v2102_v2 }
 0x7d8   :  { %v2012_v59 = vadd.f32 -1.4531521, %v2002_v30  ;;  %v1833_v18 = vmul.f32 0.3275911, %v1823_v26  ;;  %v1834_v12 = vmul.f32 0.3275911, %v8524_v21 }
 0x7d9   :  { %v2021_v11 = vmul.f32 %v2011_v20, %v8509_v22  ;;  %v1740_v33 = vpop.f32.mrf.mxu0  ;;  %v1772_v50 = vpop.f32.mrf.mxu1  ;;  %v2093_v49 = vsub.f32 0.0, %v1823_v26 }
 0x7da   :  { %v2022_v60 = vmul.f32 %v2012_v59, %v8518_v56  ;;  %v8531_v37 = vadd.f32 1.0, %v1833_v18  ;;  %v8534_v28 = vadd.f32 %v1740_v33, %v8462_v52  ;;  %v8536_v3 = vadd.f32 1.0, %v1834_v12 }
 0x7db   :  { %v2031_v15 = vadd.f32 1.4214138, %v2021_v11  ;;  %v8539_v55 = vadd.f32 %v1772_v50, %v8464_v31  ;;  %v2103_v2 = vmul.f32 %v2093_v49, %v1823_v26  ;;  %v2094_v33 = vsub.f32 0.0, %v8524_v21 }
 0x7dc   :  { %v2032_v29 = vadd.f32 1.4214138, %v2022_v60  ;;  %7220 = vrcp.f32 %v8531_v37  ;;  %v8543_v45 = vmul.f32 0.70710677, %v8534_v28  ;;  %v1892_v1 = vand.u32 2147483648, %v8531_v37 }
 0x7dd   :  { %v2041_v62 = vmul.f32 %v2031_v15, %v8509_v22  ;;  %7222 = vrcp.f32 %v8536_v3  ;;  %v8548_v13 = vmul.f32 0.70710677, %v8539_v55  ;;  %vm1886_vm11 = vweird.f32 %v8531_v37 }
 0x7de   :  { %v2042_v61 = vmul.f32 %v2032_v29, %v8518_v56  ;;  %v8552_v9 = vand.u32 2147483647, %v8543_v45  ;;  %7224 = vpow2.f32 %v2111_v34  ;;  %v1890_v34 = vand.u32 2147483647, %v8531_v37 }
 0x7df   :  { %v2051_v16 = vadd.f32 -0.28449672, %v2041_v62  ;;  %v8558_v47 = vand.u32 2147483647, %v8548_v13  ;;  %7226 = vpow2.f32 %v2113_v23  ;;  %vm1901_vm12 = vweird.f32 %v8536_v3 }
 0x7e0   :  { %v2052_v27 = vadd.f32 -0.28449672, %v2042_v61  ;;  %v1835_v5 = vmul.f32 0.3275911, %v8552_v9  ;;  %vm1891_vm15 = vcmp.eq.f32.partialorder %v1890_v34, 8.507059e+37 }
 0x7e1   :  { %v2061_v53 = vmul.f32 %v2051_v16, %v8509_v22  ;;  %v1836_v44 = vmul.f32 0.3275911, %v8558_v47 }
 0x7e2   :  { %v7221_v19 = vpop.eup %7220  ;;  %v2062_v14 = vmul.f32 %v2052_v27, %v8518_v56  ;;  %v8569_v17 = vadd.f32 1.0, %v1835_v5  ;;  %v1905_v27 = vand.u32 2147483647, %v8536_v3  ;;  %v1907_v5 = vand.u32 2147483648, %v8536_v3 }
 0x7e3   :  { %v7223_v7 = vpop.eup %7222  ;;  %v2071_v10 = vadd.f32 0.2548296, %v2061_v53  ;;  %v1882_v8 = vmul.f32 %v7221_v19, %v8531_v37  ;;  %v8573_v43 = vadd.f32 1.0, %v1836_v44  ;;  %vm1887_vm10 = vweird.f32 %v7221_v19 }
 0x7e4   :  { %v2072_v35 = vadd.f32 0.2548296, %v2062_v14  ;;  %v1897_v30 = vmul.f32 %v7223_v7, %v8536_v3  ;;  %7228 = vrcp.f32 %v8569_v17  ;;  %v7225_v18 = vpop.eup %7224  ;;  %vm1902_vm13 = vweird.f32 %v7223_v7  ;;  %vm1888_vm14 = vmor %vm1886_vm11, %vm1887_vm10 }
 0x7e5   :  { %v2081_v20 = vmul.f32 %v2071_v10, %v8509_v22  ;;  %v1883_v59 = vsub.f32 1.0, %v1882_v8  ;;  %7230 = vrcp.f32 %v8573_v43  ;;  %v7227_v50 = vpop.eup %7226  ;;  %v1893_v22 = vor.u32 1.1754944e-38, %v1892_v1  ;;  %vm8591_vm2 = vmor %vm1901_vm12, %vm1902_vm13 }
 0x7e6   :  { %v2082_v11 = vmul.f32 %v2072_v35, %v8518_v56  ;;  %v1898_v12 = vsub.f32 1.0, %v1897_v30  ;;  %vm1906_vm9 = vcmp.eq.f32.partialorder %v1905_v27, 8.507059e+37  ;;  %vm1916_vm11 = vweird.f32 %v8569_v17 }
 0x7e7   :  { %v2131_v60 = vmul.f32 %v7225_v18, %v2081_v20  ;;  %v1884_v15 = vmul.f32 %v7221_v19, %v1883_v59  ;;  %v1908_v20 = vor.u32 1.1754944e-38, %v1907_v5  ;;  %v2104_v59 = vmul.f32 %v2094_v33, %v8524_v21 }
 0x7e8   :  { %v2132_v29 = vmul.f32 %v7227_v50, %v2082_v11  ;;  %v1899_v62 = vmul.f32 %v7223_v7, %v1898_v12  ;;  %v1922_v21 = vand.u32 2147483648, %v8569_v17  ;;  %v2115_v33 = vmul.f32 1.442695, %v2103_v2 }
 0x7e9   :  { %v2141_v23 = vsub.f32 1.0, %v2131_v60  ;;  %v1885_v61 = vadd.f32 %v7221_v19, %v1884_v15  ;;  %v2117_v49 = vmul.f32 1.442695, %v2104_v59 }
 0x7ea   :  { %v7229_v56 = vpop.eup %7228  ;;  %v2142_v26 = vsub.f32 1.0, %v2132_v29  ;;  %v1900_v16 = vadd.f32 %v7223_v7, %v1899_v62  ;;  %7232 = vpow2.f32 %v2115_v33 }
 0x7eb   :  { %v8588_v53 = vpop.eup %7230  ;;  %v2151_v44 = vmul.f32 %v2141_v23, %v1811_v4  ;;  %v1912_v37 = vmul.f32 %v7229_v56, %v8569_v17  ;;  %v1889_v14 = vsel %vm1888_vm14, %v7221_v19, %v1885_v61  ;;  %vm1917_vm10 = vweird.f32 %v7229_v56 }
 0x7ec   :  { %v2152_v10 = vmul.f32 %v2142_v26, %v1812_v38  ;;  %v1927_v8 = vmul.f32 %v8588_v53, %v8573_v43  ;;  %v8597_v35 = vsel %vm1891_vm15, %v1893_v22, %v1889_v14  ;;  %v1904_v3 = vsel %vm8591_vm2, %v7223_v7, %v1900_v16  ;;  %vm1918_vm12 = vmor %vm1916_vm11, %vm1917_vm10 }
 0x7ed   :  { %v2161_v30 = vadd.f32 1.0, %v2151_v44  ;;  %v1913_v1 = vsub.f32 1.0, %v1912_v37  ;;  %v2003_v4 = vmul.f32 1.0614054, %v8597_v35  ;;  %v1909_v12 = vsel %vm1906_vm9, %v1908_v20, %v1904_v3 }
 0x7ee   :  { %v2162_v19 = vadd.f32 1.0, %v2152_v10  ;;  %v1928_v18 = vsub.f32 1.0, %v1927_v8  ;;  %v2004_v15 = vmul.f32 1.0614054, %v1909_v12  ;;  %v1920_v7 = vand.u32 2147483647, %v8569_v17 }
 0x7ef   :  { %v2171_v38 = vmul.f32 %v2161_v30, %v8555_v57  ;;  %v2013_v11 = vadd.f32 -1.4531521, %v2003_v4  ;;  %v1914_v50 = vmul.f32 %v7229_v56, %v1913_v1  ;;  %v1923_v23 = vor.u32 1.1754944e-38, %v1922_v21 }
 0x7f0   :  { %v2172_v60 = vmul.f32 %v2162_v19, %v8564_v0  ;;  %v2014_v57 = vadd.f32 -1.4531521, %v2004_v15  ;;  %vm1921_vm13 = vcmp.eq.f32.partialorder %v1920_v7, 8.507059e+37  ;;  %v1929_v22 = vmul.f32 %v8588_v53, %v1928_v18 }
 0x7f1   :  { %2230 = vmatmul.f32.vlgmr.msrb.gmra.mxu2 %v2171_v38  ;;  %v2023_v34 = vmul.f32 %v2013_v11, %v8597_v35  ;;  %v1915_v29 = vadd.f32 %v7229_v56, %v1914_v50  ;;  %vm1931_vm14 = vweird.f32 %v8573_v43  ;;  %vm1932_vm15 = vweird.f32 %v8588_v53 }
 0x7f2   :  { %2262 = vmatmul.f32.vlgmr.msrb.gmra.mxu3 %v2172_v60  ;;  %v2024_v61 = vmul.f32 %v2014_v57, %v1909_v12  ;;  %v1930_v26 = vadd.f32 %v8588_v53, %v1929_v22  ;;  %v1935_v16 = vand.u32 2147483647, %v8573_v43  ;;  %v2095_v17 = vsub.f32 0.0, %v8552_v9  ;;  %vm8616_vm2 = vmor %vm1931_vm14, %vm1932_vm15 }
 0x7f3   :  { %v2033_v0 = vadd.f32 1.4214138, %v2023_v34  ;;  %v1919_v62 = vsel %vm1918_vm12, %v7229_v56, %v1915_v29  ;;  %v1937_v56 = vand.u32 2147483648, %v8573_v43  ;;  %v2096_v4 = vsub.f32 0.0, %v8558_v47  ;;  %v7233_v34 = vpop.eup %7232 }
 0x7f4   :  { %v1924_v27 = vsel %vm1921_vm13, %v1923_v23, %v1919_v62  ;;  %v2034_v44 = vadd.f32 1.4214138, %v2024_v61  ;;  %v1934_v14 = vsel %vm8616_vm2, %v8588_v53, %v1930_v26  ;;  %vm1936_vm9 = vcmp.eq.f32.partialorder %v1935_v16, 8.507059e+37 }
 0x7f5   :  { %v2043_v2 = vmul.f32 %v2033_v0, %v8597_v35  ;;  %v2005_v37 = vmul.f32 1.0614054, %v1924_v27  ;;  %v1938_v8 = vor.u32 1.1754944e-38, %v1937_v56  ;;  %v2105_v1 = vmul.f32 %v2095_v17, %v8552_v9 }
 0x7f6   :  { %v2044_v3 = vmul.f32 %v2034_v44, %v1909_v12  ;;  %7234 = vpow2.f32 %v2117_v49  ;;  %v2106_v15 = vmul.f32 %v2096_v4, %v8558_v47  ;;  %vm1803_vm10 = vcmp.ge.f32.partialorder %v8512_v46, 0.0 }
 0x7f7   :  { %v2053_v10 = vadd.f32 -0.28449672, %v2043_v2  ;;  %v2015_v30 = vadd.f32 -1.4531521, %v2005_v37  ;;  %v1939_v43 = vsel %vm1936_vm9, %v1938_v8, %v1934_v14  ;;  %v2119_v60 = vmul.f32 1.442695, %v2105_v1 }
 0x7f8   :  { %v2054_v19 = vadd.f32 -0.28449672, %v2044_v3  ;;  %v2006_v38 = vmul.f32 1.0614054, %v1939_v43  ;;  %vm1804_vm11 = vcmp.ge.f32.partialorder %v8515_v25, 0.0  ;;  %v1813_v47 = vsel %vm1803_vm10, 1.0, %v7610_v58 }
 0x7f9   :  { %v2063_v20 = vmul.f32 %v2053_v10, %v8597_v35  ;;  %v2025_v18 = vmul.f32 %v2015_v30, %v1924_v27  ;;  %7236 = vpow2.f32 %v2119_v60  ;;  %v2121_v23 = vmul.f32 1.442695, %v2106_v15 }
 0x7fa   :  { %v2064_v53 = vmul.f32 %v2054_v19, %v1909_v12  ;;  %v2016_v50 = vadd.f32 -1.4531521, %v2006_v38  ;;  %v1783_v46 = vmul.f32 0.5, %v8503_v40  ;;  %v1814_v44 = vsel %vm1804_vm11, 1.0, %v7610_v58 }
 0x7fb   :  { %v2073_v11 = vadd.f32 0.2548296, %v2063_v20  ;;  %v2035_v59 = vadd.f32 1.4214138, %v2025_v18  ;;  %7238 = vpow2.f32 %v2121_v23  ;;  %v1784_v8 = vmul.f32 0.5, %v8506_v48 }
 0x7fc   :  { %v2074_v9 = vadd.f32 0.2548296, %v2064_v53  ;;  %v2026_v21 = vmul.f32 %v2016_v50, %v1939_v43  ;;  %v7235_v62 = vpop.eup %7234  ;;  %vm1805_vm12 = vcmp.ge.f32.partialorder %v8543_v45, 0.0  ;;  %vm1806_vm13 = vcmp.ge.f32.partialorder %v8548_v13, 0.0 }
 0x7fd   :  { %v2083_v7 = vmul.f32 %v2073_v11, %v8597_v35  ;;  %v2045_v29 = vmul.f32 %v2035_v59, %v1924_v27  ;;  %v1815_v18 = vsel %vm1805_vm12, 1.0, %v7610_v58  ;;  %v1785_v11 = vmul.f32 0.5, %v8534_v28 }
 0x7fe   :  { %v2084_v57 = vmul.f32 %v2074_v9, %v1909_v12  ;;  %v2036_v0 = vadd.f32 1.4214138, %v2026_v21  ;;  %v1816_v50 = vsel %vm1806_vm13, 1.0, %v7610_v58  ;;  %v1786_v9 = vmul.f32 0.5, %v8539_v55 }
 0x7ff   :  { %v2133_v33 = vmul.f32 %v7233_v34, %v2083_v7  ;;  %v2055_v22 = vadd.f32 -0.28449672, %v2045_v29  ;;  %v7237_v49 = vpop.eup %7236 }
 0x800   :  { %v2134_v26 = vmul.f32 %v7235_v62, %v2084_v57  ;;  %v2046_v16 = vmul.f32 %v2036_v0, %v1939_v43 }
 0x801   :  { %v2143_v61 = vsub.f32 1.0, %v2133_v33  ;;  %v2065_v35 = vmul.f32 %v2055_v22, %v1924_v27  ;;  %v7239_v40 = vpop.eup %7238 }
 0x802   :  { %v2144_v2 = vsub.f32 1.0, %v2134_v26  ;;  %v2056_v56 = vadd.f32 -0.28449672, %v2046_v16 }
 0x803   :  { %v2153_v17 = vmul.f32 %v2143_v61, %v1813_v47  ;;  %v2075_v5 = vadd.f32 0.2548296, %v2065_v35 }
 0x804   :  { %v2154_v37 = vmul.f32 %v2144_v2, %v1814_v44  ;;  %v2066_v14 = vmul.f32 %v2056_v56, %v1939_v43 }
 0x805   :  { %v2163_v12 = vadd.f32 1.0, %v2153_v17  ;;  %v2085_v25 = vmul.f32 %v2075_v5, %v1924_v27 }
 0x806   :  { %v2164_v3 = vadd.f32 1.0, %v2154_v37  ;;  %v2076_v1 = vadd.f32 0.2548296, %v2066_v14 }
 0x807   :  { %v2173_v10 = vmul.f32 %v2163_v12, %v1783_v46  ;;  %v2135_v30 = vmul.f32 %v7237_v49, %v2085_v25 }
 0x808   :  { %v2174_v4 = vmul.f32 %v2164_v3, %v1784_v8  ;;  %v2086_v19 = vmul.f32 %v2076_v1, %v1939_v43 }
 0x809   :  { %2233 = vmatmul.f32.gmra.mxu2 %v2173_v10  ;;  %v2145_v20 = vsub.f32 1.0, %v2135_v30 }
 0x80a   :  { %2265 = vmatmul.f32.gmra.mxu3 %v2174_v4  ;;  %v2136_v38 = vmul.f32 %v7239_v40, %v2086_v19 }
 0x80b   :  { %v2155_v27 = vmul.f32 %v2145_v20, %v1815_v18 }
 0x80c   :  { %v2146_v53 = vsub.f32 1.0, %v2136_v38 }
 0x80d   :  { %v2165_v48 = vadd.f32 1.0, %v2155_v27 }
 0x80e   :  { %v2156_v7 = vmul.f32 %v2146_v53, %v1816_v50 }
 0x80f   :  { %v1743_v45 = vpop.f32.mrf.mxu0  ;;  %v1775_v59 = vpop.f32.mrf.mxu1  ;;  %v2175_v15 = vmul.f32 %v2165_v48, %v1785_v11 }
 0x810   :  { %v8641_v60 = vadd.f32 %v1743_v45, %v8462_v52  ;;  %v8644_v43 = vadd.f32 %v1775_v59, %v8464_v31  ;;  %v2166_v28 = vadd.f32 1.0, %v2156_v7 }
 0x811   :  { %2236 = vmatmul.f32.gmra.mxu2 %v2175_v15 }
 0x812   :  { %v8647_v13 = vmul.f32 0.70710677, %v8641_v60  ;;  %v8650_v34 = vmul.f32 0.70710677, %v8644_v43  ;;  %v2176_v33 = vmul.f32 %v2166_v28, %v1786_v9 }
 0x814   :  { %v1827_v29 = vand.u32 2147483647, %v8647_v13  ;;  %v1828_v21 = vand.u32 2147483647, %v8650_v34  ;;  %2268 = vmatmul.f32.gmra.mxu3 %v2176_v33 }
 0x816   :  { %v1837_v57 = vmul.f32 0.3275911, %v1827_v29  ;;  %v1838_v22 = vmul.f32 0.3275911, %v1828_v21  ;;  %v2097_v25 = vsub.f32 0.0, %v1827_v29  ;;  %v2098_v49 = vsub.f32 0.0, %v1828_v21 }
 0x817   :  { %v1746_v0 = vpop.f32.mrf.mxu0  ;;  %v1778_v62 = vpop.f32.mrf.mxu1 }
 0x818   :  { %v1847_v23 = vadd.f32 1.0, %v1837_v57  ;;  %v1848_v61 = vadd.f32 1.0, %v1838_v22  ;;  %v8656_v47 = vadd.f32 %v1746_v0, %v8462_v52  ;;  %v8659_v26 = vadd.f32 %v1778_v62, %v8464_v31 }
 0x819   :  { %v2107_v20 = vmul.f32 %v2097_v25, %v1827_v29  ;;  %v2108_v40 = vmul.f32 %v2098_v49, %v1828_v21 }
 0x81a   :  { %7240 = vrcp.f32 %v1847_v23  ;;  %v8662_v55 = vmul.f32 0.70710677, %v8656_v47  ;;  %v8665_v35 = vmul.f32 0.70710677, %v8659_v26  ;;  %v1952_v10 = vand.u32 2147483648, %v1847_v23 }
 0x81b   :  { %7242 = vrcp.f32 %v1848_v61  ;;  %v1950_v3 = vand.u32 2147483647, %v1847_v23  ;;  %v1967_v30 = vand.u32 2147483648, %v1848_v61  ;;  %v1965_v4 = vand.u32 2147483647, %v1848_v61 }
 0x81c   :  { %v8668_v16 = vand.u32 2147483647, %v8662_v55  ;;  %v8671_v17 = vand.u32 2147483647, %v8665_v35  ;;  %vm1946_vm2 = vweird.f32 %v1847_v23  ;;  %v1953_v18 = vor.u32 1.1754944e-38, %v1952_v10 }
 0x81d   :  { %vm1961_vm10 = vweird.f32 %v1848_v61  ;;  %vm1951_vm11 = vcmp.eq.f32.partialorder %v1950_v3, 8.507059e+37  ;;  %v1968_v48 = vor.u32 1.1754944e-38, %v1967_v30  ;;  %vm1966_vm13 = vcmp.eq.f32.partialorder %v1965_v4, 8.507059e+37 }
 0x81e   :  { %v1839_v52 = vmul.f32 0.3275911, %v8668_v16  ;;  %v1840_v31 = vmul.f32 0.3275911, %v8671_v17  ;;  %v2123_v15 = vmul.f32 1.442695, %v2107_v20 }
 0x81f   :  { %v2125_v29 = vmul.f32 1.442695, %v2108_v40  ;;  %v2100_v20 = vsub.f32 0.0, %v8671_v17 }
 0x820   :  { %v7241_v2 = vpop.eup %7240  ;;  %v8675_v46 = vadd.f32 1.0, %v1839_v52  ;;  %v8677_v44 = vadd.f32 1.0, %v1840_v31 }
 0x821   :  { %v7243_v5 = vpop.eup %7242  ;;  %v1942_v56 = vmul.f32 %v7241_v2, %v1847_v23  ;;  %vm1947_vm14 = vweird.f32 %v7241_v2 }
 0x822   :  { %v1957_v12 = vmul.f32 %v7243_v5, %v1848_v61  ;;  %7244 = vrcp.f32 %v8675_v46  ;;  %vm1962_vm15 = vweird.f32 %v7243_v5  ;;  %vm1948_vm9 = vmor %vm1946_vm2, %vm1947_vm14  ;;  %v1980_v0 = vand.u32 2147483647, %v8675_v46 }
 0x823   :  { %v1943_v37 = vsub.f32 1.0, %v1942_v56  ;;  %7246 = vrcp.f32 %v8677_v44  ;;  %vm1963_vm12 = vmor %vm1961_vm10, %vm1962_vm15  ;;  %v1982_v62 = vand.u32 2147483648, %v8675_v46  ;;  %v1997_v52 = vand.u32 2147483648, %v8677_v44 }
 0x824   :  { %v1958_v14 = vsub.f32 1.0, %v1957_v12  ;;  %v2099_v56 = vsub.f32 0.0, %v8668_v16  ;;  %vm1976_vm2 = vweird.f32 %v8675_v46  ;;  %vm1991_vm10 = vweird.f32 %v8677_v44 }
 0x825   :  { %v1944_v8 = vmul.f32 %v7241_v2, %v1943_v37  ;;  %v1998_v3 = vor.u32 1.1754944e-38, %v1997_v52  ;;  %7248 = vpow2.f32 %v2123_v15 }
 0x826   :  { %v1959_v1 = vmul.f32 %v7243_v5, %v1958_v14  ;;  %v1983_v14 = vor.u32 1.1754944e-38, %v1982_v62  ;;  %7250 = vpow2.f32 %v2125_v29 }
 0x827   :  { %v1945_v19 = vadd.f32 %v7241_v2, %v1944_v8 }
 0x828   :  { %v1960_v27 = vadd.f32 %v7243_v5, %v1959_v1  ;;  %v7245_v38 = vpop.eup %7244 }
 0x829   :  { %v1949_v11 = vsel %vm1948_vm9, %v7241_v2, %v1945_v19  ;;  %v7247_v53 = vpop.eup %7246  ;;  %v1972_v45 = vmul.f32 %v7245_v38, %v8675_v46  ;;  %vm1977_vm14 = vweird.f32 %v7245_v38 }
 0x82a   :  { %v1954_v59 = vsel %vm1951_vm11, %v1953_v18, %v1949_v11  ;;  %v1964_v50 = vsel %vm1963_vm12, %v7243_v5, %v1960_v27  ;;  %v1987_v7 = vmul.f32 %v7247_v53, %v8677_v44  ;;  %vm1992_vm15 = vweird.f32 %v7247_v53  ;;  %vm1978_vm9 = vmor %vm1976_vm2, %vm1977_vm14 }
 0x82b   :  { %v2007_v28 = vmul.f32 1.0614054, %v1954_v59  ;;  %v1969_v9 = vsel %vm1966_vm13, %v1968_v48, %v1964_v50  ;;  %v1973_v21 = vsub.f32 1.0, %v1972_v45  ;;  %v1995_v5 = vand.u32 2147483647, %v8677_v44  ;;  %vm1993_vm12 = vmor %vm1991_vm10, %vm1992_vm15 }
 0x82c   :  { %v2008_v33 = vmul.f32 1.0614054, %v1969_v9  ;;  %v1988_v57 = vsub.f32 1.0, %v1987_v7  ;;  %vm1981_vm11 = vcmp.eq.f32.partialorder %v1980_v0, 8.507059e+37  ;;  %v2109_v44 = vmul.f32 %v2099_v56, %v8668_v16 }
 0x82d   :  { %v2017_v22 = vadd.f32 -1.4531521, %v2007_v28  ;;  %v1974_v61 = vmul.f32 %v7245_v38, %v1973_v21  ;;  %vm1996_vm13 = vcmp.eq.f32.partialorder %v1995_v5, 8.507059e+37  ;;  %v2110_v50 = vmul.f32 %v2100_v20, %v8671_v17 }
 0x82e   :  { %v2018_v23 = vadd.f32 -1.4531521, %v2008_v33  ;;  %v1989_v31 = vmul.f32 %v7247_v53, %v1988_v57  ;;  %vm1807_vm14 = vcmp.ge.f32.partialorder %v8647_v13, 0.0  ;;  %vm1808_vm15 = vcmp.ge.f32.partialorder %v8650_v34, 0.0 }
 0x82f   :  { %v2027_v2 = vmul.f32 %v2017_v22, %v1954_v59  ;;  %v1975_v37 = vadd.f32 %v7245_v38, %v1974_v61  ;;  %v2127_v22 = vmul.f32 1.442695, %v2109_v44  ;;  %v2129_v15 = vmul.f32 1.442695, %v2110_v50 }
 0x830   :  { %v2028_v12 = vmul.f32 %v2018_v23, %v1969_v9  ;;  %v1990_v49 = vadd.f32 %v7247_v53, %v1989_v31  ;;  %v7249_v23 = vpop.eup %7248  ;;  %vm1809_vm2 = vcmp.ge.f32.partialorder %v8662_v55, 0.0  ;;  %v1790_v55 = vmul.f32 0.5, %v8659_v26 }
 0x831   :  { %v2037_v25 = vadd.f32 1.4214138, %v2027_v2  ;;  %v1979_v8 = vsel %vm1978_vm9, %v7245_v38, %v1975_v37  ;;  %v7251_v29 = vpop.eup %7250  ;;  %7252 = vpow2.f32 %v2127_v22  ;;  %vm1810_vm9 = vcmp.ge.f32.partialorder %v8665_v35, 0.0  ;;  %v2213_v35 = vld [vmem:[#allocation4 + $0x6] ss:$0 sm:$0xff] }
 0x832   :  { %v2038_v10 = vadd.f32 1.4214138, %v2028_v12  ;;  %v1984_v1 = vsel %vm1981_vm11, %v1983_v14, %v1979_v8  ;;  %v1994_v4 = vsel %vm1993_vm12, %v7247_v53, %v1990_v49  ;;  %7254 = vpow2.f32 %v2129_v15 }
 0x833   :  { %v2047_v30 = vmul.f32 %v2037_v25, %v1954_v59  ;;  %v2009_v40 = vmul.f32 1.0614054, %v1984_v1  ;;  %v1999_v46 = vsel %vm1996_vm13, %v1998_v3, %v1994_v4  ;;  %v1788_v3 = vmul.f32 0.5, %v8644_v43 }
 0x834   :  { %v2048_v19 = vmul.f32 %v2038_v10, %v1969_v9  ;;  %v2010_v27 = vmul.f32 1.0614054, %v1999_v46  ;;  %v1787_v10 = vmul.f32 0.5, %v8641_v60  ;;  %v1819_v44 = vsel %vm1809_vm2, 1.0, %v7610_v58 }
 0x835   :  { %v2057_v18 = vadd.f32 -0.28449672, %v2047_v30  ;;  %v2019_v48 = vadd.f32 -1.4531521, %v2009_v40 }
 0x836   :  { %v2058_v11 = vadd.f32 -0.28449672, %v2048_v19  ;;  %v2020_v45 = vadd.f32 -1.4531521, %v2010_v27 }
 0x837   :  { %v2067_v38 = vmul.f32 %v2057_v18, %v1954_v59  ;;  %v2029_v53 = vmul.f32 %v2019_v48, %v1984_v1  ;;  %v7253_v20 = vpop.eup %7252 }
 0x838   :  { %v2068_v7 = vmul.f32 %v2058_v11, %v1969_v9  ;;  %v2030_v21 = vmul.f32 %v2020_v45, %v1999_v46  ;;  %v7255_v18 = vpop.eup %7254 }
 0x839   :  { %v2077_v28 = vadd.f32 0.2548296, %v2067_v38  ;;  %v2039_v57 = vadd.f32 1.4214138, %v2029_v53 }
 0x83a   :  { %v2078_v33 = vadd.f32 0.2548296, %v2068_v7  ;;  %v2040_v62 = vadd.f32 1.4214138, %v2030_v21 }
 0x83b   :  { %v2087_v0 = vmul.f32 %v2077_v28, %v1954_v59  ;;  %v2049_v52 = vmul.f32 %v2039_v57, %v1984_v1  ;;  %v1817_v59 = vsel %vm1807_vm14, 1.0, %v7610_v58 }
 0x83c   :  { %v2088_v61 = vmul.f32 %v2078_v33, %v1969_v9  ;;  %v2050_v2 = vmul.f32 %v2040_v62, %v1999_v46  ;;  %v1818_v9 = vsel %vm1808_vm15, 1.0, %v7610_v58 }
 0x83d   :  { %v2137_v16 = vmul.f32 %v7249_v23, %v2087_v0  ;;  %v2059_v31 = vadd.f32 -0.28449672, %v2049_v52 }
 0x83e   :  { %v2138_v17 = vmul.f32 %v7251_v29, %v2088_v61  ;;  %v2060_v56 = vadd.f32 -0.28449672, %v2050_v2 }
 0x83f   :  { %v2147_v5 = vsub.f32 1.0, %v2137_v16  ;;  %v2069_v37 = vmul.f32 %v2059_v31, %v1984_v1 }
 0x840   :  { %v2148_v12 = vsub.f32 1.0, %v2138_v17  ;;  %v2070_v14 = vmul.f32 %v2060_v56, %v1999_v46 }
 0x841   :  { %v2157_v25 = vmul.f32 %v2147_v5, %v1817_v59  ;;  %v2079_v13 = vadd.f32 0.2548296, %v2069_v37 }
 0x842   :  { %v2158_v49 = vmul.f32 %v2148_v12, %v1818_v9  ;;  %v2080_v34 = vadd.f32 0.2548296, %v2070_v14 }
 0x843   :  { %v2167_v8 = vadd.f32 1.0, %v2157_v25  ;;  %v2089_v4 = vmul.f32 %v2079_v13, %v1984_v1  ;;  %v1820_v1 = vsel %vm1810_vm9, 1.0, %v7610_v58 }
 0x844   :  { %v2168_v30 = vadd.f32 1.0, %v2158_v49  ;;  %v2090_v40 = vmul.f32 %v2080_v34, %v1999_v46  ;;  %v1789_v46 = vmul.f32 0.5, %v8656_v47 }
 0x845   :  { %v2177_v19 = vmul.f32 %v2167_v8, %v1787_v10  ;;  %v2139_v11 = vmul.f32 %v7253_v20, %v2089_v4 }
 0x846   :  { %v2178_v27 = vmul.f32 %v2168_v30, %v1788_v3  ;;  %v2140_v48 = vmul.f32 %v7255_v18, %v2090_v40 }
 0x847   :  { %2239 = vmatmul.f32.gmra.mxu2 %v2177_v19  ;;  %v2149_v60 = vsub.f32 1.0, %v2139_v11 }
 0x848   :  { %2271 = vmatmul.f32.gmra.mxu3 %v2178_v27  ;;  %v2150_v38 = vsub.f32 1.0, %v2140_v48 }
 0x849   :  { %v2159_v43 = vmul.f32 %v2149_v60, %v1819_v44 }
 0x84a   :  { %v2160_v45 = vmul.f32 %v2150_v38, %v1820_v1 }
 0x84b   :  { %v2169_v50 = vadd.f32 1.0, %v2159_v43 }
 0x84c   :  { %v2170_v7 = vadd.f32 1.0, %v2160_v45 }
 0x84d   :  { %v2179_v53 = vmul.f32 %v2169_v50, %v1789_v46 }
 0x84e   :  { %v2180_v28 = vmul.f32 %v2170_v7, %v1790_v55 }
 0x84f   :  { %2242 = vmatmul.f32.gmra.mxu2 %v2179_v53  ;;  %v2419_v53 = vld [vmem:[#allocation2 + $0x470] sm:$0xff] }
 0x850   :  { %2274 = vmatmul.f32.gmra.mxu3 %v2180_v28  ;;  %v2420_v28 = vld [vmem:[#allocation2 + $0x478] sm:$0xff]  ;;  %2444 = vmatpush.msra.mxu0 %v2419_v53 }
 0x851   :  { %2476 = vmatpush.msra.mxu1 %v2420_v28 }
 0x874   :  { %v2231_v21 = vpop.f32.mrf.mxu2 }
 0x875   :  { %v2232_v33 = vadd.f32 %v2231_v21, %v2213_v35  ;;  %v2263_v57 = vpop.f32.mrf.mxu3  ;;  %v2418_v21 = vld [vmem:[#allocation2 + $0x468] sm:$0xff] }
 0x876   :  { %2477 = vmatpush.msra.mxu1 %v2418_v21 }
 0x877   :  { %v2264_v22 = vadd.f32 %v2263_v57, %v2232_v33  ;;  %v2415_v33 = vld [vmem:[#allocation2 + $0x450] sm:$0xff]  ;;  %v2416_v57 = vld [vmem:[#allocation2 + $0x458] sm:$0xff] }
 0x878   :  { %2478 = vmatpush.msra.mxu1 %v2416_v57 }
 0x879   :  { %v8706_v0 = vadd.f32 %v2264_v22, %v8369_v24  ;;  %v2413_v22 = vld [vmem:[#allocation2 + $0x440] sm:$0xff] }
 0x87b   :  { %v2285_v62 = vsel %vm67_vm0, %v8706_v0, 0.0 }
 0x87c   :  { %2286 = vadd.xlane.f32.xlu2 %v2285_v62  ;;  %v2414_v62 = vld [vmem:[#allocation2 + $0x448] sm:$0xff] }
 0x87d   :  { %2479 = vmatpush.msra.mxu1 %v2414_v62 }
 0x88c   :  { %v2234_v47 = vpop.f32.mrf.mxu2 }
 0x88d   :  { %v2235_v23 = vadd.f32 %v2234_v47, %v2213_v35  ;;  %v2266_v26 = vpop.f32.mrf.mxu3  ;;  %v2411_v47 = vld [vmem:[#allocation2 + $0x430] sm:$0xff] }
 0x88f   :  { %v2267_v15 = vadd.f32 %v2266_v26, %v2235_v23  ;;  %v2412_v23 = vld [vmem:[#allocation2 + $0x438] sm:$0xff] }
 0x890   :  { %2480 = vmatpush.msra.mxu1 %v2412_v23 }
 0x891   :  { %v8711_v61 = vadd.f32 %v2267_v15, %v8374_v36 }
 0x893   :  { %v2288_v52 = vsel %vm67_vm0, %v8711_v61, 0.0 }
 0x894   :  { %v2237_v29 = vpop.f32.mrf.mxu2  ;;  %2289 = vadd.xlane.f32.xlu0 %v2288_v52  ;;  %v2409_v52 = vld [vmem:[#allocation2 + $0x420] sm:$0xff] }
 0x895   :  { %v2238_v16 = vadd.f32 %v2237_v29, %v2213_v35  ;;  %v2410_v29 = vld [vmem:[#allocation2 + $0x428] sm:$0xff] }
 0x896   :  { %2481 = vmatpush.msra.mxu1 %v2410_v29 }
 0x897   :  { %v2269_v2 = vpop.f32.mrf.mxu3 }
 0x898   :  { %v2270_v24 = vadd.f32 %v2269_v2, %v2238_v16 }
 0x89a   :  { %v8716_v17 = vadd.f32 %v2270_v24, %v8379_v51 }
 0x89c   :  { %v2291_v31 = vsel %vm67_vm0, %v8716_v17, 0.0 }
 0x89d   :  { %2292 = vadd.xlane.f32.xlu1 %v2291_v31  ;;  %v2407_v31 = vld [vmem:[#allocation2 + $0x410] sm:$0xff] }
 0x8ca   :  { %v2240_v5 = vpop.f32.mrf.mxu2 }
 0x8cb   :  { %v2241_v56 = vadd.f32 %v2240_v5, %v2213_v35  ;;  %v2272_v59 = vpop.f32.mrf.mxu3  ;;  %v2408_v5 = vld [vmem:[#allocation2 + $0x418] sm:$0xff] }
 0x8cc   :  { %2482 = vmatpush.msra.mxu1 %v2408_v5 }
 0x8cd   :  { %v2273_v36 = vadd.f32 %v2272_v59, %v2241_v56  ;;  %v2405_v59 = vld [vmem:[#allocation2 + $0x400] sm:$0xff] }
 0x8cf   :  { %v8721_v12 = vadd.f32 %v2273_v36, %v8384_v41  ;;  %v2406_v36 = vld [vmem:[#allocation2 + $0x408] sm:$0xff] }
 0x8d0   :  { %2483 = vmatpush.msra.mxu1 %v2406_v36 }
 0x8d1   :  { %v2294_v37 = vsel %vm67_vm0, %v8721_v12, 0.0 }
 0x8d2   :  { %2295 = vadd.xlane.f32.xlu2 %v2294_v37  ;;  %v2243_v25 = vpop.f32.mrf.mxu2 }
 0x8d3   :  { %v2244_v9 = vadd.f32 %v2243_v25, %v2213_v35  ;;  %v2275_v14 = vpop.f32.mrf.mxu3  ;;  %v2417_v35 = vld [vmem:[#allocation2 + $0x460] sm:$0xff] }
 0x8d4   :  { %2445 = vmatpush.msra.mxu0 %v2417_v35 }
 0x8d5   :  { %v2276_v51 = vadd.f32 %v2275_v14, %v2244_v9  ;;  %v8766_v14 = vld [vmem:[#allocation4 + $0x7] ss:$0 sm:$0xff] }
 0x8d6   :  { %2446 = vmatpush.msra.mxu0 %v2415_v33 }
 0x8d7   :  { %v8726_v49 = vadd.f32 %v2276_v51, %v8389_v42 }
 0x8d8   :  { %2447 = vmatpush.msra.mxu0 %v2413_v22 }
 0x8d9   :  { %v2297_v13 = vsel %vm193_vm1, %v8726_v49, 0.0 }
 0x8da   :  { %2298 = vadd.xlane.f32.xlu0 %v2297_v13  ;;  %2448 = vmatpush.msra.mxu0 %v2411_v47 }
 0x8dc   :  { %2449 = vmatpush.msra.mxu0 %v2409_v52 }
 0x8de   :  { %2450 = vmatpush.msra.mxu0 %v2407_v31 }
 0x8e0   :  { %2451 = vmatpush.msra.mxu0 %v2405_v59 }
 0x8ef   :  { %v2287_v10 = vpop.xlane.xlu2 %2286 }
 0x8f0   :  { %v2300_v8 = vmul.f32 %v2287_v10, %v7699_v39  ;;  %v8769_v10 = vld [vmem:[#allocation4 + $0x10] ss:$0 sm:$0xff] }
 0x8f2   :  { %v8732_v41 = vsub.f32 %v8706_v0, %v2300_v8 }
 0x8f4   :  { %v2310_v34 = vmul.f32 %v8732_v41, %v8732_v41 }
 0x8f6   :  { %v2315_v3 = vsel %vm67_vm0, %v2310_v34, 0.0 }
 0x8f7   :  { %2316 = vadd.xlane.f32.xlu1 %v2315_v3 }
 0x907   :  { %v2290_v30 = vpop.xlane.xlu0 %2289 }
 0x908   :  { %v2301_v42 = vmul.f32 %v2290_v30, %v7699_v39 }
 0x90a   :  { %v8739_v4 = vsub.f32 %v8711_v61, %v2301_v42 }
 0x90c   :  { %v2311_v20 = vmul.f32 %v8739_v4, %v8739_v4 }
 0x90e   :  { %v2318_v19 = vsel %vm67_vm0, %v2311_v20, 0.0 }
 0x90f   :  { %2319 = vadd.xlane.f32.xlu2 %v2318_v19 }
 0x910   :  { %v2293_v40 = vpop.xlane.xlu1 %2292 }
 0x911   :  { %v2302_v18 = vmul.f32 %v2293_v40, %v7699_v39 }
 0x913   :  { %v8746_v27 = vsub.f32 %v8716_v17, %v2302_v18 }
 0x915   :  { %v2312_v11 = vmul.f32 %v8746_v27, %v8746_v27 }
 0x917   :  { %v2321_v48 = vsel %vm67_vm0, %v2312_v11, 0.0 }
 0x918   :  { %2322 = vadd.xlane.f32.xlu0 %v2321_v48 }
 0x945   :  { %v2296_v60 = vpop.xlane.xlu2 %2295 }
 0x946   :  { %v2303_v44 = vmul.f32 %v2296_v60, %v7699_v39 }
 0x948   :  { %v8753_v38 = vsub.f32 %v8721_v12, %v2303_v44 }
 0x94a   :  { %v2313_v43 = vmul.f32 %v8753_v38, %v8753_v38 }
 0x94c   :  { %v2324_v1 = vsel %vm67_vm0, %v2313_v43, 0.0 }
 0x94d   :  { %2325 = vadd.xlane.f32.xlu1 %v2324_v1  ;;  %v2299_v45 = vpop.xlane.xlu0 %2298 }
 0x94e   :  { %v2304_v46 = vmul.f32 %v2299_v45, %v7699_v39 }
 0x950   :  { %v8760_v50 = vsub.f32 %v8726_v49, %v2304_v46 }
 0x952   :  { %v2314_v55 = vmul.f32 %v8760_v50, %v8760_v50 }
 0x954   :  { %v2327_v7 = vsel %vm193_vm1, %v2314_v55, 0.0 }
 0x955   :  { %2328 = vadd.xlane.f32.xlu2 %v2327_v7 }
 0x96a   :  { %v2317_v26 = vpop.xlane.xlu1 %2316 }
 0x96b   :  { %v2330_v15 = vmul.f32 %v2317_v26, %v7699_v39 }
 0x96d   :  { %v2335_v16 = vadd.f32 1e-05, %v2330_v15 }
 0x96f   :  { %7256 = vrsqrt.f32 %v2335_v16  ;;  %vm2346_vm11 = vweird.f32 %v2335_v16 }
 0x975   :  { %v7257_v2 = vpop.eup %7256 }
 0x976   :  { %v2341_v24 = vmul.f32 %v7257_v2, %v2335_v16  ;;  %vm2347_vm10 = vweird.f32 %v7257_v2 }
 0x977   :  { %vm2348_vm12 = vmor %vm2346_vm11, %vm2347_vm10 }
 0x978   :  { %v2342_v56 = vmul.f32 %v7257_v2, %v2341_v24 }
 0x97a   :  { %v2343_v37 = vmul.f32 0.5, %v2342_v56 }
 0x97c   :  { %v2344_v25 = vsub.f32 1.5, %v2343_v37 }
 0x97e   :  { %v2345_v9 = vmul.f32 %v7257_v2, %v2344_v25 }
 0x980   :  { %v2349_v51 = vsel %vm2348_vm12, %v7257_v2, %v2345_v9 }
 0x981   :  { %v2390_v13 = vmul.f32 %v2349_v51, %v8732_v41 }
 0x982   :  { %v2320_v34 = vpop.xlane.xlu2 %2319 }
 0x983   :  { %v2395_v8 = vmul.f32 %v2390_v13, %v8766_v14  ;;  %v2331_v3 = vmul.f32 %v2320_v34, %v7699_v39 }
 0x985   :  { %v2400_v30 = vadd.f32 %v2395_v8, %v8769_v10  ;;  %v2336_v42 = vadd.f32 1e-05, %v2331_v3 }
 0x987   :  { %6825 = vmatmul.msk.f32.vlgmr.msra.gmra.mxu0 %vm67_vm0, %v2400_v30  ;;  %6830 = vmatmul.msk.f32.vlgmr.msra.gmra.mxu1 %vm67_vm0, %v2400_v30  ;;  %7258 = vrsqrt.f32 %v2336_v42  ;;  %vm2356_vm14 = vweird.f32 %v2336_v42 }
 0x98b   :  { %v2323_v19 = vpop.xlane.xlu0 %2322 }
 0x98c   :  { %v2332_v41 = vmul.f32 %v2323_v19, %v7699_v39 }
 0x98d   :  { %v7259_v20 = vpop.eup %7258 }
 0x98e   :  { %v2351_v40 = vmul.f32 %v7259_v20, %v2336_v42  ;;  %v2337_v11 = vadd.f32 1e-05, %v2332_v41  ;;  %vm2357_vm13 = vweird.f32 %v7259_v20 }
 0x98f   :  { %vm2358_vm15 = vmor %vm2356_vm14, %vm2357_vm13 }
 0x990   :  { %v2352_v18 = vmul.f32 %v7259_v20, %v2351_v40  ;;  %7260 = vrsqrt.f32 %v2337_v11  ;;  %vm2366_vm9 = vweird.f32 %v2337_v11 }
 0x992   :  { %v2353_v48 = vmul.f32 0.5, %v2352_v18 }
 0x994   :  { %v2354_v60 = vsub.f32 1.5, %v2353_v48 }
 0x996   :  { %v2355_v44 = vmul.f32 %v7259_v20, %v2354_v60  ;;  %v7261_v43 = vpop.eup %7260 }
 0x997   :  { %v2361_v45 = vmul.f32 %v7261_v43, %v2337_v11  ;;  %vm2367_vm2 = vweird.f32 %v7261_v43 }
 0x998   :  { %v2359_v1 = vsel %vm2358_vm15, %v7259_v20, %v2355_v44  ;;  %vm2368_vm10 = vmor %vm2366_vm9, %vm2367_vm2 }
 0x999   :  { %v2391_v46 = vmul.f32 %v2359_v1, %v8739_v4  ;;  %v2362_v55 = vmul.f32 %v7261_v43, %v2361_v45 }
 0x99b   :  { %v2396_v7 = vmul.f32 %v2391_v46, %v8766_v14  ;;  %v2363_v53 = vmul.f32 0.5, %v2362_v55 }
 0x99d   :  { %v2401_v28 = vadd.f32 %v2396_v7, %v8769_v10  ;;  %v2364_v35 = vsub.f32 1.5, %v2363_v53 }
 0x99f   :  { %6826 = vmatmul.msk.f32.gmra.mxu0 %vm67_vm0, %v2401_v28  ;;  %6831 = vmatmul.msk.f32.gmra.mxu1 %vm67_vm0, %v2401_v28  ;;  %v2365_v21 = vmul.f32 %v7261_v43, %v2364_v35 }
 0x9a1   :  { %v2369_v33 = vsel %vm2368_vm10, %v7261_v43, %v2365_v21 }
 0x9a2   :  { %v2392_v57 = vmul.f32 %v2369_v33, %v8746_v27 }
 0x9a4   :  { %v2397_v4 = vmul.f32 %v2392_v57, %v8766_v14 }
 0x9a6   :  { %v2402_v22 = vadd.f32 %v2397_v4, %v8769_v10 }
 0x9a8   :  { %6827 = vmatmul.msk.f32.gmra.mxu0 %vm67_vm0, %v2402_v22  ;;  %6832 = vmatmul.msk.f32.gmra.mxu1 %vm67_vm0, %v2402_v22 }
 0x9c0   :  { %v2326_v62 = vpop.xlane.xlu1 %2325 }
 0x9c1   :  { %v2333_v47 = vmul.f32 %v2326_v62, %v7699_v39 }
 0x9c3   :  { %v2338_v23 = vadd.f32 1e-05, %v2333_v47 }
 0x9c5   :  { %7262 = vrsqrt.f32 %v2338_v23  ;;  %vm2376_vm12 = vweird.f32 %v2338_v23 }
 0x9c8   :  { %v2329_v26 = vpop.xlane.xlu2 %2328 }
 0x9c9   :  { %v2334_v15 = vmul.f32 %v2329_v26, %v7699_v39 }
 0x9cb   :  { %v7263_v52 = vpop.eup %7262  ;;  %v2339_v16 = vadd.f32 1e-05, %v2334_v15 }
 0x9cc   :  { %v2371_v29 = vmul.f32 %v7263_v52, %v2338_v23  ;;  %vm2377_vm11 = vweird.f32 %v7263_v52 }
 0x9cd   :  { %7264 = vrsqrt.f32 %v2339_v16  ;;  %vm2378_vm13 = vmor %vm2376_vm12, %vm2377_vm11  ;;  %vm2386_vm15 = vweird.f32 %v2339_v16 }
 0x9ce   :  { %v2372_v27 = vmul.f32 %v7263_v52, %v2371_v29 }
 0x9d0   :  { %v2373_v2 = vmul.f32 0.5, %v2372_v27 }
 0x9d2   :  { %v2374_v24 = vsub.f32 1.5, %v2373_v2 }
 0x9d3   :  { %v7265_v31 = vpop.eup %7264 }
 0x9d4   :  { %v2375_v5 = vmul.f32 %v7263_v52, %v2374_v24  ;;  %v2381_v56 = vmul.f32 %v7265_v31, %v2339_v16  ;;  %vm2387_vm14 = vweird.f32 %v7265_v31 }
 0x9d5   :  { %vm2388_vm2 = vmor %vm2386_vm15, %vm2387_vm14 }
 0x9d6   :  { %v2379_v59 = vsel %vm2378_vm13, %v7263_v52, %v2375_v5  ;;  %v2382_v36 = vmul.f32 %v7265_v31, %v2381_v56 }
 0x9d7   :  { %v2393_v37 = vmul.f32 %v2379_v59, %v8753_v38 }
 0x9d8   :  { %v2383_v25 = vmul.f32 0.5, %v2382_v36 }
 0x9d9   :  { %v2398_v9 = vmul.f32 %v2393_v37, %v8766_v14 }
 0x9da   :  { %v2384_v51 = vsub.f32 1.5, %v2383_v25 }
 0x9db   :  { %v2403_v13 = vadd.f32 %v2398_v9, %v8769_v10 }
 0x9dc   :  { %v2385_v8 = vmul.f32 %v7265_v31, %v2384_v51 }
 0x9dd   :  { %6828 = vmatmul.msk.f32.gmra.mxu0 %vm67_vm0, %v2403_v13  ;;  %6833 = vmatmul.msk.f32.gmra.mxu1 %vm67_vm0, %v2403_v13 }
 0x9de   :  { %v2389_v34 = vsel %vm2388_vm2, %v7265_v31, %v2385_v8 }
 0x9df   :  { %v2394_v3 = vmul.f32 %v2389_v34, %v8760_v50 }
 0x9e1   :  { %v2399_v30 = vmul.f32 %v2394_v3, %v8766_v14 }
 0x9e3   :  { %v2404_v38 = vadd.f32 %v2399_v30, %v8769_v10 }
 0x9e5   :  { %6829 = vmatmul.msk.f32.gmra.mxu0 %vm67_vm0, %v2404_v38  ;;  %6834 = vmatmul.msk.f32.gmra.mxu1 %vm67_vm0, %v2404_v38 }
 0xa04   :  { %v8799_v42 = vpop.f32.mrf.mxu0  ;;  %v2485_v50 = vpop.f32.mrf.mxu1 }
 0xa1c   :  { %v8801_v20 = vpop.f32.mrf.mxu0  ;;  %v2488_v14 = vpop.f32.mrf.mxu1 }
 0xa1d   :  { %v8893_v35 = vpack.i.bf16 %v2485_v50, %v2488_v14 }
 0xa25   :  { %v8803_v19 = vpop.f32.mrf.mxu0  ;;  %v2491_v10 = vpop.f32.mrf.mxu1 }
 0xa26   :  { %2509 = vrot.lane.b32.xlu2 %v8803_v19, %s7604_s18 }
 0xa2e   :  { %2505 = vrot.lane.b32.xlu2 %v8799_v42, %s7604_s18 }
 0xa36   :  { %2749 = vrot.lane.b32.xlu2 %v8801_v20, %s7603_s1 }
 0xa3e   :  { %2739 = vrot.lane.b32.xlu2 %v8801_v20, %s7605_s19 }
 0xa46   :  { %2741 = vrot.lane.b32.xlu2 %v8803_v19, %s7605_s19 }
 0xa5a   :  { %v8815_v40 = vpop.f32.mrf.mxu0  ;;  %v2494_v41 = vpop.f32.mrf.mxu1 }
 0xa5b   :  { %3267 = vrot.lane.b32.xlu2 %v8815_v40, %s7600_s24  ;;  %2511 = vrot.lane.b32.xlu1 %v8815_v40, %s7604_s18  ;;  %v8879_v45 = vpack.i.bf16 %v2491_v10, %v2494_v41 }
 0xa62   :  { %v8821_v18 = vpop.f32.mrf.mxu0  ;;  %v8823_v11 = vpop.f32.mrf.mxu1 }
 0xa63   :  { %2753 = vrot.lane.b32.xlu1 %v8815_v40, %s7603_s1  ;;  %6845 = vmatpush.msk.msra.mxu3 %vm609_vm4, %v8823_v11 }
 0xa64   :  { %3269 = vrot.lane.b32.xlu2 %v8821_v18, %s7600_s24  ;;  %2513 = vrot.lane.b32.xlu0 %v8821_v18, %s7604_s18 }
 0xa65   :  { %2717 = vmatpush.msra.mxu3 %v2494_v41 }
 0xa67   :  { %2718 = vmatpush.msra.mxu3 %v2491_v10 }
 0xa69   :  { %2719 = vmatpush.msra.mxu3 %v2488_v14 }
 0xa6b   :  { %2747 = vrot.lane.b32.xlu1 %v8799_v42, %s7603_s1  ;;  %2720 = vmatpush.msra.mxu3 %v2485_v50 }
 0xa6c   :  { %2745 = vrot.lane.b32.xlu2 %v8821_v18, %s7605_s19  ;;  %2507 = vrot.lane.b32.xlu0 %v8801_v20, %s7604_s18 }
 0xa73   :  { %3010 = vrot.lane.b32.xlu1 %v8803_v19, %s7606_s20 }
 0xa74   :  { %3261 = vrot.lane.b32.xlu2 %v8799_v42, %s7600_s24  ;;  %2755 = vrot.lane.b32.xlu0 %v8821_v18, %s7603_s1 }
 0xa7b   :  { %3014 = vrot.lane.b32.xlu1 %v8821_v18, %s7606_s20 }
 0xa7c   :  { %3253 = vrot.lane.b32.xlu2 %v8801_v20, %s7607_s21  ;;  %2751 = vrot.lane.b32.xlu0 %v8803_v19, %s7603_s1 }
 0xa80   :  { %v2510_v48 = vpop.permute.xlu2 %2509 }
 0xa83   :  { %2743 = vrot.lane.b32.xlu1 %v8815_v40, %s7605_s19 }
 0xa84   :  { %3004 = vrot.lane.b32.xlu2 %v8821_v18, %s7608_s22  ;;  %2737 = vrot.lane.b32.xlu0 %v8799_v42, %s7605_s19 }
 0xa88   :  { %v2506_v60 = vpop.permute.xlu2 %2505 }
 0xa8b   :  { %2996 = vrot.lane.b32.xlu1 %v8799_v42, %s7608_s22 }
 0xa8c   :  { %3196 = vrot.lane.b32.xlu2 %v8823_v11, %s7608_s22  ;;  %3012 = vrot.lane.b32.xlu0 %v8815_v40, %s7606_s20 }
 0xa90   :  { %v2750_v44 = vpop.permute.xlu2 %2749 }
 0xa93   :  { %3263 = vrot.lane.b32.xlu1 %v8801_v20, %s7600_s24 }
 0xa94   :  { %3008 = vrot.lane.b32.xlu0 %v8801_v20, %s7606_s20 }
 0xa98   :  { %v2740_v43 = vpop.permute.xlu2 %2739 }
 0xa9b   :  { %3251 = vrot.lane.b32.xlu1 %v8799_v42, %s7607_s21 }
 0xa9c   :  { %3006 = vrot.lane.b32.xlu0 %v8799_v42, %s7606_s20 }
 0xaa0   :  { %v2742_v1 = vpop.permute.xlu2 %2741 }
 0xaa3   :  { %3002 = vrot.lane.b32.xlu1 %v8815_v40, %s7608_s22 }
 0xaa4   :  { %3265 = vrot.lane.b32.xlu0 %v8803_v19, %s7600_s24 }
 0xaab   :  { %3257 = vrot.lane.b32.xlu1 %v8815_v40, %s7607_s21 }
 0xaac   :  { %2998 = vrot.lane.b32.xlu0 %v8801_v20, %s7608_s22 }
 0xab3   :  { %7065 = vrot.lane.b32.xlu1 %v8879_v45, %s7608_s22 }
 0xab4   :  { %3000 = vrot.lane.b32.xlu0 %v8803_v19, %s7608_s22 }
 0xab5   :  { %v3268_v46 = vpop.permute.xlu2 %3267 }
 0xabb   :  { %2941 = vrot.lane.b32.xlu1 %v8823_v11, %s7605_s19 }
 0xabc   :  { %3255 = vrot.lane.b32.xlu0 %v8803_v19, %s7607_s21 }
 0xabe   :  { %v3270_v55 = vpop.permute.xlu2 %3269 }
 0xac4   :  { %3259 = vrot.lane.b32.xlu0 %v8821_v18, %s7607_s21 }
 0xac6   :  { %v2746_v7 = vpop.permute.xlu2 %2745 }
 0xacc   :  { %7055 = vrot.lane.b32.xlu0 %v8879_v45, %s7605_s19 }
 0xacd   :  { %v2512_v53 = vpop.permute.xlu1 %2511 }
 0xace   :  { %v3262_v28 = vpop.permute.xlu2 %3261 }
 0xad4   :  { %7060 = vrot.lane.b32.xlu0 %v8893_v35, %s7605_s19 }
 0xad5   :  { %v2754_v21 = vpop.permute.xlu1 %2753 }
 0xad6   :  { %v8897_v33 = vpop.permute.xlu2 %3253  ;;  %v2514_v57 = vpop.permute.xlu0 %2513 }
 0xad7   :  { %6835 = vmatpush.xpose.msk.msra.mxu2 %vm419_vm5, %v2514_v57 }
 0xadb   :  { %6836 = vmatpush.xpose.msk.msra.mxu2 %vm419_vm5, %v2512_v53 }
 0xadc   :  { %7070 = vrot.lane.b32.xlu0 %v8893_v35, %s7608_s22 }
 0xadd   :  { %v2748_v4 = vpop.permute.xlu1 %2747 }
 0xade   :  { %v8903_v22 = vpop.permute.xlu2 %3004  ;;  %v2508_v62 = vpop.permute.xlu0 %2507 }
 0xadf   :  { %6837 = vmatpush.xpose.msk.msra.mxu2 %vm419_vm5, %v2510_v48 }
 0xae3   :  { %6838 = vmatpush.xpose.msk.msra.mxu2 %vm419_vm5, %v2508_v62 }
 0xae5   :  { %v3011_v47 = vpop.permute.xlu1 %3010 }
 0xae6   :  { %v3197_v23 = vpop.permute.xlu2 %3196  ;;  %v2756_v26 = vpop.permute.xlu0 %2755 }
 0xae7   :  { %6877 = vmatpush.msk.msrb.mxu3 %vm609_vm4, %v3197_v23  ;;  %6839 = vmatpush.xpose.msk.msra.mxu2 %vm419_vm5, %v2506_v60 }
 0xae8   :  { %6851 = vmatpush.xpose.msk.msrb.mxu0 %vm419_vm5, %v2756_v26 }
 0xaea   :  { %6840 = vmatmul.msk.f32.vlgmr.msra.gmra.mxu2 %vm419_vm5, %v8799_v42 }
 0xaec   :  { %6852 = vmatpush.xpose.msk.msrb.mxu0 %vm419_vm5, %v2754_v21 }
 0xaed   :  { %v3015_v15 = vpop.permute.xlu1 %3014 }
 0xaee   :  { %6867 = vmatpush.xpose.msk.msrb.mxu2 %vm419_vm5, %v3015_v15  ;;  %v2752_v52 = vpop.permute.xlu0 %2751 }
 0xaf0   :  { %6853 = vmatpush.xpose.msk.msrb.mxu0 %vm419_vm5, %v2752_v52 }
 0xaf2   :  { %6841 = vmatmul.msk.f32.gmra.mxu2 %vm419_vm5, %v8801_v20 }
 0xaf4   :  { %6854 = vmatpush.xpose.msk.msrb.mxu0 %vm419_vm5, %v2750_v44 }
 0xaf5   :  { %v2744_v29 = vpop.permute.xlu1 %2743 }
 0xaf6   :  { %v2738_v16 = vpop.permute.xlu0 %2737 }
 0xaf8   :  { %6855 = vmatpush.xpose.msk.msrb.mxu0 %vm419_vm5, %v2748_v4 }
 0xafa   :  { %6842 = vmatmul.msk.f32.gmra.mxu2 %vm419_vm5, %v8803_v19 }
 0xafb   :  { %6856 = vmatmul.msk.f32.vlgmr.msrb.gmra.mxu0 %vm419_vm5, %v2738_v16 }
 0xafc   :  { %6883 = vmatpush.xpose.msk.msra.mxu0 %vm419_vm5, %v3270_v55 }
 0xafd   :  { %v2997_v27 = vpop.permute.xlu1 %2996 }
 0xafe   :  { %v3013_v2 = vpop.permute.xlu0 %3012 }
 0xaff   :  { %6868 = vmatpush.xpose.msk.msrb.mxu2 %vm419_vm5, %v3013_v2 }
 0xb00   :  { %6884 = vmatpush.xpose.msk.msra.mxu0 %vm419_vm5, %v3268_v46 }
 0xb02   :  { %6843 = vmatmul.msk.f32.gmra.mxu2 %vm419_vm5, %v8815_v40 }
 0xb03   :  { %6857 = vmatmul.msk.f32.gmra.mxu0 %vm419_vm5, %v2740_v43  ;;  %6869 = vmatpush.xpose.msk.msrb.mxu2 %vm419_vm5, %v3011_v47 }
 0xb05   :  { %v3264_v24 = vpop.permute.xlu1 %3263 }
 0xb06   :  { %v3009_v31 = vpop.permute.xlu0 %3008 }
 0xb07   :  { %6870 = vmatpush.xpose.msk.msrb.mxu2 %vm419_vm5, %v3009_v31 }
 0xb0a   :  { %6844 = vmatmul.msk.f32.gmra.mxu2 %vm419_vm5, %v8821_v18 }
 0xb0b   :  { %6858 = vmatmul.msk.f32.gmra.mxu0 %vm419_vm5, %v2742_v1 }
 0xb0d   :  { %v3252_v5 = vpop.permute.xlu1 %3251 }
 0xb0e   :  { %v3007_v56 = vpop.permute.xlu0 %3006 }
 0xb0f   :  { %6871 = vmatpush.xpose.msk.msrb.mxu2 %vm419_vm5, %v3007_v56 }
 0xb12   :  { %6872 = vmatmul.msk.f32.vlgmr.msrb.gmra.mxu2 %vm419_vm5, %v2997_v27 }
 0xb13   :  { %6859 = vmatmul.msk.f32.gmra.mxu0 %vm419_vm5, %v2744_v29 }
 0xb15   :  { %v3003_v59 = vpop.permute.xlu1 %3002 }
 0xb16   :  { %v3266_v36 = vpop.permute.xlu0 %3265 }
 0xb17   :  { %6885 = vmatpush.xpose.msk.msra.mxu0 %vm419_vm5, %v3266_v36 }
 0xb1b   :  { %6860 = vmatmul.msk.f32.gmra.mxu0 %vm419_vm5, %v2746_v7 }
 0xb1c   :  { %6886 = vmatpush.xpose.msk.msra.mxu0 %vm419_vm5, %v3264_v24 }
 0xb1d   :  { %v3258_v37 = vpop.permute.xlu1 %3257 }
 0xb1e   :  { %v2999_v25 = vpop.permute.xlu0 %2998 }
 0xb1f   :  { %6873 = vmatmul.msk.f32.gmra.mxu2 %vm419_vm5, %v2999_v25 }
 0xb20   :  { %6887 = vmatpush.xpose.msk.msra.mxu0 %vm419_vm5, %v3262_v28 }
 0xb23   :  { %6888 = vmatmul.msk.f32.vlgmr.msra.gmra.mxu0 %vm419_vm5, %v3252_v5 }
 0xb25   :  { %v7066_v9 = vpop.permute.xlu1 %7065 }
 0xb26   :  { %v7067_v51 = vunpack.i.l.bf16 %v7066_v9  ;;  %v3001_v13 = vpop.permute.xlu0 %3000  ;;  %v7068_v8 = vunpack.i.h.bf16 %v7066_v9 }
 0xb27   :  { %6874 = vmatmul.msk.f32.gmra.mxu2 %vm419_vm5, %v3001_v13 }
 0xb28   :  { %3231 = vmatpush.msrb.mxu3 %v7067_v51 }
 0xb2a   :  { %3232 = vmatpush.msrb.mxu3 %v7068_v8 }
 0xb2b   :  { %6889 = vmatmul.msk.f32.gmra.mxu0 %vm419_vm5, %v8897_v33 }
 0xb2d   :  { %v2942_v34 = vpop.permute.xlu1 %2941 }
 0xb2e   :  { %6861 = vmatpush.msk.msrb.mxu1 %vm609_vm4, %v2942_v34  ;;  %v3256_v3 = vpop.permute.xlu0 %3255 }
 0xb2f   :  { %6875 = vmatmul.msk.f32.gmra.mxu2 %vm419_vm5, %v3003_v59 }
 0xb33   :  { %6890 = vmatmul.msk.f32.gmra.mxu0 %vm419_vm5, %v3256_v3 }
 0xb36   :  { %v3260_v30 = vpop.permute.xlu0 %3259 }
 0xb37   :  { %6876 = vmatmul.msk.f32.gmra.mxu2 %vm419_vm5, %v8903_v22 }
 0xb3b   :  { %6891 = vmatmul.msk.f32.gmra.mxu0 %vm419_vm5, %v3258_v37 }
 0xb3e   :  { %v7056_v38 = vpop.permute.xlu0 %7055 }
 0xb3f   :  { %v7057_v42 = vunpack.i.l.bf16 %v7056_v38  ;;  %v7058_v20 = vunpack.i.h.bf16 %v7056_v38 }
 0xb41   :  { %2976 = vmatpush.msrb.mxu1 %v7057_v42 }
 0xb43   :  { %6892 = vmatmul.msk.f32.gmra.mxu0 %vm419_vm5, %v3260_v30  ;;  %2977 = vmatpush.msrb.mxu1 %v7058_v20 }
 0xb46   :  { %v7061_v19 = vpop.permute.xlu0 %7060 }
 0xb47   :  { %v7062_v50 = vunpack.i.l.bf16 %v7061_v19  ;;  %v7063_v14 = vunpack.i.h.bf16 %v7061_v19 }
 0xb49   :  { %2978 = vmatpush.msrb.mxu1 %v7062_v50 }
 0xb4b   :  { %2979 = vmatpush.msrb.mxu1 %v7063_v14 }
 0xb4e   :  { %v7071_v10 = vpop.permute.xlu0 %7070 }
 0xb4f   :  { %v7072_v40 = vunpack.i.l.bf16 %v7071_v10  ;;  %v7073_v41 = vunpack.i.h.bf16 %v7071_v10 }
 0xb51   :  { %3233 = vmatpush.msrb.mxu3 %v7072_v40 }
 0xb53   :  { %3234 = vmatpush.msrb.mxu3 %v7073_v41 }
 0xb6d   :  { %v2552_v18 = vpop.f32.mrf.mxu2 }
 0xb6e   :  { %v8953_v48 = vadd.f32 %v2552_v18, %v7911_v32 }
 0xb70   :  { %v2567_v60 = vsel %vm472_vm7, %v8953_v48, -inf }
 0xb71   :  { %2568 = vmax.xlane.f32.xlu2 %v2567_v60 }
 0xb75   :  { %v2555_v44 = vpop.f32.mrf.mxu2 }
 0xb76   :  { %v8958_v43 = vadd.f32 %v2555_v44, %v7911_v32 }
 0xb78   :  { %v2794_v1 = vpop.f32.mrf.mxu0  ;;  %v2570_v55 = vsel %vm472_vm7, %v8958_v43, -inf }
 0xb79   :  { %v8961_v46 = vadd.f32 %v2794_v1, %v7911_v32  ;;  %2571 = vmax.xlane.f32.xlu0 %v2570_v55 }
 0xb7b   :  { %v2809_v7 = vsel %vm472_vm7, %v8961_v46, -inf }
 0xb7c   :  { %2810 = vmax.xlane.f32.xlu1 %v2809_v7 }
 0xb7d   :  { %v2558_v53 = vpop.f32.mrf.mxu2 }
 0xb7e   :  { %v8968_v28 = vadd.f32 %v2558_v53, %v7940_v54 }
 0xb80   :  { %v2797_v21 = vpop.f32.mrf.mxu0  ;;  %v2573_v4 = vsel %vm472_vm7, %v8968_v28, -inf }
 0xb81   :  { %v8971_v33 = vadd.f32 %v2797_v21, %v7911_v32 }
 0xb83   :  { %v2812_v57 = vsel %vm472_vm7, %v8971_v33, -inf }
 0xb84   :  { %2813 = vmax.xlane.f32.xlu2 %v2812_v57  ;;  %2574 = vmax.xlane.f32.xlu1 %v2573_v4 }
 0xb85   :  { %v2561_v22 = vpop.f32.mrf.mxu2 }
 0xb86   :  { %v8978_v62 = vadd.f32 %v2561_v22, %v7954_v63 }
 0xb88   :  { %v2800_v47 = vpop.f32.mrf.mxu0  ;;  %v2576_v26 = vsel %vm472_vm7, %v8978_v62, -inf }
 0xb89   :  { %v8981_v23 = vadd.f32 %v2800_v47, %v7940_v54  ;;  %2577 = vmax.xlane.f32.xlu0 %v2576_v26 }
 0xb8b   :  { %v2815_v15 = vsel %vm472_vm7, %v8981_v23, -inf }
 0xb8c   :  { %2816 = vmax.xlane.f32.xlu2 %v2815_v15 }
 0xb8d   :  { %v2564_v52 = vpop.f32.mrf.mxu2 }
 0xb8e   :  { %v8988_v29 = vadd.f32 %v2564_v52, %v7968_v6 }
 0xb90   :  { %v2803_v16 = vpop.f32.mrf.mxu0  ;;  %v2579_v2 = vsel %vm485_vm3, %v8988_v29, -inf }
 0xb91   :  { %v8991_v27 = vadd.f32 %v2803_v16, %v7954_v63 }
 0xb93   :  { %v2818_v24 = vsel %vm472_vm7, %v8991_v27, -inf }
 0xb94   :  { %2580 = vmax.xlane.f32.xlu2 %v2579_v2  ;;  %2819 = vmax.xlane.f32.xlu1 %v2818_v24 }
 0xb95   :  { %v3053_v31 = vpop.f32.mrf.mxu2 }
 0xb96   :  { %v8998_v5 = vadd.f32 %v3053_v31, %v7911_v32 }
 0xb98   :  { %v2806_v56 = vpop.f32.mrf.mxu0  ;;  %v3068_v37 = vsel %vm472_vm7, %v8998_v5, -inf }
 0xb99   :  { %v9001_v59 = vadd.f32 %v2806_v56, %v7968_v6 }
 0xb9b   :  { %v2821_v36 = vsel %vm485_vm3, %v9001_v59, -inf }
 0xb9c   :  { %2822 = vmax.xlane.f32.xlu0 %v2821_v36  ;;  %3069 = vmax.xlane.f32.xlu1 %v3068_v37 }
 0xba0   :  { %v3308_v25 = vpop.f32.mrf.mxu0 }
 0xba1   :  { %v9008_v9 = vadd.f32 %v3308_v25, %v7911_v32 }
 0xba2   :  { %v3056_v51 = vpop.f32.mrf.mxu2 }
 0xba3   :  { %v3323_v13 = vsel %vm472_vm7, %v9008_v9, -inf  ;;  %v9013_v8 = vadd.f32 %v3056_v51, %v7911_v32 }
 0xba4   :  { %3324 = vmax.xlane.f32.xlu2 %v3323_v13 }
 0xba5   :  { %v3071_v34 = vsel %vm472_vm7, %v9013_v8, -inf }
 0xba6   :  { %3072 = vmax.xlane.f32.xlu0 %v3071_v34 }
 0xba8   :  { %v3311_v3 = vpop.f32.mrf.mxu0 }
 0xba9   :  { %v9018_v30 = vadd.f32 %v3311_v3, %v7911_v32 }
 0xbaa   :  { %v3059_v38 = vpop.f32.mrf.mxu2 }
 0xbab   :  { %v3326_v42 = vsel %vm472_vm7, %v9018_v30, -inf  ;;  %v9033_v41 = vadd.f32 %v3059_v38, %v7940_v54 }
 0xbac   :  { %3327 = vmax.xlane.f32.xlu2 %v3326_v42 }
 0xbad   :  { %v3074_v1 = vsel %vm472_vm7, %v9033_v41, -inf }
 0xbb0   :  { %v3314_v20 = vpop.f32.mrf.mxu0 }
 0xbb1   :  { %v9023_v19 = vadd.f32 %v3314_v20, %v7940_v54 }
 0xbb2   :  { %v3062_v50 = vpop.f32.mrf.mxu2 }
 0xbb3   :  { %v3329_v14 = vsel %vm472_vm7, %v9023_v19, -inf  ;;  %v9028_v10 = vadd.f32 %v3062_v50, %v7954_v63 }
 0xbb4   :  { %3330 = vmax.xlane.f32.xlu0 %v3329_v14 }
 0xbb5   :  { %v3077_v40 = vsel %vm472_vm7, %v9028_v10, -inf }
 0xbb6   :  { %3078 = vmax.xlane.f32.xlu1 %v3077_v40 }
 0xbb8   :  { %v3317_v18 = vpop.f32.mrf.mxu0 }
 0xbb9   :  { %v9036_v60 = vadd.f32 %v3317_v18, %v7954_v63 }
 0xbba   :  { %v3065_v21 = vpop.f32.mrf.mxu2 }
 0xbbb   :  { %v3332_v44 = vsel %vm472_vm7, %v9036_v60, -inf  ;;  %v9048_v57 = vadd.f32 %v3065_v21, %v7968_v6 }
 0xbbc   :  { %3333 = vmax.xlane.f32.xlu2 %v3332_v44  ;;  %3075 = vmax.xlane.f32.xlu0 %v3074_v1 }
 0xbbd   :  { %v3080_v4 = vsel %vm485_vm3, %v9048_v57, -inf }
 0xbc0   :  { %v3320_v55 = vpop.f32.mrf.mxu0 }
 0xbc1   :  { %v9043_v7 = vadd.f32 %v3320_v55, %v7968_v6 }
 0xbc3   :  { %v3335_v53 = vsel %vm485_vm3, %v9043_v7, -inf }
 0xbc4   :  { %3336 = vmax.xlane.f32.xlu2 %v3335_v53 }
 0xbcc   :  { %3081 = vmax.xlane.f32.xlu2 %v3080_v4 }
 0xbe4   :  { %v2569_v22 = vpop.xlane.xlu2 %2568 }
 0xbe5   :  { %v2582_v15 = vsub.f32 %v8953_v48, %v2569_v22 }
 0xbe7   :  { %v2587_v2 = vmul.f32 1.442695, %v2582_v15 }
 0xbec   :  { %v2572_v16 = vpop.xlane.xlu0 %2571 }
 0xbed   :  { %v2583_v37 = vsub.f32 %v8958_v43, %v2572_v16 }
 0xbef   :  { %v2811_v47 = vpop.xlane.xlu1 %2810 }
 0xbf0   :  { %v2824_v26 = vsub.f32 %v8961_v46, %v2811_v47  ;;  %v2589_v46 = vmul.f32 1.442695, %v2583_v37 }
 0xbf2   :  { %v2829_v52 = vmul.f32 1.442695, %v2824_v26 }
 0xbf4   :  { %7266 = vpow2.f32 %v2829_v52 }
 0xbf5   :  { %7268 = vpow2.f32 %v2587_v2 }
 0xbf7   :  { %v2814_v24 = vpop.xlane.xlu2 %2813  ;;  %v2575_v31 = vpop.xlane.xlu1 %2574 }
 0xbf8   :  { %v2825_v56 = vsub.f32 %v8971_v33, %v2814_v24  ;;  %v2584_v36 = vsub.f32 %v8968_v28, %v2575_v31 }
 0xbfa   :  { %v9057_v25 = vpop.eup %7266  ;;  %v2831_v51 = vmul.f32 1.442695, %v2825_v56  ;;  %v2591_v13 = vmul.f32 1.442695, %v2584_v36 }
 0xbfb   :  { %v2839_v48 = vsel %vm472_vm7, %v9057_v25, 0.0  ;;  %v9062_v38 = vpop.eup %7268 }
 0xbfc   :  { %7270 = vpow2.f32 %v2831_v51  ;;  %2840 = vadd.xlane.f32.xlu1 %v2839_v48  ;;  %v2578_v34 = vpop.xlane.xlu0 %2577  ;;  %v2597_v50 = vsel %vm472_vm7, %v9062_v38, 0.0 }
 0xbfd   :  { %7272 = vpow2.f32 %v2591_v13  ;;  %v2585_v3 = vsub.f32 %v8978_v62, %v2578_v34 }
 0xbfe   :  { %7274 = vpow2.f32 %v2589_v46 }
 0xbff   :  { %v2817_v33 = vpop.xlane.xlu2 %2816  ;;  %v2593_v28 = vmul.f32 1.442695, %v2585_v3 }
 0xc00   :  { %v2826_v42 = vsub.f32 %v8981_v23, %v2817_v33 }
 0xc01   :  { %7276 = vpow2.f32 %v2593_v28 }
 0xc02   :  { %v9064_v43 = vpop.eup %7270  ;;  %v2833_v40 = vmul.f32 1.442695, %v2826_v42 }
 0xc03   :  { %v9067_v20 = vpop.eup %7272  ;;  %v2842_v14 = vsel %vm472_vm7, %v9064_v43, 0.0 }
 0xc04   :  { %2598 = vadd.xlane.f32.xlu1 %v2597_v50  ;;  %v2603_v62 = vsel %vm472_vm7, %v9067_v20, 0.0  ;;  %2843 = vadd.xlane.f32.xlu2 %v2842_v14  ;;  %v9075_v18 = vpop.eup %7274  ;;  %7278 = vpow2.f32 %v2833_v40 }
 0xc05   :  { %2604 = vadd.xlane.f32.xlu0 %v2603_v62  ;;  %v2600_v53 = vsel %vm472_vm7, %v9075_v18, 0.0 }
 0xc07   :  { %v2820_v44 = vpop.xlane.xlu1 %2819  ;;  %v9077_v1 = vpop.eup %7276 }
 0xc08   :  { %v2827_v23 = vsub.f32 %v8991_v27, %v2820_v44  ;;  %v2606_v21 = vsel %vm472_vm7, %v9077_v1, 0.0  ;;  %v2581_v4 = vpop.xlane.xlu2 %2580 }
 0xc09   :  { %v2586_v27 = vsub.f32 %v8988_v29, %v2581_v4 }
 0xc0a   :  { %v2835_v55 = vmul.f32 1.442695, %v2827_v23  ;;  %v9084_v47 = vpop.eup %7278 }
 0xc0b   :  { %v2845_v16 = vsel %vm472_vm7, %v9084_v47, 0.0  ;;  %v2595_v24 = vmul.f32 1.442695, %v2586_v27 }
 0xc0c   :  { %2601 = vadd.xlane.f32.xlu2 %v2600_v53  ;;  %2607 = vadd.xlane.f32.xlu1 %v2606_v21  ;;  %7280 = vpow2.f32 %v2835_v55 }
 0xc0f   :  { %v2823_v22 = vpop.xlane.xlu0 %2822  ;;  %v3070_v46 = vpop.xlane.xlu1 %3069 }
 0xc10   :  { %v2828_v26 = vsub.f32 %v9001_v59, %v2823_v22  ;;  %v3083_v28 = vsub.f32 %v8998_v5, %v3070_v46 }
 0xc12   :  { %v2837_v15 = vmul.f32 1.442695, %v2828_v26  ;;  %v9087_v52 = vpop.eup %7280  ;;  %v3088_v50 = vmul.f32 1.442695, %v3083_v28 }
 0xc13   :  { %v2848_v2 = vsel %vm472_vm7, %v9087_v52, 0.0 }
 0xc14   :  { %2846 = vadd.xlane.f32.xlu2 %v2845_v16  ;;  %7282 = vpow2.f32 %v2837_v15  ;;  %2849 = vadd.xlane.f32.xlu0 %v2848_v2 }
 0xc15   :  { %7284 = vpow2.f32 %v2595_v24 }
 0xc17   :  { %v3325_v31 = vpop.xlane.xlu2 %3324 }
 0xc18   :  { %v3338_v59 = vsub.f32 %v9008_v9, %v3325_v31 }
 0xc19   :  { %v3073_v56 = vpop.xlane.xlu0 %3072 }
 0xc1a   :  { %v9094_v36 = vpop.eup %7282  ;;  %v3084_v37 = vsub.f32 %v9013_v8, %v3073_v56  ;;  %v3343_v13 = vmul.f32 1.442695, %v3338_v59 }
 0xc1b   :  { %v2851_v29 = vsel %vm485_vm3, %v9094_v36, 0.0  ;;  %v9101_v3 = vpop.eup %7284 }
 0xc1c   :  { %v3090_v51 = vmul.f32 1.442695, %v3084_v37  ;;  %2852 = vadd.xlane.f32.xlu2 %v2851_v29  ;;  %v2609_v9 = vsel %vm485_vm3, %v9101_v3, 0.0 }
 0xc1e   :  { %7286 = vpow2.f32 %v3090_v51 }
 0xc1f   :  { %v3328_v48 = vpop.xlane.xlu2 %3327  ;;  %7288 = vpow2.f32 %v3343_v13 }
 0xc20   :  { %v3339_v34 = vsub.f32 %v9018_v30, %v3328_v48 }
 0xc22   :  { %v3345_v33 = vmul.f32 1.442695, %v3339_v34 }
 0xc24   :  { %7290 = vpow2.f32 %v3345_v33  ;;  %v9106_v8 = vpop.eup %7286  ;;  %2610 = vadd.xlane.f32.xlu2 %v2609_v9 }
 0xc25   :  { %v3101_v42 = vsel %vm472_vm7, %v9106_v8, 0.0  ;;  %v9110_v30 = vpop.eup %7288  ;;  %7292 = vpow2.f32 %v3088_v50 }
 0xc26   :  { %3102 = vadd.xlane.f32.xlu1 %v3101_v42  ;;  %v3353_v40 = vsel %vm472_vm7, %v9110_v30, 0.0 }
 0xc27   :  { %v3331_v14 = vpop.xlane.xlu0 %3330 }
 0xc28   :  { %v3340_v24 = vsub.f32 %v9023_v19, %v3331_v14 }
 0xc29   :  { %v3079_v26 = vpop.xlane.xlu1 %3078 }
 0xc2a   :  { %v9112_v62 = vpop.eup %7290  ;;  %v3086_v15 = vsub.f32 %v9028_v10, %v3079_v26 }
 0xc2b   :  { %v3356_v5 = vsel %vm472_vm7, %v9112_v62, 0.0  ;;  %v9119_v55 = vpop.eup %7292 }
 0xc2c   :  { %3357 = vadd.xlane.f32.xlu0 %v3356_v5  ;;  %3354 = vadd.xlane.f32.xlu2 %v3353_v40  ;;  %v3098_v21 = vsel %vm472_vm7, %v9119_v55, 0.0  ;;  %v3094_v27 = vmul.f32 1.442695, %v3086_v15 }
 0xc2f   :  { %v3076_v44 = vpop.xlane.xlu0 %3075 }
 0xc30   :  { %v3085_v23 = vsub.f32 %v9033_v41, %v3076_v44  ;;  %v3334_v41 = vpop.xlane.xlu2 %3333 }
 0xc32   :  { %v3092_v53 = vmul.f32 1.442695, %v3085_v23 }
 0xc34   :  { %7294 = vpow2.f32 %v3092_v53  ;;  %3099 = vadd.xlane.f32.xlu2 %v3098_v21 }
 0xc35   :  { %7296 = vpow2.f32 %v3094_v27 }
 0xc38   :  { %v3337_v16 = vpop.xlane.xlu2 %3336 }
 0xc39   :  { %v3342_v2 = vsub.f32 %v9043_v7, %v3337_v16 }
 0xc3a   :  { %v9123_v4 = vpop.eup %7294 }
 0xc3b   :  { %v3104_v22 = vsel %vm472_vm7, %v9123_v4, 0.0  ;;  %v3351_v31 = vmul.f32 1.442695, %v3342_v2  ;;  %v9136_v56 = vpop.eup %7296 }
 0xc3c   :  { %3105 = vadd.xlane.f32.xlu0 %v3104_v22 }
 0xc3d   :  { %7298 = vpow2.f32 %v3351_v31 }
 0xc3f   :  { %7075 = vrot.lane.b32.xlu1 %v8879_v45, %s7607_s21  ;;  %v3347_v45 = vmul.f32 1.442695, %v3340_v24 }
 0xc40   :  { %v3082_v59 = vpop.xlane.xlu2 %3081 }
 0xc41   :  { %7300 = vpow2.f32 %v3347_v45  ;;  %v3087_v10 = vsub.f32 %v9048_v57, %v3082_v59 }
 0xc43   :  { %v9142_v29 = vpop.eup %7298  ;;  %v3096_v19 = vmul.f32 1.442695, %v3087_v10 }
 0xc44   :  { %v3365_v51 = vsel %vm485_vm3, %v9142_v29, 0.0 }
 0xc47   :  { %v9146_v13 = vpop.eup %7300 }
 0xc4c   :  { %3451 = vrot.lane.b32.xlu2 %v8823_v11, %s7607_s21  ;;  %v3341_v11 = vsub.f32 %v9036_v60, %v3334_v41  ;;  %v3359_v60 = vsel %vm472_vm7, %v9146_v13, 0.0 }
 0xc4e   :  { %v3349_v37 = vmul.f32 1.442695, %v3341_v11 }
 0xc50   :  { %7080 = vrot.lane.b32.xlu0 %v8893_v35, %s7607_s21  ;;  %v3107_v35 = vsel %vm472_vm7, %v9136_v56, 0.0 }
 0xc69   :  { %3108 = vadd.xlane.f32.xlu1 %v3107_v35 }
 0xc6f   :  { %v2841_v7 = vpop.xlane.xlu1 %2840 }
 0xc70   :  { %7302 = vrcp.f32 %v2841_v7  ;;  %v2865_v50 = vand.u32 2147483648, %v2841_v7  ;;  %v2863_v40 = vand.u32 2147483647, %v2841_v7  ;;  %vm2859_vm10 = vweird.f32 %v2841_v7 }
 0xc71   :  { %7304 = vpow2.f32 %v3349_v37  ;;  %3366 = vadd.xlane.f32.xlu1 %v3365_v51 }
 0xc72   :  { %7306 = vpow2.f32 %v3096_v19  ;;  %v2866_v21 = vor.u32 1.1754944e-38, %v2865_v50  ;;  %vm2864_vm12 = vcmp.eq.f32.partialorder %v2863_v40, 8.507059e+37 }
 0xc75   :  { %3360 = vadd.xlane.f32.xlu2 %v3359_v60 }
 0xc76   :  { %v7303_v48 = vpop.eup %7302 }
 0xc77   :  { %v9150_v57 = vpop.eup %7304  ;;  %v2855_v46 = vmul.f32 %v7303_v48, %v2841_v7  ;;  %v2599_v34 = vpop.xlane.xlu1 %2598  ;;  %vm2860_vm9 = vweird.f32 %v7303_v48 }
 0xc78   :  { %v2844_v33 = vpop.xlane.xlu2 %2843  ;;  %7308 = vrcp.f32 %v2599_v34  ;;  %v9152_v9 = vpop.xlane.xlu0 %2604  ;;  %v3362_v14 = vsel %vm472_vm7, %v9150_v57, 0.0  ;;  %vm2861_vm11 = vmor %vm2859_vm10, %vm2860_vm9  ;;  %v2621_v35 = vand.u32 2147483647, %v2599_v34  ;;  %v2623_v10 = vand.u32 2147483648, %v2599_v34 }
 0xc79   :  { %v2856_v28 = vsub.f32 1.0, %v2855_v46  ;;  %7310 = vrcp.f32 %v2844_v33  ;;  %v9154_v42 = vpop.eup %7306  ;;  %v2879_v7 = vand.u32 2147483648, %v2844_v33  ;;  %vm2617_vm14 = vweird.f32 %v2599_v34 }
 0xc7a   :  { %3363 = vadd.xlane.f32.xlu0 %v3362_v14  ;;  %7312 = vrcp.f32 %v9152_v9  ;;  %v3110_v23 = vsel %vm485_vm3, %v9154_v42, 0.0  ;;  %v2877_v51 = vand.u32 2147483647, %v2844_v33  ;;  %vm2873_vm9 = vweird.f32 %v2844_v33 }
 0xc7b   :  { %v2857_v5 = vmul.f32 %v7303_v48, %v2856_v28  ;;  %vm2622_vm10 = vcmp.eq.f32.partialorder %v2621_v35, 8.507059e+37 }
 0xc7d   :  { %v2858_v44 = vadd.f32 %v7303_v48, %v2857_v5  ;;  %3111 = vadd.xlane.f32.xlu2 %v3110_v23  ;;  %v2880_v5 = vor.u32 1.1754944e-38, %v2879_v7 }
 0xc7e   :  { %v7309_v53 = vpop.eup %7308 }
 0xc7f   :  { %v7311_v22 = vpop.eup %7310  ;;  %v2862_v41 = vsel %vm2861_vm11, %v7303_v48, %v2858_v44  ;;  %v2613_v26 = vmul.f32 %v7309_v53, %v2599_v34  ;;  %v9162_v31 = vpop.xlane.xlu1 %2607  ;;  %vm2618_vm13 = vweird.f32 %v7309_v53  ;;  %v2624_v34 = vor.u32 1.1754944e-38, %v2623_v10 }
 0xc80   :  { %v2602_v15 = vpop.xlane.xlu2 %2601  ;;  %v2867_v27 = vsel %vm2864_vm12, %v2866_v21, %v2862_v41  ;;  %v2869_v16 = vmul.f32 %v7311_v22, %v2844_v33  ;;  %v9164_v45 = vpop.eup %7312  ;;  %vm9170_vm15 = vmor %vm2617_vm14, %vm2618_vm13  ;;  %vm2874_vm2 = vweird.f32 %v7311_v22  ;;  %vm2878_vm12 = vcmp.eq.f32.partialorder %v2877_v51, 8.507059e+37 }
 0xc81   :  { %7314 = vrcp.f32 %v2602_v15  ;;  %v2924_v2 = vmul.f32 %v9057_v25, %v2867_v27  ;;  %v2614_v24 = vsub.f32 1.0, %v2613_v26  ;;  %v2641_v25 = vmul.f32 %v9164_v45, %v9152_v9  ;;  %vm2875_vm11 = vmor %vm2873_vm9, %vm2874_vm2 }
 0xc82   :  { %v2870_v11 = vsub.f32 1.0, %v2869_v16  ;;  %7316 = vrcp.f32 %v9162_v31  ;;  %v2635_v41 = vand.u32 2147483647, %v2602_v15  ;;  %v2637_v26 = vand.u32 2147483648, %v2602_v15 }
 0xc83   :  { %v2615_v59 = vmul.f32 %v7309_v53, %v2614_v24  ;;  %6862 = vmatmul.msk.f32.vlgmr.msrb.gmra.mxu1 %vm472_vm7, %v2924_v2  ;;  %v2642_v44 = vsub.f32 1.0, %v2641_v25  ;;  %vm2631_vm14 = vweird.f32 %v2602_v15  ;;  %vm2646_vm9 = vweird.f32 %v9164_v45 }
 0xc84   :  { %v2871_v37 = vmul.f32 %v7311_v22, %v2870_v11  ;;  %vm2636_vm2 = vcmp.eq.f32.partialorder %v2635_v41, 8.507059e+37 }
 0xc85   :  { %v2616_v19 = vadd.f32 %v7309_v53, %v2615_v59  ;;  %v2643_v35 = vmul.f32 %v9164_v45, %v2642_v44 }
 0xc86   :  { %v2872_v46 = vadd.f32 %v7311_v22, %v2871_v37 }
 0xc87   :  { %v7315_v60 = vpop.eup %7314  ;;  %v2620_v28 = vsel %vm9170_vm15, %v7309_v53, %v2616_v19  ;;  %v9179_v40 = vpop.xlane.xlu0 %2849 }
 0xc88   :  { %v2627_v50 = vmul.f32 %v7315_v60, %v2602_v15  ;;  %v9176_v14 = vpop.xlane.xlu2 %2846  ;;  %v9182_v21 = vpop.eup %7316  ;;  %v2625_v53 = vsel %vm2622_vm10, %v2624_v34, %v2620_v28  ;;  %v2876_v33 = vsel %vm2875_vm11, %v7311_v22, %v2872_v46  ;;  %vm2632_vm13 = vweird.f32 %v7315_v60 }
 0xc89   :  { %7318 = vrcp.f32 %v9176_v14  ;;  %v2682_v27 = vmul.f32 %v9062_v38, %v2625_v53  ;;  %v2881_v16 = vsel %vm2878_vm12, %v2880_v5, %v2876_v33  ;;  %v2655_v11 = vmul.f32 %v9182_v21, %v9162_v31  ;;  %vm2633_vm15 = vmor %vm2631_vm14, %vm2632_vm13 }
 0xc8a   :  { %v2628_v23 = vsub.f32 1.0, %v2627_v50  ;;  %7320 = vrcp.f32 %v9179_v40  ;;  %v2925_v24 = vmul.f32 %v9064_v43, %v2881_v16  ;;  %v2638_v22 = vor.u32 1.1754944e-38, %v2637_v26 }
 0xc8b   :  { %6846 = vmatmul.msk.f32.vlgmr.msra.gmra.mxu3 %vm472_vm7, %v2682_v27  ;;  %v2649_v15 = vand.u32 2147483647, %v9152_v9  ;;  %v2656_v51 = vsub.f32 1.0, %v2655_v11  ;;  %v2644_v46 = vadd.f32 %v9164_v45, %v2643_v35  ;;  %v2893_v28 = vand.u32 2147483648, %v9176_v14 }
 0xc8c   :  { %v2629_v2 = vmul.f32 %v7315_v60, %v2628_v23  ;;  %6863 = vmatmul.msk.f32.gmra.mxu1 %vm472_vm7, %v2925_v24  ;;  %v2651_v34 = vand.u32 2147483648, %v9152_v9  ;;  %vm2645_vm11 = vweird.f32 %v9152_v9  ;;  %v2891_v44 = vand.u32 2147483647, %v9176_v14 }
 0xc8d   :  { %vm9210_vm12 = vmor %vm2645_vm11, %vm2646_vm9  ;;  %vm9214_vm13 = vcmp.eq.f32.partialorder %v2649_v15, 8.507059e+37  ;;  %vm2887_vm14 = vweird.f32 %v9176_v14  ;;  %v2657_v41 = vmul.f32 %v9182_v21, %v2656_v51  ;;  %v2894_v26 = vor.u32 1.1754944e-38, %v2893_v28 }
 0xc8e   :  { %v2630_v59 = vadd.f32 %v7315_v60, %v2629_v2  ;;  %v2907_v27 = vand.u32 2147483648, %v9179_v40  ;;  %v2652_v16 = vor.u32 1.1754944e-38, %v2651_v34  ;;  %vm2892_vm11 = vcmp.eq.f32.partialorder %v2891_v44, 8.507059e+37 }
 0xc8f   :  { %v7319_v10 = vpop.eup %7318 }
 0xc90   :  { %v9191_v38 = vpop.eup %7320  ;;  %v2883_v37 = vmul.f32 %v7319_v10, %v9176_v14  ;;  %v2634_v7 = vsel %vm2633_vm15, %v7315_v60, %v2630_v59  ;;  %v9196_v19 = vpop.xlane.xlu2 %2852  ;;  %vm2888_vm10 = vweird.f32 %v7319_v10 }
 0xc91   :  { %v2897_v43 = vmul.f32 %v9191_v38, %v9179_v40  ;;  %v2639_v25 = vsel %vm2636_vm2, %v2638_v22, %v2634_v7  ;;  %7322 = vrcp.f32 %v9196_v19  ;;  %vm2889_vm15 = vmor %vm2887_vm14, %vm2888_vm10  ;;  %vm2901_vm2 = vweird.f32 %v9179_v40 }
 0xc92   :  { %v2884_v48 = vsub.f32 1.0, %v2883_v37  ;;  %v2683_v50 = vmul.f32 %v9075_v18, %v2639_v25  ;;  %v2648_v18 = vsel %vm9210_vm12, %v9164_v45, %v2644_v46  ;;  %vm2902_vm9 = vweird.f32 %v9191_v38 }
 0xc93   :  { %v2898_v60 = vsub.f32 1.0, %v2897_v43  ;;  %v2653_v59 = vsel %vm9214_vm13, %v2652_v16, %v2648_v18  ;;  %vm2660_vm10 = vweird.f32 %v9182_v21  ;;  %v2658_v37 = vadd.f32 %v9182_v21, %v2657_v41  ;;  %vm9237_vm12 = vmor %vm2901_vm2, %vm2902_vm9 }
 0xc94   :  { %v2885_v5 = vmul.f32 %v7319_v10, %v2884_v48  ;;  %6847 = vmatmul.msk.f32.gmra.mxu3 %vm472_vm7, %v2683_v50  ;;  %v2905_v7 = vand.u32 2147483647, %v9179_v40  ;;  %v2665_v25 = vand.u32 2147483648, %v9162_v31  ;;  %v2684_v15 = vmul.f32 %v9067_v20, %v2653_v59 }
 0xc95   :  { %v2899_v23 = vmul.f32 %v9191_v38, %v2898_v60  ;;  %vm2659_vm13 = vweird.f32 %v9162_v31  ;;  %v2908_v40 = vor.u32 1.1754944e-38, %v2907_v27  ;;  %v2921_v50 = vand.u32 2147483648, %v9196_v19 }
 0xc96   :  { %v2886_v9 = vadd.f32 %v7319_v10, %v2885_v5  ;;  %vm2661_vm14 = vmor %vm2659_vm13, %vm2660_vm10  ;;  %v2666_v20 = vor.u32 1.1754944e-38, %v2665_v25 }
 0xc97   :  { %v7323_v2 = vpop.eup %7322  ;;  %v2900_v24 = vadd.f32 %v9191_v38, %v2899_v23  ;;  %v2662_v46 = vsel %vm2661_vm14, %v9182_v21, %v2658_v37  ;;  %v2919_v21 = vand.u32 2147483647, %v9196_v19  ;;  %v2922_v41 = vor.u32 1.1754944e-38, %v2921_v50 }
 0xc98   :  { %v2890_v14 = vsel %vm2889_vm15, %v7319_v10, %v2886_v9  ;;  %v2911_v11 = vmul.f32 %v7323_v2, %v9196_v19  ;;  %v2611_v45 = vpop.xlane.xlu2 %2610  ;;  %vm2906_vm15 = vcmp.eq.f32.partialorder %v2905_v7, 8.507059e+37  ;;  %vm2916_vm2 = vweird.f32 %v7323_v2 }
 0xc99   :  { %v2895_v35 = vsel %vm2892_vm11, %v2894_v26, %v2890_v14  ;;  %7324 = vrcp.f32 %v2611_v45  ;;  %v2904_v51 = vsel %vm9237_vm12, %v9191_v38, %v2900_v24  ;;  %v9254_v38 = vpop.xlane.xlu1 %3102  ;;  %vm2915_vm11 = vweird.f32 %v9196_v19 }
 0xc9a   :  { %v2926_v22 = vmul.f32 %v9084_v47, %v2895_v35  ;;  %v2912_v43 = vsub.f32 1.0, %v2911_v11  ;;  %v2663_v47 = vand.u32 2147483647, %v9162_v31  ;;  %v2909_v28 = vsel %vm2906_vm15, %v2908_v40, %v2904_v51  ;;  %vm9261_vm10 = vmor %vm2915_vm11, %vm2916_vm2 }
 0xc9b   :  { %v2927_v23 = vmul.f32 %v9087_v52, %v2909_v28  ;;  %7326 = vrcp.f32 %v9254_v38  ;;  %v2679_v52 = vand.u32 2147483648, %v2611_v45  ;;  %v2677_v19 = vand.u32 2147483647, %v2611_v45 }
 0xc9c   :  { %6864 = vmatmul.msk.f32.gmra.mxu1 %vm472_vm7, %v2926_v22  ;;  %v2913_v48 = vmul.f32 %v7323_v2, %v2912_v43  ;;  %6848 = vmatmul.msk.f32.gmra.mxu3 %vm472_vm7, %v2684_v15  ;;  %vm2664_vm9 = vcmp.eq.f32.partialorder %v2663_v47, 8.507059e+37  ;;  %vm2920_vm13 = vcmp.eq.f32.partialorder %v2919_v21, 8.507059e+37  ;;  %vm2673_vm14 = vweird.f32 %v2611_v45 }
 0xc9d   :  { %v2667_v44 = vsel %vm2664_vm9, %v2666_v20, %v2662_v46  ;;  %v2680_v14 = vor.u32 1.1754944e-38, %v2679_v52  ;;  %vm2678_vm2 = vcmp.eq.f32.partialorder %v2677_v19, 8.507059e+37  ;;  %v3136_v19 = vand.u32 2147483647, %v9254_v38 }
 0xc9e   :  { %v2914_v31 = vadd.f32 %v7323_v2, %v2913_v48  ;;  %v2685_v18 = vmul.f32 %v9077_v1, %v2667_v44 }
 0xc9f   :  { %v7325_v60 = vpop.eup %7324  ;;  %v9272_v1 = vpop.xlane.xlu0 %3357 }
 0xca0   :  { %v2669_v34 = vmul.f32 %v7325_v60, %v2611_v45  ;;  %v9256_v5 = vpop.xlane.xlu2 %3354  ;;  %v2918_v9 = vsel %vm9261_vm10, %v7323_v2, %v2914_v31  ;;  %vm2674_vm12 = vweird.f32 %v7325_v60 }
 0xca1   :  { %v2923_v16 = vsel %vm2920_vm13, %v2922_v41, %v2918_v9  ;;  %vm2675_vm15 = vmor %vm2673_vm14, %vm2674_vm12  ;;  %7328 = vrcp.f32 %v9256_v5  ;;  %v9274_v2 = vpop.eup %7326  ;;  %vm3132_vm14 = vweird.f32 %v9254_v38 }
 0xca2   :  { %v2670_v33 = vsub.f32 1.0, %v2669_v34  ;;  %v2928_v59 = vmul.f32 %v9094_v36, %v2923_v16  ;;  %v3128_v45 = vmul.f32 %v9274_v2, %v9254_v38  ;;  %vm3133_vm10 = vweird.f32 %v9274_v2 }
 0xca4   :  { %6865 = vmatmul.msk.f32.gmra.mxu1 %vm472_vm7, %v2927_v23  ;;  %v2671_v26 = vmul.f32 %v7325_v60, %v2670_v33  ;;  %6849 = vmatmul.msk.f32.gmra.mxu3 %vm472_vm7, %v2685_v18  ;;  %v3129_v10 = vsub.f32 1.0, %v3128_v45  ;;  %v3138_v33 = vand.u32 2147483648, %v9254_v38 }
 0xca6   :  { %v2672_v27 = vadd.f32 %v7325_v60, %v2671_v26  ;;  %v3130_v48 = vmul.f32 %v9274_v2, %v3129_v10 }
 0xca7   :  { %v9282_v37 = vpop.eup %7328 }
 0xca8   :  { %v3100_v24 = vpop.xlane.xlu2 %3099  ;;  %v2676_v11 = vsel %vm2675_vm15, %v7325_v60, %v2672_v27  ;;  %v3369_v36 = vmul.f32 %v9282_v37, %v9256_v5  ;;  %v3131_v53 = vadd.f32 %v9274_v2, %v3130_v48  ;;  %vm3134_vm15 = vmor %vm3132_vm14, %vm3133_vm10 }
 0xca9   :  { %7330 = vrcp.f32 %v3100_v24  ;;  %v2681_v35 = vsel %vm2678_vm2, %v2680_v14, %v2676_v11  ;;  %v3124_v51 = vand.u32 2147483648, %v3100_v24  ;;  %v3122_v20 = vand.u32 2147483647, %v3100_v24 }
 0xcaa   :  { %v2686_v22 = vmul.f32 %v9101_v3, %v2681_v35  ;;  %7332 = vrcp.f32 %v9272_v1  ;;  %v3370_v28 = vsub.f32 1.0, %v3369_v36  ;;  %vm3118_vm11 = vweird.f32 %v3100_v24 }
 0xcab   :  { %v3125_v44 = vor.u32 1.1754944e-38, %v3124_v51  ;;  %vm3123_vm13 = vcmp.eq.f32.partialorder %v3122_v20, 8.507059e+37  ;;  %v3135_v16 = vsel %vm3134_vm15, %v9274_v2, %v3131_v53  ;;  %v3139_v14 = vor.u32 1.1754944e-38, %v3138_v33 }
 0xcac   :  { %6866 = vmatmul.msk.f32.gmra.mxu1 %vm472_vm7, %v2928_v59  ;;  %6850 = vmatmul.msk.f32.gmra.mxu3 %vm472_vm7, %v2686_v22  ;;  %v3371_v18 = vmul.f32 %v9282_v37, %v3370_v28  ;;  %vm3374_vm2 = vweird.f32 %v9282_v37  ;;  %v3379_v59 = vand.u32 2147483648, %v9256_v5 }
 0xcaf   :  { %v7331_v7 = vpop.eup %7330  ;;  %v9285_v15 = vpop.xlane.xlu0 %3105 }
 0xcb0   :  { %v3114_v43 = vmul.f32 %v7331_v7, %v3100_v24  ;;  %v3452_v25 = vpop.permute.xlu2 %3451  ;;  %7334 = vrcp.f32 %v9285_v15  ;;  %vm3119_vm9 = vweird.f32 %v7331_v7  ;;  %v9292_v31 = vpop.eup %7332  ;;  %v3372_v24 = vadd.f32 %v9282_v37, %v3371_v18 }
 0xcb1   :  { %6893 = vmatpush.msk.msra.mxu1 %vm609_vm4, %v3452_v25  ;;  %v7076_v47 = vpop.permute.xlu1 %7075  ;;  %vm3120_vm12 = vmor %vm3118_vm11, %vm3119_vm9  ;;  %v3383_v9 = vmul.f32 %v9292_v31, %v9272_v1  ;;  %vm3137_vm9 = vcmp.eq.f32.partialorder %v3136_v19, 8.507059e+37  ;;  %vm3373_vm11 = vweird.f32 %v9256_v5  ;;  %v3152_v45 = vand.u32 2147483648, %v9285_v15 }
 0xcb2   :  { %v3115_v3 = vsub.f32 1.0, %v3114_v43  ;;  %v7077_v40 = vunpack.i.l.bf16 %v7076_v47  ;;  %v7078_v60 = vunpack.i.h.bf16 %v7076_v47  ;;  %v3140_v38 = vsel %vm3137_vm9, %v3139_v14, %v3135_v16  ;;  %vm3375_vm10 = vmor %vm3373_vm11, %vm3374_vm2 }
 0xcb3   :  { %v3384_v11 = vsub.f32 1.0, %v3383_v9  ;;  %v3376_v22 = vsel %vm3375_vm10, %v9282_v37, %v3372_v24  ;;  %v3184_v10 = vmul.f32 %v9106_v8, %v3140_v38  ;;  %v3150_v43 = vand.u32 2147483647, %v9285_v15 }
 0xcb4   :  { %v3116_v46 = vmul.f32 %v7331_v7, %v3115_v3  ;;  %3486 = vmatpush.msra.mxu1 %v7077_v40  ;;  %vm3388_vm2 = vweird.f32 %v9292_v31  ;;  %v3153_v47 = vor.u32 1.1754944e-38, %v3152_v45  ;;  %vm3387_vm11 = vweird.f32 %v9272_v1 }
 0xcb5   :  { %v3385_v2 = vmul.f32 %v9292_v31, %v3384_v11  ;;  %vm3151_vm9 = vcmp.eq.f32.partialorder %v3150_v43, 8.507059e+37  ;;  %vm3389_vm10 = vmor %vm3387_vm11, %vm3388_vm2 }
 0xcb6   :  { %v3117_v50 = vadd.f32 %v7331_v7, %v3116_v46  ;;  %v7335_v34 = vpop.eup %7334  ;;  %3487 = vmatpush.msra.mxu1 %v7078_v60  ;;  %v3391_v46 = vand.u32 2147483647, %v9272_v1 }
 0xcb7   :  { %v3142_v21 = vmul.f32 %v7335_v34, %v9285_v15  ;;  %v3386_v8 = vadd.f32 %v9292_v31, %v3385_v2 }
 0xcb8   :  { %v3121_v23 = vsel %vm3120_vm12, %v7331_v7, %v3117_v50  ;;  %vm3147_vm12 = vweird.f32 %v7335_v34  ;;  %v3380_v7 = vor.u32 1.1754944e-38, %v3379_v59 }
 0xcb9   :  { %v3126_v41 = vsel %vm3123_vm13, %v3125_v44, %v3121_v23  ;;  %v3143_v52 = vsub.f32 1.0, %v3142_v21  ;;  %vm3146_vm13 = vweird.f32 %v9285_v15  ;;  %v3393_v15 = vand.u32 2147483648, %v9272_v1 }
 0xcba   :  { %v3183_v26 = vmul.f32 %v9119_v55, %v3126_v41  ;;  %v3377_v55 = vand.u32 2147483647, %v9256_v5  ;;  %vm9319_vm15 = vmor %vm3146_vm13, %vm3147_vm12  ;;  %v3390_v20 = vsel %vm3389_vm10, %v9292_v31, %v3386_v8  ;;  %vm3392_vm12 = vcmp.eq.f32.partialorder %v3391_v46, 8.507059e+37 }
 0xcbb   :  { %v3144_v27 = vmul.f32 %v7335_v34, %v3143_v52  ;;  %v3394_v28 = vor.u32 1.1754944e-38, %v3393_v15 }
 0xcbc   :  { %6878 = vmatmul.msk.f32.vlgmr.msrb.gmra.mxu3 %vm472_vm7, %v3183_v26  ;;  %vm3378_vm14 = vcmp.eq.f32.partialorder %v3377_v55, 8.507059e+37 }
 0xcbd   :  { %v3145_v35 = vadd.f32 %v7335_v34, %v3144_v27  ;;  %v3381_v36 = vsel %vm3378_vm14, %v3380_v7, %v3376_v22  ;;  %v3395_v50 = vsel %vm3392_vm12, %v3394_v28, %v3390_v20 }
 0xcbe   :  { %v3438_v40 = vmul.f32 %v9110_v30, %v3381_v36  ;;  %v3439_v30 = vmul.f32 %v9112_v62, %v3395_v50 }
 0xcbf   :  { %v3149_v37 = vsel %vm9319_vm15, %v7335_v34, %v3145_v35 }
 0xcc0   :  { %v3154_v48 = vsel %vm3151_vm9, %v3153_v47, %v3149_v37 }
 0xcc1   :  { %v3185_v60 = vmul.f32 %v9123_v4, %v3154_v48 }
 0xcc2   :  { %v7081_v25 = vpop.permute.xlu0 %7080 }
 0xcc3   :  { %v7082_v3 = vunpack.i.l.bf16 %v7081_v25  ;;  %v7083_v51 = vunpack.i.h.bf16 %v7081_v25 }
 0xcc4   :  { %6879 = vmatmul.msk.f32.gmra.mxu3 %vm472_vm7, %v3184_v10 }
 0xcc5   :  { %3488 = vmatpush.msra.mxu1 %v7082_v3 }
 0xcc7   :  { %3489 = vmatpush.msra.mxu1 %v7083_v51 }
 0xcc8   :  { %6894 = vmatmul.msk.f32.vlgmr.msra.gmra.mxu1 %vm472_vm7, %v3438_v40 }
 0xccc   :  { %6880 = vmatmul.msk.f32.gmra.mxu3 %vm472_vm7, %v3185_v60 }
 0xcd0   :  { %6895 = vmatmul.msk.f32.gmra.mxu1 %vm472_vm7, %v3439_v30 }
 0xcdc   :  { %v3109_v34 = vpop.xlane.xlu1 %3108 }
 0xcdd   :  { %7336 = vrcp.f32 %v3109_v34  ;;  %v3166_v21 = vand.u32 2147483648, %v3109_v34  ;;  %v3164_v4 = vand.u32 2147483647, %v3109_v34  ;;  %vm3160_vm14 = vweird.f32 %v3109_v34 }
 0xcdf   :  { %v3167_v9 = vor.u32 1.1754944e-38, %v3166_v21  ;;  %vm3165_vm2 = vcmp.eq.f32.partialorder %v3164_v4, 8.507059e+37 }
 0xce3   :  { %v7337_v1 = vpop.eup %7336 }
 0xce4   :  { %v3156_v44 = vmul.f32 %v7337_v1, %v3109_v34  ;;  %vm3161_vm13 = vweird.f32 %v7337_v1  ;;  %v9338_v31 = vpop.xlane.xlu1 %3366 }
 0xce5   :  { %vm3162_vm15 = vmor %vm3160_vm14, %vm3161_vm13 }
 0xce6   :  { %v3157_v23 = vsub.f32 1.0, %v3156_v44  ;;  %v3435_v44 = vand.u32 2147483648, %v9338_v31 }
 0xce8   :  { %v3158_v53 = vmul.f32 %v7337_v1, %v3157_v23  ;;  %v3361_v33 = vpop.xlane.xlu2 %3360 }
 0xce9   :  { %7338 = vrcp.f32 %v3361_v33  ;;  %v3407_v11 = vand.u32 2147483648, %v3361_v33  ;;  %v3405_v35 = vand.u32 2147483647, %v3361_v33  ;;  %vm3401_vm11 = vweird.f32 %v3361_v33 }
 0xcea   :  { %v3159_v18 = vadd.f32 %v7337_v1, %v3158_v53  ;;  %7340 = vrcp.f32 %v9338_v31 }
 0xceb   :  { %v3408_v45 = vor.u32 1.1754944e-38, %v3407_v11  ;;  %vm3406_vm12 = vcmp.eq.f32.partialorder %v3405_v35, 8.507059e+37  ;;  %v3586_v35 = vld [vmem:[#allocation2 + $0x4d0] sm:$0xff] }
 0xcec   :  { %v3163_v62 = vsel %vm3162_vm15, %v7337_v1, %v3159_v18  ;;  %v3436_v18 = vor.u32 1.1754944e-38, %v3435_v44 }
 0xced   :  { %v3364_v41 = vpop.xlane.xlu0 %3363  ;;  %v3168_v26 = vsel %vm3165_vm2, %v3167_v9, %v3163_v62 }
 0xcee   :  { %7342 = vrcp.f32 %v3364_v41  ;;  %v3186_v19 = vmul.f32 %v9136_v56, %v3168_v26  ;;  %v3421_v36 = vand.u32 2147483648, %v3364_v41  ;;  %v3419_v8 = vand.u32 2147483647, %v3364_v41 }
 0xcef   :  { %v7339_v52 = vpop.eup %7338  ;;  %vm3415_vm14 = vweird.f32 %v3364_v41 }
 0xcf0   :  { %v3397_v27 = vmul.f32 %v7339_v52, %v3361_v33  ;;  %v3112_v16 = vpop.xlane.xlu2 %3111  ;;  %v9342_v14 = vpop.eup %7340  ;;  %6881 = vmatmul.msk.f32.gmra.mxu3 %vm472_vm7, %v3186_v19  ;;  %vm3402_vm9 = vweird.f32 %v7339_v52  ;;  %v3422_v20 = vor.u32 1.1754944e-38, %v3421_v36  ;;  %v3433_v33 = vand.u32 2147483647, %v9338_v31  ;;  %v3581_v36 = vld [vmem:[#allocation2 + $0x480] sm:$0xff] }
 0xcf1   :  { %7344 = vrcp.f32 %v3112_v16  ;;  %v3425_v55 = vmul.f32 %v9342_v14, %v9338_v31  ;;  %vm3403_vm10 = vmor %vm3401_vm11, %vm3402_vm9  ;;  %v3180_v15 = vand.u32 2147483648, %v3112_v16  ;;  %v3178_v46 = vand.u32 2147483647, %v3112_v16 }
 0xcf2   :  { %v3398_v24 = vsub.f32 1.0, %v3397_v27  ;;  %vm3174_vm9 = vweird.f32 %v3112_v16  ;;  %vm3420_vm11 = vcmp.eq.f32.partialorder %v3419_v8, 8.507059e+37 }
 0xcf3   :  { %v3426_v10 = vsub.f32 1.0, %v3425_v55  ;;  %v3181_v50 = vor.u32 1.1754944e-38, %v3180_v15  ;;  %v3588_v55 = vld [vmem:[#allocation2 + $0x4f0] sm:$0xff] }
 0xcf4   :  { %v7343_v59 = vpop.eup %7342  ;;  %v3399_v38 = vmul.f32 %v7339_v52, %v3398_v24  ;;  %3612 = vmatpush.msra.mxu2 %v3588_v55 }
 0xcf5   :  { %v3411_v22 = vmul.f32 %v7343_v59, %v3364_v41  ;;  %vm3416_vm13 = vweird.f32 %v7343_v59  ;;  %v3427_v40 = vmul.f32 %v9342_v14, %v3426_v10 }
 0xcf6   :  { %v3400_v2 = vadd.f32 %v7339_v52, %v3399_v38  ;;  %vm3417_vm15 = vmor %vm3415_vm14, %vm3416_vm13  ;;  %vm3179_vm13 = vcmp.eq.f32.partialorder %v3178_v46, 8.507059e+37  ;;  %vm3429_vm14 = vweird.f32 %v9338_v31  ;;  %v3587_v38 = vld [vmem:[#allocation2 + $0x4e0] sm:$0xff] }
 0xcf7   :  { %v7345_v56 = vpop.eup %7344  ;;  %v3412_v7 = vsub.f32 1.0, %v3411_v22  ;;  %v3428_v1 = vadd.f32 %v9342_v14, %v3427_v40  ;;  %3613 = vmatpush.msra.mxu2 %v3587_v38  ;;  %v3585_v22 = vld [vmem:[#allocation2 + $0x4c0] sm:$0xff] }
 0xcf8   :  { %v3170_v43 = vmul.f32 %v7345_v56, %v3112_v16  ;;  %v3404_v5 = vsel %vm3403_vm10, %v7339_v52, %v3400_v2  ;;  %vm3175_vm2 = vweird.f32 %v7345_v56 }
 0xcf9   :  { %v3413_v25 = vmul.f32 %v7343_v59, %v3412_v7  ;;  %v3409_v3 = vsel %vm3406_vm12, %v3408_v45, %v3404_v5  ;;  %vm3176_vm10 = vmor %vm3174_vm9, %vm3175_vm2  ;;  %vm3430_vm12 = vweird.f32 %v9342_v14  ;;  %vm3434_vm2 = vcmp.eq.f32.partialorder %v3433_v33, 8.507059e+37  ;;  %3614 = vmatpush.msra.mxu2 %v3586_v35  ;;  %v3583_v5 = vld [vmem:[#allocation2 + $0x4a0] sm:$0xff] }
 0xcfa   :  { %v3171_v37 = vsub.f32 1.0, %v3170_v43  ;;  %v3440_v47 = vmul.f32 %v9146_v13, %v3409_v3  ;;  %v3584_v43 = vld [vmem:[#allocation2 + $0x4b0] sm:$0xff] }
 0xcfb   :  { %v3414_v51 = vadd.f32 %v7343_v59, %v3413_v25  ;;  %3615 = vmatpush.msra.mxu2 %v3585_v22  ;;  %v3582_v25 = vld [vmem:[#allocation2 + $0x490] sm:$0xff] }
 0xcfc   :  { %v3172_v48 = vmul.f32 %v7345_v56, %v3171_v37  ;;  %6896 = vmatmul.msk.f32.gmra.mxu1 %vm472_vm7, %v3440_v47 }
 0xcfd   :  { %v3418_v28 = vsel %vm3417_vm15, %v7343_v59, %v3414_v51  ;;  %vm3431_vm15 = vmor %vm3429_vm14, %vm3430_vm12  ;;  %3616 = vmatpush.msra.mxu2 %v3584_v43 }
 0xcfe   :  { %v3173_v60 = vadd.f32 %v7345_v56, %v3172_v48  ;;  %v3423_v30 = vsel %vm3420_vm11, %v3422_v20, %v3418_v28  ;;  %v3432_v4 = vsel %vm3431_vm15, %v9342_v14, %v3428_v1 }
 0xcff   :  { %v3441_v53 = vmul.f32 %v9150_v57, %v3423_v30  ;;  %v3437_v9 = vsel %vm3434_vm2, %v3436_v18, %v3432_v4  ;;  %3617 = vmatpush.msra.mxu2 %v3583_v5 }
 0xd00   :  { %v2981_v13 = vpop.f32.mrf.mxu1  ;;  %v3177_v34 = vsel %vm3176_vm10, %v7345_v56, %v3173_v60  ;;  %v3442_v41 = vmul.f32 %v9142_v29, %v3437_v9 }
 0xd01   :  { %3511 = vrot.lane.b32.xlu2 %v2981_v13, %s7600_s24  ;;  %v3182_v23 = vsel %vm3179_vm13, %v3181_v50, %v3177_v34  ;;  %3618 = vmatpush.msra.mxu2 %v3582_v25 }
 0xd02   :  { %v3187_v21 = vmul.f32 %v9154_v42, %v3182_v23 }
 0xd03   :  { %3619 = vmatpush.msra.mxu2 %v3581_v36 }
 0xd04   :  { %6882 = vmatmul.msk.f32.gmra.mxu3 %vm472_vm7, %v3187_v21  ;;  %6897 = vmatmul.msk.f32.gmra.mxu1 %vm472_vm7, %v3441_v53 }
 0xd09   :  { %v2984_v62 = vpop.f32.mrf.mxu1 }
 0xd0a   :  { %3513 = vrot.lane.b32.xlu2 %v2984_v62, %s7600_s24 }
 0xd0c   :  { %6898 = vmatmul.msk.f32.gmra.mxu1 %vm472_vm7, %v3442_v41 }
 0xd0e   :  { %v2722_v57 = vpop.f32.mrf.mxu3 }
 0xd17   :  { %v2725_v31 = vpop.f32.mrf.mxu3 }
 0xd19   :  { %v2987_v42 = vpop.f32.mrf.mxu1 }
 0xd1a   :  { %3515 = vrot.lane.b32.xlu2 %v2987_v42, %s7600_s24 }
 0xd1f   :  { %v2728_v52 = vpop.f32.mrf.mxu3 }
 0xd21   :  { %v2990_v26 = vpop.f32.mrf.mxu1 }
 0xd22   :  { %3517 = vrot.lane.b32.xlu2 %v2990_v26, %s7600_s24 }
 0xd27   :  { %v2731_v27 = vpop.f32.mrf.mxu3 }
 0xd29   :  { %v2993_v19 = vpop.f32.mrf.mxu1 }
 0xd2a   :  { %3519 = vrot.lane.b32.xlu2 %v2993_v19, %s7600_s24 }
 0xd2f   :  { %v9367_v16 = vpop.f32.mrf.mxu3 }
 0xd3f   :  { %v3236_v29 = vpop.f32.mrf.mxu3 }
 0xd40   :  { %3531 = vrot.lane.b32.xlu1 %v3236_v29, %s7606_s20 }
 0xd45   :  { %v3491_v14 = vpop.f32.mrf.mxu1 }
 0xd46   :  { %3551 = vrot.lane.b32.xlu0 %v3491_v14, %s7603_s1 }
 0xd47   :  { %v3239_v24 = vpop.f32.mrf.mxu3 }
 0xd4d   :  { %v3494_v11 = vpop.f32.mrf.mxu1 }
 0xd4e   :  { %3533 = vrot.lane.b32.xlu0 %v3239_v24, %s7606_s20  ;;  %3553 = vrot.lane.b32.xlu1 %v3494_v11, %s7603_s1 }
 0xd4f   :  { %v3242_v59 = vpop.f32.mrf.mxu3 }
 0xd56   :  { %3535 = vrot.lane.b32.xlu0 %v3242_v59, %s7606_s20 }
 0xd5b   :  { %v3512_v3 = vpop.permute.xlu2 %3511 }
 0xd5c   :  { %v3566_v47 = vsel %vm419_vm5, %v2722_v57, %v3512_v3 }
 0xd64   :  { %v3514_v40 = vpop.permute.xlu2 %3513 }
 0xd65   :  { %v3567_v48 = vsel %vm419_vm5, %v2725_v31, %v3514_v40 }
 0xd73   :  { %v3245_v2 = vpop.f32.mrf.mxu3 }
 0xd74   :  { %3537 = vrot.lane.b32.xlu0 %v3245_v2, %s7606_s20  ;;  %v3516_v50 = vpop.permute.xlu2 %3515 }
 0xd75   :  { %v3568_v30 = vsel %vm419_vm5, %v2728_v52, %v3516_v50  ;;  %v3641_v52 = vld [vmem:[#allocation4 + $0x11] ss:$0 sm:$0xff] }
 0xd79   :  { %v3497_v56 = vpop.f32.mrf.mxu1 }
 0xd7a   :  { %3555 = vrot.lane.b32.xlu1 %v3497_v56, %s7603_s1 }
 0xd7c   :  { %v3518_v44 = vpop.permute.xlu2 %3517 }
 0xd7d   :  { %v3569_v53 = vsel %vm419_vm5, %v2731_v27, %v3518_v44 }
 0xd81   :  { %v3500_v45 = vpop.f32.mrf.mxu1 }
 0xd82   :  { %3557 = vrot.lane.b32.xlu1 %v3500_v45, %s7603_s1 }
 0xd84   :  { %v3520_v9 = vpop.permute.xlu2 %3519 }
 0xd85   :  { %v3570_v62 = vsel %vm419_vm5, %v9367_v16, %v3520_v9  ;;  %v3784_v9 = vld [vmem:[#allocation2 + $0x578] sm:$0xff] }
 0xd86   :  { %3847 = vmatpush.msrb.mxu0 %v3784_v9 }
 0xd87   :  { %v3248_v7 = vpop.f32.mrf.mxu3 }
 0xd88   :  { %3539 = vrot.lane.b32.xlu0 %v3248_v7, %s7606_s20 }
 0xd89   :  { %v3503_v10 = vpop.f32.mrf.mxu1 }
 0xd8a   :  { %3559 = vrot.lane.b32.xlu1 %v3503_v10, %s7603_s1 }
 0xdb2   :  { %v3532_v37 = vpop.permute.xlu1 %3531 }
 0xdb3   :  { %v3571_v8 = vsel %vm1479_vm6, %v3566_v47, %v3532_v37 }
 0xdb8   :  { %v3552_v15 = vpop.permute.xlu0 %3551 }
 0xdb9   :  { %v3576_v51 = vsel %vm1485_vm8, %v3571_v8, %v3552_v15 }
 0xdba   :  { %6899 = vmatmul.msk.f32.vlgmr.msra.gmra.mxu2 %vm67_vm0, %v3576_v51 }
 0xdc0   :  { %v3534_v46 = vpop.permute.xlu0 %3533  ;;  %v3554_v20 = vpop.permute.xlu1 %3553 }
 0xdc1   :  { %v3572_v28 = vsel %vm1479_vm6, %v3567_v48, %v3534_v46 }
 0xdc2   :  { %v3577_v60 = vsel %vm1485_vm8, %v3572_v28, %v3554_v20 }
 0xdc3   :  { %6900 = vmatmul.msk.f32.gmra.mxu2 %vm67_vm0, %v3577_v60 }
 0xdc8   :  { %v3536_v13 = vpop.permute.xlu0 %3535 }
 0xdc9   :  { %v3573_v34 = vsel %vm1479_vm6, %v3568_v30, %v3536_v13 }
 0xde6   :  { %v3538_v21 = vpop.permute.xlu0 %3537 }
 0xde7   :  { %v3574_v33 = vsel %vm1479_vm6, %v3569_v53, %v3538_v21 }
 0xdec   :  { %v3556_v1 = vpop.permute.xlu1 %3555 }
 0xded   :  { %v3578_v23 = vsel %vm1485_vm8, %v3573_v34, %v3556_v1 }
 0xdee   :  { %6901 = vmatmul.msk.f32.gmra.mxu2 %vm67_vm0, %v3578_v23 }
 0xdf4   :  { %v3558_v4 = vpop.permute.xlu1 %3557 }
 0xdf5   :  { %v3579_v18 = vsel %vm1485_vm8, %v3574_v33, %v3558_v4 }
 0xdf6   :  { %6902 = vmatmul.msk.f32.gmra.mxu2 %vm67_vm0, %v3579_v18  ;;  %v3783_v18 = vld [vmem:[#allocation2 + $0x570] sm:$0xff] }
 0xdf7   :  { %3815 = vmatpush.msra.mxu3 %v3783_v18 }
 0xdfa   :  { %v3540_v41 = vpop.permute.xlu0 %3539 }
 0xdfb   :  { %v3575_v57 = vsel %vm1479_vm6, %v3570_v62, %v3540_v41  ;;  %v3781_v41 = vld [vmem:[#allocation2 + $0x560] sm:$0xff] }
 0xdfc   :  { %v3560_v42 = vpop.permute.xlu1 %3559  ;;  %3816 = vmatpush.msra.mxu3 %v3781_v41 }
 0xdfd   :  { %v3580_v31 = vsel %vm1485_vm8, %v3575_v57, %v3560_v42  ;;  %v3782_v57 = vld [vmem:[#allocation2 + $0x568] sm:$0xff]  ;;  %v3779_v42 = vld [vmem:[#allocation2 + $0x550] sm:$0xff] }
 0xdfe   :  { %6903 = vmatmul.msk.f32.gmra.mxu2 %vm67_vm0, %v3580_v31  ;;  %3848 = vmatpush.msrb.mxu0 %v3782_v57  ;;  %v3777_v31 = vld [vmem:[#allocation2 + $0x540] sm:$0xff] }
 0xdff   :  { %3817 = vmatpush.msra.mxu3 %v3779_v42 }
 0xe01   :  { %3818 = vmatpush.msra.mxu3 %v3777_v31 }
 0xe3d   :  { %v3621_v26 = vpop.f32.mrf.mxu2 }
 0xe3e   :  { %v3636_v19 = vadd.f32 %v3621_v26, %v8706_v0  ;;  %v3778_v26 = vld [vmem:[#allocation2 + $0x548] sm:$0xff] }
 0xe40   :  { %v9401_v27 = vadd.f32 %v3641_v52, %v3636_v19  ;;  %v3774_v19 = vld [vmem:[#allocation2 + $0x528] sm:$0xff] }
 0xe42   :  { %v3649_v29 = vsel %vm67_vm0, %v9401_v27, 0.0 }
 0xe43   :  { %3650 = vadd.xlane.f32.xlu2 %v3649_v29 }
 0xe46   :  { %v3624_v14 = vpop.f32.mrf.mxu2 }
 0xe47   :  { %v3637_v16 = vadd.f32 %v3624_v14, %v8711_v61  ;;  %v3771_v14 = vld [vmem:[#allocation2 + $0x510] sm:$0xff] }
 0xe49   :  { %v9406_v24 = vadd.f32 %v3641_v52, %v3637_v16  ;;  %v3772_v16 = vld [vmem:[#allocation2 + $0x518] sm:$0xff] }
 0xe4b   :  { %v3652_v11 = vsel %vm67_vm0, %v9406_v24, 0.0 }
 0xe4c   :  { %3653 = vadd.xlane.f32.xlu0 %v3652_v11 }
 0xe71   :  { %v3627_v59 = vpop.f32.mrf.mxu2 }
 0xe72   :  { %v3638_v55 = vadd.f32 %v3627_v59, %v8716_v17 }
 0xe74   :  { %v9411_v38 = vadd.f32 %v3641_v52, %v3638_v55  ;;  %v3769_v55 = vld [vmem:[#allocation2 + $0x500] sm:$0xff] }
 0xe76   :  { %v3655_v35 = vsel %vm67_vm0, %v9411_v38, 0.0 }
 0xe77   :  { %3656 = vadd.xlane.f32.xlu1 %v3655_v35  ;;  %v3770_v35 = vld [vmem:[#allocation2 + $0x508] sm:$0xff] }
 0xe79   :  { %v3630_v22 = vpop.f32.mrf.mxu2 }
 0xe7a   :  { %v3639_v2 = vadd.f32 %v3630_v22, %v8721_v12 }
 0xe7c   :  { %v9416_v56 = vadd.f32 %v3641_v52, %v3639_v2 }
 0xe7e   :  { %v3658_v45 = vsel %vm67_vm0, %v9416_v56, 0.0 }
 0xe7f   :  { %3659 = vadd.xlane.f32.xlu2 %v3658_v45 }
 0xe81   :  { %v3633_v7 = vpop.f32.mrf.mxu2 }
 0xe82   :  { %v3640_v10 = vadd.f32 %v3633_v7, %v8726_v49 }
 0xe84   :  { %v9421_v43 = vadd.f32 %v3641_v52, %v3640_v10  ;;  %v3773_v52 = vld [vmem:[#allocation2 + $0x520] sm:$0xff] }
 0xe86   :  { %v3661_v5 = vsel %vm193_vm1, %v9421_v43, 0.0 }
 0xe87   :  { %3662 = vadd.xlane.f32.xlu2 %v3661_v5 }
 0xeb6   :  { %v3651_v25 = vpop.xlane.xlu2 %3650 }
 0xeb7   :  { %v3664_v36 = vmul.f32 %v3651_v25, %v7699_v39 }
 0xeb9   :  { %v9427_v3 = vsub.f32 %v9401_v27, %v3664_v36 }
 0xebb   :  { %v3674_v37 = vmul.f32 %v9427_v3, %v9427_v3 }
 0xebd   :  { %v3679_v47 = vsel %vm67_vm0, %v3674_v37, 0.0  ;;  %v9472_v37 = vld [vmem:[#allocation4 + $0x12] ss:$0 sm:$0xff] }
 0xebe   :  { %3680 = vadd.xlane.f32.xlu0 %v3679_v47 }
 0xebf   :  { %v3654_v8 = vpop.xlane.xlu0 %3653 }
 0xec0   :  { %v3665_v15 = vmul.f32 %v3654_v8, %v7699_v39 }
 0xec2   :  { %v9434_v51 = vsub.f32 %v9406_v24, %v3665_v15 }
 0xec4   :  { %v3675_v40 = vmul.f32 %v9434_v51, %v9434_v51 }
 0xec6   :  { %v3682_v48 = vsel %vm67_vm0, %v3675_v40, 0.0  ;;  %v9475_v40 = vld [vmem:[#allocation4 + $0x13] ss:$0 sm:$0xff] }
 0xec7   :  { %3683 = vadd.xlane.f32.xlu1 %v3682_v48 }
 0xeea   :  { %v3657_v46 = vpop.xlane.xlu1 %3656 }
 0xeeb   :  { %v3666_v20 = vmul.f32 %v3657_v46, %v7699_v39 }
 0xeed   :  { %v9441_v28 = vsub.f32 %v9411_v38, %v3666_v20 }
 0xeef   :  { %v3676_v60 = vmul.f32 %v9441_v28, %v9441_v28 }
 0xef1   :  { %v3685_v50 = vsel %vm67_vm0, %v3676_v60, 0.0 }
 0xef2   :  { %v3660_v13 = vpop.xlane.xlu2 %3659  ;;  %3686 = vadd.xlane.f32.xlu2 %v3685_v50 }
 0xef3   :  { %v3667_v30 = vmul.f32 %v3660_v13, %v7699_v39 }
 0xef5   :  { %v9448_v34 = vsub.f32 %v9416_v56, %v3667_v30 }
 0xef7   :  { %v3677_v1 = vmul.f32 %v9448_v34, %v9448_v34 }
 0xef9   :  { %v3688_v44 = vsel %vm67_vm0, %v3677_v1, 0.0 }
 0xefa   :  { %3689 = vadd.xlane.f32.xlu0 %v3688_v44  ;;  %v3663_v23 = vpop.xlane.xlu2 %3662 }
 0xefb   :  { %v3668_v21 = vmul.f32 %v3663_v23, %v7699_v39 }
 0xefd   :  { %v9455_v53 = vsub.f32 %v9421_v43, %v3668_v21 }
 0xeff   :  { %v3678_v33 = vmul.f32 %v9455_v53, %v9455_v53 }
 0xf01   :  { %v3691_v4 = vsel %vm193_vm1, %v3678_v33, 0.0 }
 0xf02   :  { %3692 = vadd.xlane.f32.xlu1 %v3691_v4 }
 0xf0a   :  { %4378 = vrot.lane.b32.xlu2 %v8706_v0, %s7604_s18 }
 0xf0e   :  { %4380 = vrot.lane.b32.xlu0 %v8711_v61, %s7604_s18  ;;  %v3780_v61 = vld [vmem:[#allocation2 + $0x558] sm:$0xff] }
 0xf0f   :  { %3849 = vmatpush.msrb.mxu0 %v3780_v61 }
 0xf11   :  { %3850 = vmatpush.msrb.mxu0 %v3778_v26 }
 0xf12   :  { %4386 = vrot.lane.b32.xlu2 %v8726_v49, %s7604_s18 }
 0xf16   :  { %4384 = vrot.lane.b32.xlu0 %v8721_v12, %s7604_s18  ;;  %v3776_v12 = vld [vmem:[#allocation2 + $0x538] sm:$0xff] }
 0xf17   :  { %3851 = vmatpush.msrb.mxu0 %v3776_v12 }
 0xf19   :  { %3852 = vmatpush.msrb.mxu0 %v3774_v19 }
 0xf1b   :  { %4382 = vrot.lane.b32.xlu1 %v8716_v17, %s7604_s18  ;;  %v3775_v17 = vld [vmem:[#allocation2 + $0x530] sm:$0xff]  ;;  %3853 = vmatpush.msrb.mxu0 %v3772_v16 }
 0xf1c   :  { %3819 = vmatpush.msra.mxu3 %v3775_v17 }
 0xf1d   :  { %3854 = vmatpush.msrb.mxu0 %v3770_v35 }
 0xf1e   :  { %3820 = vmatpush.msra.mxu3 %v3773_v52 }
 0xf20   :  { %3821 = vmatpush.msra.mxu3 %v3771_v14 }
 0xf22   :  { %3822 = vmatpush.msra.mxu3 %v3769_v55 }
 0xf31   :  { %v3681_v62 = vpop.xlane.xlu0 %3680 }
 0xf32   :  { %v3694_v0 = vmul.f32 %v3681_v62, %v7699_v39 }
 0xf34   :  { %v3699_v49 = vadd.f32 1e-05, %v3694_v0 }
 0xf36   :  { %7346 = vrsqrt.f32 %v3699_v49  ;;  %vm3710_vm11 = vweird.f32 %v3699_v49 }
 0xf3a   :  { %v3684_v29 = vpop.xlane.xlu1 %3683 }
 0xf3b   :  { %v3695_v11 = vmul.f32 %v3684_v29, %v7699_v39 }
 0xf3c   :  { %v7347_v59 = vpop.eup %7346 }
 0xf3d   :  { %v3705_v22 = vmul.f32 %v7347_v59, %v3699_v49  ;;  %v3700_v2 = vadd.f32 1e-05, %v3695_v11  ;;  %vm3711_vm9 = vweird.f32 %v7347_v59 }
 0xf3e   :  { %vm3712_vm10 = vmor %vm3710_vm11, %vm3711_vm9 }
 0xf3f   :  { %v3706_v45 = vmul.f32 %v7347_v59, %v3705_v22  ;;  %7348 = vrsqrt.f32 %v3700_v2  ;;  %vm3720_vm13 = vweird.f32 %v3700_v2 }
 0xf41   :  { %v3707_v7 = vmul.f32 0.5, %v3706_v45 }
 0xf43   :  { %v3708_v10 = vsub.f32 1.5, %v3707_v7 }
 0xf45   :  { %v7349_v5 = vpop.eup %7348  ;;  %v3709_v25 = vmul.f32 %v7347_v59, %v3708_v10 }
 0xf46   :  { %v3715_v36 = vmul.f32 %v7349_v5, %v3700_v2  ;;  %vm3721_vm12 = vweird.f32 %v7349_v5 }
 0xf47   :  { %v3713_v47 = vsel %vm3712_vm10, %v7347_v59, %v3709_v25  ;;  %vm3722_vm14 = vmor %vm3720_vm13, %vm3721_vm12 }
 0xf48   :  { %v3754_v8 = vmul.f32 %v3713_v47, %v9427_v3  ;;  %v3716_v15 = vmul.f32 %v7349_v5, %v3715_v36 }
 0xf4a   :  { %v3759_v48 = vmul.f32 %v3754_v8, %v9472_v37  ;;  %v3717_v46 = vmul.f32 0.5, %v3716_v15  ;;  %v3786_v8 = vld [vmem:[#allocation4 + $0x14] ss:$8 sm:$0x3] }
 0xf4b   :  { %v9504_v15 = vperm.slane %v3786_v8, 1 }
 0xf4c   :  { %v3764_v20 = vadd.f32 %v3759_v48, %v9475_v40  ;;  %v3718_v60 = vsub.f32 1.5, %v3717_v46 }
 0xf4e   :  { %v3719_v50 = vmul.f32 %v7349_v5, %v3718_v60  ;;  %6904 = vmatmul.msk.f32.vlgmr.msra.gmra.mxu3 %vm67_vm0, %v3764_v20  ;;  %6909 = vmatmul.msk.f32.vlgmr.msrb.gmra.mxu0 %vm67_vm0, %v3764_v20  ;;  %v9512_v60 = vperm.slane %v3786_v8, 0 }
 0xf50   :  { %v3723_v13 = vsel %vm3722_vm14, %v7349_v5, %v3719_v50 }
 0xf51   :  { %v3755_v3 = vmul.f32 %v3723_v13, %v9434_v51 }
 0xf53   :  { %v3760_v30 = vmul.f32 %v3755_v3, %v9472_v37 }
 0xf55   :  { %v3765_v1 = vadd.f32 %v3760_v30, %v9475_v40 }
 0xf57   :  { %6905 = vmatmul.msk.f32.gmra.mxu3 %vm67_vm0, %v3765_v1  ;;  %6910 = vmatmul.msk.f32.gmra.mxu0 %vm67_vm0, %v3765_v1 }
 0xf65   :  { %v3687_v44 = vpop.xlane.xlu2 %3686 }
 0xf66   :  { %v3696_v23 = vmul.f32 %v3687_v44, %v7699_v39  ;;  %v4302_v44 = vld [vmem:[#allocation2 + $0x770] sm:$0xff] }
 0xf67   :  { %4336 = vmatpush.msrb.mxu2 %v4302_v44 }
 0xf68   :  { %v3701_v21 = vadd.f32 1e-05, %v3696_v23 }
 0xf6a   :  { %7350 = vrsqrt.f32 %v3701_v21  ;;  %vm3730_vm2 = vweird.f32 %v3701_v21 }
 0xf6d   :  { %v3690_v33 = vpop.xlane.xlu0 %3689 }
 0xf6e   :  { %v3697_v4 = vmul.f32 %v3690_v33, %v7699_v39  ;;  %v4301_v33 = vld [vmem:[#allocation2 + $0x760] sm:$0xff] }
 0xf6f   :  { %4337 = vmatpush.msrb.mxu2 %v4301_v33  ;;  %v4280_v33 = vld [vmem:[#allocation2 + $0x610] sm:$0xff] }
 0xf70   :  { %v7351_v18 = vpop.eup %7350  ;;  %v3702_v9 = vadd.f32 1e-05, %v3697_v4 }
 0xf71   :  { %v3725_v62 = vmul.f32 %v7351_v18, %v3701_v21  ;;  %vm3731_vm15 = vweird.f32 %v7351_v18 }
 0xf72   :  { %7352 = vrsqrt.f32 %v3702_v9  ;;  %vm3732_vm9 = vmor %vm3730_vm2, %vm3731_vm15  ;;  %vm3740_vm10 = vweird.f32 %v3702_v9 }
 0xf73   :  { %v3726_v51 = vmul.f32 %v7351_v18, %v3725_v62 }
 0xf75   :  { %v3727_v41 = vmul.f32 0.5, %v3726_v51  ;;  %v3693_v57 = vpop.xlane.xlu1 %3692 }
 0xf76   :  { %v3698_v0 = vmul.f32 %v3693_v57, %v7699_v39  ;;  %v4286_v57 = vld [vmem:[#allocation2 + $0x670] sm:$0xff] }
 0xf77   :  { %v3728_v42 = vsub.f32 1.5, %v3727_v41  ;;  %4304 = vmatpush.msrb.mxu1 %v4286_v57  ;;  %v4279_v57 = vld [vmem:[#allocation2 + $0x600] sm:$0xff] }
 0xf78   :  { %v7353_v61 = vpop.eup %7352  ;;  %v3703_v49 = vadd.f32 1e-05, %v3698_v0  ;;  %v4299_v0 = vld [vmem:[#allocation2 + $0x740] sm:$0xff] }
 0xf79   :  { %v3729_v31 = vmul.f32 %v7351_v18, %v3728_v42  ;;  %v3735_v26 = vmul.f32 %v7353_v61, %v3702_v9  ;;  %vm3741_vm11 = vweird.f32 %v7353_v61 }
 0xf7a   :  { %7354 = vrsqrt.f32 %v3703_v49  ;;  %vm3742_vm12 = vmor %vm3740_vm10, %vm3741_vm11  ;;  %vm3750_vm14 = vweird.f32 %v3703_v49 }
 0xf7b   :  { %v3733_v17 = vsel %vm3732_vm9, %v7351_v18, %v3729_v31  ;;  %v3736_v12 = vmul.f32 %v7353_v61, %v3735_v26  ;;  %v4300_v18 = vld [vmem:[#allocation2 + $0x750] sm:$0xff]  ;;  %v4285_v31 = vld [vmem:[#allocation2 + $0x660] sm:$0xff] }
 0xf7c   :  { %v3756_v52 = vmul.f32 %v3733_v17, %v9441_v28  ;;  %4338 = vmatpush.msrb.mxu2 %v4300_v18  ;;  %v4298_v26 = vld [vmem:[#allocation2 + $0x730] sm:$0xff]  ;;  %4305 = vmatpush.msrb.mxu1 %v4285_v31 }
 0xf7d   :  { %v3737_v19 = vmul.f32 0.5, %v3736_v12 }
 0xf7e   :  { %v3761_v29 = vmul.f32 %v3756_v52, %v9472_v37  ;;  %4339 = vmatpush.msrb.mxu2 %v4299_v0  ;;  %v4292_v0 = vld [vmem:[#allocation2 + $0x6d0] sm:$0xff] }
 0xf7f   :  { %v3738_v14 = vsub.f32 1.5, %v3737_v19  ;;  %v4284_v19 = vld [vmem:[#allocation2 + $0x650] sm:$0xff] }
 0xf80   :  { %v7355_v16 = vpop.eup %7354  ;;  %v3766_v11 = vadd.f32 %v3761_v29, %v9475_v40  ;;  %4340 = vmatpush.msrb.mxu2 %v4298_v26  ;;  %v4297_v29 = vld [vmem:[#allocation2 + $0x720] sm:$0xff]  ;;  %4306 = vmatpush.msrb.mxu1 %v4284_v19 }
 0xf81   :  { %v3739_v59 = vmul.f32 %v7353_v61, %v3738_v14  ;;  %v3745_v55 = vmul.f32 %v7355_v16, %v3703_v49  ;;  %vm3751_vm13 = vweird.f32 %v7355_v16  ;;  %v4291_v19 = vld [vmem:[#allocation2 + $0x6c0] sm:$0xff] }
 0xf82   :  { %6906 = vmatmul.msk.f32.gmra.mxu3 %vm67_vm0, %v3766_v11  ;;  %6911 = vmatmul.msk.f32.gmra.mxu0 %vm67_vm0, %v3766_v11  ;;  %vm3752_vm15 = vmor %vm3750_vm14, %vm3751_vm13 }
 0xf83   :  { %v3743_v35 = vsel %vm3742_vm12, %v7353_v61, %v3739_v59  ;;  %v3746_v22 = vmul.f32 %v7355_v16, %v3745_v55  ;;  %4341 = vmatpush.msrb.mxu2 %v4297_v29  ;;  %v4283_v59 = vld [vmem:[#allocation2 + $0x640] sm:$0xff]  ;;  %v4296_v55 = vld [vmem:[#allocation2 + $0x710] sm:$0xff] }
 0xf84   :  { %v3757_v28 = vmul.f32 %v3743_v35, %v9448_v34  ;;  %4307 = vmatpush.msrb.mxu1 %v4283_v59 }
 0xf85   :  { %v3747_v2 = vmul.f32 0.5, %v3746_v22  ;;  %4342 = vmatpush.msrb.mxu2 %v4296_v55 }
 0xf86   :  { %v3762_v45 = vmul.f32 %v3757_v28, %v9472_v37 }
 0xf87   :  { %v3748_v7 = vsub.f32 1.5, %v3747_v2  ;;  %v4282_v2 = vld [vmem:[#allocation2 + $0x630] sm:$0xff] }
 0xf88   :  { %v3767_v10 = vadd.f32 %v3762_v45, %v9475_v40  ;;  %v4295_v45 = vld [vmem:[#allocation2 + $0x700] sm:$0xff]  ;;  %4308 = vmatpush.msrb.mxu1 %v4282_v2 }
 0xf89   :  { %v3749_v5 = vmul.f32 %v7355_v16, %v3748_v7  ;;  %4343 = vmatpush.msrb.mxu2 %v4295_v45  ;;  %v4276_v45 = vld [vmem:[#allocation2 + $0x5d0] sm:$0xff] }
 0xf8a   :  { %6907 = vmatmul.msk.f32.gmra.mxu3 %vm67_vm0, %v3767_v10  ;;  %6912 = vmatmul.msk.f32.gmra.mxu0 %vm67_vm0, %v3767_v10 }
 0xf8b   :  { %v3753_v25 = vsel %vm3752_vm15, %v7355_v16, %v3749_v5 }
 0xf8c   :  { %v3758_v36 = vmul.f32 %v3753_v25, %v9455_v53 }
 0xf8e   :  { %v3763_v47 = vmul.f32 %v3758_v36, %v9472_v37 }
 0xf90   :  { %v3768_v34 = vadd.f32 %v3763_v47, %v9475_v40  ;;  %v4281_v47 = vld [vmem:[#allocation2 + $0x620] sm:$0xff] }
 0xf91   :  { %4309 = vmatpush.msrb.mxu1 %v4281_v47 }
 0xf92   :  { %6908 = vmatmul.msk.f32.gmra.mxu3 %vm67_vm0, %v3768_v34  ;;  %6913 = vmatmul.msk.f32.gmra.mxu0 %vm67_vm0, %v3768_v34  ;;  %v4294_v34 = vld [vmem:[#allocation2 + $0x6f0] sm:$0xff] }
 0xf93   :  { %4344 = vmatpush.msrb.mxu2 %v4294_v34  ;;  %4310 = vmatpush.msrb.mxu1 %v4280_v33 }
 0xf95   :  { %4311 = vmatpush.msrb.mxu1 %v4279_v57 }
 0xfcb   :  { %v3856_v48 = vpop.f32.mrf.mxu0 }
 0xfcc   :  { %v9507_v46 = vadd.f32 %v3856_v48, %v9504_v15 }
 0xfce   :  { %v9510_v20 = vmul.f32 0.70710677, %v9507_v46 }
 0xfd0   :  { %v9515_v53 = vand.u32 2147483647, %v9510_v20 }
 0xfd1   :  { %v3824_v37 = vpop.f32.mrf.mxu3 }
 0xfd2   :  { %v3922_v40 = vmul.f32 0.3275911, %v9515_v53  ;;  %v9519_v50 = vadd.f32 %v3824_v37, %v9512_v60  ;;  %v4182_v36 = vsub.f32 0.0, %v9515_v53 }
 0xfd4   :  { %v3932_v13 = vadd.f32 1.0, %v3922_v40  ;;  %v9522_v3 = vmul.f32 0.70710677, %v9519_v50  ;;  %v3859_v30 = vpop.f32.mrf.mxu0 }
 0xfd5   :  { %v9525_v1 = vadd.f32 %v3859_v30, %v9504_v15 }
 0xfd6   :  { %7356 = vrcp.f32 %v3932_v13  ;;  %v9528_v23 = vand.u32 2147483647, %v9522_v3  ;;  %v3967_v14 = vand.u32 2147483648, %v3932_v13  ;;  %v3965_v11 = vand.u32 2147483647, %v3932_v13 }
 0xfd7   :  { %v9531_v21 = vmul.f32 0.70710677, %v9525_v1  ;;  %vm3961_vm9 = vweird.f32 %v3932_v13 }
 0xfd8   :  { %v3921_v4 = vmul.f32 0.3275911, %v9528_v23  ;;  %v3968_v7 = vor.u32 1.1754944e-38, %v3967_v14  ;;  %vm3966_vm10 = vcmp.eq.f32.partialorder %v3965_v11, 8.507059e+37  ;;  %v4181_v26 = vsub.f32 0.0, %v9528_v23 }
 0xfd9   :  { %v9535_v9 = vand.u32 2147483647, %v9531_v21 }
 0xfda   :  { %v3827_v62 = vpop.f32.mrf.mxu3  ;;  %v9537_v51 = vadd.f32 1.0, %v3921_v4  ;;  %v4293_v4 = vld [vmem:[#allocation2 + $0x6e0] sm:$0xff] }
 0xfdb   :  { %v9540_v41 = vadd.f32 %v3827_v62, %v9512_v60  ;;  %v3924_v61 = vmul.f32 0.3275911, %v9535_v9  ;;  %4345 = vmatpush.msrb.mxu2 %v4293_v4  ;;  %v4275_v4 = vld [vmem:[#allocation2 + $0x5c0] sm:$0xff] }
 0xfdc   :  { %v7357_v42 = vpop.eup %7356  ;;  %7358 = vrcp.f32 %v9537_v51  ;;  %v3950_v37 = vand.u32 2147483647, %v9537_v51  ;;  %v3952_v44 = vand.u32 2147483648, %v9537_v51  ;;  %vm3946_vm13 = vweird.f32 %v9537_v51 }
 0xfdd   :  { %v3957_v49 = vmul.f32 %v7357_v42, %v3932_v13  ;;  %v9544_v17 = vadd.f32 1.0, %v3924_v61  ;;  %v9547_v52 = vmul.f32 0.70710677, %v9540_v41  ;;  %vm3962_vm2 = vweird.f32 %v7357_v42  ;;  %4346 = vmatpush.msrb.mxu2 %v4292_v0 }
 0xfde   :  { %vm3963_vm11 = vmor %vm3961_vm9, %vm3962_vm2  ;;  %v4192_v61 = vmul.f32 %v4182_v36, %v9515_v53  ;;  %vm3951_vm15 = vcmp.eq.f32.partialorder %v3950_v37, 8.507059e+37  ;;  %v3953_v14 = vor.u32 1.1754944e-38, %v3952_v44  ;;  %v4277_v53 = vld [vmem:[#allocation2 + $0x5e0] sm:$0xff]  ;;  %v4191_v37 = vmul.f32 %v4181_v26, %v9528_v23 }
 0xfdf   :  { %v3958_v12 = vsub.f32 1.0, %v3957_v49  ;;  %7360 = vrcp.f32 %v9544_v17  ;;  %v9551_v35 = vand.u32 2147483647, %v9547_v52  ;;  %v4278_v49 = vld [vmem:[#allocation2 + $0x5f0] sm:$0xff]  ;;  %v3995_v55 = vand.u32 2147483647, %v9544_v17  ;;  %4347 = vmatpush.msrb.mxu2 %v4291_v19 }
 0xfe0   :  { %4312 = vmatpush.msrb.mxu1 %v4278_v49  ;;  %vm3991_vm9 = vweird.f32 %v9544_v17  ;;  %v4184_v44 = vsub.f32 0.0, %v9535_v9  ;;  %v4287_v49 = vld [vmem:[#allocation2 + $0x680] sm:$0xff] }
 0xfe1   :  { %v3959_v16 = vmul.f32 %v7357_v42, %v3958_v12  ;;  %v3923_v5 = vmul.f32 0.3275911, %v9551_v35 }
 0xfe2   :  { %v7359_v22 = vpop.eup %7358  ;;  %4313 = vmatpush.msrb.mxu1 %v4277_v53 }
 0xfe3   :  { %v3960_v28 = vadd.f32 %v7357_v42, %v3959_v16  ;;  %v3942_v10 = vmul.f32 %v7359_v22, %v9537_v51  ;;  %v9559_v40 = vadd.f32 1.0, %v3923_v5  ;;  %vm3947_vm12 = vweird.f32 %v7359_v22  ;;  %v4290_v51 = vld [vmem:[#allocation2 + $0x6b0] sm:$0xff] }
 0xfe4   :  { %vm3948_vm14 = vmor %vm3946_vm13, %vm3947_vm12  ;;  %v3997_v16 = vand.u32 2147483648, %v9544_v17  ;;  %4348 = vmatpush.msrb.mxu2 %v4290_v51  ;;  %4314 = vmatpush.msrb.mxu1 %v4276_v45 }
 0xfe5   :  { %v3964_v25 = vsel %vm3963_vm11, %v7357_v42, %v3960_v28  ;;  %v3943_v48 = vsub.f32 1.0, %v3942_v10  ;;  %v9561_v13 = vpop.eup %7360  ;;  %7362 = vrcp.f32 %v9559_v40  ;;  %v4203_v10 = vmul.f32 1.442695, %v4192_v61  ;;  %v4274_v61 = vld [vmem:[#allocation2 + $0x5b0] sm:$0xff] }
 0xfe6   :  { %v9556_v8 = vsel %vm3966_vm10, %v3968_v7, %v3964_v25  ;;  %v3987_v62 = vmul.f32 %v9561_v13, %v9544_v17  ;;  %vm3992_vm2 = vweird.f32 %v9561_v13  ;;  %v3998_v34 = vor.u32 1.1754944e-38, %v3997_v16  ;;  %4315 = vmatpush.msrb.mxu1 %v4275_v4  ;;  %v4273_v16 = vld [vmem:[#allocation2 + $0x5a0] sm:$0xff] }
 0xfe7   :  { %v4092_v30 = vmul.f32 1.0614054, %v9556_v8  ;;  %v3944_v18 = vmul.f32 %v7359_v22, %v3943_v48  ;;  %vm3993_vm11 = vmor %vm3991_vm9, %vm3992_vm2  ;;  %vm3996_vm10 = vcmp.eq.f32.partialorder %v3995_v55, 8.507059e+37  ;;  %7364 = vpow2.f32 %v4203_v10 }
 0xfe8   :  { %v3988_v12 = vsub.f32 1.0, %v3987_v62  ;;  %v3982_v23 = vand.u32 2147483648, %v9559_v40  ;;  %4316 = vmatpush.msrb.mxu1 %v4274_v61  ;;  %vm3976_vm13 = vweird.f32 %v9559_v40  ;;  %vm3891_vm9 = vcmp.ge.f32.partialorder %v9522_v3, 0.0 }
 0xfe9   :  { %v4102_v42 = vadd.f32 -1.4531521, %v4092_v30  ;;  %v3945_v31 = vadd.f32 %v7359_v22, %v3944_v18  ;;  %v4288_v18 = vld [vmem:[#allocation2 + $0x690] sm:$0xff] }
 0xfea   :  { %v3989_v59 = vmul.f32 %v9561_v13, %v3988_v12  ;;  %v4201_v12 = vmul.f32 1.442695, %v4191_v37  ;;  %4317 = vmatpush.msrb.mxu1 %v4273_v16  ;;  %v3983_v51 = vor.u32 1.1754944e-38, %v3982_v23  ;;  %v3901_v16 = vsel %vm3891_vm9, 1.0, %v7610_v58 }
 0xfeb   :  { %v4112_v29 = vmul.f32 %v4102_v42, %v9556_v8  ;;  %v3949_v11 = vsel %vm3948_vm14, %v7359_v22, %v3945_v31  ;;  %v9579_v7 = vpop.eup %7362  ;;  %v4289_v22 = vld [vmem:[#allocation2 + $0x6a0] sm:$0xff]  ;;  %v3980_v31 = vand.u32 2147483647, %v9559_v40 }
 0xfec   :  { %v9577_v2 = vsel %vm3951_vm15, %v3953_v14, %v3949_v11  ;;  %v3990_v25 = vadd.f32 %v9561_v13, %v3989_v59  ;;  %v3972_v47 = vmul.f32 %v9579_v7, %v9559_v40  ;;  %4349 = vmatpush.msrb.mxu2 %v4289_v22  ;;  %vm3977_vm12 = vweird.f32 %v9579_v7 }
 0xfed   :  { %v4122_v28 = vadd.f32 1.4214138, %v4112_v29  ;;  %v4091_v5 = vmul.f32 1.0614054, %v9577_v2  ;;  %v4194_v14 = vmul.f32 %v4184_v44, %v9535_v9  ;;  %vm3978_vm14 = vmor %vm3976_vm13, %vm3977_vm12  ;;  %vm3892_vm15 = vcmp.ge.f32.partialorder %v9510_v20, 0.0  ;;  %v4272_v9 = vld [vmem:[#allocation2 + $0x590] sm:$0xff]  ;;  %v7365_v45 = vpop.eup %7364 }
 0xfee   :  { %v3994_v17 = vsel %vm3993_vm11, %v9561_v13, %v3990_v25  ;;  %v3973_v33 = vsub.f32 1.0, %v3972_v47  ;;  %4350 = vmatpush.msrb.mxu2 %v4288_v18  ;;  %vm3981_vm2 = vcmp.eq.f32.partialorder %v3980_v31, 8.507059e+37  ;;  %7366 = vpow2.f32 %v4201_v12  ;;  %4318 = vmatpush.msrb.mxu1 %v4272_v9  ;;  %v4271_v47 = vld [vmem:[#allocation2 + $0x580] sm:$0xff] }
 0xfef   :  { %v4132_v36 = vmul.f32 %v4122_v28, %v9556_v8  ;;  %v4101_v48 = vadd.f32 -1.4531521, %v4091_v5  ;;  %v9592_v62 = vsel %vm3996_vm10, %v3998_v34, %v3994_v17  ;;  %v4207_v25 = vmul.f32 1.442695, %v4194_v14 }
 0xff0   :  { %v4094_v0 = vmul.f32 1.0614054, %v9592_v62  ;;  %v3974_v42 = vmul.f32 %v9579_v7, %v3973_v33  ;;  %4351 = vmatpush.msrb.mxu2 %v4287_v49  ;;  %4319 = vmatpush.msrb.mxu1 %v4271_v47  ;;  %v3902_v17 = vsel %vm3892_vm15, 1.0, %v7610_v58  ;;  %vm3894_vm11 = vcmp.ge.f32.partialorder %v9531_v21, 0.0 }
 0xff1   :  { %v4142_v30 = vadd.f32 -0.28449672, %v4132_v36  ;;  %v4111_v57 = vmul.f32 %v4101_v48, %v9577_v2  ;;  %v4183_v36 = vsub.f32 0.0, %v9551_v35  ;;  %7368 = vpow2.f32 %v4207_v25 }
 0xff2   :  { %v4104_v19 = vadd.f32 -1.4531521, %v4094_v0  ;;  %v3975_v53 = vadd.f32 %v9579_v7, %v3974_v42  ;;  %v3871_v9 = vmul.f32 0.5, %v9519_v50  ;;  %vm3893_vm10 = vcmp.ge.f32.partialorder %v9547_v52, 0.0 }
 0xff3   :  { %v4152_v13 = vmul.f32 %v4142_v30, %v9556_v8  ;;  %v4121_v26 = vadd.f32 1.4214138, %v4111_v57  ;;  %v4193_v4 = vmul.f32 %v4183_v36, %v9551_v35  ;;  %v3904_v36 = vsel %vm3894_vm11, 1.0, %v7610_v58 }
 0xff4   :  { %v4114_v59 = vmul.f32 %v4104_v19, %v9592_v62  ;;  %v3979_v28 = vsel %vm3978_vm14, %v9579_v7, %v3975_v53  ;;  %v7367_v57 = vpop.eup %7366 }
 0xff5   :  { %v4162_v29 = vadd.f32 0.2548296, %v4152_v13  ;;  %v4131_v11 = vmul.f32 %v4121_v26, %v9577_v2  ;;  %v3984_v5 = vsel %vm3981_vm2, %v3983_v51, %v3979_v28  ;;  %v3872_v13 = vmul.f32 0.5, %v9507_v46 }
 0xff6   :  { %v4124_v40 = vadd.f32 1.4214138, %v4114_v59  ;;  %v4093_v34 = vmul.f32 1.0614054, %v3984_v5  ;;  %v4205_v35 = vmul.f32 1.442695, %v4193_v4 }
 0xff7   :  { %v4172_v55 = vmul.f32 %v4162_v29, %v9556_v8  ;;  %v4141_v10 = vadd.f32 -0.28449672, %v4131_v11  ;;  %v7369_v46 = vpop.eup %7368 }
 0xff8   :  { %v4134_v8 = vmul.f32 %v4124_v40, %v9592_v62  ;;  %v4103_v7 = vadd.f32 -1.4531521, %v4093_v34  ;;  %7370 = vpow2.f32 %v4205_v35 }
 0xff9   :  { %v4222_v22 = vmul.f32 %v7365_v45, %v4172_v55  ;;  %v4151_v48 = vmul.f32 %v4141_v10, %v9577_v2 }
 0xffa   :  { %v4144_v44 = vadd.f32 -0.28449672, %v4134_v8  ;;  %v4113_v18 = vmul.f32 %v4103_v7, %v3984_v5 }
 0xffb   :  { %v4232_v37 = vsub.f32 1.0, %v4222_v22  ;;  %v4161_v30 = vadd.f32 0.2548296, %v4151_v48 }
 0xffc   :  { %v4154_v23 = vmul.f32 %v4144_v44, %v9592_v62  ;;  %v4123_v49 = vadd.f32 1.4214138, %v4113_v18 }
 0xffd   :  { %v4242_v33 = vmul.f32 %v4232_v37, %v3902_v17  ;;  %v4171_v0 = vmul.f32 %v4161_v30, %v9577_v2  ;;  %v3874_v17 = vmul.f32 0.5, %v9525_v1  ;;  %v3903_v1 = vsel %vm3893_vm10, 1.0, %v7610_v58 }
 0xffe   :  { %v4164_v26 = vadd.f32 0.2548296, %v4154_v23  ;;  %v4133_v19 = vmul.f32 %v4123_v49, %v3984_v5  ;;  %v7371_v8 = vpop.eup %7370 }
 0xfff   :  { %v4252_v42 = vadd.f32 1.0, %v4242_v33  ;;  %v3862_v61 = vpop.f32.mrf.mxu0  ;;  %v4221_v20 = vmul.f32 %v7367_v57, %v4171_v0 }
0x1000   :  { %v9623_v31 = vadd.f32 %v3862_v61, %v9504_v15  ;;  %v4174_v14 = vmul.f32 %v4164_v26, %v9592_v62  ;;  %v4143_v53 = vadd.f32 -0.28449672, %v4133_v19 }
0x1001   :  { %v4262_v12 = vmul.f32 %v4252_v42, %v3872_v13  ;;  %v4231_v29 = vsub.f32 1.0, %v4221_v20 }
0x1002   :  { %v9626_v2 = vmul.f32 0.70710677, %v9623_v31  ;;  %v4224_v59 = vmul.f32 %v7369_v46, %v4174_v14  ;;  %v4153_v55 = vmul.f32 %v4143_v53, %v3984_v5 }
0x1003   :  { %4352 = vmatmul.f32.vlgmr.msrb.gmra.mxu2 %v4262_v12  ;;  %v4241_v3 = vmul.f32 %v4231_v29, %v3901_v16 }
0x1004   :  { %v3916_v11 = vand.u32 2147483647, %v9626_v2  ;;  %v4234_v40 = vsub.f32 1.0, %v4224_v59  ;;  %v4163_v22 = vadd.f32 0.2548296, %v4153_v55  ;;  %vm3896_vm12 = vcmp.ge.f32.partialorder %v9626_v2, 0.0 }
0x1005   :  { %v3830_v51 = vpop.f32.mrf.mxu3  ;;  %v4251_v28 = vadd.f32 1.0, %v4241_v3  ;;  %v3873_v3 = vmul.f32 0.5, %v9540_v41 }
0x1006   :  { %v3926_v45 = vmul.f32 0.3275911, %v3916_v11  ;;  %v9634_v62 = vadd.f32 %v3830_v51, %v9512_v60  ;;  %v4244_v50 = vmul.f32 %v4234_v40, %v3904_v36  ;;  %v4173_v48 = vmul.f32 %v4163_v22, %v3984_v5 }
0x1007   :  { %v3865_v10 = vpop.f32.mrf.mxu0  ;;  %v4261_v25 = vmul.f32 %v4251_v28, %v3871_v9  ;;  %v4186_v5 = vsub.f32 0.0, %v3916_v11  ;;  %v9680_v9 = vmul.f32 0.5, %v9623_v31 }
0x1008   :  { %v9637_v47 = vadd.f32 1.0, %v3926_v45  ;;  %v9640_v21 = vmul.f32 0.70710677, %v9634_v62  ;;  %v9643_v34 = vadd.f32 %v3865_v10, %v9504_v15  ;;  %v4254_v30 = vadd.f32 1.0, %v4244_v50 }
0x1009   :  { %4320 = vmatmul.f32.vlgmr.msrb.gmra.mxu1 %v4261_v25  ;;  %v4223_v44 = vmul.f32 %v7371_v8, %v4173_v48  ;;  %v4196_v29 = vmul.f32 %v4186_v5, %v3916_v11 }
0x100a   :  { %7372 = vrcp.f32 %v9637_v47  ;;  %v3915_v37 = vand.u32 2147483647, %v9640_v21  ;;  %v9648_v7 = vmul.f32 0.70710677, %v9643_v34  ;;  %v4264_v57 = vmul.f32 %v4254_v30, %v3874_v17 }
0x100b   :  { %v4233_v23 = vsub.f32 1.0, %v4223_v44  ;;  %v4211_v11 = vmul.f32 1.442695, %v4196_v29  ;;  %vm4021_vm13 = vweird.f32 %v9637_v47  ;;  %v4027_v8 = vand.u32 2147483648, %v9637_v47 }
0x100c   :  { %v3925_v33 = vmul.f32 0.3275911, %v3915_v37  ;;  %v3918_v4 = vand.u32 2147483647, %v9648_v7  ;;  %v4185_v20 = vsub.f32 0.0, %v3915_v37  ;;  %4355 = vmatmul.f32.gmra.mxu2 %v4264_v57 }
0x100d   :  { %v3833_v18 = vpop.f32.mrf.mxu3  ;;  %v4243_v19 = vmul.f32 %v4233_v23, %v3903_v1 }
0x100e   :  { %v9654_v0 = vadd.f32 %v3833_v18, %v9512_v60  ;;  %v9656_v13 = vadd.f32 1.0, %v3925_v33  ;;  %v3928_v42 = vmul.f32 0.3275911, %v3918_v4  ;;  %v4195_v16 = vmul.f32 %v4185_v20, %v3915_v37 }
0x100f   :  { %v3868_v61 = vpop.f32.mrf.mxu0  ;;  %v4253_v51 = vadd.f32 1.0, %v4243_v19  ;;  %v4188_v41 = vsub.f32 0.0, %v3918_v4  ;;  %v4025_v18 = vand.u32 2147483647, %v9637_v47  ;;  %v4028_v19 = vor.u32 1.1754944e-38, %v4027_v8 }
0x1010   :  { %v9658_v49 = vpop.eup %7372  ;;  %v9662_v52 = vmul.f32 0.70710677, %v9654_v0  ;;  %v9665_v26 = vadd.f32 %v3868_v61, %v9504_v15  ;;  %7374 = vrcp.f32 %v9656_v13  ;;  %v9670_v35 = vadd.f32 1.0, %v3928_v42 }
0x1011   :  { %v4017_v12 = vmul.f32 %v9658_v49, %v9637_v47  ;;  %v4263_v22 = vmul.f32 %v4253_v51, %v3873_v3  ;;  %v4209_v31 = vmul.f32 1.442695, %v4195_v16  ;;  %vm4022_vm14 = vweird.f32 %v9658_v49 }
0x1012   :  { %v3917_v14 = vand.u32 2147483647, %v9662_v52  ;;  %7376 = vrcp.f32 %v9670_v35  ;;  %v9677_v59 = vmul.f32 0.70710677, %v9665_v26  ;;  %v4198_v44 = vmul.f32 %v4188_v41, %v3918_v4  ;;  %vm9717_vm15 = vmor %vm4021_vm13, %vm4022_vm14 }
0x1013   :  { %v4018_v46 = vsub.f32 1.0, %v4017_v12  ;;  %4323 = vmatmul.f32.gmra.mxu1 %v4263_v22  ;;  %v9724_v4 = vsel %vm3896_vm12, 1.0, %v7610_v58  ;;  %vm4051_vm2 = vweird.f32 %v9670_v35  ;;  %v4057_v47 = vand.u32 2147483648, %v9670_v35 }
0x1014   :  { %v3927_v53 = vmul.f32 0.3275911, %v3917_v14  ;;  %v9691_v40 = vand.u32 2147483647, %v9677_v59  ;;  %v4187_v36 = vsub.f32 0.0, %v3917_v14  ;;  %vm4026_vm9 = vcmp.eq.f32.partialorder %v4025_v18, 8.507059e+37 }
0x1015   :  { %v4019_v15 = vmul.f32 %v9658_v49, %v4018_v46  ;;  %v3836_v55 = vpop.f32.mrf.mxu3  ;;  %vm4006_vm11 = vweird.f32 %v9656_v13  ;;  %v4010_v22 = vand.u32 2147483647, %v9656_v13  ;;  %v4055_v18 = vand.u32 2147483647, %v9670_v35 }
0x1016   :  { %v9682_v28 = vadd.f32 1.0, %v3927_v53  ;;  %v9685_v45 = vadd.f32 %v3836_v55, %v9512_v60  ;;  %v9687_v10 = vpop.eup %7374  ;;  %v3930_v60 = vmul.f32 0.3275911, %v9691_v40  ;;  %v4197_v57 = vmul.f32 %v4187_v36, %v3917_v14 }
0x1017   :  { %v4002_v25 = vmul.f32 %v9687_v10, %v9656_v13  ;;  %v4020_v50 = vadd.f32 %v9658_v49, %v4019_v15  ;;  %vm4007_vm10 = vweird.f32 %v9687_v10  ;;  %vm4011_vm14 = vcmp.eq.f32.partialorder %v4010_v22, 8.507059e+37 }
0x1018   :  { %7378 = vrcp.f32 %v9682_v28  ;;  %v9700_v48 = vpop.eup %7376  ;;  %v9704_v17 = vmul.f32 0.70710677, %v9685_v45  ;;  %v9708_v33 = vadd.f32 1.0, %v3930_v60  ;;  %v9743_v16 = vmul.f32 1.442695, %v4197_v57  ;;  %vm9756_vm12 = vmor %vm4006_vm11, %vm4007_vm10 }
0x1019   :  { %7380 = vpow2.f32 %v4211_v11  ;;  %v4003_v37 = vsub.f32 1.0, %v4002_v25  ;;  %v4047_v30 = vmul.f32 %v9700_v48, %v9670_v35  ;;  %v4024_v1 = vsel %vm9717_vm15, %v9658_v49, %v4020_v50 }
0x101a   :  { %7382 = vpow2.f32 %v4209_v31  ;;  %v9713_v23 = vand.u32 2147483647, %v9704_v17  ;;  %v9741_v49 = vmul.f32 1.442695, %v4198_v44  ;;  %v9747_v3 = vsel %vm4026_vm9, %v4028_v19, %v4024_v1 }
0x101b   :  { %v4004_v5 = vmul.f32 %v9687_v10, %v4003_v37  ;;  %v4048_v61 = vsub.f32 1.0, %v4047_v30  ;;  %7384 = vrcp.f32 %v9708_v33  ;;  %v4096_v51 = vmul.f32 1.0614054, %v9747_v3 }
0x101c   :  { %v3929_v12 = vmul.f32 0.3275911, %v9713_v23  ;;  %v4190_v11 = vsub.f32 0.0, %v9691_v40  ;;  %v4012_v25 = vand.u32 2147483648, %v9656_v13  ;;  %vm4081_vm13 = vweird.f32 %v9708_v33 }
0x101d   :  { %v4049_v2 = vmul.f32 %v9700_v48, %v4048_v61  ;;  %v4005_v14 = vadd.f32 %v9687_v10, %v4004_v5  ;;  %v4106_v60 = vadd.f32 -1.4531521, %v4096_v51  ;;  %v4087_v30 = vand.u32 2147483648, %v9708_v33 }
0x101e   :  { %v9730_v20 = vpop.eup %7378  ;;  %v9745_v53 = vadd.f32 1.0, %v3929_v12  ;;  %v4013_v44 = vor.u32 1.1754944e-38, %v4012_v25  ;;  %vm4052_vm15 = vweird.f32 %v9700_v48  ;;  %v4058_v5 = vor.u32 1.1754944e-38, %v4057_v47 }
0x101f   :  { %v4032_v29 = vmul.f32 %v9730_v20, %v9682_v28  ;;  %v9739_v46 = vpop.eup %7380  ;;  %v4009_v50 = vsel %vm9756_vm12, %v9687_v10, %v4005_v14  ;;  %v4050_v8 = vadd.f32 %v9700_v48, %v4049_v2  ;;  %v4116_v13 = vmul.f32 %v4106_v60, %v9747_v3  ;;  %vm4053_vm9 = vmor %vm4051_vm2, %vm4052_vm15 }
0x1020   :  { %v9752_v55 = vpop.eup %7382  ;;  %7386 = vrcp.f32 %v9745_v53  ;;  %v9773_v42 = vsel %vm4011_vm14, %v4013_v44, %v4009_v50  ;;  %vm4036_vm11 = vweird.f32 %v9682_v28  ;;  %vm4056_vm10 = vcmp.eq.f32.partialorder %v4055_v18, 8.507059e+37 }
0x1021   :  { %v4033_v15 = vsub.f32 1.0, %v4032_v29  ;;  %v7385_v31 = vpop.eup %7384  ;;  %v4126_v61 = vadd.f32 1.4214138, %v4116_v13  ;;  %v4095_v1 = vmul.f32 1.0614054, %v9773_v42  ;;  %v4054_v12 = vsel %vm4053_vm9, %v9700_v48, %v4050_v8 }
0x1022   :  { %v4077_v37 = vmul.f32 %v7385_v31, %v9708_v33  ;;  %v9783_v47 = vsel %vm4056_vm10, %v4058_v5, %v4054_v12  ;;  %vm4037_vm12 = vweird.f32 %v9730_v20  ;;  %v4040_v35 = vand.u32 2147483647, %v9682_v28 }
0x1023   :  { %v4034_v36 = vmul.f32 %v9730_v20, %v4033_v15  ;;  %v4136_v14 = vmul.f32 %v4126_v61, %v9747_v3  ;;  %v4105_v15 = vadd.f32 -1.4531521, %v4095_v1  ;;  %v4098_v51 = vmul.f32 1.0614054, %v9783_v47  ;;  %vm9791_vm2 = vmor %vm4036_vm11, %vm4037_vm12 }
0x1024   :  { %v4078_v57 = vsub.f32 1.0, %v4077_v37  ;;  %vm9798_vm14 = vcmp.eq.f32.partialorder %v4040_v35, 8.507059e+37  ;;  %v4042_v25 = vand.u32 2147483648, %v9682_v28  ;;  %vm4082_vm15 = vweird.f32 %v7385_v31 }
0x1025   :  { %v4035_v10 = vadd.f32 %v9730_v20, %v4034_v36  ;;  %v4146_v50 = vadd.f32 -0.28449672, %v4136_v14  ;;  %v4115_v8 = vmul.f32 %v4105_v15, %v9773_v42  ;;  %v4108_v37 = vadd.f32 -1.4531521, %v4098_v51  ;;  %vm4083_vm9 = vmor %vm4081_vm13, %vm4082_vm15 }
0x1026   :  { %v9781_v19 = vpop.eup %7386  ;;  %v4079_v2 = vmul.f32 %v7385_v31, %v4078_v57  ;;  %v4043_v44 = vor.u32 1.1754944e-38, %v4042_v25  ;;  %v4085_v13 = vand.u32 2147483647, %v9708_v33  ;;  %v4088_v18 = vor.u32 1.1754944e-38, %v4087_v30 }
0x1027   :  { %v4062_v29 = vmul.f32 %v9781_v19, %v9745_v53  ;;  %v4039_v41 = vsel %vm9791_vm2, %v9730_v20, %v4035_v10  ;;  %v4156_v20 = vmul.f32 %v4146_v50, %v9747_v3  ;;  %v4125_v57 = vadd.f32 1.4214138, %v4115_v8 }
0x1028   :  { %v4080_v36 = vadd.f32 %v7385_v31, %v4079_v2  ;;  %v4118_v10 = vmul.f32 %v4108_v37, %v9783_v47  ;;  %v9812_v28 = vsel %vm9798_vm14, %v4043_v44, %v4039_v41  ;;  %vm4086_vm11 = vcmp.eq.f32.partialorder %v4085_v13, 8.507059e+37  ;;  %v4412_v44 = vld [vmem:[#allocation2 + $0x860] sm:$0xff] }
0x1029   :  { %v4063_v60 = vsub.f32 1.0, %v4062_v29  ;;  %vm4066_vm10 = vweird.f32 %v9745_v53  ;;  %v4166_v1 = vadd.f32 0.2548296, %v4156_v20  ;;  %v4135_v30 = vmul.f32 %v4125_v57, %v9773_v42 }
0x102a   :  { %v4084_v61 = vsel %vm4083_vm9, %v7385_v31, %v4080_v36  ;;  %v4128_v12 = vadd.f32 1.4214138, %v4118_v10  ;;  %v4097_v2 = vmul.f32 1.0614054, %v9812_v28  ;;  %vm4067_vm13 = vweird.f32 %v9781_v19  ;;  %v4411_v10 = vld [vmem:[#allocation2 + $0x850] sm:$0xff] }
0x102b   :  { %v4064_v5 = vmul.f32 %v9781_v19, %v4063_v60  ;;  %v9817_v35 = vsel %vm4086_vm11, %v4088_v18, %v4084_v61  ;;  %v4070_v33 = vand.u32 2147483647, %v9745_v53  ;;  %vm3895_vm12 = vcmp.ge.f32.partialorder %v9640_v21, 0.0  ;;  %vm9825_vm2 = vmor %vm4066_vm10, %vm4067_vm13 }
0x102c   :  { %v4176_v31 = vmul.f32 %v4166_v1, %v9747_v3  ;;  %v4145_v14 = vadd.f32 -0.28449672, %v4135_v30  ;;  %v4138_v15 = vmul.f32 %v4128_v12, %v9783_v47  ;;  %v4107_v51 = vadd.f32 -1.4531521, %v4097_v2 }
0x102d   :  { %v4065_v29 = vadd.f32 %v9781_v19, %v4064_v5  ;;  %v4200_v41 = vmul.f32 %v4190_v11, %v9691_v40  ;;  %v4100_v22 = vmul.f32 1.0614054, %v9817_v35  ;;  %v4072_v3 = vand.u32 2147483648, %v9745_v53  ;;  %v4413_v11 = vld [vmem:[#allocation2 + $0x870] sm:$0xff] }
0x102e   :  { %v4226_v36 = vmul.f32 %v9739_v46, %v4176_v31  ;;  %v4155_v60 = vmul.f32 %v4145_v14, %v9773_v42  ;;  %v4148_v50 = vadd.f32 -0.28449672, %v4138_v15  ;;  %v4117_v8 = vmul.f32 %v4107_v51, %v9812_v28  ;;  %4415 = vmatpush.msrb.mxu3 %v4413_v11  ;;  %v4407_v11 = vld [vmem:[#allocation2 + $0x810] sm:$0xff] }
0x102f   :  { %v4069_v25 = vsel %vm9825_vm2, %v9781_v19, %v4065_v29  ;;  %7388 = vpow2.f32 %v9741_v49  ;;  %v4110_v37 = vadd.f32 -1.4531521, %v4100_v22  ;;  %vm4071_vm14 = vcmp.eq.f32.partialorder %v4070_v33, 8.507059e+37  ;;  %v4410_v29 = vld [vmem:[#allocation2 + $0x840] sm:$0xff] }
0x1030   :  { %v4073_v40 = vor.u32 1.1754944e-38, %v4072_v3  ;;  %v4236_v13 = vsub.f32 1.0, %v4226_v36  ;;  %v4165_v18 = vadd.f32 0.2548296, %v4155_v60  ;;  %v4158_v19 = vmul.f32 %v4148_v50, %v9783_v47  ;;  %4416 = vmatpush.msrb.mxu3 %v4412_v44  ;;  %v4408_v60 = vld [vmem:[#allocation2 + $0x820] sm:$0xff] }
0x1031   :  { %v4127_v5 = vadd.f32 1.4214138, %v4117_v8  ;;  %v4219_v53 = vmul.f32 1.442695, %v4200_v41  ;;  %v4189_v46 = vsub.f32 0.0, %v9713_v23  ;;  %v4120_v20 = vmul.f32 %v4110_v37, %v9817_v35  ;;  %v4409_v41 = vld [vmem:[#allocation2 + $0x830] sm:$0xff] }
0x1032   :  { %v9844_v57 = vsel %vm4071_vm14, %v4073_v40, %v4069_v25  ;;  %v4246_v49 = vmul.f32 %v4236_v13, %v9724_v4  ;;  %v4175_v61 = vmul.f32 %v4165_v18, %v9773_v42  ;;  %v4168_v1 = vadd.f32 0.2548296, %v4158_v19  ;;  %4417 = vmatpush.msrb.mxu3 %v4411_v10 }
0x1033   :  { %v4137_v30 = vmul.f32 %v4127_v5, %v9812_v28  ;;  %vm3898_vm15 = vcmp.ge.f32.partialorder %v9648_v7, 0.0  ;;  %v4130_v12 = vadd.f32 1.4214138, %v4120_v20  ;;  %v4099_v2 = vmul.f32 1.0614054, %v9844_v57  ;;  %v4406_v20 = vld [vmem:[#allocation2 + $0x800] sm:$0xff] }
0x1034   :  { %v4256_v33 = vadd.f32 1.0, %v4246_v49  ;;  %v4225_v31 = vmul.f32 %v9752_v55, %v4175_v61  ;;  %v4178_v14 = vmul.f32 %v4168_v1, %v9783_v47  ;;  %7390 = vpow2.f32 %v9743_v16  ;;  %4418 = vmatpush.msrb.mxu3 %v4410_v29 }
0x1035   :  { %v4147_v15 = vadd.f32 -0.28449672, %v4137_v30  ;;  %v7389_v4 = vpop.eup %7388  ;;  %v4199_v42 = vmul.f32 %v4189_v46, %v9713_v23  ;;  %v4140_v51 = vmul.f32 %v4130_v12, %v9817_v35  ;;  %v4109_v48 = vadd.f32 -1.4531521, %v4099_v2  ;;  %v4405_v30 = vld [vmem:[#allocation2 + $0x7f0] sm:$0xff] }
0x1036   :  { %v4266_v22 = vmul.f32 %v4256_v33, %v9680_v9  ;;  %v4235_v25 = vsub.f32 1.0, %v4225_v31  ;;  %v4228_v3 = vmul.f32 %v7389_v4, %v4178_v14  ;;  %v3905_v55 = vsel %vm3895_vm12, 1.0, %v7610_v58  ;;  %4419 = vmatpush.msrb.mxu3 %v4409_v41  ;;  %v4404_v33 = vld [vmem:[#allocation2 + $0x7e0] sm:$0xff] }
0x1037   :  { %v4157_v36 = vmul.f32 %v4147_v15, %v9812_v28  ;;  %v4150_v47 = vadd.f32 -0.28449672, %v4140_v51  ;;  %v4119_v16 = vmul.f32 %v4109_v48, %v9844_v57  ;;  %7392 = vpow2.f32 %v4219_v53  ;;  %v4403_v15 = vld [vmem:[#allocation2 + $0x7d0] sm:$0xff] }
0x1038   :  { %4358 = vmatmul.f32.gmra.mxu2 %v4266_v22  ;;  %v4245_v23 = vmul.f32 %v4235_v25, %v3905_v55  ;;  %v4238_v50 = vsub.f32 1.0, %v4228_v3  ;;  %v3875_v9 = vmul.f32 0.5, %v9634_v62  ;;  %v3908_v37 = vsel %vm3898_vm15, 1.0, %v7610_v58  ;;  %4420 = vmatpush.msrb.mxu3 %v4408_v60 }
0x1039   :  { %v4167_v8 = vadd.f32 0.2548296, %v4157_v36  ;;  %v4160_v40 = vmul.f32 %v4150_v47, %v9817_v35  ;;  %v4129_v21 = vadd.f32 1.4214138, %v4119_v16  ;;  %v4217_v44 = vmul.f32 1.442695, %v4199_v42 }
0x103a   :  { %v4255_v13 = vadd.f32 1.0, %v4245_v23  ;;  %v4248_v18 = vmul.f32 %v4238_v50, %v3908_v37  ;;  %v7391_v5 = vpop.eup %7390  ;;  %v3878_v53 = vmul.f32 0.5, %v9643_v34  ;;  %vm3897_vm9 = vcmp.ge.f32.partialorder %v9662_v52, 0.0  ;;  %4421 = vmatpush.msrb.mxu3 %v4407_v11  ;;  %v4303_v37 = vld [vmem:[#allocation4 + $0x15] ss:$0 sm:$0xff] }
0x103b   :  { %v4177_v19 = vmul.f32 %v4167_v8, %v9812_v28  ;;  %v4170_v46 = vadd.f32 0.2548296, %v4160_v40  ;;  %v4139_v62 = vmul.f32 %v4129_v21, %v9844_v57  ;;  %7394 = vpow2.f32 %v4217_v44  ;;  %v4401_v8 = vld [vmem:[#allocation2 + $0x7b0] sm:$0xff] }
0x103c   :  { %v4265_v7 = vmul.f32 %v4255_v13, %v3875_v9  ;;  %v4258_v10 = vadd.f32 1.0, %v4248_v18  ;;  %4422 = vmatpush.msrb.mxu3 %v4406_v20  ;;  %v3907_v34 = vsel %vm3897_vm9, 1.0, %v7610_v58  ;;  %vm3900_vm11 = vcmp.ge.f32.partialorder %v9677_v59, 0.0  ;;  %v4402_v59 = vld [vmem:[#allocation2 + $0x7c0] sm:$0xff]  ;;  %v4379_v18 = vpop.permute.xlu2 %4378  ;;  %v4381_v20 = vpop.permute.xlu0 %4380 }
0x103d   :  { %v4227_v49 = vmul.f32 %v7391_v5, %v4177_v19  ;;  %v4180_v61 = vmul.f32 %v4170_v46, %v9817_v35  ;;  %v4149_v1 = vadd.f32 -0.28449672, %v4139_v62  ;;  %v7393_v12 = vpop.eup %7392  ;;  %v3877_v4 = vmul.f32 0.5, %v9654_v0  ;;  %v4400_v9 = vld [vmem:[#allocation2 + $0x7a0] sm:$0xff] }
0x103e   :  { %4326 = vmatmul.f32.gmra.mxu1 %v4265_v7  ;;  %v4268_v28 = vmul.f32 %v4258_v10, %v3878_v53  ;;  %4423 = vmatpush.msrb.mxu3 %v4405_v30  ;;  %v3910_v42 = vsel %vm3900_vm11, 1.0, %v7610_v58  ;;  %v3880_v3 = vmul.f32 0.5, %v9665_v26  ;;  %vm3899_vm10 = vcmp.ge.f32.partialorder %v9704_v17, 0.0  ;;  %v4399_v26 = vld [vmem:[#allocation2 + $0x790] sm:$0xff]  ;;  %v4398_v17 = vld [vmem:[#allocation2 + $0x780] sm:$0xff]  ;;  %v4383_v30 = vpop.permute.xlu1 %4382 }
0x103f   :  { %v4237_v2 = vsub.f32 1.0, %v4227_v49  ;;  %v4230_v29 = vmul.f32 %v7393_v12, %v4180_v61  ;;  %v4159_v52 = vmul.f32 %v4149_v1, %v9844_v57  ;;  %v3909_v16 = vsel %vm3899_vm10, 1.0, %v7610_v58 }
0x1040   :  { %4361 = vmatmul.f32.gmra.mxu2 %v4268_v28  ;;  %4424 = vmatpush.msrb.mxu3 %v4404_v33 }
0x1041   :  { %v4247_v31 = vmul.f32 %v4237_v2, %v3907_v34  ;;  %v4240_v35 = vsub.f32 1.0, %v4230_v29  ;;  %v4169_v14 = vadd.f32 0.2548296, %v4159_v52  ;;  %v7395_v22 = vpop.eup %7394 }
0x1042   :  { %4425 = vmatpush.msrb.mxu3 %v4403_v15 }
0x1043   :  { %v4257_v51 = vadd.f32 1.0, %v4247_v31  ;;  %v4250_v48 = vmul.f32 %v4240_v35, %v3910_v42  ;;  %v4179_v41 = vmul.f32 %v4169_v14, %v9844_v57  ;;  %v3879_v57 = vmul.f32 0.5, %v9685_v45 }
0x1044   :  { %4426 = vmatpush.msrb.mxu3 %v4402_v59  ;;  %v4385_v52 = vpop.permute.xlu0 %4384 }
0x1045   :  { %v4267_v25 = vmul.f32 %v4257_v51, %v3877_v4  ;;  %v4260_v36 = vadd.f32 1.0, %v4250_v48  ;;  %v4229_v55 = vmul.f32 %v7395_v22, %v4179_v41  ;;  %v4387_v4 = vpop.permute.xlu2 %4386  ;;  %v4414_v51 = vld [vmem:[#allocation4 + $0x16] ss:$0 sm:$0xff] }
0x1046   :  { %4427 = vmatpush.msrb.mxu3 %v4401_v8 }
0x1047   :  { %4329 = vmatmul.f32.gmra.mxu1 %v4267_v25  ;;  %v4270_v0 = vmul.f32 %v4260_v36, %v3880_v3  ;;  %v4239_v47 = vsub.f32 1.0, %v4229_v55 }
0x1048   :  { %4428 = vmatpush.msrb.mxu3 %v4400_v9 }
0x1049   :  { %4364 = vmatmul.f32.gmra.mxu2 %v4270_v0  ;;  %v4249_v60 = vmul.f32 %v4239_v47, %v3909_v16 }
0x104a   :  { %4429 = vmatpush.msrb.mxu3 %v4399_v26 }
0x104b   :  { %v4259_v23 = vadd.f32 1.0, %v4249_v60 }
0x104c   :  { %4430 = vmatpush.msrb.mxu3 %v4398_v17 }
0x104d   :  { %v4269_v50 = vmul.f32 %v4259_v23, %v3879_v57 }
0x104f   :  { %4332 = vmatmul.f32.gmra.mxu1 %v4269_v50 }
0x1086   :  { %v4321_v40 = vpop.f32.mrf.mxu1  ;;  %v4353_v11 = vpop.f32.mrf.mxu2 }
0x1087   :  { %v4322_v21 = vadd.f32 %v4321_v40, %v4303_v37 }
0x1089   :  { %v4354_v44 = vadd.f32 %v4353_v11, %v4322_v21 }
0x108b   :  { %v4368_v13 = vadd.f32 %v4354_v44, %v9401_v27 }
0x108d   :  { %v4393_v45 = vsel %vm67_vm0, %v4368_v13, %v4379_v18 }
0x108e   :  { %4431 = vmatmul.f32.vlgmr.msrb.gmra.mxu3 %v4393_v45 }
0x108f   :  { %v4356_v53 = vpop.f32.mrf.mxu2 }
0x1090   :  { %v4324_v19 = vpop.f32.mrf.mxu1 }
0x1091   :  { %v4325_v5 = vadd.f32 %v4324_v19, %v4303_v37 }
0x1093   :  { %v4357_v46 = vadd.f32 %v4356_v53, %v4325_v5 }
0x1095   :  { %v4369_v62 = vadd.f32 %v4357_v46, %v9406_v24 }
0x1097   :  { %v4394_v7 = vsel %vm67_vm0, %v4369_v62, %v4381_v20 }
0x1098   :  { %4434 = vmatmul.f32.gmra.mxu3 %v4394_v7 }
0x10bb   :  { %v4327_v10 = vpop.f32.mrf.mxu1  ;;  %v4359_v49 = vpop.f32.mrf.mxu2 }
0x10bc   :  { %v4328_v61 = vadd.f32 %v4327_v10, %v4303_v37 }
0x10be   :  { %v4360_v1 = vadd.f32 %v4359_v49, %v4328_v61 }
0x10c0   :  { %v4370_v27 = vadd.f32 %v4360_v1, %v9411_v38 }
0x10c2   :  { %v4395_v12 = vsel %vm67_vm0, %v4370_v27, %v4383_v30  ;;  %v4583_v27 = vld [vmem:[#allocation2 + $0x8f0] sm:$0xff]  ;;  %v4584_v30 = vld [vmem:[#allocation2 + $0x8f8] sm:$0xff] }
0x10c3   :  { %4437 = vmatmul.f32.gmra.mxu3 %v4395_v12  ;;  %v4362_v34 = vpop.f32.mrf.mxu2  ;;  %4608 = vmatpush.msra.mxu0 %v4583_v27 }
0x10c4   :  { %v4330_v28 = vpop.f32.mrf.mxu1  ;;  %4640 = vmatpush.msra.mxu1 %v4584_v30 }
0x10c5   :  { %v4331_v2 = vadd.f32 %v4330_v28, %v4303_v37 }
0x10c7   :  { %v4363_v29 = vadd.f32 %v4362_v34, %v4331_v2  ;;  %v4581_v2 = vld [vmem:[#allocation2 + $0x8e0] sm:$0xff]  ;;  %v4582_v34 = vld [vmem:[#allocation2 + $0x8e8] sm:$0xff] }
0x10c8   :  { %4609 = vmatpush.msra.mxu0 %v4581_v2  ;;  %4641 = vmatpush.msra.mxu1 %v4582_v34 }
0x10c9   :  { %v4371_v24 = vadd.f32 %v4363_v29, %v9416_v56 }
0x10cb   :  { %v4396_v33 = vsel %vm67_vm0, %v4371_v24, %v4385_v52  ;;  %v4579_v24 = vld [vmem:[#allocation2 + $0x8d0] sm:$0xff]  ;;  %v4580_v52 = vld [vmem:[#allocation2 + $0x8d8] sm:$0xff] }
0x10cc   :  { %4440 = vmatmul.f32.gmra.mxu3 %v4396_v33  ;;  %v4333_v31 = vpop.f32.mrf.mxu1  ;;  %v4365_v14 = vpop.f32.mrf.mxu2  ;;  %4610 = vmatpush.msra.mxu0 %v4579_v24  ;;  %v4577_v33 = vld [vmem:[#allocation2 + $0x8c0] sm:$0xff] }
0x10cd   :  { %v4334_v35 = vadd.f32 %v4333_v31, %v4303_v37  ;;  %4642 = vmatpush.msra.mxu1 %v4580_v52  ;;  %v4578_v31 = vld [vmem:[#allocation2 + $0x8c8] sm:$0xff] }
0x10ce   :  { %4611 = vmatpush.msra.mxu0 %v4577_v33 }
0x10cf   :  { %v4366_v15 = vadd.f32 %v4365_v14, %v4334_v35  ;;  %4643 = vmatpush.msra.mxu1 %v4578_v31  ;;  %v4575_v35 = vld [vmem:[#allocation2 + $0x8b0] sm:$0xff]  ;;  %v4576_v14 = vld [vmem:[#allocation2 + $0x8b8] sm:$0xff] }
0x10d0   :  { %4612 = vmatpush.msra.mxu0 %v4575_v35 }
0x10d1   :  { %v4372_v38 = vadd.f32 %v4366_v15, %v9421_v43  ;;  %v4573_v15 = vld [vmem:[#allocation2 + $0x8a0] sm:$0xff]  ;;  %4644 = vmatpush.msra.mxu1 %v4576_v14 }
0x10d2   :  { %4613 = vmatpush.msra.mxu0 %v4573_v15 }
0x10d3   :  { %v4397_v42 = vsel %vm67_vm0, %v4372_v38, %v4387_v4  ;;  %v4574_v38 = vld [vmem:[#allocation2 + $0x8a8] sm:$0xff]  ;;  %v4571_v4 = vld [vmem:[#allocation2 + $0x890] sm:$0xff] }
0x10d4   :  { %4443 = vmatmul.f32.gmra.mxu3 %v4397_v42  ;;  %v4572_v42 = vld [vmem:[#allocation2 + $0x898] sm:$0xff]  ;;  %4645 = vmatpush.msra.mxu1 %v4574_v38 }
0x10d5   :  { %4614 = vmatpush.msra.mxu0 %v4571_v4 }
0x10d6   :  { %4646 = vmatpush.msra.mxu1 %v4572_v42 }
0x1111   :  { %v4432_v48 = vpop.f32.mrf.mxu3 }
0x1112   :  { %v9892_v41 = vadd.f32 %v4432_v48, %v4414_v51  ;;  %v4569_v48 = vld [vmem:[#allocation2 + $0x880] sm:$0xff] }
0x1113   :  { %4615 = vmatpush.msra.mxu0 %v4569_v48 }
0x1114   :  { %v4449_v56 = vsel %vm67_vm0, %v9892_v41, 0.0 }
0x1115   :  { %4450 = vadd.xlane.f32.xlu1 %v4449_v56  ;;  %v4570_v56 = vld [vmem:[#allocation2 + $0x888] sm:$0xff] }
0x1116   :  { %4647 = vmatpush.msra.mxu1 %v4570_v56 }
0x111b   :  { %v4435_v59 = vpop.f32.mrf.mxu3 }
0x111c   :  { %v9896_v22 = vadd.f32 %v4435_v59, %v4414_v51 }
0x111e   :  { %v4452_v25 = vsel %vm67_vm0, %v9896_v22, 0.0 }
0x111f   :  { %4453 = vadd.xlane.f32.xlu0 %v4452_v25 }
0x1146   :  { %v4438_v43 = vpop.f32.mrf.mxu3 }
0x1147   :  { %v9900_v3 = vadd.f32 %v4438_v43, %v4414_v51 }
0x1149   :  { %v4455_v36 = vsel %vm67_vm0, %v9900_v3, 0.0 }
0x114a   :  { %4456 = vadd.xlane.f32.xlu2 %v4455_v36 }
0x114f   :  { %v4441_v55 = vpop.f32.mrf.mxu3 }
0x1150   :  { %v9904_v0 = vadd.f32 %v4441_v55, %v4414_v51 }
0x1152   :  { %v4458_v47 = vsel %vm67_vm0, %v9904_v0, 0.0 }
0x1153   :  { %4459 = vadd.xlane.f32.xlu1 %v4458_v47 }
0x1157   :  { %v4444_v16 = vpop.f32.mrf.mxu3 }
0x1158   :  { %v9908_v60 = vadd.f32 %v4444_v16, %v4414_v51 }
0x115a   :  { %v4461_v57 = vsel %vm193_vm1, %v9908_v60, 0.0 }
0x115b   :  { %4462 = vadd.xlane.f32.xlu0 %v4461_v57 }
0x1188   :  { %v4451_v23 = vpop.xlane.xlu1 %4450 }
0x1189   :  { %v4464_v50 = vmul.f32 %v4451_v23, %v7699_v39  ;;  %v9949_v23 = vld [vmem:[#allocation4 + $0x17] ss:$0 sm:$0xff] }
0x118b   :  { %v9914_v8 = vsub.f32 %v9892_v41, %v4464_v50 }
0x118d   :  { %v4474_v9 = vmul.f32 %v9914_v8, %v9914_v8 }
0x118f   :  { %v4479_v26 = vsel %vm67_vm0, %v4474_v9, 0.0 }
0x1190   :  { %4480 = vadd.xlane.f32.xlu2 %v4479_v26  ;;  %v9952_v26 = vld [vmem:[#allocation4 + $0x20] ss:$0 sm:$0xff] }
0x1192   :  { %v4454_v17 = vpop.xlane.xlu0 %4453 }
0x1193   :  { %v4465_v37 = vmul.f32 %v4454_v17, %v7699_v39 }
0x1195   :  { %v9921_v40 = vsub.f32 %v9896_v22, %v4465_v37 }
0x1197   :  { %v4475_v21 = vmul.f32 %v9921_v40, %v9921_v40 }
0x1199   :  { %v4482_v11 = vsel %vm67_vm0, %v4475_v21, 0.0 }
0x119a   :  { %4483 = vadd.xlane.f32.xlu1 %v4482_v11 }
0x11bd   :  { %v4457_v44 = vpop.xlane.xlu2 %4456 }
0x11be   :  { %v4466_v13 = vmul.f32 %v4457_v44, %v7699_v39 }
0x11c0   :  { %v9928_v18 = vsub.f32 %v9900_v3, %v4466_v13 }
0x11c2   :  { %v4476_v45 = vmul.f32 %v9928_v18, %v9928_v18 }
0x11c4   :  { %v4485_v19 = vsel %vm67_vm0, %v4476_v45, 0.0 }
0x11c5   :  { %4486 = vadd.xlane.f32.xlu0 %v4485_v19 }
0x11c6   :  { %v4460_v5 = vpop.xlane.xlu1 %4459 }
0x11c7   :  { %v4467_v53 = vmul.f32 %v4460_v5, %v7699_v39 }
0x11c9   :  { %v9935_v46 = vsub.f32 %v9904_v0, %v4467_v53 }
0x11cb   :  { %v4477_v62 = vmul.f32 %v9935_v46, %v9935_v46 }
0x11cd   :  { %v4488_v20 = vsel %vm67_vm0, %v4477_v62, 0.0 }
0x11ce   :  { %4489 = vadd.xlane.f32.xlu2 %v4488_v20  ;;  %v4463_v7 = vpop.xlane.xlu0 %4462 }
0x11cf   :  { %v4468_v10 = vmul.f32 %v4463_v7, %v7699_v39 }
0x11d1   :  { %v9942_v49 = vsub.f32 %v9908_v60, %v4468_v10 }
0x11d3   :  { %v4478_v61 = vmul.f32 %v9942_v49, %v9942_v49 }
0x11d5   :  { %v4491_v1 = vsel %vm193_vm1, %v4478_v61, 0.0 }
0x11d6   :  { %4492 = vadd.xlane.f32.xlu1 %v4491_v1 }
0x1203   :  { %v4481_v12 = vpop.xlane.xlu2 %4480 }
0x1204   :  { %v4494_v28 = vmul.f32 %v4481_v12, %v7699_v39 }
0x1206   :  { %v4499_v29 = vadd.f32 1e-05, %v4494_v28 }
0x1208   :  { %7396 = vrsqrt.f32 %v4499_v29  ;;  %vm4510_vm12 = vweird.f32 %v4499_v29 }
0x120d   :  { %v4484_v43 = vpop.xlane.xlu1 %4483 }
0x120e   :  { %v7397_v51 = vpop.eup %7396  ;;  %v4495_v55 = vmul.f32 %v4484_v43, %v7699_v39 }
0x120f   :  { %v4505_v59 = vmul.f32 %v7397_v51, %v4499_v29  ;;  %vm4511_vm13 = vweird.f32 %v7397_v51 }
0x1210   :  { %v4500_v16 = vadd.f32 1e-05, %v4495_v55  ;;  %vm4512_vm2 = vmor %vm4510_vm12, %vm4511_vm13 }
0x1211   :  { %v4506_v25 = vmul.f32 %v7397_v51, %v4505_v59 }
0x1212   :  { %7398 = vrsqrt.f32 %v4500_v16  ;;  %vm4520_vm15 = vweird.f32 %v4500_v16 }
0x1213   :  { %v4507_v36 = vmul.f32 0.5, %v4506_v25 }
0x1215   :  { %v4508_v47 = vsub.f32 1.5, %v4507_v36 }
0x1217   :  { %v4509_v57 = vmul.f32 %v7397_v51, %v4508_v47 }
0x1218   :  { %v7399_v37 = vpop.eup %7398 }
0x1219   :  { %v4513_v50 = vsel %vm4512_vm2, %v7397_v51, %v4509_v57  ;;  %v4515_v11 = vmul.f32 %v7399_v37, %v4500_v16  ;;  %vm4521_vm14 = vweird.f32 %v7399_v37 }
0x121a   :  { %v4554_v9 = vmul.f32 %v4513_v50, %v9914_v8  ;;  %vm4522_vm9 = vmor %vm4520_vm15, %vm4521_vm14 }
0x121b   :  { %v4516_v44 = vmul.f32 %v7399_v37, %v4515_v11 }
0x121c   :  { %v4559_v17 = vmul.f32 %v4554_v9, %v9949_v23 }
0x121d   :  { %v4517_v13 = vmul.f32 0.5, %v4516_v44 }
0x121e   :  { %v4564_v21 = vadd.f32 %v4559_v17, %v9952_v26 }
0x121f   :  { %v4518_v45 = vsub.f32 1.5, %v4517_v13 }
0x1220   :  { %6914 = vmatmul.msk.f32.vlgmr.msra.gmra.mxu0 %vm67_vm0, %v4564_v21  ;;  %6919 = vmatmul.msk.f32.vlgmr.msra.gmra.mxu1 %vm67_vm0, %v4564_v21 }
0x1221   :  { %v4519_v19 = vmul.f32 %v7399_v37, %v4518_v45 }
0x1223   :  { %v4523_v8 = vsel %vm4522_vm9, %v7399_v37, %v4519_v19 }
0x1224   :  { %v4555_v5 = vmul.f32 %v4523_v8, %v9921_v40 }
0x1226   :  { %v4560_v53 = vmul.f32 %v4555_v5, %v9949_v23 }
0x1228   :  { %v4565_v62 = vadd.f32 %v4560_v53, %v9952_v26 }
0x122a   :  { %6915 = vmatmul.msk.f32.gmra.mxu0 %vm67_vm0, %v4565_v62  ;;  %6920 = vmatmul.msk.f32.gmra.mxu1 %vm67_vm0, %v4565_v62 }
0x1238   :  { %v4487_v20 = vpop.xlane.xlu0 %4486 }
0x1239   :  { %v4496_v7 = vmul.f32 %v4487_v20, %v7699_v39 }
0x123b   :  { %v4501_v10 = vadd.f32 1e-05, %v4496_v7 }
0x123d   :  { %7400 = vrsqrt.f32 %v4501_v10  ;;  %vm4530_vm10 = vweird.f32 %v4501_v10 }
0x1241   :  { %v4490_v61 = vpop.xlane.xlu2 %4489 }
0x1242   :  { %v4497_v1 = vmul.f32 %v4490_v61, %v7699_v39 }
0x1243   :  { %v7401_v27 = vpop.eup %7400 }
0x1244   :  { %v4502_v30 = vadd.f32 1e-05, %v4497_v1  ;;  %v4525_v12 = vmul.f32 %v7401_v27, %v4501_v10  ;;  %vm4531_vm11 = vweird.f32 %v7401_v27 }
0x1245   :  { %vm4532_vm13 = vmor %vm4530_vm10, %vm4531_vm11 }
0x1246   :  { %7402 = vrsqrt.f32 %v4502_v30  ;;  %v4526_v40 = vmul.f32 %v7401_v27, %v4525_v12  ;;  %vm4540_vm2 = vweird.f32 %v4502_v30 }
0x1248   :  { %v4527_v28 = vmul.f32 0.5, %v4526_v40 }
0x1249   :  { %v4493_v2 = vpop.xlane.xlu1 %4492 }
0x124a   :  { %v4528_v34 = vsub.f32 1.5, %v4527_v28  ;;  %v4498_v29 = vmul.f32 %v4493_v2, %v7699_v39 }
0x124c   :  { %v7403_v24 = vpop.eup %7402  ;;  %v4529_v52 = vmul.f32 %v7401_v27, %v4528_v34  ;;  %v4503_v31 = vadd.f32 1e-05, %v4498_v29 }
0x124d   :  { %v4535_v33 = vmul.f32 %v7403_v24, %v4502_v30  ;;  %vm4541_vm12 = vweird.f32 %v7403_v24 }
0x124e   :  { %v4533_v35 = vsel %vm4532_vm13, %v7401_v27, %v4529_v52  ;;  %7404 = vrsqrt.f32 %v4503_v31  ;;  %vm4542_vm14 = vmor %vm4540_vm2, %vm4541_vm12  ;;  %vm4550_vm9 = vweird.f32 %v4503_v31 }
0x124f   :  { %v4536_v14 = vmul.f32 %v7403_v24, %v4535_v33  ;;  %v4556_v15 = vmul.f32 %v4533_v35, %v9928_v18 }
0x1251   :  { %v4537_v38 = vmul.f32 0.5, %v4536_v14  ;;  %v4561_v4 = vmul.f32 %v4556_v15, %v9949_v23 }
0x1253   :  { %v4538_v42 = vsub.f32 1.5, %v4537_v38  ;;  %v4566_v51 = vadd.f32 %v4561_v4, %v9952_v26 }
0x1254   :  { %v7405_v48 = vpop.eup %7404 }
0x1255   :  { %v4539_v56 = vmul.f32 %v7403_v24, %v4538_v42  ;;  %v4545_v59 = vmul.f32 %v7405_v48, %v4503_v31  ;;  %6916 = vmatmul.msk.f32.gmra.mxu0 %vm67_vm0, %v4566_v51  ;;  %6921 = vmatmul.msk.f32.gmra.mxu1 %vm67_vm0, %v4566_v51  ;;  %vm4551_vm15 = vweird.f32 %v7405_v48 }
0x1256   :  { %vm4552_vm11 = vmor %vm4550_vm9, %vm4551_vm15 }
0x1257   :  { %v4543_v25 = vsel %vm4542_vm14, %v7403_v24, %v4539_v56  ;;  %v4546_v18 = vmul.f32 %v7405_v48, %v4545_v59 }
0x1258   :  { %v4557_v43 = vmul.f32 %v4543_v25, %v9935_v46 }
0x1259   :  { %v4547_v36 = vmul.f32 0.5, %v4546_v18 }
0x125a   :  { %v4562_v55 = vmul.f32 %v4557_v43, %v9949_v23 }
0x125b   :  { %v4548_v47 = vsub.f32 1.5, %v4547_v36 }
0x125c   :  { %v4567_v16 = vadd.f32 %v4562_v55, %v9952_v26 }
0x125d   :  { %v4549_v57 = vmul.f32 %v7405_v48, %v4548_v47 }
0x125e   :  { %6917 = vmatmul.msk.f32.gmra.mxu0 %vm67_vm0, %v4567_v16  ;;  %6922 = vmatmul.msk.f32.gmra.mxu1 %vm67_vm0, %v4567_v16 }
0x125f   :  { %v4553_v50 = vsel %vm4552_vm11, %v7405_v48, %v4549_v57 }
0x1260   :  { %v4558_v9 = vmul.f32 %v4553_v50, %v9942_v49 }
0x1262   :  { %v4563_v46 = vmul.f32 %v4558_v9, %v9949_v23 }
0x1264   :  { %v4568_v17 = vadd.f32 %v4563_v46, %v9952_v26 }
0x1266   :  { %6918 = vmatmul.msk.f32.gmra.mxu0 %vm67_vm0, %v4568_v17  ;;  %6923 = vmatmul.msk.f32.gmra.mxu1 %vm67_vm0, %v4568_v17 }
0x129d   :  { %v9981_v37 = vpop.f32.mrf.mxu0  ;;  %v4649_v21 = vpop.f32.mrf.mxu1 }
0x12a7   :  { %v9983_v11 = vpop.f32.mrf.mxu0  ;;  %v4652_v44 = vpop.f32.mrf.mxu1 }
0x12a8   :  { %v10074_v7 = vpack.i.bf16 %v4649_v21, %v4652_v44 }
0x12d2   :  { %v9985_v13 = vpop.f32.mrf.mxu0  ;;  %v4655_v45 = vpop.f32.mrf.mxu1 }
0x12d3   :  { %4673 = vrot.lane.b32.xlu1 %v9985_v13, %s7604_s18 }
0x12db   :  { %v9989_v49 = vpop.f32.mrf.mxu0  ;;  %v4658_v23 = vpop.f32.mrf.mxu1 }
0x12dc   :  { %v9991_v26 = vpack.i.bf16 %v4655_v45, %v4658_v23  ;;  %4917 = vrot.lane.b32.xlu1 %v9989_v49, %s7603_s1  ;;  %4675 = vrot.lane.b32.xlu2 %v9989_v49, %s7604_s18 }
0x12e3   :  { %v9997_v19 = vpop.f32.mrf.mxu0  ;;  %v9999_v8 = vpop.f32.mrf.mxu1 }
0x12e4   :  { %4911 = vrot.lane.b32.xlu1 %v9981_v37, %s7603_s1  ;;  %6934 = vmatpush.msk.msra.mxu3 %vm609_vm4, %v9999_v8 }
0x12e5   :  { %4919 = vrot.lane.b32.xlu2 %v9997_v19, %s7603_s1  ;;  %4677 = vrot.lane.b32.xlu0 %v9997_v19, %s7604_s18 }
0x12e6   :  { %4881 = vmatpush.msra.mxu3 %v4658_v23 }
0x12e8   :  { %4882 = vmatpush.msra.mxu3 %v4655_v45 }
0x12ea   :  { %4883 = vmatpush.msra.mxu3 %v4652_v44 }
0x12ec   :  { %5174 = vrot.lane.b32.xlu1 %v9985_v13, %s7606_s20  ;;  %4884 = vmatpush.msra.mxu3 %v4649_v21 }
0x12ed   :  { %4915 = vrot.lane.b32.xlu2 %v9985_v13, %s7603_s1  ;;  %4671 = vrot.lane.b32.xlu0 %v9983_v11, %s7604_s18 }
0x12f4   :  { %5178 = vrot.lane.b32.xlu1 %v9997_v19, %s7606_s20 }
0x12f5   :  { %4901 = vrot.lane.b32.xlu2 %v9981_v37, %s7605_s19  ;;  %4669 = vrot.lane.b32.xlu0 %v9981_v37, %s7604_s18 }
0x12fc   :  { %4907 = vrot.lane.b32.xlu1 %v9989_v49, %s7605_s19 }
0x12fd   :  { %5176 = vrot.lane.b32.xlu2 %v9989_v49, %s7606_s20  ;;  %4913 = vrot.lane.b32.xlu0 %v9983_v11, %s7603_s1 }
0x1304   :  { %5160 = vrot.lane.b32.xlu1 %v9981_v37, %s7608_s22 }
0x1305   :  { %5172 = vrot.lane.b32.xlu2 %v9983_v11, %s7606_s20  ;;  %4903 = vrot.lane.b32.xlu0 %v9983_v11, %s7605_s19 }
0x130c   :  { %5427 = vrot.lane.b32.xlu1 %v9983_v11, %s7600_s24 }
0x130d   :  { %5170 = vrot.lane.b32.xlu2 %v9981_v37, %s7606_s20  ;;  %4905 = vrot.lane.b32.xlu0 %v9985_v13, %s7605_s19 }
0x1314   :  { %5415 = vrot.lane.b32.xlu1 %v9981_v37, %s7607_s21 }
0x1315   :  { %5429 = vrot.lane.b32.xlu2 %v9985_v13, %s7600_s24  ;;  %5431 = vrot.lane.b32.xlu0 %v9989_v49, %s7600_s24 }
0x131c   :  { %5166 = vrot.lane.b32.xlu1 %v9989_v49, %s7608_s22 }
0x131d   :  { %5162 = vrot.lane.b32.xlu2 %v9983_v11, %s7608_s22  ;;  %5433 = vrot.lane.b32.xlu0 %v9997_v19, %s7600_s24 }
0x1324   :  { %5421 = vrot.lane.b32.xlu1 %v9989_v49, %s7607_s21 }
0x1325   :  { %5164 = vrot.lane.b32.xlu2 %v9985_v13, %s7608_s22  ;;  %4909 = vrot.lane.b32.xlu0 %v9997_v19, %s7605_s19 }
0x132c   :  { %5105 = vrot.lane.b32.xlu1 %v9999_v8, %s7605_s19 }
0x132d   :  { %5419 = vrot.lane.b32.xlu2 %v9985_v13, %s7607_s21  ;;  %5425 = vrot.lane.b32.xlu0 %v9981_v37, %s7600_s24 }
0x1335   :  { %5423 = vrot.lane.b32.xlu2 %v9997_v19, %s7607_s21  ;;  %5417 = vrot.lane.b32.xlu0 %v9983_v11, %s7607_s21 }
0x1336   :  { %v4676_v5 = vpop.permute.xlu2 %4675 }
0x133d   :  { %5360 = vrot.lane.b32.xlu2 %v9999_v8, %s7608_s22  ;;  %5168 = vrot.lane.b32.xlu0 %v9997_v19, %s7608_s22 }
0x133f   :  { %v4920_v53 = vpop.permute.xlu2 %4919 }
0x1340   :  { %6940 = vmatpush.xpose.msk.msrb.mxu0 %vm419_vm5, %v4920_v53 }
0x1345   :  { %7085 = vrot.lane.b32.xlu0 %v9991_v26, %s7605_s19  ;;  %v4674_v62 = vpop.permute.xlu1 %4673 }
0x1347   :  { %v4916_v20 = vpop.permute.xlu2 %4915 }
0x134d   :  { %7090 = vrot.lane.b32.xlu0 %v10074_v7, %s7605_s19 }
0x134e   :  { %v4918_v10 = vpop.permute.xlu1 %4917 }
0x134f   :  { %v4902_v61 = vpop.permute.xlu2 %4901  ;;  %6941 = vmatpush.xpose.msk.msrb.mxu0 %vm419_vm5, %v4918_v10 }
0x1353   :  { %6942 = vmatpush.xpose.msk.msrb.mxu0 %vm419_vm5, %v4916_v20 }
0x1356   :  { %v4912_v1 = vpop.permute.xlu1 %4911 }
0x1357   :  { %v5177_v27 = vpop.permute.xlu2 %5176  ;;  %v4678_v30 = vpop.permute.xlu0 %4677 }
0x1358   :  { %6924 = vmatpush.xpose.msk.msra.mxu2 %vm419_vm5, %v4678_v30 }
0x135c   :  { %6925 = vmatpush.xpose.msk.msra.mxu2 %vm419_vm5, %v4676_v5 }
0x135e   :  { %v5175_v12 = vpop.permute.xlu1 %5174 }
0x135f   :  { %v5173_v40 = vpop.permute.xlu2 %5172  ;;  %v4672_v28 = vpop.permute.xlu0 %4671 }
0x1360   :  { %6926 = vmatpush.xpose.msk.msra.mxu2 %vm419_vm5, %v4674_v62 }
0x1364   :  { %6927 = vmatpush.xpose.msk.msra.mxu2 %vm419_vm5, %v4672_v28 }
0x1366   :  { %v5179_v2 = vpop.permute.xlu1 %5178 }
0x1367   :  { %v5171_v34 = vpop.permute.xlu2 %5170  ;;  %v4670_v29 = vpop.permute.xlu0 %4669 }
0x1368   :  { %6928 = vmatpush.xpose.msk.msra.mxu2 %vm419_vm5, %v4670_v29 }
0x136b   :  { %6929 = vmatmul.msk.f32.vlgmr.msra.gmra.mxu2 %vm419_vm5, %v9981_v37 }
0x136c   :  { %6956 = vmatpush.xpose.msk.msrb.mxu2 %vm419_vm5, %v5179_v2 }
0x136e   :  { %v4908_v24 = vpop.permute.xlu1 %4907 }
0x136f   :  { %v5430_v52 = vpop.permute.xlu2 %5429  ;;  %v4914_v33 = vpop.permute.xlu0 %4913 }
0x1370   :  { %6957 = vmatpush.xpose.msk.msrb.mxu2 %vm419_vm5, %v5177_v27  ;;  %6943 = vmatpush.xpose.msk.msrb.mxu0 %vm419_vm5, %v4914_v33 }
0x1373   :  { %6930 = vmatmul.msk.f32.gmra.mxu2 %vm419_vm5, %v9983_v11 }
0x1374   :  { %6958 = vmatpush.xpose.msk.msrb.mxu2 %vm419_vm5, %v5175_v12  ;;  %6944 = vmatpush.xpose.msk.msrb.mxu0 %vm419_vm5, %v4912_v1 }
0x1376   :  { %v5161_v31 = vpop.permute.xlu1 %5160 }
0x1377   :  { %v5163_v35 = vpop.permute.xlu2 %5162  ;;  %v4904_v14 = vpop.permute.xlu0 %4903  ;;  %6945 = vmatmul.msk.f32.vlgmr.msrb.gmra.mxu0 %vm419_vm5, %v4902_v61 }
0x1378   :  { %6959 = vmatpush.xpose.msk.msrb.mxu2 %vm419_vm5, %v5173_v40 }
0x137b   :  { %6931 = vmatmul.msk.f32.gmra.mxu2 %vm419_vm5, %v9985_v13 }
0x137c   :  { %6960 = vmatpush.xpose.msk.msrb.mxu2 %vm419_vm5, %v5171_v34 }
0x137e   :  { %v5428_v15 = vpop.permute.xlu1 %5427 }
0x137f   :  { %v5165_v38 = vpop.permute.xlu2 %5164  ;;  %v4906_v4 = vpop.permute.xlu0 %4905  ;;  %6946 = vmatmul.msk.f32.gmra.mxu0 %vm419_vm5, %v4904_v14 }
0x1383   :  { %6932 = vmatmul.msk.f32.gmra.mxu2 %vm419_vm5, %v9989_v49 }
0x1386   :  { %v5416_v42 = vpop.permute.xlu1 %5415 }
0x1387   :  { %v5420_v51 = vpop.permute.xlu2 %5419  ;;  %v5432_v48 = vpop.permute.xlu0 %5431  ;;  %6947 = vmatmul.msk.f32.gmra.mxu0 %vm419_vm5, %v4906_v4 }
0x138b   :  { %6933 = vmatmul.msk.f32.gmra.mxu2 %vm419_vm5, %v9997_v19 }
0x138e   :  { %v5167_v56 = vpop.permute.xlu1 %5166 }
0x138f   :  { %v5424_v59 = vpop.permute.xlu2 %5423  ;;  %v5434_v25 = vpop.permute.xlu0 %5433  ;;  %6948 = vmatmul.msk.f32.gmra.mxu0 %vm419_vm5, %v4908_v24 }
0x1390   :  { %6972 = vmatpush.xpose.msk.msra.mxu0 %vm419_vm5, %v5434_v25 }
0x1393   :  { %6961 = vmatmul.msk.f32.vlgmr.msrb.gmra.mxu2 %vm419_vm5, %v5161_v31 }
0x1394   :  { %6973 = vmatpush.xpose.msk.msra.mxu0 %vm419_vm5, %v5432_v48 }
0x1396   :  { %v5422_v43 = vpop.permute.xlu1 %5421 }
0x1397   :  { %v5361_v18 = vpop.permute.xlu2 %5360  ;;  %v4910_v36 = vpop.permute.xlu0 %4909 }
0x1398   :  { %6966 = vmatpush.msk.msrb.mxu3 %vm609_vm4, %v5361_v18  ;;  %6949 = vmatmul.msk.f32.gmra.mxu0 %vm419_vm5, %v4910_v36 }
0x1399   :  { %6974 = vmatpush.xpose.msk.msra.mxu0 %vm419_vm5, %v5430_v52 }
0x139b   :  { %6962 = vmatmul.msk.f32.gmra.mxu2 %vm419_vm5, %v5163_v35 }
0x139d   :  { %6975 = vmatpush.xpose.msk.msra.mxu0 %vm419_vm5, %v5428_v15 }
0x139e   :  { %v5106_v55 = vpop.permute.xlu1 %5105 }
0x139f   :  { %6950 = vmatpush.msk.msrb.mxu1 %vm609_vm4, %v5106_v55  ;;  %v5426_v47 = vpop.permute.xlu0 %5425 }
0x13a1   :  { %6976 = vmatpush.xpose.msk.msra.mxu0 %vm419_vm5, %v5426_v47 }
0x13a3   :  { %6963 = vmatmul.msk.f32.gmra.mxu2 %vm419_vm5, %v5165_v38 }
0x13a4   :  { %6977 = vmatmul.msk.f32.vlgmr.msra.gmra.mxu0 %vm419_vm5, %v5416_v42 }
0x13a7   :  { %v5418_v16 = vpop.permute.xlu0 %5417 }
0x13ab   :  { %6964 = vmatmul.msk.f32.gmra.mxu2 %vm419_vm5, %v5167_v56 }
0x13ac   :  { %6978 = vmatmul.msk.f32.gmra.mxu0 %vm419_vm5, %v5418_v16 }
0x13af   :  { %v5169_v57 = vpop.permute.xlu0 %5168 }
0x13b3   :  { %6965 = vmatmul.msk.f32.gmra.mxu2 %vm419_vm5, %v5169_v57 }
0x13b4   :  { %6979 = vmatmul.msk.f32.gmra.mxu0 %vm419_vm5, %v5420_v51 }
0x13b7   :  { %v7086_v50 = vpop.permute.xlu0 %7085 }
0x13b8   :  { %v7087_v9 = vunpack.i.l.bf16 %v7086_v50  ;;  %v7088_v46 = vunpack.i.h.bf16 %v7086_v50 }
0x13ba   :  { %5140 = vmatpush.msrb.mxu1 %v7087_v9 }
0x13bc   :  { %6980 = vmatmul.msk.f32.gmra.mxu0 %vm419_vm5, %v5422_v43  ;;  %5141 = vmatpush.msrb.mxu1 %v7088_v46 }
0x13bf   :  { %v7091_v17 = vpop.permute.xlu0 %7090 }
0x13c0   :  { %v7092_v37 = vunpack.i.l.bf16 %v7091_v17  ;;  %v7093_v21 = vunpack.i.h.bf16 %v7091_v17 }
0x13c2   :  { %5142 = vmatpush.msrb.mxu1 %v7092_v37 }
0x13c4   :  { %6981 = vmatmul.msk.f32.gmra.mxu0 %vm419_vm5, %v5424_v59  ;;  %5143 = vmatpush.msrb.mxu1 %v7093_v21 }
0x13ee   :  { %v4716_v11 = vpop.f32.mrf.mxu2 }
0x13ef   :  { %v10125_v44 = vadd.f32 %v4716_v11, %v7911_v32 }
0x13f1   :  { %v4731_v13 = vsel %vm472_vm7, %v10125_v44, -inf }
0x13f2   :  { %4732 = vmax.xlane.f32.xlu0 %v4731_v13 }
0x13f4   :  { %v4958_v45 = vpop.f32.mrf.mxu0 }
0x13f5   :  { %v10130_v49 = vadd.f32 %v4958_v45, %v7911_v32 }
0x13f6   :  { %v4719_v23 = vpop.f32.mrf.mxu2 }
0x13f7   :  { %v10133_v19 = vadd.f32 %v4719_v23, %v7911_v32  ;;  %v4973_v5 = vsel %vm472_vm7, %v10130_v49, -inf }
0x13f8   :  { %4974 = vmax.xlane.f32.xlu1 %v4973_v5 }
0x13f9   :  { %v4734_v53 = vsel %vm472_vm7, %v10133_v19, -inf }
0x13fa   :  { %4735 = vmax.xlane.f32.xlu2 %v4734_v53 }
0x13fc   :  { %v4961_v62 = vpop.f32.mrf.mxu0 }
0x13fd   :  { %v10140_v20 = vadd.f32 %v4961_v62, %v7911_v32 }
0x13fe   :  { %v4722_v10 = vpop.f32.mrf.mxu2 }
0x13ff   :  { %v10143_v61 = vadd.f32 %v4722_v10, %v7940_v54  ;;  %v4976_v1 = vsel %vm472_vm7, %v10140_v20, -inf }
0x1400   :  { %4977 = vmax.xlane.f32.xlu0 %v4976_v1 }
0x1401   :  { %v4737_v27 = vsel %vm472_vm7, %v10143_v61, -inf }
0x1402   :  { %4738 = vmax.xlane.f32.xlu1 %v4737_v27 }
0x1404   :  { %v4964_v30 = vpop.f32.mrf.mxu0 }
0x1405   :  { %v10150_v12 = vadd.f32 %v4964_v30, %v7940_v54 }
0x1406   :  { %v4725_v40 = vpop.f32.mrf.mxu2 }
0x1407   :  { %v10153_v28 = vadd.f32 %v4725_v40, %v7954_v63  ;;  %v4979_v2 = vsel %vm472_vm7, %v10150_v12, -inf }
0x1408   :  { %4980 = vmax.xlane.f32.xlu2 %v4979_v2 }
0x1409   :  { %v4740_v34 = vsel %vm472_vm7, %v10153_v28, -inf }
0x140a   :  { %4741 = vmax.xlane.f32.xlu0 %v4740_v34 }
0x140c   :  { %v4967_v29 = vpop.f32.mrf.mxu0 }
0x140d   :  { %v10160_v24 = vadd.f32 %v4967_v29, %v7954_v63 }
0x140e   :  { %v4728_v52 = vpop.f32.mrf.mxu2 }
0x140f   :  { %v10163_v33 = vadd.f32 %v4728_v52, %v7968_v6  ;;  %v4982_v31 = vsel %vm472_vm7, %v10160_v24, -inf }
0x1410   :  { %4983 = vmax.xlane.f32.xlu1 %v4982_v31 }
0x1411   :  { %v4743_v35 = vsel %vm485_vm3, %v10163_v33, -inf }
0x1412   :  { %4744 = vmax.xlane.f32.xlu2 %v4743_v35 }
0x1415   :  { %v4970_v14 = vpop.f32.mrf.mxu0 }
0x1416   :  { %v10170_v15 = vadd.f32 %v4970_v14, %v7968_v6  ;;  %v5217_v38 = vpop.f32.mrf.mxu2 }
0x1417   :  { %v10173_v4 = vadd.f32 %v5217_v38, %v7911_v32 }
0x1418   :  { %v4985_v42 = vsel %vm485_vm3, %v10170_v15, -inf }
0x1419   :  { %4986 = vmax.xlane.f32.xlu0 %v4985_v42  ;;  %v5232_v51 = vsel %vm472_vm7, %v10173_v4, -inf }
0x141a   :  { %5233 = vmax.xlane.f32.xlu1 %v5232_v51 }
0x141e   :  { %v5220_v48 = vpop.f32.mrf.mxu2 }
0x141f   :  { %v10180_v56 = vadd.f32 %v5220_v48, %v7911_v32 }
0x1421   :  { %v5472_v59 = vpop.f32.mrf.mxu0  ;;  %v5235_v25 = vsel %vm472_vm7, %v10180_v56, -inf }
0x1422   :  { %v10185_v43 = vadd.f32 %v5472_v59, %v7911_v32  ;;  %5236 = vmax.xlane.f32.xlu0 %v5235_v25 }
0x1424   :  { %v5487_v18 = vsel %vm472_vm7, %v10185_v43, -inf }
0x1425   :  { %5488 = vmax.xlane.f32.xlu2 %v5487_v18 }
0x1426   :  { %v5223_v36 = vpop.f32.mrf.mxu2 }
0x1427   :  { %v10205_v37 = vadd.f32 %v5223_v36, %v7940_v54 }
0x1429   :  { %v5475_v55 = vpop.f32.mrf.mxu0  ;;  %v5238_v13 = vsel %vm472_vm7, %v10205_v37, -inf }
0x142a   :  { %v10190_v47 = vadd.f32 %v5475_v55, %v7911_v32 }
0x142c   :  { %v5490_v16 = vsel %vm472_vm7, %v10190_v47, -inf }
0x142d   :  { %5491 = vmax.xlane.f32.xlu2 %v5490_v16 }
0x142e   :  { %v5226_v57 = vpop.f32.mrf.mxu2 }
0x142f   :  { %v10195_v50 = vadd.f32 %v5226_v57, %v7954_v63 }
0x1431   :  { %v5478_v9 = vpop.f32.mrf.mxu0  ;;  %v5241_v46 = vsel %vm472_vm7, %v10195_v50, -inf }
0x1432   :  { %v10200_v17 = vadd.f32 %v5478_v9, %v7940_v54  ;;  %5242 = vmax.xlane.f32.xlu1 %v5241_v46 }
0x1434   :  { %v5493_v32 = vsel %vm472_vm7, %v10200_v17, -inf }
0x1435   :  { %5494 = vmax.xlane.f32.xlu0 %v5493_v32 }
0x1436   :  { %v5229_v53 = vpop.f32.mrf.mxu2 }
0x1439   :  { %v5481_v21 = vpop.f32.mrf.mxu0 }
0x143a   :  { %v10208_v11 = vadd.f32 %v5481_v21, %v7954_v63  ;;  %v10220_v63 = vadd.f32 %v5229_v53, %v7968_v6 }
0x143c   :  { %v5496_v45 = vsel %vm472_vm7, %v10208_v11, -inf  ;;  %v5244_v62 = vsel %vm485_vm3, %v10220_v63, -inf }
0x143d   :  { %5239 = vmax.xlane.f32.xlu0 %v5238_v13  ;;  %5497 = vmax.xlane.f32.xlu2 %v5496_v45 }
0x1441   :  { %v5484_v23 = vpop.f32.mrf.mxu0 }
0x1442   :  { %v10215_v5 = vadd.f32 %v5484_v23, %v7968_v6 }
0x1444   :  { %v5499_v54 = vsel %vm485_vm3, %v10215_v5, -inf }
0x1445   :  { %5500 = vmax.xlane.f32.xlu2 %v5499_v54 }
0x144d   :  { %5245 = vmax.xlane.f32.xlu2 %v5244_v62 }
0x1465   :  { %v4733_v10 = vpop.xlane.xlu0 %4732 }
0x1466   :  { %v4746_v30 = vsub.f32 %v10125_v44, %v4733_v10 }
0x1468   :  { %v4751_v2 = vmul.f32 1.442695, %v4746_v30 }
0x146b   :  { %v4975_v1 = vpop.xlane.xlu1 %4974 }
0x146c   :  { %v4988_v27 = vsub.f32 %v10130_v49, %v4975_v1 }
0x146d   :  { %v4736_v34 = vpop.xlane.xlu2 %4735 }
0x146e   :  { %v4993_v40 = vmul.f32 1.442695, %v4988_v27  ;;  %v4747_v35 = vsub.f32 %v10133_v19, %v4736_v34 }
0x1470   :  { %7406 = vpow2.f32 %v4993_v40  ;;  %v4753_v42 = vmul.f32 1.442695, %v4747_v35 }
0x1471   :  { %7408 = vpow2.f32 %v4751_v2 }
0x1473   :  { %v4978_v29 = vpop.xlane.xlu0 %4977 }
0x1474   :  { %v4989_v52 = vsub.f32 %v10140_v20, %v4978_v29 }
0x1475   :  { %v4739_v31 = vpop.xlane.xlu1 %4738 }
0x1476   :  { %v10227_v6 = vpop.eup %7406  ;;  %v4995_v14 = vmul.f32 1.442695, %v4989_v52  ;;  %v4748_v38 = vsub.f32 %v10143_v61, %v4739_v31 }
0x1477   :  { %v5003_v49 = vsel %vm472_vm7, %v10227_v6, 0.0  ;;  %v10233_v48 = vpop.eup %7408 }
0x1478   :  { %7410 = vpow2.f32 %v4995_v14  ;;  %v4755_v44 = vmul.f32 1.442695, %v4748_v38  ;;  %5004 = vadd.xlane.f32.xlu1 %v5003_v49  ;;  %v4761_v18 = vsel %vm472_vm7, %v10233_v48, 0.0 }
0x147a   :  { %7412 = vpow2.f32 %v4755_v44 }
0x147b   :  { %v4981_v51 = vpop.xlane.xlu2 %4980  ;;  %7414 = vpow2.f32 %v4753_v42 }
0x147c   :  { %v4990_v19 = vsub.f32 %v10150_v12, %v4981_v51 }
0x147d   :  { %v4742_v20 = vpop.xlane.xlu0 %4741 }
0x147e   :  { %v10235_v59 = vpop.eup %7410  ;;  %v4749_v25 = vsub.f32 %v10153_v28, %v4742_v20  ;;  %v4997_v57 = vmul.f32 1.442695, %v4990_v19 }
0x147f   :  { %v5006_v61 = vsel %vm472_vm7, %v10235_v59, 0.0 }
0x1480   :  { %v10243_v36 = vpop.eup %7412  ;;  %v4757_v55 = vmul.f32 1.442695, %v4749_v25  ;;  %5007 = vadd.xlane.f32.xlu2 %v5006_v61  ;;  %4762 = vadd.xlane.f32.xlu1 %v4761_v18 }
0x1481   :  { %v4767_v16 = vsel %vm472_vm7, %v10243_v36, 0.0  ;;  %v10247_v9 = vpop.eup %7414 }
0x1482   :  { %7416 = vpow2.f32 %v4757_v55  ;;  %4768 = vadd.xlane.f32.xlu0 %v4767_v16  ;;  %v4764_v32 = vsel %vm472_vm7, %v10247_v9, 0.0 }
0x1483   :  { %v4984_v12 = vpop.xlane.xlu1 %4983  ;;  %7418 = vpow2.f32 %v4997_v57 }
0x1484   :  { %v4991_v28 = vsub.f32 %v10160_v24, %v4984_v12 }
0x1485   :  { %v4745_v23 = vpop.xlane.xlu2 %4744 }
0x1486   :  { %v4999_v46 = vmul.f32 1.442695, %v4991_v28  ;;  %v4750_v62 = vsub.f32 %v10163_v33, %v4745_v23 }
0x1488   :  { %v10252_v21 = vpop.eup %7416  ;;  %7420 = vpow2.f32 %v4999_v46  ;;  %4765 = vadd.xlane.f32.xlu2 %v4764_v32  ;;  %v4759_v30 = vmul.f32 1.442695, %v4750_v62 }
0x1489   :  { %v4770_v13 = vsel %vm472_vm7, %v10252_v21, 0.0  ;;  %v10256_v45 = vpop.eup %7418 }
0x148a   :  { %4771 = vadd.xlane.f32.xlu1 %v4770_v13  ;;  %v5009_v1 = vsel %vm472_vm7, %v10256_v45, 0.0 }
0x148c   :  { %v4987_v54 = vpop.xlane.xlu0 %4986 }
0x148d   :  { %v4992_v53 = vsub.f32 %v10170_v15, %v4987_v54  ;;  %v5234_v35 = vpop.xlane.xlu1 %5233 }
0x148e   :  { %v10259_v24 = vpop.eup %7420  ;;  %v5247_v38 = vsub.f32 %v10173_v4, %v5234_v35 }
0x148f   :  { %v5001_v10 = vmul.f32 1.442695, %v4992_v53  ;;  %v5012_v27 = vsel %vm472_vm7, %v10259_v24, 0.0 }
0x1490   :  { %5010 = vadd.xlane.f32.xlu2 %v5009_v1  ;;  %5013 = vadd.xlane.f32.xlu0 %v5012_v27  ;;  %v5252_v51 = vmul.f32 1.442695, %v5247_v38 }
0x1491   :  { %7422 = vpow2.f32 %v5001_v10 }
0x1492   :  { %7424 = vpow2.f32 %v4759_v30 }
0x1495   :  { %v5237_v40 = vpop.xlane.xlu0 %5236 }
0x1496   :  { %v5248_v2 = vsub.f32 %v10180_v56, %v5237_v40 }
0x1497   :  { %v10267_v34 = vpop.eup %7422 }
0x1498   :  { %v5254_v15 = vmul.f32 1.442695, %v5248_v2  ;;  %v5489_v29 = vpop.xlane.xlu2 %5488  ;;  %v5015_v33 = vsel %vm485_vm3, %v10267_v34, 0.0  ;;  %v10272_v14 = vpop.eup %7424 }
0x1499   :  { %v5502_v52 = vsub.f32 %v10185_v43, %v5489_v29  ;;  %5016 = vadd.xlane.f32.xlu2 %v5015_v33  ;;  %v4773_v44 = vsel %vm485_vm3, %v10272_v14, 0.0 }
0x149a   :  { %7426 = vpow2.f32 %v5254_v15 }
0x149b   :  { %v5507_v31 = vmul.f32 1.442695, %v5502_v52 }
0x149d   :  { %7428 = vpow2.f32 %v5507_v31 }
0x14a0   :  { %v10275_v56 = vpop.eup %7426  ;;  %v5492_v49 = vpop.xlane.xlu2 %5491 }
0x14a1   :  { %v5503_v42 = vsub.f32 %v10190_v47, %v5492_v49  ;;  %4774 = vadd.xlane.f32.xlu2 %v4773_v44  ;;  %v5265_v43 = vsel %vm472_vm7, %v10275_v56, 0.0 }
0x14a2   :  { %5266 = vadd.xlane.f32.xlu1 %v5265_v43 }
0x14a3   :  { %v5509_v20 = vmul.f32 1.442695, %v5503_v42  ;;  %v10282_v19 = vpop.eup %7428 }
0x14a4   :  { %v5517_v4 = vsel %vm472_vm7, %v10282_v19, 0.0 }
0x14a5   :  { %7430 = vpow2.f32 %v5509_v20  ;;  %v5243_v62 = vpop.xlane.xlu1 %5242 }
0x14a6   :  { %7432 = vpow2.f32 %v5252_v51  ;;  %v5250_v10 = vsub.f32 %v10195_v50, %v5243_v62 }
0x14a8   :  { %v5495_v16 = vpop.xlane.xlu0 %5494  ;;  %v5258_v27 = vmul.f32 1.442695, %v5250_v10 }
0x14a9   :  { %5518 = vadd.xlane.f32.xlu2 %v5517_v4  ;;  %v5504_v12 = vsub.f32 %v10200_v17, %v5495_v16 }
0x14ab   :  { %v10286_v25 = vpop.eup %7430  ;;  %v5511_v46 = vmul.f32 1.442695, %v5504_v12 }
0x14ac   :  { %v5520_v47 = vsel %vm472_vm7, %v10286_v25, 0.0  ;;  %v10290_v61 = vpop.eup %7432 }
0x14ad   :  { %5521 = vadd.xlane.f32.xlu0 %v5520_v47  ;;  %v5262_v18 = vsel %vm472_vm7, %v10290_v61, 0.0  ;;  %7434 = vpow2.f32 %v5511_v46 }
0x14b0   :  { %v10298_v55 = vpop.xlane.xlu2 %5497  ;;  %v5240_v28 = vpop.xlane.xlu0 %5239 }
0x14b1   :  { %5263 = vadd.xlane.f32.xlu2 %v5262_v18  ;;  %v5249_v13 = vsub.f32 %v10205_v37, %v5240_v28 }
0x14b3   :  { %v5256_v23 = vmul.f32 1.442695, %v5249_v13  ;;  %v10307_v53 = vpop.eup %7434 }
0x14b5   :  { %7436 = vpow2.f32 %v5256_v23 }
0x14b8   :  { %v5501_v57 = vpop.xlane.xlu2 %5500 }
0x14b9   :  { %v5506_v40 = vsub.f32 %v10215_v5, %v5501_v57 }
0x14bb   :  { %7095 = vrot.lane.b32.xlu1 %v9991_v26, %s7608_s22  ;;  %v10311_v17 = vpop.eup %7436  ;;  %v5515_v33 = vmul.f32 1.442695, %v5506_v40 }
0x14bc   :  { %v5268_v37 = vsel %vm472_vm7, %v10311_v17, 0.0 }
0x14c0   :  { %v5246_v32 = vpop.xlane.xlu2 %5245 }
0x14c1   :  { %5615 = vrot.lane.b32.xlu0 %v9999_v8, %s7607_s21  ;;  %v5251_v8 = vsub.f32 %v10220_v63, %v5246_v32 }
0x14c3   :  { %v5260_v54 = vmul.f32 1.442695, %v5251_v8 }
0x14c5   :  { %7438 = vpow2.f32 %v5260_v54 }
0x14c9   :  { %7100 = vrot.lane.b32.xlu2 %v10074_v7, %s7608_s22 }
0x14cb   :  { %v10314_v1 = vpop.eup %7438 }
0x14cc   :  { %v5274_v30 = vsel %vm485_vm3, %v10314_v1, 0.0 }
0x14d1   :  { %7105 = vrot.lane.b32.xlu2 %v9991_v26, %s7607_s21  ;;  %v5523_v26 = vsel %vm472_vm7, %v10307_v53, 0.0 }
0x14e5   :  { %5524 = vadd.xlane.f32.xlu1 %v5523_v26 }
0x14eb   :  { %5269 = vadd.xlane.f32.xlu0 %v5268_v37  ;;  %v5005_v63 = vpop.xlane.xlu1 %5004 }
0x14ec   :  { %7440 = vrcp.f32 %v5005_v63  ;;  %v5029_v38 = vand.u32 2147483648, %v5005_v63  ;;  %v5027_v44 = vand.u32 2147483647, %v5005_v63  ;;  %vm5023_vm13 = vweird.f32 %v5005_v63 }
0x14ed   :  { %5275 = vadd.xlane.f32.xlu1 %v5274_v30  ;;  %7442 = vpow2.f32 %v5258_v27 }
0x14ee   :  { %v5030_v51 = vor.u32 1.1754944e-38, %v5029_v38  ;;  %vm5028_vm2 = vcmp.eq.f32.partialorder %v5027_v44, 8.507059e+37 }
0x14f2   :  { %v7441_v2 = vpop.eup %7440 }
0x14f3   :  { %v5019_v15 = vmul.f32 %v7441_v2, %v5005_v63  ;;  %v10321_v29 = vpop.xlane.xlu2 %5007  ;;  %v4763_v50 = vpop.xlane.xlu1 %4762  ;;  %vm5024_vm10 = vweird.f32 %v7441_v2 }
0x14f4   :  { %7444 = vrcp.f32 %v10321_v29  ;;  %v10326_v35 = vpop.eup %7442  ;;  %vm5025_vm12 = vmor %vm5023_vm13, %vm5024_vm10  ;;  %v4785_v23 = vand.u32 2147483647, %v4763_v50  ;;  %v4787_v54 = vand.u32 2147483648, %v4763_v50  ;;  %v5041_v63 = vand.u32 2147483647, %v10321_v29 }
0x14f5   :  { %v5020_v52 = vsub.f32 1.0, %v5019_v15  ;;  %7446 = vrcp.f32 %v4763_v50  ;;  %v10324_v31 = vpop.xlane.xlu0 %4768  ;;  %v5271_v42 = vsel %vm472_vm7, %v10326_v35, 0.0  ;;  %v5043_v27 = vand.u32 2147483648, %v10321_v29 }
0x14f6   :  { %7448 = vrcp.f32 %v10324_v31  ;;  %vm4781_vm15 = vweird.f32 %v4763_v50  ;;  %vm4786_vm10 = vcmp.eq.f32.partialorder %v4785_v23, 8.507059e+37 }
0x14f7   :  { %v5021_v49 = vmul.f32 %v7441_v2, %v5020_v52  ;;  %7450 = vpow2.f32 %v5515_v33 }
0x14f9   :  { %v5022_v5 = vadd.f32 %v7441_v2, %v5021_v49 }
0x14fa   :  { %v10331_v43 = vpop.eup %7444  ;;  %5272 = vadd.xlane.f32.xlu2 %v5271_v42 }
0x14fb   :  { %v7447_v20 = vpop.eup %7446  ;;  %v5026_v4 = vsel %vm5025_vm12, %v7441_v2, %v5022_v5  ;;  %v5033_v47 = vmul.f32 %v10331_v43, %v10321_v29  ;;  %v10335_v18 = vpop.xlane.xlu2 %4765  ;;  %vm5038_vm9 = vweird.f32 %v10331_v43 }
0x14fc   :  { %v5031_v16 = vsel %vm5028_vm2, %v5030_v51, %v5026_v4  ;;  %v4777_v57 = vmul.f32 %v7447_v20, %v4763_v50  ;;  %7452 = vrcp.f32 %v10335_v18  ;;  %v10338_v12 = vpop.eup %7448  ;;  %vm4782_vm14 = vweird.f32 %v7447_v20 }
0x14fd   :  { %v5088_v28 = vmul.f32 %v10227_v6, %v5031_v16  ;;  %v5034_v46 = vsub.f32 1.0, %v5033_v47  ;;  %v10341_v32 = vpop.xlane.xlu1 %4771  ;;  %v10343_v13 = vpop.eup %7450  ;;  %v4805_v6 = vmul.f32 %v10338_v12, %v10324_v31  ;;  %vm4783_vm11 = vmor %vm4781_vm15, %vm4782_vm14  ;;  %v4801_v42 = vand.u32 2147483648, %v10335_v18 }
0x14fe   :  { %v4778_v8 = vsub.f32 1.0, %v4777_v57  ;;  %7454 = vrcp.f32 %v10341_v32  ;;  %v5529_v10 = vsel %vm485_vm3, %v10343_v13, 0.0  ;;  %vm5037_vm3 = vweird.f32 %v10321_v29 }
0x14ff   :  { %7110 = vrot.lane.b32.xlu0 %v10074_v7, %s7607_s21  ;;  %6951 = vmatmul.msk.f32.vlgmr.msrb.gmra.mxu1 %vm472_vm7, %v5088_v28  ;;  %v5035_v62 = vmul.f32 %v10331_v43, %v5034_v46  ;;  %v4788_v7 = vor.u32 1.1754944e-38, %v4787_v54  ;;  %v4806_v38 = vsub.f32 1.0, %v4805_v6  ;;  %vm5039_vm13 = vmor %vm5037_vm3, %vm5038_vm9  ;;  %v5044_v51 = vor.u32 1.1754944e-38, %v5043_v27 }
0x1500   :  { %v4779_v26 = vmul.f32 %v7447_v20, %v4778_v8  ;;  %v4799_v4 = vand.u32 2147483647, %v10335_v18  ;;  %vm5042_vm2 = vcmp.eq.f32.partialorder %v5041_v63, 8.507059e+37  ;;  %vm4795_vm14 = vweird.f32 %v10335_v18 }
0x1501   :  { %v5036_v33 = vadd.f32 %v10331_v43, %v5035_v62  ;;  %v4807_v47 = vmul.f32 %v10338_v12, %v4806_v38  ;;  %v4802_v46 = vor.u32 1.1754944e-38, %v4801_v42  ;;  %vm4810_vm9 = vweird.f32 %v10338_v12 }
0x1502   :  { %v7453_v37 = vpop.eup %7452  ;;  %v4780_v30 = vadd.f32 %v7447_v20, %v4779_v26  ;;  %5530 = vadd.xlane.f32.xlu2 %v5529_v10 }
0x1503   :  { %v4791_v40 = vmul.f32 %v7453_v37, %v10335_v18  ;;  %v10358_v2 = vpop.xlane.xlu2 %5010  ;;  %v10360_v15 = vpop.xlane.xlu0 %5013  ;;  %vm4796_vm12 = vweird.f32 %v7453_v37  ;;  %v4808_v26 = vadd.f32 %v10338_v12, %v4807_v47 }
0x1504   :  { %v4784_v52 = vsel %vm4783_vm11, %v7447_v20, %v4780_v30  ;;  %7456 = vrcp.f32 %v10358_v2  ;;  %v10364_v49 = vpop.eup %7454  ;;  %vm4797_vm15 = vmor %vm4795_vm14, %vm4796_vm12  ;;  %vm4800_vm11 = vcmp.eq.f32.partialorder %v4799_v4, 8.507059e+37  ;;  %v5057_v27 = vand.u32 2147483648, %v10358_v2 }
0x1505   :  { %v4789_v50 = vsel %vm4786_vm10, %v4788_v7, %v4784_v52  ;;  %v4792_v44 = vsub.f32 1.0, %v4791_v40  ;;  %7458 = vrcp.f32 %v10360_v15  ;;  %v4819_v16 = vmul.f32 %v10364_v49, %v10341_v32 }
0x1506   :  { %v4846_v5 = vmul.f32 %v10233_v48, %v4789_v50  ;;  %v5040_v48 = vsel %vm5039_vm13, %v10331_v43, %v5036_v33  ;;  %vm4809_vm10 = vweird.f32 %v10324_v31  ;;  %v5055_v52 = vand.u32 2147483647, %v10358_v2 }
0x1507   :  { %v4793_v20 = vmul.f32 %v7453_v37, %v4792_v44  ;;  %v5045_v57 = vsel %vm5042_vm2, %v5044_v51, %v5040_v48  ;;  %v4820_v43 = vsub.f32 1.0, %v4819_v16  ;;  %vm10398_vm3 = vmor %vm4809_vm10, %vm4810_vm9  ;;  %vm5051_vm12 = vweird.f32 %v10358_v2 }
0x1508   :  { %6935 = vmatmul.msk.f32.vlgmr.msra.gmra.mxu3 %vm472_vm7, %v4846_v5  ;;  %v5089_v8 = vmul.f32 %v10235_v59, %v5045_v57  ;;  %v4815_v59 = vand.u32 2147483648, %v10324_v31  ;;  %v5505_v5 = vsub.f32 %v10208_v11, %v10298_v55  ;;  %v5058_v42 = vor.u32 1.1754944e-38, %v5057_v27 }
0x1509   :  { %v4794_v29 = vadd.f32 %v7453_v37, %v4793_v20  ;;  %v4821_v38 = vmul.f32 %v10364_v49, %v4820_v43  ;;  %vm5056_vm9 = vcmp.eq.f32.partialorder %v5055_v52, 8.507059e+37  ;;  %v4829_v11 = vand.u32 2147483648, %v10341_v32 }
0x150a   :  { %v7457_v28 = vpop.eup %7456  ;;  %6952 = vmatmul.msk.f32.gmra.mxu1 %vm472_vm7, %v5089_v8  ;;  %v4816_v50 = vor.u32 1.1754944e-38, %v4815_v59  ;;  %v4827_v48 = vand.u32 2147483647, %v10341_v32  ;;  %v5069_v8 = vand.u32 2147483647, %v10360_v15 }
0x150b   :  { %v10380_v23 = vpop.eup %7458  ;;  %v5047_v54 = vmul.f32 %v7457_v28, %v10358_v2  ;;  %v4798_v62 = vsel %vm4797_vm15, %v7453_v37, %v4794_v29  ;;  %v4813_v37 = vand.u32 2147483647, %v10324_v31  ;;  %vm5052_vm13 = vweird.f32 %v7457_v28 }
0x150c   :  { %v5061_v18 = vmul.f32 %v10380_v23, %v10360_v15  ;;  %v10388_v6 = vpop.xlane.xlu2 %5016  ;;  %v4803_v10 = vsel %vm4800_vm11, %v4802_v46, %v4798_v62  ;;  %v4812_v31 = vsel %vm10398_vm3, %v10338_v12, %v4808_v26  ;;  %vm5053_vm14 = vmor %vm5051_vm12, %vm5052_vm13  ;;  %vm4823_vm15 = vweird.f32 %v10341_v32 }
0x150d   :  { %v5048_v63 = vsub.f32 1.0, %v5047_v54  ;;  %7460 = vrcp.f32 %v10388_v6  ;;  %v4847_v7 = vmul.f32 %v10247_v9, %v4803_v10  ;;  %vm4814_vm2 = vcmp.eq.f32.partialorder %v4813_v37, 8.507059e+37 }
0x150e   :  { %v5062_v30 = vsub.f32 1.0, %v5061_v18  ;;  %v4817_v20 = vsel %vm4814_vm2, %v4816_v50, %v4812_v31  ;;  %v4822_v12 = vadd.f32 %v10364_v49, %v4821_v38  ;;  %vm4824_vm11 = vweird.f32 %v10364_v49 }
0x150f   :  { %v5049_v33 = vmul.f32 %v7457_v28, %v5048_v63  ;;  %vm5066_vm10 = vweird.f32 %v10380_v23  ;;  %v5071_v29 = vand.u32 2147483648, %v10360_v15  ;;  %vm10427_vm3 = vmor %vm4823_vm15, %vm4824_vm11  ;;  %vm5065_vm13 = vweird.f32 %v10360_v15 }
0x1510   :  { %6936 = vmatmul.msk.f32.gmra.mxu3 %vm472_vm7, %v4847_v7  ;;  %v5063_v44 = vmul.f32 %v10380_v23, %v5062_v30  ;;  %vm10434_vm12 = vmor %vm5065_vm13, %vm5066_vm10  ;;  %v4830_v32 = vor.u32 1.1754944e-38, %v4829_v11  ;;  %vm4828_vm2 = vcmp.eq.f32.partialorder %v4827_v48, 8.507059e+37  ;;  %v5085_v30 = vand.u32 2147483648, %v10388_v6 }
0x1511   :  { %v5050_v9 = vadd.f32 %v7457_v28, %v5049_v33  ;;  %v5072_v43 = vor.u32 1.1754944e-38, %v5071_v29  ;;  %v5083_v40 = vand.u32 2147483647, %v10388_v6 }
0x1512   :  { %v5064_v55 = vadd.f32 %v10380_v23, %v5063_v44 }
0x1513   :  { %v10412_v51 = vpop.eup %7460  ;;  %v5054_v4 = vsel %vm5053_vm14, %v7457_v28, %v5050_v9  ;;  %v4848_v28 = vmul.f32 %v10243_v36, %v4817_v20  ;;  %v4826_v36 = vsel %vm10427_vm3, %v10364_v49, %v4822_v12  ;;  %vm5070_vm14 = vcmp.eq.f32.partialorder %v5069_v8, 8.507059e+37 }
0x1514   :  { %v5075_v2 = vmul.f32 %v10412_v51, %v10388_v6  ;;  %v4775_v47 = vpop.xlane.xlu2 %4774  ;;  %v5059_v16 = vsel %vm5056_vm9, %v5058_v42, %v5054_v4  ;;  %v5068_v15 = vsel %vm10434_vm12, %v10380_v23, %v5064_v55  ;;  %v4831_v10 = vsel %vm4828_vm2, %v4830_v32, %v4826_v36 }
0x1515   :  { %7462 = vrcp.f32 %v4775_v47  ;;  %v5090_v54 = vmul.f32 %v10256_v45, %v5059_v16  ;;  %v5513_v45 = vmul.f32 1.442695, %v5505_v5  ;;  %v10447_v63 = vpop.xlane.xlu1 %5266  ;;  %v5073_v49 = vsel %vm5070_vm14, %v5072_v43, %v5068_v15 }
0x1516   :  { %v5076_v57 = vsub.f32 1.0, %v5075_v2  ;;  %vm5080_vm15 = vweird.f32 %v10412_v51  ;;  %v4849_v7 = vmul.f32 %v10252_v21, %v4831_v10  ;;  %vm5079_vm9 = vweird.f32 %v10388_v6 }
0x1517   :  { %6953 = vmatmul.msk.f32.gmra.mxu1 %vm472_vm7, %v5090_v54  ;;  %7464 = vpow2.f32 %v5513_v45  ;;  %v5091_v33 = vmul.f32 %v10259_v24, %v5073_v49  ;;  %vm10459_vm11 = vmor %vm5079_vm9, %vm5080_vm15  ;;  %v4843_v31 = vand.u32 2147483648, %v4775_v47  ;;  %v4841_v50 = vand.u32 2147483647, %v4775_v47 }
0x1518   :  { %6937 = vmatmul.msk.f32.gmra.mxu3 %vm472_vm7, %v4848_v28  ;;  %v5077_v26 = vmul.f32 %v10412_v51, %v5076_v57  ;;  %7466 = vrcp.f32 %v10447_v63  ;;  %v5086_v6 = vor.u32 1.1754944e-38, %v5085_v30  ;;  %vm4837_vm3 = vweird.f32 %v4775_v47 }
0x1519   :  { %vm5084_vm13 = vcmp.eq.f32.partialorder %v5083_v40, 8.507059e+37  ;;  %v4844_v44 = vor.u32 1.1754944e-38, %v4843_v31  ;;  %vm4842_vm2 = vcmp.eq.f32.partialorder %v4841_v50, 8.507059e+37 }
0x151a   :  { %v5078_v27 = vadd.f32 %v10412_v51, %v5077_v26 }
0x151b   :  { %v7463_v18 = vpop.eup %7462 }
0x151c   :  { %v4833_v59 = vmul.f32 %v7463_v18, %v4775_v47  ;;  %v10449_v37 = vpop.xlane.xlu2 %5518  ;;  %vm4838_vm10 = vweird.f32 %v7463_v18  ;;  %v5082_v21 = vsel %vm10459_vm11, %v10412_v51, %v5078_v27 }
0x151d   :  { %vm4839_vm12 = vmor %vm4837_vm3, %vm4838_vm10  ;;  %v10468_v24 = vpop.eup %7464  ;;  %v5087_v42 = vsel %vm5084_vm13, %v5086_v6, %v5082_v21  ;;  %vm5296_vm3 = vweird.f32 %v10447_v63 }
0x151e   :  { %v4834_v23 = vsub.f32 1.0, %v4833_v59  ;;  %v7467_v4 = vpop.eup %7466  ;;  %v5092_v2 = vmul.f32 %v10267_v34, %v5087_v42  ;;  %v5526_v47 = vsel %vm472_vm7, %v10468_v24, 0.0  ;;  %v5302_v59 = vand.u32 2147483648, %v10447_v63 }
0x151f   :  { %6954 = vmatmul.msk.f32.gmra.mxu1 %vm472_vm7, %v5091_v33  ;;  %v5292_v51 = vmul.f32 %v7467_v4, %v10447_v63  ;;  %vm5297_vm11 = vweird.f32 %v7467_v4 }
0x1520   :  { %v4835_v38 = vmul.f32 %v7463_v18, %v4834_v23  ;;  %6938 = vmatmul.msk.f32.gmra.mxu3 %vm472_vm7, %v4849_v7  ;;  %v10477_v55 = vpop.xlane.xlu0 %5521  ;;  %v5300_v23 = vand.u32 2147483647, %v10447_v63  ;;  %vm5298_vm13 = vmor %vm5296_vm3, %vm5297_vm11  ;;  %v5303_v52 = vor.u32 1.1754944e-38, %v5302_v59 }
0x1521   :  { %v5293_v48 = vsub.f32 1.0, %v5292_v51  ;;  %v5555_v59 = vand.u32 2147483647, %v10477_v55 }
0x1522   :  { %v4836_v9 = vadd.f32 %v7463_v18, %v4835_v38 }
0x1523   :  { %v5294_v8 = vmul.f32 %v7467_v4, %v5293_v48  ;;  %v5543_v48 = vand.u32 2147483648, %v10449_v37 }
0x1524   :  { %v5264_v5 = vpop.xlane.xlu2 %5263  ;;  %v4840_v20 = vsel %vm4839_vm12, %v7463_v18, %v4836_v9 }
0x1525   :  { %7468 = vrcp.f32 %v5264_v5  ;;  %v4845_v12 = vsel %vm4842_vm2, %v4844_v44, %v4840_v20  ;;  %v5288_v46 = vand.u32 2147483648, %v5264_v5  ;;  %v5286_v62 = vand.u32 2147483647, %v5264_v5 }
0x1526   :  { %v4850_v16 = vmul.f32 %v10272_v14, %v4845_v12  ;;  %vm5282_vm15 = vweird.f32 %v5264_v5  ;;  %v5295_v43 = vadd.f32 %v7467_v4, %v5294_v8  ;;  %7470 = vrcp.f32 %v10449_v37 }
0x1527   :  { %6955 = vmatmul.msk.f32.gmra.mxu1 %vm472_vm7, %v5092_v2  ;;  %v5289_v26 = vor.u32 1.1754944e-38, %v5288_v46  ;;  %vm5287_vm10 = vcmp.eq.f32.partialorder %v5286_v62, 8.507059e+37  ;;  %7472 = vrcp.f32 %v10477_v55 }
0x1528   :  { %6939 = vmatmul.msk.f32.gmra.mxu3 %vm472_vm7, %v4850_v16  ;;  %v5299_v33 = vsel %vm5298_vm13, %v7467_v4, %v5295_v43 }
0x1529   :  { %5527 = vadd.xlane.f32.xlu0 %v5526_v47 }
0x152b   :  { %v7469_v11 = vpop.eup %7468 }
0x152c   :  { %v5278_v29 = vmul.f32 %v7469_v11, %v5264_v5  ;;  %v7101_v57 = vpop.permute.xlu2 %7100  ;;  %vm5283_vm14 = vweird.f32 %v7469_v11  ;;  %v7471_v63 = vpop.eup %7470 }
0x152d   :  { %v7096_v28 = vpop.permute.xlu1 %7095  ;;  %vm5284_vm9 = vmor %vm5282_vm15, %vm5283_vm14  ;;  %v7102_v15 = vunpack.i.l.bf16 %v7101_v57  ;;  %v7103_v27 = vunpack.i.h.bf16 %v7101_v57  ;;  %v5533_v21 = vmul.f32 %v7471_v63, %v10449_v37  ;;  %v10492_v6 = vpop.eup %7472  ;;  %vm5538_vm12 = vweird.f32 %v7471_v63 }
0x152e   :  { %v5279_v34 = vsub.f32 1.0, %v5278_v29  ;;  %v7097_v14 = vunpack.i.l.bf16 %v7096_v28  ;;  %v7098_v36 = vunpack.i.h.bf16 %v7096_v28  ;;  %v5547_v44 = vmul.f32 %v10492_v6, %v10477_v55 }
0x152f   :  { %v5534_v9 = vsub.f32 1.0, %v5533_v21  ;;  %vm5537_vm14 = vweird.f32 %v10449_v37  ;;  %vm5552_vm3 = vweird.f32 %v10492_v6 }
0x1530   :  { %v5280_v54 = vmul.f32 %v7469_v11, %v5279_v34  ;;  %5395 = vmatpush.msrb.mxu3 %v7097_v14  ;;  %v5548_v4 = vsub.f32 1.0, %v5547_v44  ;;  %vm10505_vm15 = vmor %vm5537_vm14, %vm5538_vm12  ;;  %v5541_v34 = vand.u32 2147483647, %v10449_v37 }
0x1531   :  { %v5535_v20 = vmul.f32 %v7471_v63, %v5534_v9 }
0x1532   :  { %v5281_v32 = vadd.f32 %v7469_v11, %v5280_v54  ;;  %5396 = vmatpush.msrb.mxu3 %v7098_v36  ;;  %v5549_v29 = vmul.f32 %v10492_v6, %v5548_v4  ;;  %vm5542_vm13 = vcmp.eq.f32.partialorder %v5541_v34, 8.507059e+37 }
0x1533   :  { %v5616_v45 = vpop.permute.xlu0 %5615  ;;  %v5536_v51 = vadd.f32 %v7471_v63, %v5535_v20 }
0x1534   :  { %v5285_v18 = vsel %vm5284_vm9, %v7469_v11, %v5281_v32  ;;  %6982 = vmatpush.msk.msra.mxu1 %vm609_vm4, %v5616_v45  ;;  %v7106_v10 = vpop.permute.xlu2 %7105  ;;  %5397 = vmatpush.msrb.mxu3 %v7102_v15  ;;  %vm5301_vm4 = vcmp.eq.f32.partialorder %v5300_v23, 8.507059e+37  ;;  %v5544_v32 = vor.u32 1.1754944e-38, %v5543_v48  ;;  %v5557_v15 = vand.u32 2147483648, %v10477_v55 }
0x1535   :  { %v5290_v49 = vsel %vm5287_vm10, %v5289_v26, %v5285_v18  ;;  %v7107_v30 = vunpack.i.l.bf16 %v7106_v10  ;;  %v7108_v40 = vunpack.i.h.bf16 %v7106_v10  ;;  %v5304_v38 = vsel %vm5301_vm4, %v5303_v52, %v5299_v33 }
0x1536   :  { %v5347_v7 = vmul.f32 %v10290_v61, %v5290_v49  ;;  %5398 = vmatpush.msrb.mxu3 %v7103_v27  ;;  %v5348_v31 = vmul.f32 %v10275_v56, %v5304_v38  ;;  %v5540_v54 = vsel %vm10505_vm15, %v7471_v63, %v5536_v51  ;;  %v5550_v26 = vadd.f32 %v10492_v6, %v5549_v29 }
0x1537   :  { %5650 = vmatpush.msra.mxu1 %v7107_v30  ;;  %v5545_v10 = vsel %vm5542_vm13, %v5544_v32, %v5540_v54  ;;  %vm5551_vm4 = vweird.f32 %v10477_v55  ;;  %v5558_v33 = vor.u32 1.1754944e-38, %v5557_v15 }
0x1538   :  { %6967 = vmatmul.msk.f32.vlgmr.msrb.gmra.mxu3 %vm472_vm7, %v5347_v7  ;;  %vm10524_vm12 = vmor %vm5551_vm4, %vm5552_vm3 }
0x1539   :  { %5651 = vmatpush.msra.mxu1 %v7108_v40  ;;  %v5602_v40 = vmul.f32 %v10282_v19, %v5545_v10 }
0x1540   :  { %6968 = vmatmul.msk.f32.gmra.mxu3 %vm472_vm7, %v5348_v31 }
0x1558   :  { %v10489_v61 = vpop.xlane.xlu1 %5524 }
0x1559   :  { %v5571_v20 = vand.u32 2147483648, %v10489_v61 }
0x155b   :  { %v5572_v29 = vor.u32 1.1754944e-38, %v5571_v20 }
0x155e   :  { %v5270_v50 = vpop.xlane.xlu0 %5269 }
0x155f   :  { %7474 = vrcp.f32 %v5270_v50  ;;  %v5316_v16 = vand.u32 2147483648, %v5270_v50  ;;  %v5314_v47 = vand.u32 2147483647, %v5270_v50  ;;  %vm5310_vm9 = vweird.f32 %v5270_v50 }
0x1560   :  { %v10496_v5 = vpop.xlane.xlu1 %5275  ;;  %7476 = vrcp.f32 %v10489_v61 }
0x1561   :  { %7478 = vrcp.f32 %v10496_v5  ;;  %v5317_v8 = vor.u32 1.1754944e-38, %v5316_v16  ;;  %vm5315_vm10 = vcmp.eq.f32.partialorder %v5314_v47, 8.507059e+37  ;;  %v5344_v16 = vand.u32 2147483648, %v10496_v5 }
0x1562   :  { %v5342_v47 = vand.u32 2147483647, %v10496_v5 }
0x1563   :  { %v5345_v28 = vor.u32 1.1754944e-38, %v5344_v16 }
0x1565   :  { %v7475_v56 = vpop.eup %7474 }
0x1566   :  { %v5306_v42 = vmul.f32 %v7475_v56, %v5270_v50  ;;  %vm5311_vm2 = vweird.f32 %v7475_v56  ;;  %v10500_v11 = vpop.eup %7476 }
0x1567   :  { %v10510_v14 = vpop.eup %7478  ;;  %vm5312_vm11 = vmor %vm5310_vm9, %vm5311_vm2  ;;  %v5561_v62 = vmul.f32 %v10500_v11, %v10489_v61  ;;  %vm5556_vm2 = vcmp.eq.f32.partialorder %v5555_v59, 8.507059e+37  ;;  %vm5566_vm15 = vweird.f32 %v10500_v11 }
0x1568   :  { %v5307_v12 = vsub.f32 1.0, %v5306_v42  ;;  %v5334_v45 = vmul.f32 %v10510_v14, %v10496_v5  ;;  %v5569_v42 = vand.u32 2147483647, %v10489_v61  ;;  %vm5339_vm3 = vweird.f32 %v10510_v14 }
0x1569   :  { %v5562_v30 = vsub.f32 1.0, %v5561_v62 }
0x156a   :  { %v5308_v2 = vmul.f32 %v7475_v56, %v5307_v12  ;;  %v5335_v52 = vsub.f32 1.0, %v5334_v45 }
0x156b   :  { %v5563_v38 = vmul.f32 %v10500_v11, %v5562_v30 }
0x156c   :  { %v5309_v57 = vadd.f32 %v7475_v56, %v5308_v2  ;;  %v5336_v21 = vmul.f32 %v10510_v14, %v5335_v52 }
0x156d   :  { %v5273_v46 = vpop.xlane.xlu2 %5272  ;;  %v5564_v19 = vadd.f32 %v10500_v11, %v5563_v38 }
0x156e   :  { %7480 = vrcp.f32 %v5273_v46  ;;  %v5313_v36 = vsel %vm5312_vm11, %v7475_v56, %v5309_v57  ;;  %v5330_v50 = vand.u32 2147483648, %v5273_v46  ;;  %v5328_v44 = vand.u32 2147483647, %v5273_v46 }
0x156f   :  { %v5318_v37 = vsel %vm5315_vm10, %v5317_v8, %v5313_v36  ;;  %vm5324_vm9 = vweird.f32 %v5273_v46  ;;  %vm5565_vm11 = vweird.f32 %v10489_v61  ;;  %v5337_v2 = vadd.f32 %v10510_v14, %v5336_v21 }
0x1570   :  { %v5349_v18 = vmul.f32 %v10311_v17, %v5318_v37  ;;  %v5554_v17 = vsel %vm10524_vm12, %v10492_v6, %v5550_v26  ;;  %v5331_v4 = vor.u32 1.1754944e-38, %v5330_v50  ;;  %vm5329_vm13 = vcmp.eq.f32.partialorder %v5328_v44, 8.507059e+37  ;;  %vm5567_vm4 = vmor %vm5565_vm11, %vm5566_vm15 }
0x1571   :  { %v7111_v43 = vpop.permute.xlu0 %7110  ;;  %v5559_v63 = vsel %vm5556_vm2, %v5558_v33, %v5554_v17  ;;  %vm5338_vm12 = vweird.f32 %v10496_v5  ;;  %v5568_v48 = vsel %vm5567_vm4, %v10500_v11, %v5564_v19  ;;  %vm5343_vm15 = vcmp.eq.f32.partialorder %v5342_v47, 8.507059e+37  ;;  %v5748_v47 = vld [vmem:[#allocation2 + $0x930] sm:$0xff] }
0x1572   :  { %v7112_v49 = vunpack.i.l.bf16 %v7111_v43  ;;  %6969 = vmatmul.msk.f32.gmra.mxu3 %vm472_vm7, %v5349_v18  ;;  %v7113_v7 = vunpack.i.h.bf16 %v7111_v43  ;;  %v5603_v6 = vmul.f32 %v10286_v25, %v5559_v63  ;;  %vm5340_vm2 = vmor %vm5338_vm12, %vm5339_vm3 }
0x1573   :  { %v5341_v57 = vsel %vm5340_vm2, %v10510_v14, %v5337_v2  ;;  %v5751_v2 = vld [vmem:[#allocation2 + $0x960] sm:$0xff] }
0x1574   :  { %v7481_v23 = vpop.eup %7480  ;;  %5652 = vmatpush.msra.mxu1 %v7112_v49 }
0x1575   :  { %v5320_v55 = vmul.f32 %v7481_v23, %v5273_v46  ;;  %vm5325_vm14 = vweird.f32 %v7481_v23  ;;  %v5346_v46 = vsel %vm5343_vm15, %v5345_v28, %v5341_v57  ;;  %v5531_v54 = vpop.xlane.xlu2 %5530 }
0x1576   :  { %5653 = vmatpush.msra.mxu1 %v7113_v7  ;;  %vm5326_vm10 = vmor %vm5324_vm9, %vm5325_vm14  ;;  %vm5570_vm14 = vcmp.eq.f32.partialorder %v5569_v42, 8.507059e+37  ;;  %v5351_v5 = vmul.f32 %v10314_v1, %v5346_v46  ;;  %7482 = vrcp.f32 %v5531_v54  ;;  %v5599_v33 = vand.u32 2147483648, %v5531_v54 }
0x1577   :  { %v5321_v31 = vsub.f32 1.0, %v5320_v55  ;;  %6983 = vmatmul.msk.f32.vlgmr.msra.gmra.mxu1 %vm472_vm7, %v5602_v40  ;;  %v5573_v34 = vsel %vm5570_vm14, %v5572_v29, %v5568_v48  ;;  %vm5593_vm4 = vweird.f32 %v5531_v54  ;;  %v5597_v55 = vand.u32 2147483647, %v5531_v54  ;;  %v5746_v48 = vld [vmem:[#allocation2 + $0x910] sm:$0xff]  ;;  %v5745_v29 = vld [vmem:[#allocation2 + $0x900] sm:$0xff] }
0x1578   :  { %v5604_v8 = vmul.f32 %v10307_v53, %v5573_v34  ;;  %v5600_v63 = vor.u32 1.1754944e-38, %v5599_v33 }
0x1579   :  { %v5322_v9 = vmul.f32 %v7481_v23, %v5321_v31  ;;  %vm5598_vm2 = vcmp.eq.f32.partialorder %v5597_v55, 8.507059e+37 }
0x157b   :  { %v5323_v56 = vadd.f32 %v7481_v23, %v5322_v9 }
0x157c   :  { %v5145_v12 = vpop.f32.mrf.mxu1  ;;  %v7483_v53 = vpop.eup %7482 }
0x157d   :  { %5675 = vrot.lane.b32.xlu1 %v5145_v12, %s7600_s24  ;;  %v5327_v25 = vsel %vm5326_vm10, %v7481_v23, %v5323_v56  ;;  %v5589_v1 = vmul.f32 %v7483_v53, %v5531_v54  ;;  %vm5594_vm3 = vweird.f32 %v7483_v53  ;;  %v5752_v12 = vld [vmem:[#allocation2 + $0x970] sm:$0xff] }
0x157e   :  { %v5332_v51 = vsel %vm5329_vm13, %v5331_v4, %v5327_v25  ;;  %vm5595_vm12 = vmor %vm5593_vm4, %vm5594_vm3  ;;  %5776 = vmatpush.msra.mxu2 %v5752_v12  ;;  %v5750_v25 = vld [vmem:[#allocation2 + $0x950] sm:$0xff] }
0x157f   :  { %6984 = vmatmul.msk.f32.gmra.mxu1 %vm472_vm7, %v5603_v6  ;;  %v5350_v61 = vmul.f32 %v10326_v35, %v5332_v51  ;;  %v5590_v15 = vsub.f32 1.0, %v5589_v1  ;;  %v5749_v51 = vld [vmem:[#allocation2 + $0x940] sm:$0xff] }
0x1580   :  { %5777 = vmatpush.msra.mxu2 %v5751_v2 }
0x1581   :  { %6970 = vmatmul.msk.f32.gmra.mxu3 %vm472_vm7, %v5350_v61  ;;  %v5591_v59 = vmul.f32 %v7483_v53, %v5590_v15  ;;  %v5747_v61 = vld [vmem:[#allocation2 + $0x920] sm:$0xff] }
0x1582   :  { %5778 = vmatpush.msra.mxu2 %v5750_v25 }
0x1583   :  { %v5592_v17 = vadd.f32 %v7483_v53, %v5591_v59 }
0x1584   :  { %5779 = vmatpush.msra.mxu2 %v5749_v51 }
0x1585   :  { %v5596_v31 = vsel %vm5595_vm12, %v7483_v53, %v5592_v17 }
0x1586   :  { %v5601_v21 = vsel %vm5598_vm2, %v5600_v63, %v5596_v31  ;;  %5780 = vmatpush.msra.mxu2 %v5748_v47 }
0x1587   :  { %6985 = vmatmul.msk.f32.gmra.mxu1 %vm472_vm7, %v5604_v8  ;;  %v5148_v35 = vpop.f32.mrf.mxu1  ;;  %v5606_v9 = vmul.f32 %v10343_v13, %v5601_v21 }
0x1588   :  { %5677 = vrot.lane.b32.xlu1 %v5148_v35, %s7600_s24  ;;  %5781 = vmatpush.msra.mxu2 %v5747_v61 }
0x1589   :  { %6971 = vmatmul.msk.f32.gmra.mxu3 %vm472_vm7, %v5351_v5 }
0x158a   :  { %5782 = vmatpush.msra.mxu2 %v5746_v48 }
0x158b   :  { %v10558_v11 = vpop.f32.mrf.mxu3 }
0x158c   :  { %5783 = vmatpush.msra.mxu2 %v5745_v29 }
0x1593   :  { %v10560_v62 = vpop.f32.mrf.mxu3 }
0x1594   :  { %v5151_v14 = vpop.f32.mrf.mxu1 }
0x1595   :  { %5679 = vrot.lane.b32.xlu1 %v5151_v14, %s7600_s24 }
0x159b   :  { %v10563_v26 = vpop.f32.mrf.mxu3 }
0x159c   :  { %v5528_v36 = vpop.xlane.xlu0 %5527  ;;  %v5154_v32 = vpop.f32.mrf.mxu1 }
0x159d   :  { %7484 = vrcp.f32 %v5528_v36  ;;  %5681 = vrot.lane.b32.xlu1 %v5154_v32, %s7600_s24  ;;  %v5585_v10 = vand.u32 2147483648, %v5528_v36  ;;  %v5583_v27 = vand.u32 2147483647, %v5528_v36  ;;  %vm5579_vm11 = vweird.f32 %v5528_v36 }
0x159f   :  { %v5586_v7 = vor.u32 1.1754944e-38, %v5585_v10  ;;  %vm5584_vm13 = vcmp.eq.f32.partialorder %v5583_v27, 8.507059e+37 }
0x15a3   :  { %v7485_v37 = vpop.eup %7484  ;;  %v10567_v30 = vpop.f32.mrf.mxu3 }
0x15a4   :  { %v5575_v45 = vmul.f32 %v7485_v37, %v5528_v36  ;;  %v5157_v18 = vpop.f32.mrf.mxu1  ;;  %vm5580_vm9 = vweird.f32 %v7485_v37 }
0x15a5   :  { %5683 = vrot.lane.b32.xlu1 %v5157_v18, %s7600_s24  ;;  %vm5581_vm10 = vmor %vm5579_vm11, %vm5580_vm9 }
0x15a6   :  { %v5576_v43 = vsub.f32 1.0, %v5575_v45 }
0x15a8   :  { %v5577_v49 = vmul.f32 %v7485_v37, %v5576_v43 }
0x15aa   :  { %v5578_v23 = vadd.f32 %v7485_v37, %v5577_v49 }
0x15ab   :  { %v10571_v50 = vpop.f32.mrf.mxu3 }
0x15ac   :  { %v5582_v40 = vsel %vm5581_vm10, %v7485_v37, %v5578_v23 }
0x15ad   :  { %v5587_v52 = vsel %vm5584_vm13, %v5586_v7, %v5582_v40 }
0x15ae   :  { %v5605_v38 = vmul.f32 %v10468_v24, %v5587_v52  ;;  %v5805_v52 = vld [vmem:[#allocation4 + $0x21] ss:$0 sm:$0xff] }
0x15b0   :  { %6986 = vmatmul.msk.f32.gmra.mxu1 %vm472_vm7, %v5605_v38 }
0x15b8   :  { %6987 = vmatmul.msk.f32.gmra.mxu1 %vm472_vm7, %v5606_v9 }
0x15bb   :  { %v5400_v44 = vpop.f32.mrf.mxu3 }
0x15bc   :  { %5695 = vrot.lane.b32.xlu2 %v5400_v44, %s7606_s20 }
0x15c3   :  { %v5403_v6 = vpop.f32.mrf.mxu3 }
0x15c4   :  { %5697 = vrot.lane.b32.xlu2 %v5403_v6, %s7606_s20 }
0x15ef   :  { %v5676_v57 = vpop.permute.xlu1 %5675 }
0x15f0   :  { %v5730_v34 = vsel %vm419_vm5, %v10558_v11, %v5676_v57 }
0x15f4   :  { %v5655_v24 = vpop.f32.mrf.mxu1 }
0x15f5   :  { %5715 = vrot.lane.b32.xlu0 %v5655_v24, %s7603_s1  ;;  %v5406_v19 = vpop.f32.mrf.mxu3 }
0x15f6   :  { %5699 = vrot.lane.b32.xlu2 %v5406_v19, %s7606_s20 }
0x15fa   :  { %v5678_v35 = vpop.permute.xlu1 %5677 }
0x15fb   :  { %v5731_v14 = vsel %vm419_vm5, %v10560_v62, %v5678_v35 }
0x15fc   :  { %v5658_v56 = vpop.f32.mrf.mxu1 }
0x15fd   :  { %5717 = vrot.lane.b32.xlu0 %v5658_v56, %s7603_s1 }
0x1604   :  { %v5661_v42 = vpop.f32.mrf.mxu1  ;;  %v5409_v20 = vpop.f32.mrf.mxu3 }
0x1605   :  { %5719 = vrot.lane.b32.xlu0 %v5661_v42, %s7603_s1  ;;  %5701 = vrot.lane.b32.xlu2 %v5409_v20, %s7606_s20 }
0x1607   :  { %v5680_v11 = vpop.permute.xlu1 %5679 }
0x1608   :  { %v5732_v37 = vsel %vm419_vm5, %v10563_v26, %v5680_v11 }
0x160c   :  { %v5412_v13 = vpop.f32.mrf.mxu3 }
0x160d   :  { %5703 = vrot.lane.b32.xlu2 %v5412_v13, %s7606_s20 }
0x160f   :  { %v5682_v62 = vpop.permute.xlu1 %5681 }
0x1610   :  { %v5733_v10 = vsel %vm419_vm5, %v10567_v30, %v5682_v62  ;;  %v5943_v62 = vld [vmem:[#allocation2 + $0x9d0] sm:$0xff] }
0x1616   :  { %v5696_v28 = vpop.permute.xlu2 %5695 }
0x1617   :  { %v5735_v46 = vsel %vm1479_vm6, %v5730_v34, %v5696_v28  ;;  %v5684_v26 = vpop.permute.xlu1 %5683 }
0x1618   :  { %v5734_v7 = vsel %vm419_vm5, %v10571_v50, %v5684_v26 }
0x161e   :  { %v5698_v54 = vpop.permute.xlu2 %5697 }
0x161f   :  { %v5736_v36 = vsel %vm1479_vm6, %v5731_v14, %v5698_v54 }
0x162d   :  { %v5664_v4 = vpop.f32.mrf.mxu1 }
0x162e   :  { %5721 = vrot.lane.b32.xlu0 %v5664_v4, %s7603_s1 }
0x1635   :  { %v5667_v16 = vpop.f32.mrf.mxu1 }
0x1636   :  { %5723 = vrot.lane.b32.xlu0 %v5667_v16, %s7603_s1 }
0x1650   :  { %v5700_v1 = vpop.permute.xlu2 %5699 }
0x1651   :  { %v5737_v15 = vsel %vm1479_vm6, %v5732_v37, %v5700_v1  ;;  %v5947_v37 = vld [vmem:[#allocation2 + $0x9f0] sm:$0xff] }
0x1652   :  { %5979 = vmatpush.msra.mxu3 %v5947_v37 }
0x165f   :  { %v5702_v18 = vpop.permute.xlu2 %5701 }
0x1660   :  { %v5738_v59 = vsel %vm1479_vm6, %v5733_v10, %v5702_v18  ;;  %v5944_v18 = vld [vmem:[#allocation2 + $0x9d8] sm:$0xff]  ;;  %v5941_v10 = vld [vmem:[#allocation2 + $0x9c0] sm:$0xff] }
0x1667   :  { %v5716_v8 = vpop.permute.xlu0 %5715  ;;  %v5704_v23 = vpop.permute.xlu2 %5703 }
0x1668   :  { %v5740_v5 = vsel %vm1485_vm8, %v5735_v46, %v5716_v8  ;;  %v5739_v17 = vsel %vm1479_vm6, %v5734_v7, %v5704_v23  ;;  %v5937_v7 = vld [vmem:[#allocation2 + $0x9a0] sm:$0xff] }
0x1669   :  { %6988 = vmatmul.msk.f32.vlgmr.msra.gmra.mxu2 %vm67_vm0, %v5740_v5 }
0x166f   :  { %v5718_v53 = vpop.permute.xlu0 %5717 }
0x1670   :  { %v5741_v32 = vsel %vm1485_vm8, %v5736_v36, %v5718_v53 }
0x1671   :  { %6989 = vmatmul.msk.f32.gmra.mxu2 %vm67_vm0, %v5741_v32 }
0x1677   :  { %v5720_v45 = vpop.permute.xlu0 %5719 }
0x1678   :  { %v5742_v43 = vsel %vm1485_vm8, %v5737_v15, %v5720_v45  ;;  %v5948_v15 = vld [vmem:[#allocation2 + $0x9f8] sm:$0xff]  ;;  %v5945_v45 = vld [vmem:[#allocation2 + $0x9e0] sm:$0xff] }
0x1679   :  { %6990 = vmatmul.msk.f32.gmra.mxu2 %vm67_vm0, %v5742_v43  ;;  %6011 = vmatpush.msrb.mxu0 %v5948_v15  ;;  %v5946_v43 = vld [vmem:[#allocation2 + $0x9e8] sm:$0xff] }
0x167a   :  { %5980 = vmatpush.msra.mxu3 %v5945_v45 }
0x167b   :  { %6012 = vmatpush.msrb.mxu0 %v5946_v43 }
0x167c   :  { %5981 = vmatpush.msra.mxu3 %v5943_v62 }
0x167d   :  { %6013 = vmatpush.msrb.mxu0 %v5944_v18 }
0x167e   :  { %5982 = vmatpush.msra.mxu3 %v5941_v10 }
0x16a0   :  { %v5722_v49 = vpop.permute.xlu0 %5721 }
0x16a1   :  { %v5743_v27 = vsel %vm1485_vm8, %v5738_v59, %v5722_v49  ;;  %v5942_v59 = vld [vmem:[#allocation2 + $0x9c8] sm:$0xff]  ;;  %v5939_v49 = vld [vmem:[#allocation2 + $0x9b0] sm:$0xff] }
0x16a2   :  { %6991 = vmatmul.msk.f32.gmra.mxu2 %vm67_vm0, %v5743_v27  ;;  %6014 = vmatpush.msrb.mxu0 %v5942_v59  ;;  %v5940_v27 = vld [vmem:[#allocation2 + $0x9b8] sm:$0xff] }
0x16a3   :  { %5983 = vmatpush.msra.mxu3 %v5939_v49 }
0x16a4   :  { %6015 = vmatpush.msrb.mxu0 %v5940_v27 }
0x16a5   :  { %5984 = vmatpush.msra.mxu3 %v5937_v7 }
0x16a8   :  { %v5724_v40 = vpop.permute.xlu0 %5723 }
0x16a9   :  { %v5744_v33 = vsel %vm1485_vm8, %v5739_v17, %v5724_v40  ;;  %v5938_v17 = vld [vmem:[#allocation2 + $0x9a8] sm:$0xff] }
0x16aa   :  { %6992 = vmatmul.msk.f32.gmra.mxu2 %vm67_vm0, %v5744_v33  ;;  %6016 = vmatpush.msrb.mxu0 %v5938_v17  ;;  %v5935_v33 = vld [vmem:[#allocation2 + $0x990] sm:$0xff] }
0x16ab   :  { %5985 = vmatpush.msra.mxu3 %v5935_v33 }
0x16ec   :  { %v5785_v30 = vpop.f32.mrf.mxu2 }
0x16ed   :  { %v5800_v55 = vadd.f32 %v5785_v30, %v9892_v41  ;;  %v5936_v30 = vld [vmem:[#allocation2 + $0x998] sm:$0xff] }
0x16ee   :  { %6017 = vmatpush.msrb.mxu0 %v5936_v30 }
0x16ef   :  { %v10611_v38 = vadd.f32 %v5805_v52, %v5800_v55  ;;  %v5934_v55 = vld [vmem:[#allocation2 + $0x988] sm:$0xff] }
0x16f0   :  { %6018 = vmatpush.msrb.mxu0 %v5934_v55 }
0x16f1   :  { %v5813_v31 = vsel %vm67_vm0, %v10611_v38, 0.0 }
0x16f2   :  { %5814 = vadd.xlane.f32.xlu1 %v5813_v31 }
0x16f4   :  { %v5788_v63 = vpop.f32.mrf.mxu2 }
0x16f5   :  { %v5801_v50 = vadd.f32 %v5788_v63, %v9896_v22 }
0x16f7   :  { %v10616_v21 = vadd.f32 %v5805_v52, %v5801_v50 }
0x16f9   :  { %v5816_v9 = vsel %vm67_vm0, %v10616_v21, 0.0 }
0x16fa   :  { %5817 = vadd.xlane.f32.xlu2 %v5816_v9 }
0x16fc   :  { %v5791_v44 = vpop.f32.mrf.mxu2 }
0x16fd   :  { %v5802_v6 = vadd.f32 %v5791_v44, %v9900_v3 }
0x16ff   :  { %v10621_v24 = vadd.f32 %v5805_v52, %v5802_v6 }
0x1701   :  { %v5819_v41 = vsel %vm67_vm0, %v10621_v24, 0.0 }
0x1702   :  { %5820 = vadd.xlane.f32.xlu0 %v5819_v41 }
0x1725   :  { %v5794_v19 = vpop.f32.mrf.mxu2 }
0x1726   :  { %v5803_v56 = vadd.f32 %v5794_v19, %v9904_v0 }
0x1728   :  { %v10626_v42 = vadd.f32 %v5805_v52, %v5803_v56 }
0x172a   :  { %v5822_v22 = vsel %vm67_vm0, %v10626_v42, 0.0 }
0x172b   :  { %5823 = vadd.xlane.f32.xlu1 %v5822_v22 }
0x172d   :  { %v5797_v20 = vpop.f32.mrf.mxu2 }
0x172e   :  { %v5804_v13 = vadd.f32 %v5797_v20, %v9908_v60 }
0x1730   :  { %v10631_v4 = vadd.f32 %v5805_v52, %v5804_v13  ;;  %v5933_v52 = vld [vmem:[#allocation2 + $0x980] sm:$0xff] }
0x1731   :  { %5986 = vmatpush.msra.mxu3 %v5933_v52 }
0x1732   :  { %v5825_v3 = vsel %vm193_vm1, %v10631_v4, 0.0 }
0x1733   :  { %5826 = vadd.xlane.f32.xlu2 %v5825_v3 }
0x1765   :  { %v5815_v12 = vpop.xlane.xlu1 %5814 }
0x1766   :  { %v5828_v2 = vmul.f32 %v5815_v12, %v7699_v39 }
0x1768   :  { %v10637_v0 = vsub.f32 %v10611_v38, %v5828_v2  ;;  %v10673_v2 = vld [vmem:[#allocation4 + $0x22] ss:$0 sm:$0xff] }
0x176a   :  { %v5838_v25 = vmul.f32 %v10637_v0, %v10637_v0 }
0x176c   :  { %v5843_v16 = vsel %vm67_vm0, %v5838_v25, 0.0 }
0x176d   :  { %5844 = vadd.xlane.f32.xlu0 %v5843_v16  ;;  %v5818_v51 = vpop.xlane.xlu2 %5817 }
0x176e   :  { %v5829_v60 = vmul.f32 %v5818_v51, %v7699_v39 }
0x1770   :  { %v10644_v47 = vsub.f32 %v10616_v21, %v5829_v60  ;;  %v10676_v60 = vld [vmem:[#allocation4 + $0x23] ss:$0 sm:$0xff] }
0x1772   :  { %v5839_v61 = vmul.f32 %v10644_v47, %v10644_v47 }
0x1774   :  { %v5846_v48 = vsel %vm67_vm0, %v5839_v61, 0.0 }
0x1775   :  { %v5821_v29 = vpop.xlane.xlu0 %5820  ;;  %5847 = vadd.xlane.f32.xlu1 %v5846_v48 }
0x1776   :  { %v5830_v57 = vmul.f32 %v5821_v29, %v7699_v39 }
0x1778   :  { %v10651_v28 = vsub.f32 %v10621_v24, %v5830_v57 }
0x177a   :  { %v5840_v34 = vmul.f32 %v10651_v28, %v10651_v28 }
0x177c   :  { %v5849_v46 = vsel %vm67_vm0, %v5840_v34, 0.0 }
0x177d   :  { %5850 = vadd.xlane.f32.xlu2 %v5849_v46 }
0x179e   :  { %v5824_v8 = vpop.xlane.xlu1 %5823 }
0x179f   :  { %v5831_v5 = vmul.f32 %v5824_v8, %v7699_v39 }
0x17a1   :  { %v10658_v35 = vsub.f32 %v10626_v42, %v5831_v5 }
0x17a3   :  { %v5841_v54 = vmul.f32 %v10658_v35, %v10658_v35 }
0x17a5   :  { %v5852_v14 = vsel %vm67_vm0, %v5841_v54, 0.0 }
0x17a6   :  { %5853 = vadd.xlane.f32.xlu0 %v5852_v14  ;;  %v5827_v36 = vpop.xlane.xlu2 %5826 }
0x17a7   :  { %v5832_v53 = vmul.f32 %v5827_v36, %v7699_v39 }
0x17a9   :  { %v10665_v32 = vsub.f32 %v10631_v4, %v5832_v53 }
0x17ab   :  { %v5842_v11 = vmul.f32 %v10665_v32, %v10665_v32 }
0x17ad   :  { %v5855_v1 = vsel %vm193_vm1, %v5842_v11, 0.0 }
0x17ae   :  { %5856 = vadd.xlane.f32.xlu1 %v5855_v1 }
0x17e0   :  { %v5845_v26 = vpop.xlane.xlu0 %5844 }
0x17e1   :  { %v5858_v23 = vmul.f32 %v5845_v26, %v7699_v39 }
0x17e3   :  { %v5863_v40 = vadd.f32 1e-05, %v5858_v23 }
0x17e5   :  { %7486 = vrsqrt.f32 %v5863_v40  ;;  %vm5874_vm7 = vweird.f32 %v5863_v40 }
0x17e8   :  { %v5848_v31 = vpop.xlane.xlu1 %5847 }
0x17e9   :  { %v5859_v63 = vmul.f32 %v5848_v31, %v7699_v39 }
0x17eb   :  { %v7487_v50 = vpop.eup %7486  ;;  %v5864_v9 = vadd.f32 1e-05, %v5859_v63 }
0x17ec   :  { %v5869_v44 = vmul.f32 %v7487_v50, %v5863_v40  ;;  %vm5875_vm5 = vweird.f32 %v7487_v50 }
0x17ed   :  { %7488 = vrsqrt.f32 %v5864_v9  ;;  %vm5876_vm6 = vmor %vm5874_vm7, %vm5875_vm5  ;;  %vm5884_vm14 = vweird.f32 %v5864_v9 }
0x17ee   :  { %v5870_v6 = vmul.f32 %v7487_v50, %v5869_v44 }
0x17f0   :  { %v5871_v41 = vmul.f32 0.5, %v5870_v6  ;;  %v5851_v19 = vpop.xlane.xlu2 %5850 }
0x17f1   :  { %v5860_v56 = vmul.f32 %v5851_v19, %v7699_v39 }
0x17f2   :  { %v5872_v22 = vsub.f32 1.5, %v5871_v41 }
0x17f3   :  { %v7489_v20 = vpop.eup %7488  ;;  %v5865_v13 = vadd.f32 1e-05, %v5860_v56  ;;  %v5950_v56 = vld [vmem:[#allocation4 + $0x24] ss:$8 sm:$0x3] }
0x17f4   :  { %v5873_v3 = vmul.f32 %v7487_v50, %v5872_v22  ;;  %v5879_v12 = vmul.f32 %v7489_v20, %v5864_v9  ;;  %vm5885_vm8 = vweird.f32 %v7489_v20  ;;  %v10704_v22 = vperm.slane %v5950_v56, 1 }
0x17f5   :  { %7490 = vrsqrt.f32 %v5865_v13  ;;  %vm5886_vm15 = vmor %vm5884_vm14, %vm5885_vm8  ;;  %vm5894_vm11 = vweird.f32 %v5865_v13 }
0x17f6   :  { %v5877_v25 = vsel %vm5876_vm6, %v7487_v50, %v5873_v3  ;;  %v5880_v16 = vmul.f32 %v7489_v20, %v5879_v12  ;;  %v6466_v3 = vld [vmem:[#allocation2 + $0xbf0] sm:$0xff] }
0x17f7   :  { %v5918_v51 = vmul.f32 %v5877_v25, %v10637_v0  ;;  %v10709_v25 = vperm.slane %v5950_v56, 0  ;;  %6500 = vmatpush.msrb.mxu2 %v6466_v3 }
0x17f8   :  { %v5881_v61 = vmul.f32 0.5, %v5880_v16 }
0x17f9   :  { %v5923_v48 = vmul.f32 %v5918_v51, %v10673_v2  ;;  %v6464_v51 = vld [vmem:[#allocation2 + $0xbd0] sm:$0xff] }
0x17fa   :  { %v5882_v29 = vsub.f32 1.5, %v5881_v61 }
0x17fb   :  { %v7491_v57 = vpop.eup %7490  ;;  %v5928_v34 = vadd.f32 %v5923_v48, %v10676_v60 }
0x17fc   :  { %v5883_v46 = vmul.f32 %v7489_v20, %v5882_v29  ;;  %v5889_v8 = vmul.f32 %v7491_v57, %v5865_v13  ;;  %vm5895_vm9 = vweird.f32 %v7491_v57  ;;  %v6450_v29 = vld [vmem:[#allocation2 + $0xaf0] sm:$0xff] }
0x17fd   :  { %6993 = vmatmul.msk.f32.vlgmr.msra.gmra.mxu3 %vm67_vm0, %v5928_v34  ;;  %6998 = vmatmul.msk.f32.vlgmr.msrb.gmra.mxu0 %vm67_vm0, %v5928_v34  ;;  %vm5896_vm10 = vmor %vm5894_vm11, %vm5895_vm9 }
0x17fe   :  { %v5887_v5 = vsel %vm5886_vm15, %v7489_v20, %v5883_v46  ;;  %v5890_v0 = vmul.f32 %v7491_v57, %v5889_v8  ;;  %6468 = vmatpush.msrb.mxu1 %v6450_v29 }
0x17ff   :  { %v5919_v54 = vmul.f32 %v5887_v5, %v10644_v47  ;;  %v6449_v5 = vld [vmem:[#allocation2 + $0xae0] sm:$0xff] }
0x1800   :  { %v5891_v14 = vmul.f32 0.5, %v5890_v0  ;;  %v6462_v0 = vld [vmem:[#allocation2 + $0xbb0] sm:$0xff]  ;;  %6469 = vmatpush.msrb.mxu1 %v6449_v5 }
0x1801   :  { %v5924_v36 = vmul.f32 %v5919_v54, %v10673_v2 }
0x1802   :  { %v5892_v53 = vsub.f32 1.5, %v5891_v14 }
0x1803   :  { %v5929_v11 = vadd.f32 %v5924_v36, %v10676_v60  ;;  %v6448_v36 = vld [vmem:[#allocation2 + $0xad0] sm:$0xff] }
0x1804   :  { %v5893_v1 = vmul.f32 %v7491_v57, %v5892_v53  ;;  %6470 = vmatpush.msrb.mxu1 %v6448_v36  ;;  %v6441_v36 = vld [vmem:[#allocation2 + $0xa60] sm:$0xff] }
0x1805   :  { %6994 = vmatmul.msk.f32.gmra.mxu3 %vm67_vm0, %v5929_v11  ;;  %6999 = vmatmul.msk.f32.gmra.mxu0 %vm67_vm0, %v5929_v11 }
0x1806   :  { %v5897_v37 = vsel %vm5896_vm10, %v7491_v57, %v5893_v1  ;;  %v6463_v57 = vld [vmem:[#allocation2 + $0xbc0] sm:$0xff] }
0x1807   :  { %v5920_v15 = vmul.f32 %v5897_v37, %v10651_v28  ;;  %v6461_v1 = vld [vmem:[#allocation2 + $0xba0] sm:$0xff] }
0x1808   :  { %v6447_v37 = vld [vmem:[#allocation2 + $0xac0] sm:$0xff] }
0x1809   :  { %v5925_v45 = vmul.f32 %v5920_v15, %v10673_v2  ;;  %v6460_v15 = vld [vmem:[#allocation2 + $0xb90] sm:$0xff]  ;;  %6471 = vmatpush.msrb.mxu1 %v6447_v37 }
0x180b   :  { %v5930_v47 = vadd.f32 %v5925_v45, %v10676_v60 }
0x180d   :  { %6995 = vmatmul.msk.f32.gmra.mxu3 %vm67_vm0, %v5930_v47  ;;  %7000 = vmatmul.msk.f32.gmra.mxu0 %vm67_vm0, %v5930_v47 }
0x1819   :  { %v5854_v43 = vpop.xlane.xlu0 %5853 }
0x181a   :  { %v5861_v62 = vmul.f32 %v5854_v43, %v7699_v39 }
0x181c   :  { %v5866_v18 = vadd.f32 1e-05, %v5861_v62 }
0x181e   :  { %7492 = vrsqrt.f32 %v5866_v18  ;;  %vm5904_vm13 = vweird.f32 %v5866_v18 }
0x1821   :  { %v5857_v10 = vpop.xlane.xlu1 %5856 }
0x1822   :  { %v5862_v59 = vmul.f32 %v5857_v10, %v7699_v39  ;;  %v6459_v10 = vld [vmem:[#allocation2 + $0xb80] sm:$0xff] }
0x1824   :  { %v7493_v49 = vpop.eup %7492  ;;  %v5867_v27 = vadd.f32 1e-05, %v5862_v59 }
0x1825   :  { %v5899_v26 = vmul.f32 %v7493_v49, %v5866_v18  ;;  %vm5905_vm3 = vweird.f32 %v7493_v49  ;;  %v6446_v18 = vld [vmem:[#allocation2 + $0xab0] sm:$0xff] }
0x1826   :  { %7494 = vrsqrt.f32 %v5867_v27  ;;  %vm5906_vm4 = vmor %vm5904_vm13, %vm5905_vm3  ;;  %vm5914_vm2 = vweird.f32 %v5867_v27  ;;  %6472 = vmatpush.msrb.mxu1 %v6446_v18 }
0x1827   :  { %v5900_v28 = vmul.f32 %v7493_v49, %v5899_v26 }
0x1829   :  { %v5901_v23 = vmul.f32 0.5, %v5900_v28  ;;  %v6445_v28 = vld [vmem:[#allocation2 + $0xaa0] sm:$0xff] }
0x182a   :  { %6473 = vmatpush.msrb.mxu1 %v6445_v28  ;;  %v6440_v28 = vld [vmem:[#allocation2 + $0xa50] sm:$0xff] }
0x182b   :  { %v5902_v7 = vsub.f32 1.5, %v5901_v23  ;;  %v6458_v23 = vld [vmem:[#allocation2 + $0xb70] sm:$0xff] }
0x182c   :  { %v7495_v17 = vpop.eup %7494 }
0x182d   :  { %v5903_v40 = vmul.f32 %v7493_v49, %v5902_v7  ;;  %v5909_v33 = vmul.f32 %v7495_v17, %v5867_v27  ;;  %vm5915_vm12 = vweird.f32 %v7495_v17 }
0x182e   :  { %vm5916_vm5 = vmor %vm5914_vm2, %vm5915_vm12 }
0x182f   :  { %v5907_v30 = vsel %vm5906_vm4, %v7493_v49, %v5903_v40  ;;  %v5910_v52 = vmul.f32 %v7495_v17, %v5909_v33 }
0x1830   :  { %v5921_v55 = vmul.f32 %v5907_v30, %v10658_v35 }
0x1831   :  { %v5911_v31 = vmul.f32 0.5, %v5910_v52 }
0x1832   :  { %v5926_v63 = vmul.f32 %v5921_v55, %v10673_v2  ;;  %v6444_v55 = vld [vmem:[#allocation2 + $0xa90] sm:$0xff] }
0x1833   :  { %v5912_v50 = vsub.f32 1.5, %v5911_v31  ;;  %v6457_v31 = vld [vmem:[#allocation2 + $0xb60] sm:$0xff]  ;;  %6474 = vmatpush.msrb.mxu1 %v6444_v55 }
0x1834   :  { %v5931_v9 = vadd.f32 %v5926_v63, %v10676_v60 }
0x1835   :  { %v5913_v44 = vmul.f32 %v7495_v17, %v5912_v50 }
0x1836   :  { %6996 = vmatmul.msk.f32.gmra.mxu3 %vm67_vm0, %v5931_v9  ;;  %7001 = vmatmul.msk.f32.gmra.mxu0 %vm67_vm0, %v5931_v9 }
0x1837   :  { %v5917_v6 = vsel %vm5916_vm5, %v7495_v17, %v5913_v44 }
0x1838   :  { %v5922_v41 = vmul.f32 %v5917_v6, %v10665_v32  ;;  %v6465_v32 = vld [vmem:[#allocation2 + $0xbe0] sm:$0xff] }
0x1839   :  { %6501 = vmatpush.msrb.mxu2 %v6465_v32 }
0x183a   :  { %v5927_v19 = vmul.f32 %v5922_v41, %v10673_v2  ;;  %v6443_v41 = vld [vmem:[#allocation2 + $0xa80] sm:$0xff] }
0x183b   :  { %6502 = vmatpush.msrb.mxu2 %v6464_v51  ;;  %6475 = vmatpush.msrb.mxu1 %v6443_v41  ;;  %v6442_v51 = vld [vmem:[#allocation2 + $0xa70] sm:$0xff] }
0x183c   :  { %v5932_v35 = vadd.f32 %v5927_v19, %v10676_v60  ;;  %v6456_v19 = vld [vmem:[#allocation2 + $0xb50] sm:$0xff] }
0x183d   :  { %6503 = vmatpush.msrb.mxu2 %v6463_v57  ;;  %6476 = vmatpush.msrb.mxu1 %v6442_v51 }
0x183e   :  { %6997 = vmatmul.msk.f32.gmra.mxu3 %vm67_vm0, %v5932_v35  ;;  %7002 = vmatmul.msk.f32.gmra.mxu0 %vm67_vm0, %v5932_v35 }
0x183f   :  { %6504 = vmatpush.msrb.mxu2 %v6462_v0  ;;  %6477 = vmatpush.msrb.mxu1 %v6441_v36 }
0x1841   :  { %6505 = vmatpush.msrb.mxu2 %v6461_v1  ;;  %6478 = vmatpush.msrb.mxu1 %v6440_v28 }
0x1843   :  { %6506 = vmatpush.msrb.mxu2 %v6460_v15 }
0x1845   :  { %6507 = vmatpush.msrb.mxu2 %v6459_v10 }
0x1847   :  { %6508 = vmatpush.msrb.mxu2 %v6458_v23  ;;  %v6453_v23 = vld [vmem:[#allocation2 + $0xb20] sm:$0xff] }
0x1849   :  { %6509 = vmatpush.msrb.mxu2 %v6457_v31 }
0x184b   :  { %6510 = vmatpush.msrb.mxu2 %v6456_v19  ;;  %v6451_v19 = vld [vmem:[#allocation2 + $0xb00] sm:$0xff] }
0x187a   :  { %v6020_v20 = vpop.f32.mrf.mxu0 }
0x187b   :  { %v6021_v13 = vadd.f32 %v6020_v20, %v10704_v22 }
0x187d   :  { %v10707_v12 = vmul.f32 0.70710677, %v6021_v13  ;;  %v10748_v63 = vmul.f32 0.5, %v6021_v13 }
0x187f   :  { %v6076_v2 = vand.u32 2147483647, %v10707_v12  ;;  %vm6056_vm7 = vcmp.ge.f32.partialorder %v10707_v12, 0.0 }
0x1880   :  { %v5988_v16 = vpop.f32.mrf.mxu3  ;;  %v10753_v44 = vsel %vm6056_vm7, 1.0, %v7610_v58 }
0x1881   :  { %v6086_v60 = vmul.f32 0.3275911, %v6076_v2  ;;  %v10713_v61 = vadd.f32 %v5988_v16, %v10709_v25  ;;  %v6346_v45 = vsub.f32 0.0, %v6076_v2 }
0x1882   :  { %v6023_v48 = vpop.f32.mrf.mxu0 }
0x1883   :  { %v10715_v34 = vadd.f32 1.0, %v6086_v60  ;;  %v10718_v46 = vmul.f32 0.70710677, %v10713_v61  ;;  %v10721_v8 = vadd.f32 %v6023_v48, %v10704_v22  ;;  %v6356_v7 = vmul.f32 %v6346_v45, %v6076_v2  ;;  %v6455_v60 = vld [vmem:[#allocation2 + $0xb40] sm:$0xff] }
0x1884   :  { %6511 = vmatpush.msrb.mxu2 %v6455_v60 }
0x1885   :  { %7496 = vrcp.f32 %v10715_v34  ;;  %v6075_v54 = vand.u32 2147483647, %v10718_v46  ;;  %v10726_v14 = vmul.f32 0.70710677, %v10721_v8  ;;  %v6129_v50 = vand.u32 2147483647, %v10715_v34 }
0x1886   :  { %v6131_v9 = vand.u32 2147483648, %v10715_v34  ;;  %v6367_v35 = vmul.f32 1.442695, %v6356_v7  ;;  %vm6125_vm8 = vweird.f32 %v10715_v34  ;;  %v6439_v7 = vld [vmem:[#allocation2 + $0xa40] sm:$0xff] }
0x1887   :  { %v6085_v53 = vmul.f32 0.3275911, %v6075_v54  ;;  %v10729_v47 = vand.u32 2147483647, %v10726_v14  ;;  %v6345_v17 = vsub.f32 0.0, %v6075_v54  ;;  %vm6130_vm15 = vcmp.eq.f32.partialorder %v6129_v50, 8.507059e+37  ;;  %6479 = vmatpush.msrb.mxu1 %v6439_v7 }
0x1888   :  { %v5991_v11 = vpop.f32.mrf.mxu3  ;;  %v6132_v48 = vor.u32 1.1754944e-38, %v6131_v9  ;;  %v6438_v9 = vld [vmem:[#allocation2 + $0xa30] sm:$0xff] }
0x1889   :  { %v10732_v43 = vadd.f32 %v5991_v11, %v10709_v25  ;;  %v10734_v62 = vadd.f32 1.0, %v6085_v53  ;;  %v6088_v49 = vmul.f32 0.3275911, %v10729_v47  ;;  %v6355_v56 = vmul.f32 %v6345_v17, %v6075_v54  ;;  %v6454_v53 = vld [vmem:[#allocation2 + $0xb30] sm:$0xff]  ;;  %6480 = vmatpush.msrb.mxu1 %v6438_v9 }
0x188a   :  { %v6026_v52 = vpop.f32.mrf.mxu0  ;;  %v6348_v16 = vsub.f32 0.0, %v10729_v47  ;;  %6512 = vmatpush.msrb.mxu2 %v6454_v53 }
0x188b   :  { %v7497_v59 = vpop.eup %7496  ;;  %v10738_v27 = vmul.f32 0.70710677, %v10732_v43  ;;  %7498 = vrcp.f32 %v10734_v62  ;;  %v10743_v40 = vadd.f32 1.0, %v6088_v49  ;;  %v10758_v13 = vadd.f32 %v6026_v52, %v10704_v22  ;;  %v6452_v52 = vld [vmem:[#allocation2 + $0xb10] sm:$0xff] }
0x188c   :  { %v6121_v26 = vmul.f32 %v7497_v59, %v10715_v34  ;;  %vm6126_vm6 = vweird.f32 %v7497_v59  ;;  %v6114_v2 = vand.u32 2147483647, %v10734_v62  ;;  %v6116_v34 = vand.u32 2147483648, %v10734_v62  ;;  %6513 = vmatpush.msrb.mxu2 %v6453_v23 }
0x188d   :  { %v10746_v30 = vand.u32 2147483647, %v10738_v27  ;;  %7500 = vrcp.f32 %v10743_v40  ;;  %vm6127_vm14 = vmor %vm6125_vm8, %vm6126_vm6  ;;  %v10772_v0 = vmul.f32 0.70710677, %v10758_v13  ;;  %v6365_v37 = vmul.f32 1.442695, %v6355_v56 }
0x188e   :  { %v6122_v33 = vsub.f32 1.0, %v6121_v26  ;;  %vm10783_vm9 = vcmp.eq.f32.partialorder %v6114_v2, 8.507059e+37  ;;  %v6358_v10 = vmul.f32 %v6348_v16, %v10729_v47  ;;  %vm6110_vm10 = vweird.f32 %v10734_v62  ;;  %6514 = vmatpush.msrb.mxu2 %v6452_v52 }
0x188f   :  { %v6087_v20 = vmul.f32 0.3275911, %v10746_v30  ;;  %v10793_v26 = vand.u32 2147483647, %v10772_v0  ;;  %vm6155_vm13 = vweird.f32 %v10743_v40  ;;  %v6161_v60 = vand.u32 2147483648, %v10743_v40 }
0x1890   :  { %v6123_v6 = vmul.f32 %v7497_v59, %v6122_v33  ;;  %v5994_v3 = vpop.f32.mrf.mxu3  ;;  %v6117_v33 = vor.u32 1.1754944e-38, %v6116_v34  ;;  %6515 = vmatpush.msrb.mxu2 %v6451_v19 }
0x1891   :  { %v10760_v12 = vpop.eup %7498  ;;  %v10768_v57 = vadd.f32 1.0, %v6087_v20  ;;  %v10775_v54 = vadd.f32 %v5994_v3, %v10709_v25  ;;  %v6090_v50 = vmul.f32 0.3275911, %v10793_v26  ;;  %v6371_v3 = vmul.f32 1.442695, %v6358_v10 }
0x1892   :  { %v6124_v32 = vadd.f32 %v7497_v59, %v6123_v6  ;;  %v6106_v29 = vmul.f32 %v10760_v12, %v10734_v62  ;;  %vm6111_vm11 = vweird.f32 %v10760_v12  ;;  %v6347_v62 = vsub.f32 0.0, %v10746_v30 }
0x1893   :  { %7502 = vrcp.f32 %v10768_v57  ;;  %v10780_v15 = vpop.eup %7500  ;;  %v10797_v47 = vmul.f32 0.70710677, %v10775_v54  ;;  %vm6112_vm3 = vmor %vm6110_vm10, %vm6111_vm11  ;;  %vm6140_vm12 = vweird.f32 %v10768_v57  ;;  %v6146_v28 = vand.u32 2147483648, %v10768_v57 }
0x1894   :  { %v6128_v5 = vsel %vm6127_vm14, %v7497_v59, %v6124_v32  ;;  %v6107_v1 = vsub.f32 1.0, %v6106_v29  ;;  %7504 = vpow2.f32 %v6367_v35  ;;  %v6151_v49 = vmul.f32 %v10780_v15, %v10743_v40 }
0x1895   :  { %v10777_v11 = vsel %vm6130_vm15, %v6132_v48, %v6128_v5  ;;  %7506 = vpow2.f32 %v6365_v37  ;;  %v10807_v41 = vand.u32 2147483647, %v10797_v47  ;;  %v10813_v32 = vadd.f32 1.0, %v6090_v50  ;;  %v6436_v37 = vld [vmem:[#allocation2 + $0xa10] sm:$0xff] }
0x1896   :  { %v6256_v45 = vmul.f32 1.0614054, %v10777_v11  ;;  %v6108_v59 = vmul.f32 %v10760_v12, %v6107_v1  ;;  %v6152_v31 = vsub.f32 1.0, %v6151_v49  ;;  %vm6156_vm4 = vweird.f32 %v10780_v15 }
0x1897   :  { %7508 = vrcp.f32 %v10813_v32  ;;  %v6159_v5 = vand.u32 2147483647, %v10743_v40  ;;  %v6357_v53 = vmul.f32 %v6347_v62, %v10746_v30  ;;  %v6089_v1 = vmul.f32 0.3275911, %v10807_v41  ;;  %v6435_v30 = vld [vmem:[#allocation2 + $0xa00] sm:$0xff]  ;;  %vm6157_vm2 = vmor %vm6155_vm13, %vm6156_vm4 }
0x1898   :  { %v6266_v17 = vadd.f32 -1.4531521, %v6256_v45  ;;  %v6109_v55 = vadd.f32 %v10760_v12, %v6108_v59  ;;  %v6153_v20 = vmul.f32 %v10780_v15, %v6152_v31  ;;  %7510 = vpow2.f32 %v6371_v3 }
0x1899   :  { %v10809_v35 = vpop.eup %7502  ;;  %v10837_v23 = vadd.f32 1.0, %v6089_v1  ;;  %vm6160_vm7 = vcmp.eq.f32.partialorder %v6159_v5, 8.507059e+37  ;;  %vm6185_vm6 = vweird.f32 %v10813_v32  ;;  %v6144_v19 = vand.u32 2147483647, %v10768_v57 }
0x189a   :  { %v6276_v6 = vmul.f32 %v6266_v17, %v10777_v11  ;;  %v6113_v56 = vsel %vm6112_vm3, %v10760_v12, %v6109_v55  ;;  %v10815_v2 = vpop.eup %7504  ;;  %v6136_v48 = vmul.f32 %v10809_v35, %v10768_v57  ;;  %v6437_v12 = vld [vmem:[#allocation2 + $0xa20] sm:$0xff]  ;;  %v6154_v10 = vadd.f32 %v10780_v15, %v6153_v20 }
0x189b   :  { %v10819_v51 = vsel %vm10783_vm9, %v6117_v33, %v6113_v56  ;;  %6481 = vmatpush.msrb.mxu1 %v6437_v12  ;;  %v10831_v45 = vpop.eup %7506  ;;  %v6162_v33 = vor.u32 1.1754944e-38, %v6161_v60  ;;  %vm6141_vm5 = vweird.f32 %v10809_v35  ;;  %v10847_v55 = vmul.f32 1.442695, %v6357_v53 }
0x189c   :  { %v6286_v16 = vadd.f32 1.4214138, %v6276_v6  ;;  %v6255_v29 = vmul.f32 1.0614054, %v10819_v51  ;;  %v6137_v36 = vsub.f32 1.0, %v6136_v48  ;;  %v6158_v17 = vsel %vm6157_vm2, %v10780_v15, %v6154_v10  ;;  %vm6142_vm8 = vmor %vm6140_vm12, %vm6141_vm5 }
0x189d   :  { %6482 = vmatpush.msrb.mxu1 %v6436_v37  ;;  %7512 = vrcp.f32 %v10837_v23  ;;  %v7509_v31 = vpop.eup %7508  ;;  %v10851_v40 = vsel %vm6160_vm7, %v6162_v33, %v6158_v17  ;;  %v6191_v3 = vand.u32 2147483648, %v10813_v32  ;;  %v6147_v60 = vor.u32 1.1754944e-38, %v6146_v28 }
0x189e   :  { %v6296_v34 = vmul.f32 %v6286_v16, %v10777_v11  ;;  %v6265_v18 = vadd.f32 -1.4531521, %v6255_v29  ;;  %v6138_v49 = vmul.f32 %v10809_v35, %v6137_v36  ;;  %v6181_v6 = vmul.f32 %v7509_v31, %v10813_v32  ;;  %v10859_v56 = vpop.eup %7510 }
0x189f   :  { %6483 = vmatpush.msrb.mxu1 %v6435_v30  ;;  %v6258_v62 = vmul.f32 1.0614054, %v10851_v40  ;;  %vm6145_vm14 = vcmp.eq.f32.partialorder %v6144_v19, 8.507059e+37  ;;  %vm6055_vm15 = vcmp.ge.f32.partialorder %v10718_v46, 0.0  ;;  %vm6186_vm9 = vweird.f32 %v7509_v31 }
0x18a0   :  { %v6306_v59 = vadd.f32 -0.28449672, %v6296_v34  ;;  %v6275_v7 = vmul.f32 %v6265_v18, %v10819_v51  ;;  %v6139_v9 = vadd.f32 %v10809_v35, %v6138_v49  ;;  %v6182_v12 = vsub.f32 1.0, %v6181_v6  ;;  %vm6187_vm10 = vmor %vm6185_vm6, %vm6186_vm9 }
0x18a1   :  { %v6268_v29 = vadd.f32 -1.4531521, %v6258_v62  ;;  %v6189_v57 = vand.u32 2147483647, %v10813_v32  ;;  %v6176_v10 = vand.u32 2147483648, %v10837_v23  ;;  %v6192_v33 = vor.u32 1.1754944e-38, %v6191_v3 }
0x18a2   :  { %v6316_v52 = vmul.f32 %v6306_v59, %v10777_v11  ;;  %v6285_v50 = vadd.f32 1.4214138, %v6275_v7  ;;  %v6143_v16 = vsel %vm6142_vm8, %v10809_v35, %v6139_v9  ;;  %v6183_v1 = vmul.f32 %v7509_v31, %v6182_v12 }
0x18a3   :  { %v10866_v34 = vsel %vm6145_vm14, %v6147_v60, %v6143_v16  ;;  %v7513_v36 = vpop.eup %7512  ;;  %v6278_v35 = vmul.f32 %v6268_v29, %v10851_v40  ;;  %vm10875_vm11 = vcmp.eq.f32.partialorder %v6189_v57, 8.507059e+37  ;;  %v6350_v3 = vsub.f32 0.0, %v10793_v26 }
0x18a4   :  { %v6326_v15 = vadd.f32 0.2548296, %v6316_v52  ;;  %v6295_v20 = vmul.f32 %v6285_v50, %v10819_v51  ;;  %v6257_v37 = vmul.f32 1.0614054, %v10866_v34  ;;  %v6166_v18 = vmul.f32 %v7513_v36, %v10837_v23 }
0x18a5   :  { %v6288_v28 = vadd.f32 1.4214138, %v6278_v35  ;;  %v6184_v7 = vadd.f32 %v7509_v31, %v6183_v1  ;;  %vm6171_vm3 = vweird.f32 %v7513_v36  ;;  %vm6170_vm13 = vweird.f32 %v10837_v23 }
0x18a6   :  { %v6336_v48 = vmul.f32 %v6326_v15, %v10777_v11  ;;  %v6305_v5 = vadd.f32 -0.28449672, %v6295_v20  ;;  %v6267_v30 = vadd.f32 -1.4531521, %v6257_v37  ;;  %v6167_v17 = vsub.f32 1.0, %v6166_v18  ;;  %vm6172_vm4 = vmor %vm6170_vm13, %vm6171_vm3 }
0x18a7   :  { %v6298_v50 = vmul.f32 %v6288_v28, %v10851_v40  ;;  %v6188_v15 = vsel %vm6187_vm10, %v7509_v31, %v6184_v7  ;;  %v6174_v20 = vand.u32 2147483647, %v10837_v23  ;;  %7514 = vpow2.f32 %v10847_v55 }
0x18a8   :  { %v6386_v53 = vmul.f32 %v10815_v2, %v6336_v48  ;;  %v6315_v11 = vmul.f32 %v6305_v5, %v10819_v51  ;;  %v6277_v9 = vmul.f32 %v6267_v30, %v10866_v34  ;;  %v6168_v62 = vmul.f32 %v7513_v36, %v6167_v17 }
0x18a9   :  { %v10888_v19 = vsel %vm10875_vm11, %v6192_v33, %v6188_v15  ;;  %v6308_v16 = vadd.f32 -0.28449672, %v6298_v50  ;;  %v6177_v5 = vor.u32 1.1754944e-38, %v6176_v10  ;;  %vm6175_vm12 = vcmp.eq.f32.partialorder %v6174_v20, 8.507059e+37 }
0x18aa   :  { %v6396_v49 = vsub.f32 1.0, %v6386_v53  ;;  %v6325_v2 = vadd.f32 0.2548296, %v6315_v11  ;;  %v6287_v60 = vadd.f32 1.4214138, %v6277_v9  ;;  %v6169_v48 = vadd.f32 %v7513_v36, %v6168_v62 }
0x18ab   :  { %v6260_v31 = vmul.f32 1.0614054, %v10888_v19  ;;  %v6318_v12 = vmul.f32 %v6308_v16, %v10851_v40  ;;  %v6035_v28 = vmul.f32 0.5, %v10713_v61  ;;  %vm6058_vm2 = vcmp.ge.f32.partialorder %v10726_v14, 0.0 }
0x18ac   :  { %v6406_v52 = vmul.f32 %v6396_v49, %v10753_v44  ;;  %v6335_v6 = vmul.f32 %v6325_v2, %v10819_v51  ;;  %v6297_v29 = vmul.f32 %v6287_v60, %v10866_v34  ;;  %v6173_v1 = vsel %vm6172_vm4, %v7513_v36, %v6169_v48 }
0x18ad   :  { %v6270_v53 = vadd.f32 -1.4531521, %v6260_v31  ;;  %v6328_v23 = vadd.f32 0.2548296, %v6318_v12  ;;  %v10902_v37 = vsel %vm6175_vm12, %v6177_v5, %v6173_v1  ;;  %v6360_v36 = vmul.f32 %v6350_v3, %v10793_v26 }
0x18ae   :  { %v6416_v32 = vadd.f32 1.0, %v6406_v52  ;;  %v6385_v44 = vmul.f32 %v10831_v45, %v6335_v6  ;;  %v6065_v45 = vsel %vm6055_vm15, 1.0, %v7610_v58  ;;  %v6307_v35 = vadd.f32 -0.28449672, %v6297_v29  ;;  %v7515_v6 = vpop.eup %7514 }
0x18af   :  { %v6280_v18 = vmul.f32 %v6270_v53, %v10888_v19  ;;  %v6259_v10 = vmul.f32 1.0614054, %v10902_v37  ;;  %v6338_v46 = vmul.f32 %v6328_v23, %v10851_v40  ;;  %v6375_v50 = vmul.f32 1.442695, %v6360_v36 }
0x18b0   :  { %v6426_v51 = vmul.f32 %v6416_v32, %v10748_v63  ;;  %v6395_v57 = vsub.f32 1.0, %v6385_v44  ;;  %v6317_v49 = vmul.f32 %v6307_v35, %v10866_v34  ;;  %v6068_v14 = vsel %vm6058_vm2, 1.0, %v7610_v58 }
0x18b1   :  { %v6290_v7 = vadd.f32 1.4214138, %v6280_v18  ;;  %v6269_v2 = vadd.f32 -1.4531521, %v6259_v10  ;;  %v6388_v17 = vmul.f32 %v10859_v56, %v6338_v46  ;;  %vm6057_vm5 = vcmp.ge.f32.partialorder %v10738_v27, 0.0 }
0x18b2   :  { %6516 = vmatmul.f32.vlgmr.msrb.gmra.mxu2 %v6426_v51  ;;  %v6405_v63 = vmul.f32 %v6395_v57, %v6065_v45  ;;  %v6327_v26 = vadd.f32 0.2548296, %v6317_v49  ;;  %v6349_v16 = vsub.f32 0.0, %v10807_v41  ;;  %v6038_v48 = vmul.f32 0.5, %v10721_v8 }
0x18b3   :  { %v6029_v11 = vpop.f32.mrf.mxu0  ;;  %v6300_v52 = vmul.f32 %v6290_v7, %v10888_v19  ;;  %v6279_v40 = vmul.f32 %v6269_v2, %v10902_v37  ;;  %v6398_v61 = vsub.f32 1.0, %v6388_v17  ;;  %7516 = vpow2.f32 %v6375_v50 }
0x18b4   :  { %v10909_v59 = vadd.f32 %v6029_v11, %v10704_v22  ;;  %v6415_v30 = vadd.f32 1.0, %v6405_v63  ;;  %v6337_v15 = vmul.f32 %v6327_v26, %v10866_v34  ;;  %v6067_v1 = vsel %vm6057_vm5, 1.0, %v7610_v58 }
0x18b5   :  { %v6310_v20 = vadd.f32 -0.28449672, %v6300_v52  ;;  %v6408_v3 = vmul.f32 %v6398_v61, %v6068_v14  ;;  %v6289_v31 = vadd.f32 1.4214138, %v6279_v40  ;;  %v6359_v8 = vmul.f32 %v6349_v16, %v10807_v41 }
0x18b6   :  { %v10916_v55 = vmul.f32 0.70710677, %v10909_v59  ;;  %v6425_v33 = vmul.f32 %v6415_v30, %v6035_v28  ;;  %v6387_v44 = vmul.f32 %v7515_v6, %v6337_v15  ;;  %v6037_v36 = vmul.f32 0.5, %v10732_v43 }
0x18b7   :  { %v6320_v34 = vmul.f32 %v6310_v20, %v10888_v19  ;;  %v6418_v29 = vadd.f32 1.0, %v6408_v3  ;;  %v6299_v35 = vmul.f32 %v6289_v31, %v10902_v37  ;;  %v6373_v28 = vmul.f32 1.442695, %v6359_v8 }
0x18b8   :  { %v10922_v9 = vand.u32 2147483647, %v10916_v55  ;;  %6484 = vmatmul.f32.vlgmr.msrb.gmra.mxu1 %v6425_v33  ;;  %v6397_v57 = vsub.f32 1.0, %v6387_v44  ;;  %vm6060_vm7 = vcmp.ge.f32.partialorder %v10772_v0, 0.0  ;;  %v6040_v61 = vmul.f32 0.5, %v10758_v13 }
0x18b9   :  { %v5997_v62 = vpop.f32.mrf.mxu3  ;;  %v6330_v53 = vadd.f32 0.2548296, %v6320_v34  ;;  %v6428_v23 = vmul.f32 %v6418_v29, %v6038_v48  ;;  %v7517_v10 = vpop.eup %7516  ;;  %v6309_v2 = vadd.f32 -0.28449672, %v6299_v35  ;;  %v6070_v15 = vsel %vm6060_vm7, 1.0, %v7610_v58 }
0x18ba   :  { %v6092_v56 = vmul.f32 0.3275911, %v10922_v9  ;;  %v10929_v32 = vadd.f32 %v5997_v62, %v10709_v25  ;;  %vm6059_vm8 = vcmp.ge.f32.partialorder %v10797_v47, 0.0  ;;  %v6352_v62 = vsub.f32 0.0, %v10922_v9 }
0x18bb   :  { %v6032_v60 = vpop.f32.mrf.mxu0  ;;  %6519 = vmatmul.f32.gmra.mxu2 %v6428_v23  ;;  %v6340_v27 = vmul.f32 %v6330_v53, %v10888_v19  ;;  %v6319_v50 = vmul.f32 %v6309_v2, %v10902_v37 }
0x18bc   :  { %v10934_v51 = vadd.f32 1.0, %v6092_v56  ;;  %v10937_v12 = vmul.f32 0.70710677, %v10929_v32  ;;  %v10940_v5 = vadd.f32 %v6032_v60, %v10704_v22  ;;  %v6407_v22 = vmul.f32 %v6397_v57, %v6067_v1 }
0x18bd   :  { %v6390_v7 = vmul.f32 %v7517_v10, %v6340_v27  ;;  %v6329_v56 = vadd.f32 0.2548296, %v6319_v50  ;;  %v6039_v57 = vmul.f32 0.5, %v10775_v54 }
0x18be   :  { %7518 = vrcp.f32 %v10934_v51  ;;  %v10948_v45 = vand.u32 2147483647, %v10937_v12  ;;  %v10952_v63 = vmul.f32 0.70710677, %v10940_v5  ;;  %v6417_v46 = vadd.f32 1.0, %v6407_v22 }
0x18bf   :  { %v6400_v40 = vsub.f32 1.0, %v6390_v7  ;;  %v6221_v0 = vand.u32 2147483648, %v10934_v51  ;;  %vm6215_vm14 = vweird.f32 %v10934_v51  ;;  %v6219_v60 = vand.u32 2147483647, %v10934_v51 }
0x18c0   :  { %v6091_v11 = vmul.f32 0.3275911, %v10948_v45  ;;  %v10958_v41 = vand.u32 2147483647, %v10952_v63  ;;  %v6427_v33 = vmul.f32 %v6417_v46, %v6037_v36  ;;  %v6339_v31 = vmul.f32 %v6329_v56, %v10902_v37 }
0x18c1   :  { %v6000_v18 = vpop.f32.mrf.mxu3  ;;  %v6410_v20 = vmul.f32 %v6400_v40, %v6070_v15  ;;  %v6222_v48 = vor.u32 1.1754944e-38, %v6221_v0  ;;  %vm6220_vm9 = vcmp.eq.f32.partialorder %v6219_v60, 8.507059e+37  ;;  %v6362_v37 = vmul.f32 %v6352_v62, %v10922_v9 }
0x18c2   :  { %v10961_v49 = vadd.f32 %v6000_v18, %v10709_v25  ;;  %v10963_v30 = vadd.f32 1.0, %v6091_v11  ;;  %v6094_v26 = vmul.f32 0.3275911, %v10958_v41  ;;  %6487 = vmatmul.f32.gmra.mxu1 %v6427_v33  ;;  %v6069_v11 = vsel %vm6059_vm8, 1.0, %v7610_v58 }
0x18c3   :  { %v6420_v34 = vadd.f32 1.0, %v6410_v20  ;;  %v6351_v46 = vsub.f32 0.0, %v10948_v45 }
0x18c4   :  { %v7519_v17 = vpop.eup %7518  ;;  %7520 = vrcp.f32 %v10963_v30  ;;  %v10969_v19 = vadd.f32 1.0, %v6094_v26  ;;  %v10972_v25 = vmul.f32 0.70710677, %v10961_v49  ;;  %v6206_v18 = vand.u32 2147483648, %v10963_v30 }
0x18c5   :  { %v6211_v43 = vmul.f32 %v7519_v17, %v10934_v51  ;;  %7522 = vpow2.f32 %v6373_v28  ;;  %vm6216_vm6 = vweird.f32 %v7519_v17  ;;  %v6430_v23 = vmul.f32 %v6420_v34, %v6040_v61 }
0x18c6   :  { %7524 = vrcp.f32 %v10969_v19  ;;  %v10980_v14 = vand.u32 2147483647, %v10972_v25  ;;  %vm6217_vm15 = vmor %vm6215_vm14, %vm6216_vm6  ;;  %vm6200_vm11 = vweird.f32 %v10963_v30  ;;  %v6204_v47 = vand.u32 2147483647, %v10963_v30 }
0x18c7   :  { %v6212_v52 = vsub.f32 1.0, %v6211_v43  ;;  %6522 = vmatmul.f32.gmra.mxu2 %v6430_v23  ;;  %v6251_v26 = vand.u32 2147483648, %v10969_v19  ;;  %v6207_v33 = vor.u32 1.1754944e-38, %v6206_v18  ;;  %v6361_v15 = vmul.f32 %v6351_v46, %v10948_v45 }
0x18c8   :  { %v6093_v13 = vmul.f32 0.3275911, %v10980_v14  ;;  %vm6205_vm13 = vcmp.eq.f32.partialorder %v6204_v47, 8.507059e+37  ;;  %vm6245_vm12 = vweird.f32 %v10969_v19  ;;  %v6353_v46 = vsub.f32 0.0, %v10980_v14 }
0x18c9   :  { %v6213_v6 = vmul.f32 %v7519_v17, %v6212_v52  ;;  %v6252_v34 = vor.u32 1.1754944e-38, %v6251_v26 }
0x18ca   :  { %v7521_v3 = vpop.eup %7520  ;;  %v10990_v53 = vadd.f32 1.0, %v6093_v13  ;;  %v6354_v13 = vsub.f32 0.0, %v10958_v41 }
0x18cb   :  { %v6214_v16 = vadd.f32 %v7519_v17, %v6213_v6  ;;  %v6196_v44 = vmul.f32 %v7521_v3, %v10963_v30  ;;  %v7523_v29 = vpop.eup %7522  ;;  %vm6201_vm10 = vweird.f32 %v7521_v3  ;;  %v6249_v30 = vand.u32 2147483647, %v10969_v19 }
0x18cc   :  { %v6389_v35 = vmul.f32 %v7523_v29, %v6339_v31  ;;  %v7525_v51 = vpop.eup %7524  ;;  %7526 = vrcp.f32 %v10990_v53  ;;  %vm6202_vm3 = vmor %vm6200_vm11, %vm6201_vm10  ;;  %vm6230_vm6 = vweird.f32 %v10990_v53  ;;  %vm6064_vm11 = vcmp.ge.f32.partialorder %v10952_v63, 0.0 }
0x18cd   :  { %v6218_v1 = vsel %vm6217_vm15, %v7519_v17, %v6214_v16  ;;  %v6197_v8 = vsub.f32 1.0, %v6196_v44  ;;  %v6241_v27 = vmul.f32 %v7525_v51, %v10969_v19  ;;  %v6379_v17 = vmul.f32 1.442695, %v6362_v37 }
0x18ce   :  { %v10992_v22 = vsel %vm6220_vm9, %v6222_v48, %v6218_v1  ;;  %v6399_v10 = vsub.f32 1.0, %v6389_v35  ;;  %vm6246_vm4 = vweird.f32 %v7525_v51  ;;  %vm6250_vm5 = vcmp.eq.f32.partialorder %v6249_v30, 8.507059e+37 }
0x18cf   :  { %v6198_v54 = vmul.f32 %v7521_v3, %v6197_v8  ;;  %v6262_v36 = vmul.f32 1.0614054, %v10992_v22  ;;  %v6242_v28 = vsub.f32 1.0, %v6241_v27  ;;  %vm6247_vm2 = vmor %vm6245_vm12, %vm6246_vm4  ;;  %v6234_v48 = vand.u32 2147483647, %v10990_v53 }
0x18d0   :  { %v6409_v9 = vmul.f32 %v6399_v10, %v6069_v11  ;;  %7528 = vpow2.f32 %v6379_v17  ;;  %v6377_v37 = vmul.f32 1.442695, %v6361_v15  ;;  %vm6062_vm15 = vcmp.ge.f32.partialorder %v10916_v55, 0.0 }
0x18d1   :  { %v6272_v7 = vadd.f32 -1.4531521, %v6262_v36  ;;  %v6199_v2 = vadd.f32 %v7521_v3, %v6198_v54  ;;  %v6243_v43 = vmul.f32 %v7525_v51, %v6242_v28  ;;  %vm6235_vm14 = vcmp.eq.f32.partialorder %v6234_v48, 8.507059e+37 }
0x18d2   :  { %v6419_v52 = vadd.f32 1.0, %v6409_v9  ;;  %v7527_v61 = vpop.eup %7526  ;;  %7530 = vpow2.f32 %v6377_v37  ;;  %vm6061_vm9 = vcmp.ge.f32.partialorder %v10937_v12, 0.0  ;;  %v6041_v12 = vmul.f32 0.5, %v10929_v32 }
0x18d3   :  { %v6282_v40 = vmul.f32 %v6272_v7, %v10992_v22  ;;  %v6203_v50 = vsel %vm6202_vm3, %v7521_v3, %v6199_v2  ;;  %v6226_v6 = vmul.f32 %v7527_v61, %v10990_v53  ;;  %v6236_v3 = vand.u32 2147483648, %v10990_v53 }
0x18d4   :  { %v11008_v0 = vsel %vm6205_vm13, %v6207_v33, %v6203_v50  ;;  %v6429_v62 = vmul.f32 %v6419_v52, %v6039_v57  ;;  %v6244_v16 = vadd.f32 %v7525_v51, %v6243_v43  ;;  %vm6231_vm7 = vweird.f32 %v7527_v61 }
0x18d5   :  { %v6292_v20 = vadd.f32 1.4214138, %v6282_v40  ;;  %v6261_v56 = vmul.f32 1.0614054, %v11008_v0  ;;  %v6227_v60 = vsub.f32 1.0, %v6226_v6  ;;  %vm6232_vm8 = vmor %vm6230_vm6, %vm6231_vm7  ;;  %v6237_v54 = vor.u32 1.1754944e-38, %v6236_v3 }
0x18d6   :  { %6490 = vmatmul.f32.gmra.mxu1 %v6429_v62  ;;  %v6248_v31 = vsel %vm6247_vm2, %v7525_v51, %v6244_v16  ;;  %v6364_v51 = vmul.f32 %v6354_v13, %v10958_v41  ;;  %v7529_v2 = vpop.eup %7528  ;;  %v6363_v52 = vmul.f32 %v6353_v46, %v10980_v14  ;;  %v6071_v48 = vsel %vm6061_vm9, 1.0, %v7610_v58 }
0x18d7   :  { %v6302_v45 = vmul.f32 %v6292_v20, %v10992_v22  ;;  %v6271_v44 = vadd.f32 -1.4531521, %v6261_v56  ;;  %v6228_v29 = vmul.f32 %v7527_v61, %v6227_v60  ;;  %v6253_v1 = vsel %vm6250_vm5, %v6252_v34, %v6248_v31 }
0x18d8   :  { %v6264_v8 = vmul.f32 1.0614054, %v6253_v1  ;;  %v6383_v17 = vmul.f32 1.442695, %v6364_v51  ;;  %v7531_v20 = vpop.eup %7530  ;;  %v6042_v56 = vmul.f32 0.5, %v10909_v59  ;;  %vm6063_vm10 = vcmp.ge.f32.partialorder %v10972_v25, 0.0 }
0x18d9   :  { %v6312_v57 = vadd.f32 -0.28449672, %v6302_v45  ;;  %v6281_v19 = vmul.f32 %v6271_v44, %v11008_v0  ;;  %v6229_v11 = vadd.f32 %v7527_v61, %v6228_v29  ;;  %v6381_v13 = vmul.f32 1.442695, %v6363_v52 }
0x18da   :  { %v6274_v18 = vadd.f32 -1.4531521, %v6264_v8  ;;  %7532 = vpow2.f32 %v6383_v17 }
0x18db   :  { %v6322_v23 = vmul.f32 %v6312_v57, %v10992_v22  ;;  %v6291_v35 = vadd.f32 1.4214138, %v6281_v19  ;;  %v6233_v36 = vsel %vm6232_vm8, %v7527_v61, %v6229_v11  ;;  %7534 = vpow2.f32 %v6381_v13 }
0x18dc   :  { %v6284_v47 = vmul.f32 %v6274_v18, %v6253_v1  ;;  %v6238_v53 = vsel %vm6235_vm14, %v6237_v54, %v6233_v36  ;;  %v6074_v11 = vsel %vm6064_vm11, 1.0, %v7610_v58  ;;  %v6073_v36 = vsel %vm6063_vm10, 1.0, %v7610_v58 }
0x18dd   :  { %v6332_v27 = vadd.f32 0.2548296, %v6322_v23  ;;  %v6301_v10 = vmul.f32 %v6291_v35, %v11008_v0  ;;  %v6263_v7 = vmul.f32 1.0614054, %v6238_v53 }
0x18de   :  { %v6294_v41 = vadd.f32 1.4214138, %v6284_v47  ;;  %v6043_v47 = vmul.f32 0.5, %v10961_v49 }
0x18df   :  { %v6342_v28 = vmul.f32 %v6332_v27, %v10992_v22  ;;  %v6311_v9 = vadd.f32 -0.28449672, %v6301_v10  ;;  %v6273_v43 = vadd.f32 -1.4531521, %v6263_v7  ;;  %v6072_v22 = vsel %vm6062_vm15, 1.0, %v7610_v58 }
0x18e0   :  { %v6304_v40 = vmul.f32 %v6294_v41, %v6253_v1  ;;  %v6044_v27 = vmul.f32 0.5, %v10940_v5 }
0x18e1   :  { %v6392_v26 = vmul.f32 %v7529_v2, %v6342_v28  ;;  %v6321_v33 = vmul.f32 %v6311_v9, %v11008_v0  ;;  %v6283_v15 = vmul.f32 %v6273_v43, %v6238_v53 }
0x18e2   :  { %v6314_v30 = vadd.f32 -0.28449672, %v6304_v40 }
0x18e3   :  { %v6402_v50 = vsub.f32 1.0, %v6392_v26  ;;  %v6331_v61 = vadd.f32 0.2548296, %v6321_v33  ;;  %v6293_v62 = vadd.f32 1.4214138, %v6283_v15 }
0x18e4   :  { %v6324_v3 = vmul.f32 %v6314_v30, %v6253_v1 }
0x18e5   :  { %v6412_v6 = vmul.f32 %v6402_v50, %v6072_v22  ;;  %v6341_v55 = vmul.f32 %v6331_v61, %v11008_v0  ;;  %v6303_v60 = vmul.f32 %v6293_v62, %v6238_v53  ;;  %v7533_v0 = vpop.eup %7532 }
0x18e6   :  { %v6334_v45 = vadd.f32 0.2548296, %v6324_v3  ;;  %v7535_v18 = vpop.eup %7534 }
0x18e7   :  { %v6422_v14 = vadd.f32 1.0, %v6412_v6  ;;  %v6391_v16 = vmul.f32 %v7531_v20, %v6341_v55  ;;  %v6313_v31 = vadd.f32 -0.28449672, %v6303_v60 }
0x18e8   :  { %v6344_v29 = vmul.f32 %v6334_v45, %v6253_v1 }
0x18e9   :  { %v6432_v44 = vmul.f32 %v6422_v14, %v6042_v56  ;;  %v6401_v34 = vsub.f32 1.0, %v6391_v16  ;;  %v6323_v19 = vmul.f32 %v6313_v31, %v6238_v53 }
0x18ea   :  { %v6394_v59 = vmul.f32 %v7533_v0, %v6344_v29 }
0x18eb   :  { %6525 = vmatmul.f32.gmra.mxu2 %v6432_v44  ;;  %v6411_v57 = vmul.f32 %v6401_v34, %v6071_v48  ;;  %v6333_v23 = vadd.f32 0.2548296, %v6323_v19 }
0x18ec   :  { %v6404_v35 = vsub.f32 1.0, %v6394_v59 }
0x18ed   :  { %v6421_v8 = vadd.f32 1.0, %v6411_v57  ;;  %v6343_v51 = vmul.f32 %v6333_v23, %v6238_v53  ;;  %v6467_v53 = vld [vmem:[#allocation4 + $0x25] ss:$0 sm:$0xff] }
0x18ee   :  { %v6414_v54 = vmul.f32 %v6404_v35, %v6074_v11 }
0x18ef   :  { %v6431_v37 = vmul.f32 %v6421_v8, %v6041_v12  ;;  %v6393_v1 = vmul.f32 %v7535_v18, %v6343_v51 }
0x18f0   :  { %v6424_v10 = vadd.f32 1.0, %v6414_v54 }
0x18f1   :  { %6493 = vmatmul.f32.gmra.mxu1 %v6431_v37  ;;  %v6403_v63 = vsub.f32 1.0, %v6393_v1 }
0x18f2   :  { %v6434_v32 = vmul.f32 %v6424_v10, %v6044_v27 }
0x18f3   :  { %v6413_v46 = vmul.f32 %v6403_v63, %v6073_v36  ;;  %v6666_v63 = vld [vmem:[#allocation2 + $0xc70] sm:$0xff] }
0x18f4   :  { %6528 = vmatmul.f32.gmra.mxu2 %v6434_v32  ;;  %6691 = vmatpush.msrb.mxu3 %v6666_v63  ;;  %v6665_v32 = vld [vmem:[#allocation2 + $0xc60] sm:$0xff] }
0x18f5   :  { %v6423_v28 = vadd.f32 1.0, %v6413_v46 }
0x18f6   :  { %6692 = vmatpush.msrb.mxu3 %v6665_v32 }
0x18f7   :  { %v6433_v9 = vmul.f32 %v6423_v28, %v6043_v47  ;;  %v6664_v47 = vld [vmem:[#allocation2 + $0xc50] sm:$0xff] }
0x18f8   :  { %6693 = vmatpush.msrb.mxu3 %v6664_v47 }
0x18f9   :  { %6496 = vmatmul.f32.gmra.mxu1 %v6433_v9  ;;  %v6663_v9 = vld [vmem:[#allocation2 + $0xc40] sm:$0xff] }
0x18fa   :  { %6694 = vmatpush.msrb.mxu3 %v6663_v9 }
0x1935   :  { %v6485_v7 = vpop.f32.mrf.mxu1  ;;  %v6517_v25 = vpop.f32.mrf.mxu2 }
0x1936   :  { %v6486_v2 = vadd.f32 %v6485_v7, %v6467_v53  ;;  %v6661_v7 = vld [vmem:[#allocation2 + $0xc20] sm:$0xff] }
0x1938   :  { %v6518_v41 = vadd.f32 %v6517_v25, %v6486_v2  ;;  %v6660_v2 = vld [vmem:[#allocation2 + $0xc10] sm:$0xff] }
0x193a   :  { %v6532_v17 = vadd.f32 %v6518_v41, %v10611_v38 }
0x193c   :  { %v6539_v5 = vsel %vm67_vm0, %v6532_v17, 0.0 }
0x193d   :  { %6540 = vadd.xlane.f32.xlu2 %v6539_v5 }
0x193e   :  { %v6520_v33 = vpop.f32.mrf.mxu2 }
0x193f   :  { %v6488_v26 = vpop.f32.mrf.mxu1 }
0x1940   :  { %v6489_v58 = vadd.f32 %v6488_v26, %v6467_v53 }
0x1942   :  { %v6521_v43 = vadd.f32 %v6520_v33, %v6489_v58 }
0x1944   :  { %v6533_v52 = vadd.f32 %v6521_v43, %v10616_v21 }
0x1946   :  { %v6542_v49 = vsel %vm67_vm0, %v6533_v52, 0.0 }
0x1947   :  { %6543 = vadd.xlane.f32.xlu0 %v6542_v49 }
0x194a   :  { %v6523_v61 = vpop.f32.mrf.mxu2 }
0x1953   :  { %v6491_v40 = vpop.f32.mrf.mxu1 }
0x1954   :  { %v6492_v50 = vadd.f32 %v6491_v40, %v6467_v53  ;;  %v11083_v40 = vld [vmem:[#allocation4 + $0x26] ss:$0 sm:$0xff] }
0x1956   :  { %v6524_v15 = vadd.f32 %v6523_v61, %v6492_v50 }
0x1958   :  { %v6534_v22 = vadd.f32 %v6524_v15, %v10621_v24 }
0x195a   :  { %v6545_v38 = vsel %vm67_vm0, %v6534_v22, 0.0 }
0x195b   :  { %6546 = vadd.xlane.f32.xlu1 %v6545_v38 }
0x196e   :  { %v6494_v30 = vpop.f32.mrf.mxu1  ;;  %v6526_v55 = vpop.f32.mrf.mxu2 }
0x196f   :  { %v6495_v6 = vadd.f32 %v6494_v30, %v6467_v53 }
0x1971   :  { %v6527_v62 = vadd.f32 %v6526_v55, %v6495_v6 }
0x1973   :  { %v6535_v20 = vadd.f32 %v6527_v62, %v10626_v42 }
0x1975   :  { %v6548_v21 = vsel %vm67_vm0, %v6535_v20, 0.0 }
0x1976   :  { %6549 = vadd.xlane.f32.xlu2 %v6548_v21  ;;  %v6497_v56 = vpop.f32.mrf.mxu1 }
0x1977   :  { %v6498_v13 = vadd.f32 %v6497_v56, %v6467_v53  ;;  %v6529_v3 = vpop.f32.mrf.mxu2  ;;  %v6662_v53 = vld [vmem:[#allocation2 + $0xc30] sm:$0xff] }
0x1978   :  { %6695 = vmatpush.msrb.mxu3 %v6662_v53 }
0x1979   :  { %v6530_v14 = vadd.f32 %v6529_v3, %v6498_v13 }
0x197a   :  { %6696 = vmatpush.msrb.mxu3 %v6661_v7 }
0x197b   :  { %v6536_v16 = vadd.f32 %v6530_v14, %v10631_v4 }
0x197c   :  { %6697 = vmatpush.msrb.mxu3 %v6660_v2 }
0x197d   :  { %v6551_v24 = vsel %vm193_vm1, %v6536_v16, 0.0 }
0x197e   :  { %6552 = vadd.xlane.f32.xlu0 %v6551_v24 }
0x19b0   :  { %v6541_v60 = vpop.xlane.xlu2 %6540 }
0x19b1   :  { %v6554_v45 = vmul.f32 %v6541_v60, %v7699_v39 }
0x19b3   :  { %v11052_v44 = vsub.f32 %v6532_v17, %v6554_v45  ;;  %v6659_v17 = vld [vmem:[#allocation2 + $0xc00] sm:$0xff] }
0x19b4   :  { %6698 = vmatpush.msrb.mxu3 %v6659_v17  ;;  %v6667_v17 = vld [vmem:[#allocation4 + $0x30] ss:$0 sm:$0xff] }
0x19b5   :  { %v6564_v42 = vmul.f32 %v11052_v44, %v11052_v44 }
0x19b7   :  { %v6569_v34 = vsel %vm67_vm0, %v6564_v42, 0.0 }
0x19b8   :  { %6570 = vadd.xlane.f32.xlu1 %v6569_v34 }
0x19ba   :  { %v6544_v31 = vpop.xlane.xlu0 %6543 }
0x19bb   :  { %v6555_v48 = vmul.f32 %v6544_v31, %v7699_v39 }
0x19bd   :  { %v11058_v29 = vsub.f32 %v6533_v52, %v6555_v48 }
0x19bf   :  { %v6565_v4 = vmul.f32 %v11058_v29, %v11058_v29 }
0x19c1   :  { %v6572_v0 = vsel %vm67_vm0, %v6565_v4, 0.0 }
0x19c2   :  { %6573 = vadd.xlane.f32.xlu2 %v6572_v0 }
0x19ce   :  { %v6547_v57 = vpop.xlane.xlu1 %6546 }
0x19cf   :  { %v6556_v19 = vmul.f32 %v6547_v57, %v7699_v39 }
0x19d1   :  { %v11064_v59 = vsub.f32 %v6534_v22, %v6556_v19  ;;  %v11086_v22 = vld [vmem:[#allocation4 + $0x27] ss:$0 sm:$0xff] }
0x19d3   :  { %v6566_v12 = vmul.f32 %v11064_v59, %v11064_v59 }
0x19d5   :  { %v6575_v8 = vsel %vm67_vm0, %v6566_v12, 0.0 }
0x19d6   :  { %6576 = vadd.xlane.f32.xlu0 %v6575_v8 }
0x19e9   :  { %v6550_v23 = vpop.xlane.xlu2 %6549 }
0x19ea   :  { %v6557_v35 = vmul.f32 %v6550_v23, %v7699_v39 }
0x19ec   :  { %v11070_v11 = vsub.f32 %v6535_v20, %v6557_v35 }
0x19ee   :  { %v6567_v37 = vmul.f32 %v11070_v11, %v11070_v11 }
0x19f0   :  { %v6578_v51 = vsel %vm67_vm0, %v6567_v37, 0.0 }
0x19f1   :  { %6579 = vadd.xlane.f32.xlu1 %v6578_v51  ;;  %v6553_v18 = vpop.xlane.xlu0 %6552 }
0x19f2   :  { %v6558_v54 = vmul.f32 %v6553_v18, %v7699_v39 }
0x19f4   :  { %v11076_v1 = vsub.f32 %v6536_v16, %v6558_v54 }
0x19f6   :  { %v6568_v27 = vmul.f32 %v11076_v1, %v11076_v1 }
0x19f8   :  { %v6581_v10 = vsel %vm193_vm1, %v6568_v27, 0.0 }
0x19f9   :  { %6582 = vadd.xlane.f32.xlu2 %v6581_v10 }
0x1a2b   :  { %v6571_v36 = vpop.xlane.xlu1 %6570 }
0x1a2c   :  { %v6584_v46 = vmul.f32 %v6571_v36, %v7699_v39 }
0x1a2e   :  { %v6589_v28 = vadd.f32 1e-05, %v6584_v46 }
0x1a30   :  { %7536 = vrsqrt.f32 %v6589_v28  ;;  %vm6600_vm13 = vweird.f32 %v6589_v28 }
0x1a35   :  { %v6574_v5 = vpop.xlane.xlu2 %6573 }
0x1a36   :  { %v7537_v25 = vpop.eup %7536  ;;  %v6585_v58 = vmul.f32 %v6574_v5, %v7699_v39 }
0x1a37   :  { %v6595_v41 = vmul.f32 %v7537_v25, %v6589_v28  ;;  %vm6601_vm3 = vweird.f32 %v7537_v25 }
0x1a38   :  { %v6590_v43 = vadd.f32 1e-05, %v6585_v58  ;;  %vm6602_vm4 = vmor %vm6600_vm13, %vm6601_vm3  ;;  %vm6715_vm13 = vcmask 523265  }
0x1a39   :  { %v6596_v26 = vmul.f32 %v7537_v25, %v6595_v41 }
0x1a3a   :  { %7538 = vrsqrt.f32 %v6590_v43  ;;  %vm6610_vm2 = vweird.f32 %v6590_v43 }
0x1a3b   :  { %v6597_v33 = vmul.f32 0.5, %v6596_v26 }
0x1a3d   :  { %v6598_v52 = vsub.f32 1.5, %v6597_v33 }
0x1a3f   :  { %v6599_v49 = vmul.f32 %v7537_v25, %v6598_v52 }
0x1a40   :  { %v7539_v15 = vpop.eup %7538 }
0x1a41   :  { %v6603_v50 = vsel %vm6602_vm4, %v7537_v25, %v6599_v49  ;;  %v6605_v30 = vmul.f32 %v7539_v15, %v6590_v43  ;;  %vm6611_vm12 = vweird.f32 %v7539_v15  ;;  %vm6718_vm4 = vcmask 516096  }
0x1a42   :  { %v6644_v61 = vmul.f32 %v6603_v50, %v11052_v44  ;;  %vm6612_vm5 = vmor %vm6610_vm2, %vm6611_vm12  ;;  %vm6721_vm12 = vcmask 523266  }
0x1a43   :  { %v6606_v55 = vmul.f32 %v7539_v15, %v6605_v30 }
0x1a44   :  { %v6649_v38 = vmul.f32 %v6644_v61, %v11083_v40 }
0x1a45   :  { %v6607_v62 = vmul.f32 0.5, %v6606_v55 }
0x1a46   :  { %v6654_v6 = vadd.f32 %v6649_v38, %v11086_v22 }
0x1a47   :  { %v6608_v20 = vsub.f32 1.5, %v6607_v62 }
0x1a48   :  { %7003 = vmatmul.msk.f32.vlgmr.msrb.gmra.mxu3 %vm67_vm0, %v6654_v6 }
0x1a49   :  { %v6577_v21 = vpop.xlane.xlu0 %6576  ;;  %v6609_v13 = vmul.f32 %v7539_v15, %v6608_v20 }
0x1a4a   :  { %v6586_v56 = vmul.f32 %v6577_v21, %v7699_v39 }
0x1a4b   :  { %v6613_v14 = vsel %vm6612_vm5, %v7539_v15, %v6609_v13 }
0x1a4c   :  { %v6591_v3 = vadd.f32 1e-05, %v6586_v56  ;;  %v6645_v16 = vmul.f32 %v6613_v14, %v11058_v29 }
0x1a4e   :  { %7540 = vrsqrt.f32 %v6591_v3  ;;  %v6650_v24 = vmul.f32 %v6645_v16, %v11083_v40  ;;  %vm6620_vm6 = vweird.f32 %v6591_v3 }
0x1a50   :  { %v6655_v60 = vadd.f32 %v6650_v24, %v11086_v22 }
0x1a52   :  { %7004 = vmatmul.msk.f32.gmra.mxu3 %vm67_vm0, %v6655_v60 }
0x1a54   :  { %v7541_v45 = vpop.eup %7540 }
0x1a55   :  { %v6615_v44 = vmul.f32 %v7541_v45, %v6591_v3  ;;  %vm6621_vm7 = vweird.f32 %v7541_v45 }
0x1a56   :  { %vm6622_vm8 = vmor %vm6620_vm6, %vm6621_vm7 }
0x1a57   :  { %v6616_v42 = vmul.f32 %v7541_v45, %v6615_v44 }
0x1a59   :  { %v6617_v34 = vmul.f32 0.5, %v6616_v42 }
0x1a5b   :  { %v6618_v31 = vsub.f32 1.5, %v6617_v34 }
0x1a5d   :  { %v6619_v48 = vmul.f32 %v7541_v45, %v6618_v31 }
0x1a5f   :  { %v6623_v4 = vsel %vm6622_vm8, %v7541_v45, %v6619_v48 }
0x1a60   :  { %v6646_v0 = vmul.f32 %v6623_v4, %v11064_v59 }
0x1a62   :  { %v6651_v29 = vmul.f32 %v6646_v0, %v11083_v40 }
0x1a64   :  { %v6580_v57 = vpop.xlane.xlu1 %6579  ;;  %v6656_v19 = vadd.f32 %v6651_v29, %v11086_v22 }
0x1a65   :  { %v6587_v12 = vmul.f32 %v6580_v57, %v7699_v39 }
0x1a66   :  { %7005 = vmatmul.msk.f32.gmra.mxu3 %vm67_vm0, %v6656_v19 }
0x1a67   :  { %v6592_v8 = vadd.f32 1e-05, %v6587_v12 }
0x1a69   :  { %7542 = vrsqrt.f32 %v6592_v8  ;;  %vm6630_vm15 = vweird.f32 %v6592_v8 }
0x1a6c   :  { %v6583_v23 = vpop.xlane.xlu2 %6582 }
0x1a6d   :  { %v6588_v37 = vmul.f32 %v6583_v23, %v7699_v39 }
0x1a6f   :  { %v7543_v35 = vpop.eup %7542  ;;  %v6593_v18 = vadd.f32 1e-05, %v6588_v37 }
0x1a70   :  { %v6625_v51 = vmul.f32 %v7543_v35, %v6592_v8  ;;  %vm6631_vm14 = vweird.f32 %v7543_v35 }
0x1a71   :  { %7544 = vrsqrt.f32 %v6593_v18  ;;  %vm6632_vm9 = vmor %vm6630_vm15, %vm6631_vm14  ;;  %vm6640_vm10 = vweird.f32 %v6593_v18 }
0x1a72   :  { %v6626_v54 = vmul.f32 %v7543_v35, %v6625_v51 }
0x1a74   :  { %v6627_v59 = vmul.f32 0.5, %v6626_v54 }
0x1a76   :  { %v6628_v27 = vsub.f32 1.5, %v6627_v59 }
0x1a77   :  { %v7545_v63 = vpop.eup %7544 }
0x1a78   :  { %v6629_v10 = vmul.f32 %v7543_v35, %v6628_v27  ;;  %v6635_v32 = vmul.f32 %v7545_v63, %v6593_v18  ;;  %vm6641_vm11 = vweird.f32 %v7545_v63 }
0x1a79   :  { %vm6642_vm3 = vmor %vm6640_vm10, %vm6641_vm11 }
0x1a7a   :  { %v6633_v36 = vsel %vm6632_vm9, %v7543_v35, %v6629_v10  ;;  %v6636_v47 = vmul.f32 %v7545_v63, %v6635_v32 }
0x1a7b   :  { %v6647_v46 = vmul.f32 %v6633_v36, %v11070_v11 }
0x1a7c   :  { %v6637_v9 = vmul.f32 0.5, %v6636_v47 }
0x1a7d   :  { %v6652_v28 = vmul.f32 %v6647_v46, %v11083_v40 }
0x1a7e   :  { %v6638_v53 = vsub.f32 1.5, %v6637_v9 }
0x1a7f   :  { %v6657_v39 = vadd.f32 %v6652_v28, %v11086_v22 }
0x1a80   :  { %v6639_v7 = vmul.f32 %v7545_v63, %v6638_v53 }
0x1a81   :  { %7006 = vmatmul.msk.f32.gmra.mxu3 %vm67_vm0, %v6657_v39 }
0x1a82   :  { %v6643_v2 = vsel %vm6642_vm3, %v7545_v63, %v6639_v7 }
0x1a83   :  { %v6648_v25 = vmul.f32 %v6643_v2, %v11076_v1 }
0x1a85   :  { %v6653_v41 = vmul.f32 %v6648_v25, %v11083_v40 }
0x1a87   :  { %v6658_v11 = vadd.f32 %v6653_v41, %v11086_v22 }
0x1a89   :  { %7007 = vmatmul.msk.f32.gmra.mxu3 %vm67_vm0, %v6658_v11 }
0x1acb   :  { %v6700_v5 = vpop.f32.mrf.mxu3 }
0x1acc   :  { %v6701_v26 = vadd.f32 %v6700_v5, %v6667_v17 }
0x1ace   :  { %6716 = vst.msk [vmem:[%s11135_s4 - $0x1] sm:$0xfe] %vm6715_vm13, %v6701_v26 }
0x1ad5   :  { %v6703_v58 = vpop.f32.mrf.mxu3 }
0x1ad6   :  { %v6704_v33 = vadd.f32 %v6703_v58, %v6667_v17 }
0x1ad8   :  { %6717 = vst.msk [vmem:[%s11135_s4 + $0x7] sm:$0xff] %vm67_vm0, %v6704_v33 }
0x1ae9   :  { %v6706_v1 = vpop.f32.mrf.mxu3 }
0x1aea   :  { %v6707_v43 = vadd.f32 %v6706_v1, %v6667_v17 }
0x1aec   :  { %6719 = vst.msk [vmem:[%s11135_s4 + $0xf] sm:$0x1] %vm6718_vm4, %v6707_v43 }
0x1aed   :  { %7008 = vst.msk [vmem:[%s11135_s4 + $0xe] sm:$0xfc] %vm6721_vm12, %v6707_v43 }
0x1b04   :  { %v6709_v52 = vpop.f32.mrf.mxu3 }
0x1b05   :  { %v6710_v49 = vadd.f32 %v6709_v52, %v6667_v17 }
0x1b07   :  { %7009 = vst.msk [vmem:[%s11135_s4 + $0x16] sm:$0xff] %vm67_vm0, %v6710_v49 }
0x1b0c   :  { %v6712_v40 = vpop.f32.mrf.mxu3 }
0x1b0d   :  { %v6713_v50 = vadd.f32 %v6712_v40, %v6667_v17 }
0x1b0f   :  { %7010 = vst.msk [vmem:[%s11135_s4 + $0x1e] sm:$0x3] %vm193_vm1, %v6713_v50 }
0x1b10   :  { %6729 = vsyncpa [#allocation3], 1 }
0x1b11   :  { %6730 = vsyncpa [#allocation5], 1 }

</bundles_post_ra>
